<compile_context>
chip_gen: v7x
topology: tpu7x:2x2x1
jax: 0.10.0
libtpu: 0.0.40
codegen_flags: <defaults>
</compile_context>

<pallas_src>
import functools

import jax
import jax.numpy as jnp
from jax.experimental import pallas as pl
from jax.experimental.pallas import tpu as pltpu

F32 = jnp.float32
BF16 = jnp.bfloat16
VMEM_SPEC = pl.BlockSpec(memory_space=pltpu.MemorySpace.VMEM)


def _round_up(x, m):
    return ((x + m - 1) // m) * m


# ----------------------------- Pallas kernels --------------------------------

def _mm_bias_act_kernel(a_ref, w_ref, b_ref, o_ref, *, activation):
    # (M,K)bf16 @ (K,N)bf16 -> f32, + bias, optional ReLU. BN already folded into w/b.
    y = jnp.dot(a_ref[...], w_ref[...], preferred_element_type=jnp.float32) + b_ref[...]
    if activation == "relu":
        y = jnp.maximum(y, 0.0)
    o_ref[...] = y.astype(o_ref.dtype)


def _mm_bias_res_relu_kernel(a_ref, w_ref, b_ref, r_ref, o_ref):
    # conv2 of a BasicBlock: matmul + bias + residual add + ReLU in one epilogue.
    y = (jnp.dot(a_ref[...], w_ref[...], preferred_element_type=jnp.float32)
         + b_ref[...] + r_ref[...])
    o_ref[...] = jnp.maximum(y, 0.0).astype(o_ref.dtype)


def _window_max_kernel(x_ref, o_ref):
    o_ref[...] = jnp.max(x_ref[...], axis=1)


def _branches_att_kernel(a_ref, w_ref, b_ref, w1_ref, b1_ref, v_ref,
                         fw_ref, fb_ref, o_ref):
    # All 6 branch FCs (side BN + avgpool already folded into w_ref/b_ref), tanh-scored
    # softmax attention pooling over the 6 tokens, and final_fc — one kernel.
    tokens = (jnp.einsum("gbk,gkn->gbn", a_ref[...], w_ref[...],
                         preferred_element_type=jnp.float32) + b_ref[...])   # (G,Bp,D)
    G, Bp, D = tokens.shape
    h = jnp.tanh(jnp.dot(tokens.reshape(G * Bp, D), w1_ref[...],
                         preferred_element_type=jnp.float32) + b1_ref[...])
    e = jnp.sum(h.reshape(G, Bp, D) * v_ref[...], axis=-1, keepdims=True)    # (G,Bp,1)
    m = jnp.max(e, axis=0, keepdims=True)
    p = jnp.exp(e - m)
    att = p / jnp.sum(p, axis=0, keepdims=True)                              # softmax over G
    pooled = jnp.sum(att * tokens, axis=0)                                   # (Bp,D)
    o_ref[...] = (jnp.dot(pooled, fw_ref[...], preferred_element_type=jnp.float32)
                  + fb_ref[...])


# ------------------------------ NN building blocks ---------------------------

def conv2d_fused(x, cp, kh, kw, stride, pad, residual=None, activation=None):
    """NHWC conv via im2col + MXU matmul with BN/bias/residual/ReLU fused in the epilogue."""
    B, H, W, Cin = x.shape
    w2, b2 = cp["w"], cp["b"]                  # (Kp, Cout) bf16 , (1, Cout) f32
    Kp, Cout = w2.shape
    xp = jnp.pad(x, ((0, 0), (pad, pad), (pad, pad), (0, 0))) if pad else x
    oh = (H + 2 * pad - kh) // stride + 1
    ow = (W + 2 * pad - kw) // stride + 1
    cols = []
    for i in range(kh):
        for j in range(kw):
            cols.append(xp[:, i:i + stride * (oh - 1) + 1:stride,
                           j:j + stride * (ow - 1) + 1:stride, :])
    a = jnp.stack(cols, axis=3).reshape(B * oh * ow, kh * kw * Cin)
    M, K = a.shape
    Mp = _round_up(M, 8)
    if Mp != M or Kp != K:
        a = jnp.pad(a, ((0, Mp - M), (0, Kp - K)))
    a = a.astype(BF16)

    if residual is None:
        kern = functools.partial(_mm_bias_act_kernel, activation=activation)
        ins = (a, w2, b2)
    else:
        r = residual if Mp == M else jnp.pad(residual, ((0, Mp - M), (0, 0)))
        kern = _mm_bias_res_relu_kernel
        ins = (a, w2, b2, r)

    y = pl.pallas_call(
        kern,
        out_shape=jax.ShapeDtypeStruct((Mp, Cout), F32),
        in_specs=[VMEM_SPEC] * len(ins),
        out_specs=VMEM_SPEC,
    )(*ins)
    if Mp != M:
        y = y[:M]
    return y.reshape(B, oh, ow, Cout)


def maxpool2d(x, k=3, stride=2, pad=1):
    B, H, W, C = x.shape
    xp = jnp.pad(x, ((0, 0), (pad, pad), (pad, pad), (0, 0)),
                 constant_values=-1e30)
    oh = (H + 2 * pad - k) // stride + 1
    ow = (W + 2 * pad - k) // stride + 1
    cols = []
    for i in range(k):
        for j in range(k):
            cols.append(xp[:, i:i + stride * (oh - 1) + 1:stride,
                           j:j + stride * (ow - 1) + 1:stride, :])
    patches = jnp.stack(cols, axis=3).reshape(B * oh * ow, k * k, C)
    M = B * oh * ow
    Mp, Cp = _round_up(M, 8), _round_up(C, 128)
    p_p = jnp.pad(patches, ((0, Mp - M), (0, 0), (0, Cp - C)))
    out = pl.pallas_call(
        _window_max_kernel,
        out_shape=jax.ShapeDtypeStruct((Mp, Cp), F32),
        in_specs=[VMEM_SPEC],
        out_specs=VMEM_SPEC,
    )(p_p)
    return out[:M, :C].reshape(B, oh, ow, C)


def basic_block(x, p, stride):
    B = x.shape[0]
    h1 = conv2d_fused(x, p["conv1"], 3, 3, stride, 1, activation="relu")
    _, oh, ow, Cout = h1.shape
    idn = conv2d_fused(x, p["down"], 1, 1, stride, 0) if "down" in p else x
    return conv2d_fused(h1, p["conv2"], 3, 3, 1, 1,
                        residual=idn.reshape(B * oh * ow, Cout), activation="relu")


def bn_scale_shift(bnp, eps=1e-5):
    scale = bnp["gamma"] / jnp.sqrt(bnp["var"] + eps)
    shift = bnp["beta"] - bnp["mean"] * scale
    return scale, shift


# ------------------------------ parameters -----------------------------------

class ParamGen:
    def __init__(self, seed):
        self._key = jax.random.PRNGKey(seed)

    def normal(self, shape, scale):
        self._key, sub = jax.random.split(self._key)
        return scale * jax.random.normal(sub, shape, F32)


def make_bn(pg, c):
    return dict(gamma=1.0 + pg.normal((c,), 0.05),
                beta=pg.normal((c,), 0.05),
                mean=pg.normal((c,), 0.05),
                var=1.0 + jnp.abs(pg.normal((c,), 0.05)))


def make_conv(pg, kh, kw, cin, cout):
    return pg.normal((kh, kw, cin, cout), float(kh * kw * cin) ** -0.5)


def make_linear(pg, cin, cout):
    return dict(w=pg.normal((cin, cout), float(cin) ** -0.5),
                b=pg.normal((cout,), 0.01))


def make_block(pg, cin, cout, stride):
    p = dict(conv1=make_conv(pg, 3, 3, cin, cout), bn1=make_bn(pg, cout),
             conv2=make_conv(pg, 3, 3, cout, cout), bn2=make_bn(pg, cout))
    if stride != 1 or cin != cout:
        p["down_conv"] = make_conv(pg, 1, 1, cin, cout)
        p["down_bn"] = make_bn(pg, cout)
    return p


def make_meta(input_hw=32):
    chans = [16, 16, 32, 64, 128]
    s = (input_hw + 2 * 3 - 7) // 2 + 1          # conv1 7x7/s2 p3
    s = (s + 2 - 3) // 2 + 1                     # maxpool 3x3/s2 p1
    spatial = [s]                                # x0
    for st in (1, 2, 2, 2):                      # layer1..layer4
        s = s if st == 1 else (s + 2 - 3) // 2 + 1
        spatial.append(s)
    flat = [c * sz * sz for c, sz in zip(chans, spatial)]
    return dict(chans=chans, spatial=spatial, flat=flat)


def make_params(meta):
    pg = ParamGen(42)
    c0, c1, c2, c3, c4 = meta["chans"]
    nf = 256
    raw = dict(
        conv1=make_conv(pg, 7, 7, 3, c0), bn1=make_bn(pg, c0),
        layer1=make_block(pg, c0, c1, 1),
        layer2=make_block(pg, c1, c2, 2),
        layer3=make_block(pg, c2, c3, 2),
        layer4=make_block(pg, c3, c4, 2),
    )
    for i, f in enumerate(meta["flat"]):
        raw[f"conv_block_{i}"] = make_bn(pg, f)   # BN over the flattened feature dim
        raw[f"fc{i}"] = make_linear(pg, f, nf)
    raw["fc5"] = make_linear(pg, c4, nf)
    raw["att"] = dict(w1=make_linear(pg, nf, nf), v=make_linear(pg, nf, 1))
    raw["final_fc"] = make_linear(pg, nf, 7)
    return raw


def prepare_params(raw, meta):
    """Fold eval-mode BatchNorms into conv / FC weights, pad K once, cast matmul operands
    to bf16, and stack the 6 branch FCs (fc5's global avg-pool folded into its weights)."""
    def prep_conv(w, bn):
        s, t = bn_scale_shift(bn)
        w = w * s                                 # per-Cout BN scale folded into weights
        kh, kw, cin, cout = w.shape
        K = kh * kw * cin
        Kp = _round_up(K, 128)
        w2 = jnp.pad(w.reshape(K, cout), ((0, Kp - K), (0, 0))).astype(BF16)
        return dict(w=w2, b=t.reshape(1, cout).astype(F32))

    def prep_block(bp):
        out = dict(conv1=prep_conv(bp["conv1"], bp["bn1"]),
                   conv2=prep_conv(bp["conv2"], bp["bn2"]))
        if "down_conv" in bp:
            out["down"] = prep_conv(bp["down_conv"], bp["down_bn"])
        return out

    P = dict(conv1=prep_conv(raw["conv1"], raw["bn1"]),
             layer1=prep_block(raw["layer1"]), layer2=prep_block(raw["layer2"]),
             layer3=prep_block(raw["layer3"]), layer4=prep_block(raw["layer4"]))

    flat = meta["flat"]
    Kmax = max(flat)
    Ws, Bs = [], []
    for i, f in enumerate(flat):
        s, t = bn_scale_shift(raw[f"conv_block_{i}"])   # eval BN == affine -> fold into FC
        w, b = raw[f"fc{i}"]["w"], raw[f"fc{i}"]["b"]
        Ws.append(jnp.pad(w * s[:, None], ((0, Kmax - f), (0, 0))))
        Bs.append(b + t @ w)
    hw = meta["spatial"][-1] ** 2                       # fold avgpool into fc5's weight rows
    w5 = jnp.tile(raw["fc5"]["w"] / hw, (hw, 1))
    Ws.append(jnp.pad(w5, ((0, Kmax - w5.shape[0]), (0, 0))))
    Bs.append(raw["fc5"]["b"])
    P["branch_w"] = jnp.stack(Ws).astype(BF16)          # (6, Kmax, 256)
    P["branch_b"] = jnp.stack(Bs)[:, None, :].astype(F32)  # (6, 1, 256)

    P["att_w1"] = raw["att"]["w1"]["w"].astype(F32)
    P["att_b1"] = raw["att"]["w1"]["b"].reshape(1, -1).astype(F32)
    P["att_v"] = raw["att"]["v"]["w"].reshape(1, -1).astype(F32)
    # att v-bias dropped: softmax is shift-invariant, so it cannot change the output.
    P["final_w"] = raw["final_fc"]["w"].astype(F32)
    P["final_b"] = raw["final_fc"]["b"].reshape(1, -1).astype(F32)
    return P


# ------------------------------ forward ---------------------------------------

def forward(x_nchw, P):
    x = jnp.transpose(x_nchw, (0, 2, 3, 1)).astype(F32)     # NCHW -> NHWC once
    B = x.shape[0]

    # encoder0: conv7x7/s2 (+ folded BN + ReLU) + maxpool3x3/s2
    x = conv2d_fused(x, P["conv1"], 7, 7, 2, 3, activation="relu")
    x0 = maxpool2d(x)
    x1 = basic_block(x0, P["layer1"], 1)
    x2 = basic_block(x1, P["layer2"], 2)
    x3 = basic_block(x2, P["layer3"], 2)
    x4 = basic_block(x3, P["layer4"], 2)

    # Stack the 6 branch inputs: 5 flattened encoder outputs + flat(x4) again
    # (branch 5's global avg-pool is folded into its FC weights).
    Gw = P["branch_w"]
    Kmax = Gw.shape[1]
    Bp = _round_up(B, 8)
    rows = []
    for xi in (x0, x1, x2, x3, x4):
        f = xi.reshape(B, -1)                               # Flatten() (NHWC order; see TODO)
        rows.append(jnp.pad(f, ((0, Bp - B), (0, Kmax - f.shape[1]))))
    rows.append(rows[-1])
    A = jnp.stack(rows).astype(BF16)                        # (6, Bp, Kmax)

    out = pl.pallas_call(
        _branches_att_kernel,
        out_shape=jax.ShapeDtypeStruct((Bp, P["final_w"].shape[1]), F32),
        in_specs=[VMEM_SPEC] * 8,
        out_specs=VMEM_SPEC,
    )(A, Gw, P["branch_b"], P["att_w1"], P["att_b1"], P["att_v"],
      P["final_w"], P["final_b"])
    return out[:B]


if __name__ == "__main__":
    meta = make_meta(32)
    params = prepare_params(make_params(meta), meta)
    x = jax.random.normal(jax.random.PRNGKey(0), (2, 3, 32, 32), F32)
    fwd = jax.jit(forward)
    out = jax.block_until_ready(fwd(x, params))
    assert out.shape == (2, 7), out.shape
    assert bool(jnp.all(jnp.isfinite(out)))
    print("KERNEL_OK")
</pallas_src>

<mosaic_0001>
module attributes {stable_mosaic.version = 11 : i64} {
  func.func @_mm_bias_act_kernel(%arg0: memref<512x256xbf16, #tpu.memory_space<vmem>>, %arg1: memref<256x16xbf16, #tpu.memory_space<vmem>>, %arg2: memref<1x16xf32, #tpu.memory_space<vmem>>, %arg3: memref<512x16xf32, #tpu.memory_space<vmem>>) attributes {dimension_semantics = [], scalar_prefetch = 0 : i64, scratch_operands = 0 : i64, tpu.core_type = #tpu.core_type<tc>} {
    %c0 = arith.constant 0 : index
    %c0_0 = arith.constant 0 : index
    %0 = vector.load %arg0[%c0, %c0_0] : memref<512x256xbf16, #tpu.memory_space<vmem>>, vector<512x256xbf16>
    %c0_1 = arith.constant 0 : index
    %c0_2 = arith.constant 0 : index
    %1 = vector.load %arg1[%c0_1, %c0_2] : memref<256x16xbf16, #tpu.memory_space<vmem>>, vector<256x16xbf16>
    %cst = arith.constant dense<0.000000e+00> : vector<512x16xf32>
    %2 = tpu.matmul %0, %1, %cst {dimension_numbers = #tpu.dot_dimension_numbers<[1], [0], [0], [1], [0, 0, 1, 1], [], []>} : vector<512x256xbf16>, vector<256x16xbf16>, vector<512x16xf32> -> vector<512x16xf32>
    %c0_3 = arith.constant 0 : index
    %c0_4 = arith.constant 0 : index
    %3 = vector.load %arg2[%c0_3, %c0_4] : memref<1x16xf32, #tpu.memory_space<vmem>>, vector<1x16xf32>
    %4 = vector.broadcast %3 : vector<1x16xf32> to vector<512x16xf32>
    %5 = arith.addf %2, %4 : vector<512x16xf32>
    %cst_5 = arith.constant 0.000000e+00 : f32
    %6 = vector.broadcast %cst_5 : f32 to vector<512x16xf32>
    %7 = arith.maximumf %5, %6 : vector<512x16xf32>
    %c0_6 = arith.constant 0 : index
    %c0_7 = arith.constant 0 : index
    %8 = vector.load %arg3[%c0_6, %c0_7] : memref<512x16xf32, #tpu.memory_space<vmem>>, vector<512x16xf32>
    tpu.vector_store %arg3[%c0_6, %c0_7], %7 {strides = array<i32>} : memref<512x16xf32, #tpu.memory_space<vmem>>, vector<512x16xf32>,
    return
  }
}

module attributes {stable_mosaic.version = 11 : i64} {
  func.func @_window_max_kernel(%arg0: memref<128x9x128xf32, #tpu.memory_space<vmem>>, %arg1: memref<128x128xf32, #tpu.memory_space<vmem>>) attributes {dimension_semantics = [], scalar_prefetch = 0 : i64, scratch_operands = 0 : i64, tpu.core_type = #tpu.core_type<tc>} {
    %c0 = arith.constant 0 : index
    %c0_0 = arith.constant 0 : index
    %c0_1 = arith.constant 0 : index
    %0 = vector.load %arg0[%c0, %c0_0, %c0_1] : memref<128x9x128xf32, #tpu.memory_space<vmem>>, vector<128x9x128xf32>
    %cst = arith.constant dense<0xFF800000> : vector<128x128xf32>
    %1 = vector.multi_reduction <maximumf>, %0, %cst [1] : vector<128x9x128xf32> to vector<128x128xf32>
    %c0_2 = arith.constant 0 : index
    %c0_3 = arith.constant 0 : index
    %2 = vector.load %arg1[%c0_2, %c0_3] : memref<128x128xf32, #tpu.memory_space<vmem>>, vector<128x128xf32>
    tpu.vector_store %arg1[%c0_2, %c0_3], %1 {strides = array<i32>} : memref<128x128xf32, #tpu.memory_space<vmem>>, vector<128x128xf32>,
    return
  }
}

module attributes {stable_mosaic.version = 11 : i64} {
  func.func @_mm_bias_act_kernel(%arg0: memref<128x256xbf16, #tpu.memory_space<vmem>>, %arg1: memref<256x16xbf16, #tpu.memory_space<vmem>>, %arg2: memref<1x16xf32, #tpu.memory_space<vmem>>, %arg3: memref<128x16xf32, #tpu.memory_space<vmem>>) attributes {dimension_semantics = [], scalar_prefetch = 0 : i64, scratch_operands = 0 : i64, tpu.core_type = #tpu.core_type<tc>} {
    %c0 = arith.constant 0 : index
    %c0_0 = arith.constant 0 : index
    %0 = vector.load %arg0[%c0, %c0_0] : memref<128x256xbf16, #tpu.memory_space<vmem>>, vector<128x256xbf16>
    %c0_1 = arith.constant 0 : index
    %c0_2 = arith.constant 0 : index
    %1 = vector.load %arg1[%c0_1, %c0_2] : memref<256x16xbf16, #tpu.memory_space<vmem>>, vector<256x16xbf16>
    %cst = arith.constant dense<0.000000e+00> : vector<128x16xf32>
    %2 = tpu.matmul %0, %1, %cst {dimension_numbers = #tpu.dot_dimension_numbers<[1], [0], [0], [1], [0, 0, 1, 1], [], []>} : vector<128x256xbf16>, vector<256x16xbf16>, vector<128x16xf32> -> vector<128x16xf32>
    %c0_3 = arith.constant 0 : index
    %c0_4 = arith.constant 0 : index
    %3 = vector.load %arg2[%c0_3, %c0_4] : memref<1x16xf32, #tpu.memory_space<vmem>>, vector<1x16xf32>
    %4 = vector.broadcast %3 : vector<1x16xf32> to vector<128x16xf32>
    %5 = arith.addf %2, %4 : vector<128x16xf32>
    %cst_5 = arith.constant 0.000000e+00 : f32
    %6 = vector.broadcast %cst_5 : f32 to vector<128x16xf32>
    %7 = arith.maximumf %5, %6 : vector<128x16xf32>
    %c0_6 = arith.constant 0 : index
    %c0_7 = arith.constant 0 : index
    %8 = vector.load %arg3[%c0_6, %c0_7] : memref<128x16xf32, #tpu.memory_space<vmem>>, vector<128x16xf32>
    tpu.vector_store %arg3[%c0_6, %c0_7], %7 {strides = array<i32>} : memref<128x16xf32, #tpu.memory_space<vmem>>, vector<128x16xf32>,
    return
  }
}

module attributes {stable_mosaic.version = 11 : i64} {
  func.func @_mm_bias_res_relu_kernel(%arg0: memref<128x256xbf16, #tpu.memory_space<vmem>>, %arg1: memref<256x16xbf16, #tpu.memory_space<vmem>>, %arg2: memref<1x16xf32, #tpu.memory_space<vmem>>, %arg3: memref<128x16xf32, #tpu.memory_space<vmem>>, %arg4: memref<128x16xf32, #tpu.memory_space<vmem>>) attributes {dimension_semantics = [], scalar_prefetch = 0 : i64, scratch_operands = 0 : i64, tpu.core_type = #tpu.core_type<tc>} {
    %c0 = arith.constant 0 : index
    %c0_0 = arith.constant 0 : index
    %0 = vector.load %arg0[%c0, %c0_0] : memref<128x256xbf16, #tpu.memory_space<vmem>>, vector<128x256xbf16>
    %c0_1 = arith.constant 0 : index
    %c0_2 = arith.constant 0 : index
    %1 = vector.load %arg1[%c0_1, %c0_2] : memref<256x16xbf16, #tpu.memory_space<vmem>>, vector<256x16xbf16>
    %cst = arith.constant dense<0.000000e+00> : vector<128x16xf32>
    %2 = tpu.matmul %0, %1, %cst {dimension_numbers = #tpu.dot_dimension_numbers<[1], [0], [0], [1], [0, 0, 1, 1], [], []>} : vector<128x256xbf16>, vector<256x16xbf16>, vector<128x16xf32> -> vector<128x16xf32>
    %c0_3 = arith.constant 0 : index
    %c0_4 = arith.constant 0 : index
    %3 = vector.load %arg2[%c0_3, %c0_4] : memref<1x16xf32, #tpu.memory_space<vmem>>, vector<1x16xf32>
    %4 = vector.broadcast %3 : vector<1x16xf32> to vector<128x16xf32>
    %5 = arith.addf %2, %4 : vector<128x16xf32>
    %c0_5 = arith.constant 0 : index
    %c0_6 = arith.constant 0 : index
    %6 = vector.load %arg3[%c0_5, %c0_6] : memref<128x16xf32, #tpu.memory_space<vmem>>, vector<128x16xf32>
    %7 = arith.addf %5, %6 : vector<128x16xf32>
    %cst_7 = arith.constant 0.000000e+00 : f32
    %8 = vector.broadcast %cst_7 : f32 to vector<128x16xf32>
    %9 = arith.maximumf %7, %8 : vector<128x16xf32>
    %c0_8 = arith.constant 0 : index
    %c0_9 = arith.constant 0 : index
    %10 = vector.load %arg4[%c0_8, %c0_9] : memref<128x16xf32, #tpu.memory_space<vmem>>, vector<128x16xf32>
    tpu.vector_store %arg4[%c0_8, %c0_9], %9 {strides = array<i32>} : memref<128x16xf32, #tpu.memory_space<vmem>>, vector<128x16xf32>,
    return
  }
}

module attributes {stable_mosaic.version = 11 : i64} {
  func.func @_mm_bias_act_kernel(%arg0: memref<32x256xbf16, #tpu.memory_space<vmem>>, %arg1: memref<256x32xbf16, #tpu.memory_space<vmem>>, %arg2: memref<1x32xf32, #tpu.memory_space<vmem>>, %arg3: memref<32x32xf32, #tpu.memory_space<vmem>>) attributes {dimension_semantics = [], scalar_prefetch = 0 : i64, scratch_operands = 0 : i64, tpu.core_type = #tpu.core_type<tc>} {
    %c0 = arith.constant 0 : index
    %c0_0 = arith.constant 0 : index
    %0 = vector.load %arg0[%c0, %c0_0] : memref<32x256xbf16, #tpu.memory_space<vmem>>, vector<32x256xbf16>
    %c0_1 = arith.constant 0 : index
    %c0_2 = arith.constant 0 : index
    %1 = vector.load %arg1[%c0_1, %c0_2] : memref<256x32xbf16, #tpu.memory_space<vmem>>, vector<256x32xbf16>
    %cst = arith.constant dense<0.000000e+00> : vector<32x32xf32>
    %2 = tpu.matmul %0, %1, %cst {dimension_numbers = #tpu.dot_dimension_numbers<[1], [0], [0], [1], [0, 0, 1, 1], [], []>} : vector<32x256xbf16>, vector<256x32xbf16>, vector<32x32xf32> -> vector<32x32xf32>
    %c0_3 = arith.constant 0 : index
    %c0_4 = arith.constant 0 : index
    %3 = vector.load %arg2[%c0_3, %c0_4] : memref<1x32xf32, #tpu.memory_space<vmem>>, vector<1x32xf32>
    %4 = vector.broadcast %3 : vector<1x32xf32> to vector<32x32xf32>
    %5 = arith.addf %2, %4 : vector<32x32xf32>
    %cst_5 = arith.constant 0.000000e+00 : f32
    %6 = vector.broadcast %cst_5 : f32 to vector<32x32xf32>
    %7 = arith.maximumf %5, %6 : vector<32x32xf32>
    %c0_6 = arith.constant 0 : index
    %c0_7 = arith.constant 0 : index
    %8 = vector.load %arg3[%c0_6, %c0_7] : memref<32x32xf32, #tpu.memory_space<vmem>>, vector<32x32xf32>
    tpu.vector_store %arg3[%c0_6, %c0_7], %7 {strides = array<i32>} : memref<32x32xf32, #tpu.memory_space<vmem>>, vector<32x32xf32>,
    return
  }
}

module attributes {stable_mosaic.version = 11 : i64} {
  func.func @_mm_bias_act_kernel(%arg0: memref<32x128xbf16, #tpu.memory_space<vmem>>, %arg1: memref<128x32xbf16, #tpu.memory_space<vmem>>, %arg2: memref<1x32xf32, #tpu.memory_space<vmem>>, %arg3: memref<32x32xf32, #tpu.memory_space<vmem>>) attributes {dimension_semantics = [], scalar_prefetch = 0 : i64, scratch_operands = 0 : i64, tpu.core_type = #tpu.core_type<tc>} {
    %c0 = arith.constant 0 : index
    %c0_0 = arith.constant 0 : index
    %0 = vector.load %arg0[%c0, %c0_0] : memref<32x128xbf16, #tpu.memory_space<vmem>>, vector<32x128xbf16>
    %c0_1 = arith.constant 0 : index
    %c0_2 = arith.constant 0 : index
    %1 = vector.load %arg1[%c0_1, %c0_2] : memref<128x32xbf16, #tpu.memory_space<vmem>>, vector<128x32xbf16>
    %cst = arith.constant dense<0.000000e+00> : vector<32x32xf32>
    %2 = tpu.matmul %0, %1, %cst {dimension_numbers = #tpu.dot_dimension_numbers<[1], [0], [0], [1], [0, 0, 1, 1], [], []>} : vector<32x128xbf16>, vector<128x32xbf16>, vector<32x32xf32> -> vector<32x32xf32>
    %c0_3 = arith.constant 0 : index
    %c0_4 = arith.constant 0 : index
    %3 = vector.load %arg2[%c0_3, %c0_4] : memref<1x32xf32, #tpu.memory_space<vmem>>, vector<1x32xf32>
    %4 = vector.broadcast %3 : vector<1x32xf32> to vector<32x32xf32>
    %5 = arith.addf %2, %4 : vector<32x32xf32>
    %c0_5 = arith.constant 0 : index
    %c0_6 = arith.constant 0 : index
    %6 = vector.load %arg3[%c0_5, %c0_6] : memref<32x32xf32, #tpu.memory_space<vmem>>, vector<32x32xf32>
    tpu.vector_store %arg3[%c0_5, %c0_6], %5 {strides = array<i32>} : memref<32x32xf32, #tpu.memory_space<vmem>>, vector<32x32xf32>,
    return
  }
}

module attributes {stable_mosaic.version = 11 : i64} {
  func.func @_mm_bias_res_relu_kernel(%arg0: memref<32x384xbf16, #tpu.memory_space<vmem>>, %arg1: memref<384x32xbf16, #tpu.memory_space<vmem>>, %arg2: memref<1x32xf32, #tpu.memory_space<vmem>>, %arg3: memref<32x32xf32, #tpu.memory_space<vmem>>, %arg4: memref<32x32xf32, #tpu.memory_space<vmem>>) attributes {dimension_semantics = [], scalar_prefetch = 0 : i64, scratch_operands = 0 : i64, tpu.core_type = #tpu.core_type<tc>} {
    %c0 = arith.constant 0 : index
    %c0_0 = arith.constant 0 : index
    %0 = vector.load %arg0[%c0, %c0_0] : memref<32x384xbf16, #tpu.memory_space<vmem>>, vector<32x384xbf16>
    %c0_1 = arith.constant 0 : index
    %c0_2 = arith.constant 0 : index
    %1 = vector.load %arg1[%c0_1, %c0_2] : memref<384x32xbf16, #tpu.memory_space<vmem>>, vector<384x32xbf16>
    %cst = arith.constant dense<0.000000e+00> : vector<32x32xf32>
    %2 = tpu.matmul %0, %1, %cst {dimension_numbers = #tpu.dot_dimension_numbers<[1], [0], [0], [1], [0, 0, 1, 1], [], []>} : vector<32x384xbf16>, vector<384x32xbf16>, vector<32x32xf32> -> vector<32x32xf32>
    %c0_3 = arith.constant 0 : index
    %c0_4 = arith.constant 0 : index
    %3 = vector.load %arg2[%c0_3, %c0_4] : memref<1x32xf32, #tpu.memory_space<vmem>>, vector<1x32xf32>
    %4 = vector.broadcast %3 : vector<1x32xf32> to vector<32x32xf32>
    %5 = arith.addf %2, %4 : vector<32x32xf32>
    %c0_5 = arith.constant 0 : index
    %c0_6 = arith.constant 0 : index
    %6 = vector.load %arg3[%c0_5, %c0_6] : memref<32x32xf32, #tpu.memory_space<vmem>>, vector<32x32xf32>
    %7 = arith.addf %5, %6 : vector<32x32xf32>
    %cst_7 = arith.constant 0.000000e+00 : f32
    %8 = vector.broadcast %cst_7 : f32 to vector<32x32xf32>
    %9 = arith.maximumf %7, %8 : vector<32x32xf32>
    %c0_8 = arith.constant 0 : index
    %c0_9 = arith.constant 0 : index
    %10 = vector.load %arg4[%c0_8, %c0_9] : memref<32x32xf32, #tpu.memory_space<vmem>>, vector<32x32xf32>
    tpu.vector_store %arg4[%c0_8, %c0_9], %9 {strides = array<i32>} : memref<32x32xf32, #tpu.memory_space<vmem>>, vector<32x32xf32>,
    return
  }
}

module attributes {stable_mosaic.version = 11 : i64} {
  func.func @_mm_bias_act_kernel(%arg0: memref<8x384xbf16, #tpu.memory_space<vmem>>, %arg1: memref<384x64xbf16, #tpu.memory_space<vmem>>, %arg2: memref<1x64xf32, #tpu.memory_space<vmem>>, %arg3: memref<8x64xf32, #tpu.memory_space<vmem>>) attributes {dimension_semantics = [], scalar_prefetch = 0 : i64, scratch_operands = 0 : i64, tpu.core_type = #tpu.core_type<tc>} {
    %c0 = arith.constant 0 : index
    %c0_0 = arith.constant 0 : index
    %0 = vector.load %arg0[%c0, %c0_0] : memref<8x384xbf16, #tpu.memory_space<vmem>>, vector<8x384xbf16>
    %c0_1 = arith.constant 0 : index
    %c0_2 = arith.constant 0 : index
    %1 = vector.load %arg1[%c0_1, %c0_2] : memref<384x64xbf16, #tpu.memory_space<vmem>>, vector<384x64xbf16>
    %cst = arith.constant dense<0.000000e+00> : vector<8x64xf32>
    %2 = tpu.matmul %0, %1, %cst {dimension_numbers = #tpu.dot_dimension_numbers<[1], [0], [0], [1], [0, 0, 1, 1], [], []>} : vector<8x384xbf16>, vector<384x64xbf16>, vector<8x64xf32> -> vector<8x64xf32>
    %c0_3 = arith.constant 0 : index
    %c0_4 = arith.constant 0 : index
    %3 = vector.load %arg2[%c0_3, %c0_4] : memref<1x64xf32, #tpu.memory_space<vmem>>, vector<1x64xf32>
    %4 = vector.broadcast %3 : vector<1x64xf32> to vector<8x64xf32>
    %5 = arith.addf %2, %4 : vector<8x64xf32>
    %cst_5 = arith.constant 0.000000e+00 : f32
    %6 = vector.broadcast %cst_5 : f32 to vector<8x64xf32>
    %7 = arith.maximumf %5, %6 : vector<8x64xf32>
    %c0_6 = arith.constant 0 : index
    %c0_7 = arith.constant 0 : index
    %8 = vector.load %arg3[%c0_6, %c0_7] : memref<8x64xf32, #tpu.memory_space<vmem>>, vector<8x64xf32>
    tpu.vector_store %arg3[%c0_6, %c0_7], %7 {strides = array<i32>} : memref<8x64xf32, #tpu.memory_space<vmem>>, vector<8x64xf32>,
    return
  }
}

module attributes {stable_mosaic.version = 11 : i64} {
  func.func @_mm_bias_res_relu_kernel(%arg0: memref<8x640xbf16, #tpu.memory_space<vmem>>, %arg1: memref<640x64xbf16, #tpu.memory_space<vmem>>, %arg2: memref<1x64xf32, #tpu.memory_space<vmem>>, %arg3: memref<8x64xf32, #tpu.memory_space<vmem>>, %arg4: memref<8x64xf32, #tpu.memory_space<vmem>>) attributes {dimension_semantics = [], scalar_prefetch = 0 : i64, scratch_operands = 0 : i64, tpu.core_type = #tpu.core_type<tc>} {
    %c0 = arith.constant 0 : index
    %c0_0 = arith.constant 0 : index
    %0 = vector.load %arg0[%c0, %c0_0] : memref<8x640xbf16, #tpu.memory_space<vmem>>, vector<8x640xbf16>
    %c0_1 = arith.constant 0 : index
    %c0_2 = arith.constant 0 : index
    %1 = vector.load %arg1[%c0_1, %c0_2] : memref<640x64xbf16, #tpu.memory_space<vmem>>, vector<640x64xbf16>
    %cst = arith.constant dense<0.000000e+00> : vector<8x64xf32>
    %2 = tpu.matmul %0, %1, %cst {dimension_numbers = #tpu.dot_dimension_numbers<[1], [0], [0], [1], [0, 0, 1, 1], [], []>} : vector<8x640xbf16>, vector<640x64xbf16>, vector<8x64xf32> -> vector<8x64xf32>
    %c0_3 = arith.constant 0 : index
    %c0_4 = arith.constant 0 : index
    %3 = vector.load %arg2[%c0_3, %c0_4] : memref<1x64xf32, #tpu.memory_space<vmem>>, vector<1x64xf32>
    %4 = vector.broadcast %3 : vector<1x64xf32> to vector<8x64xf32>
    %5 = arith.addf %2, %4 : vector<8x64xf32>
    %c0_5 = arith.constant 0 : index
    %c0_6 = arith.constant 0 : index
    %6 = vector.load %arg3[%c0_5, %c0_6] : memref<8x64xf32, #tpu.memory_space<vmem>>, vector<8x64xf32>
    %7 = arith.addf %5, %6 : vector<8x64xf32>
    %cst_7 = arith.constant 0.000000e+00 : f32
    %8 = vector.broadcast %cst_7 : f32 to vector<8x64xf32>
    %9 = arith.maximumf %7, %8 : vector<8x64xf32>
    %c0_8 = arith.constant 0 : index
    %c0_9 = arith.constant 0 : index
    %10 = vector.load %arg4[%c0_8, %c0_9] : memref<8x64xf32, #tpu.memory_space<vmem>>, vector<8x64xf32>
    tpu.vector_store %arg4[%c0_8, %c0_9], %9 {strides = array<i32>} : memref<8x64xf32, #tpu.memory_space<vmem>>, vector<8x64xf32>,
    return
  }
}

module attributes {stable_mosaic.version = 11 : i64} {
  func.func @_mm_bias_act_kernel(%arg0: memref<8x128xbf16, #tpu.memory_space<vmem>>, %arg1: memref<128x64xbf16, #tpu.memory_space<vmem>>, %arg2: memref<1x64xf32, #tpu.memory_space<vmem>>, %arg3: memref<8x64xf32, #tpu.memory_space<vmem>>) attributes {dimension_semantics = [], scalar_prefetch = 0 : i64, scratch_operands = 0 : i64, tpu.core_type = #tpu.core_type<tc>} {
    %c0 = arith.constant 0 : index
    %c0_0 = arith.constant 0 : index
    %0 = vector.load %arg0[%c0, %c0_0] : memref<8x128xbf16, #tpu.memory_space<vmem>>, vector<8x128xbf16>
    %c0_1 = arith.constant 0 : index
    %c0_2 = arith.constant 0 : index
    %1 = vector.load %arg1[%c0_1, %c0_2] : memref<128x64xbf16, #tpu.memory_space<vmem>>, vector<128x64xbf16>
    %cst = arith.constant dense<0.000000e+00> : vector<8x64xf32>
    %2 = tpu.matmul %0, %1, %cst {dimension_numbers = #tpu.dot_dimension_numbers<[1], [0], [0], [1], [0, 0, 1, 1], [], []>} : vector<8x128xbf16>, vector<128x64xbf16>, vector<8x64xf32> -> vector<8x64xf32>
    %c0_3 = arith.constant 0 : index
    %c0_4 = arith.constant 0 : index
    %3 = vector.load %arg2[%c0_3, %c0_4] : memref<1x64xf32, #tpu.memory_space<vmem>>, vector<1x64xf32>
    %4 = vector.broadcast %3 : vector<1x64xf32> to vector<8x64xf32>
    %5 = arith.addf %2, %4 : vector<8x64xf32>
    %c0_5 = arith.constant 0 : index
    %c0_6 = arith.constant 0 : index
    %6 = vector.load %arg3[%c0_5, %c0_6] : memref<8x64xf32, #tpu.memory_space<vmem>>, vector<8x64xf32>
    tpu.vector_store %arg3[%c0_5, %c0_6], %5 {strides = array<i32>} : memref<8x64xf32, #tpu.memory_space<vmem>>, vector<8x64xf32>,
    return
  }
}

module attributes {stable_mosaic.version = 11 : i64} {
  func.func @_mm_bias_act_kernel(%arg0: memref<8x640xbf16, #tpu.memory_space<vmem>>, %arg1: memref<640x128xbf16, #tpu.memory_space<vmem>>, %arg2: memref<1x128xf32, #tpu.memory_space<vmem>>, %arg3: memref<8x128xf32, #tpu.memory_space<vmem>>) attributes {dimension_semantics = [], scalar_prefetch = 0 : i64, scratch_operands = 0 : i64, tpu.core_type = #tpu.core_type<tc>} {
    %c0 = arith.constant 0 : index
    %c0_0 = arith.constant 0 : index
    %0 = vector.load %arg0[%c0, %c0_0] : memref<8x640xbf16, #tpu.memory_space<vmem>>, vector<8x640xbf16>
    %c0_1 = arith.constant 0 : index
    %c0_2 = arith.constant 0 : index
    %1 = vector.load %arg1[%c0_1, %c0_2] : memref<640x128xbf16, #tpu.memory_space<vmem>>, vector<640x128xbf16>
    %cst = arith.constant dense<0.000000e+00> : vector<8x128xf32>
    %2 = tpu.matmul %0, %1, %cst {dimension_numbers = #tpu.dot_dimension_numbers<[1], [0], [0], [1], [0, 0, 1, 1], [], []>} : vector<8x640xbf16>, vector<640x128xbf16>, vector<8x128xf32> -> vector<8x128xf32>
    %c0_3 = arith.constant 0 : index
    %c0_4 = arith.constant 0 : index
    %3 = vector.load %arg2[%c0_3, %c0_4] : memref<1x128xf32, #tpu.memory_space<vmem>>, vector<1x128xf32>
    %4 = vector.broadcast %3 : vector<1x128xf32> to vector<8x128xf32>
    %5 = arith.addf %2, %4 : vector<8x128xf32>
    %cst_5 = arith.constant 0.000000e+00 : f32
    %6 = vector.broadcast %cst_5 : f32 to vector<8x128xf32>
    %7 = arith.maximumf %5, %6 : vector<8x128xf32>
    %c0_6 = arith.constant 0 : index
    %c0_7 = arith.constant 0 : index
    %8 = vector.load %arg3[%c0_6, %c0_7] : memref<8x128xf32, #tpu.memory_space<vmem>>, vector<8x128xf32>
    tpu.vector_store %arg3[%c0_6, %c0_7], %7 {strides = array<i32>} : memref<8x128xf32, #tpu.memory_space<vmem>>, vector<8x128xf32>,
    return
  }
}

module attributes {stable_mosaic.version = 11 : i64} {
  func.func @_mm_bias_act_kernel(%arg0: memref<8x128xbf16, #tpu.memory_space<vmem>>, %arg1: memref<128x128xbf16, #tpu.memory_space<vmem>>, %arg2: memref<1x128xf32, #tpu.memory_space<vmem>>, %arg3: memref<8x128xf32, #tpu.memory_space<vmem>>) attributes {dimension_semantics = [], scalar_prefetch = 0 : i64, scratch_operands = 0 : i64, tpu.core_type = #tpu.core_type<tc>} {
    %c0 = arith.constant 0 : index
    %c0_0 = arith.constant 0 : index
    %0 = vector.load %arg0[%c0, %c0_0] : memref<8x128xbf16, #tpu.memory_space<vmem>>, vector<8x128xbf16>
    %c0_1 = arith.constant 0 : index
    %c0_2 = arith.constant 0 : index
    %1 = vector.load %arg1[%c0_1, %c0_2] : memref<128x128xbf16, #tpu.memory_space<vmem>>, vector<128x128xbf16>
    %cst = arith.constant dense<0.000000e+00> : vector<8x128xf32>
    %2 = tpu.matmul %0, %1, %cst {dimension_numbers = #tpu.dot_dimension_numbers<[1], [0], [0], [1], [0, 0, 1, 1], [], []>} : vector<8x128xbf16>, vector<128x128xbf16>, vector<8x128xf32> -> vector<8x128xf32>
    %c0_3 = arith.constant 0 : index
    %c0_4 = arith.constant 0 : index
    %3 = vector.load %arg2[%c0_3, %c0_4] : memref<1x128xf32, #tpu.memory_space<vmem>>, vector<1x128xf32>
    %4 = vector.broadcast %3 : vector<1x128xf32> to vector<8x128xf32>
    %5 = arith.addf %2, %4 : vector<8x128xf32>
    %c0_5 = arith.constant 0 : index
    %c0_6 = arith.constant 0 : index
    %6 = vector.load %arg3[%c0_5, %c0_6] : memref<8x128xf32, #tpu.memory_space<vmem>>, vector<8x128xf32>
    tpu.vector_store %arg3[%c0_5, %c0_6], %5 {strides = array<i32>} : memref<8x128xf32, #tpu.memory_space<vmem>>, vector<8x128xf32>,
    return
  }
}

module attributes {stable_mosaic.version = 11 : i64} {
  func.func @_mm_bias_res_relu_kernel(%arg0: memref<8x1152xbf16, #tpu.memory_space<vmem>>, %arg1: memref<1152x128xbf16, #tpu.memory_space<vmem>>, %arg2: memref<1x128xf32, #tpu.memory_space<vmem>>, %arg3: memref<8x128xf32, #tpu.memory_space<vmem>>, %arg4: memref<8x128xf32, #tpu.memory_space<vmem>>) attributes {dimension_semantics = [], scalar_prefetch = 0 : i64, scratch_operands = 0 : i64, tpu.core_type = #tpu.core_type<tc>} {
    %c0 = arith.constant 0 : index
    %c0_0 = arith.constant 0 : index
    %0 = vector.load %arg0[%c0, %c0_0] : memref<8x1152xbf16, #tpu.memory_space<vmem>>, vector<8x1152xbf16>
    %c0_1 = arith.constant 0 : index
    %c0_2 = arith.constant 0 : index
    %1 = vector.load %arg1[%c0_1, %c0_2] : memref<1152x128xbf16, #tpu.memory_space<vmem>>, vector<1152x128xbf16>
    %cst = arith.constant dense<0.000000e+00> : vector<8x128xf32>
    %2 = tpu.matmul %0, %1, %cst {dimension_numbers = #tpu.dot_dimension_numbers<[1], [0], [0], [1], [0, 0, 1, 1], [], []>} : vector<8x1152xbf16>, vector<1152x128xbf16>, vector<8x128xf32> -> vector<8x128xf32>
    %c0_3 = arith.constant 0 : index
    %c0_4 = arith.constant 0 : index
    %3 = vector.load %arg2[%c0_3, %c0_4] : memref<1x128xf32, #tpu.memory_space<vmem>>, vector<1x128xf32>
    %4 = vector.broadcast %3 : vector<1x128xf32> to vector<8x128xf32>
    %5 = arith.addf %2, %4 : vector<8x128xf32>
    %c0_5 = arith.constant 0 : index
    %c0_6 = arith.constant 0 : index
    %6 = vector.load %arg3[%c0_5, %c0_6] : memref<8x128xf32, #tpu.memory_space<vmem>>, vector<8x128xf32>
    %7 = arith.addf %5, %6 : vector<8x128xf32>
    %cst_7 = arith.constant 0.000000e+00 : f32
    %8 = vector.broadcast %cst_7 : f32 to vector<8x128xf32>
    %9 = arith.maximumf %7, %8 : vector<8x128xf32>
    %c0_8 = arith.constant 0 : index
    %c0_9 = arith.constant 0 : index
    %10 = vector.load %arg4[%c0_8, %c0_9] : memref<8x128xf32, #tpu.memory_space<vmem>>, vector<8x128xf32>
    tpu.vector_store %arg4[%c0_8, %c0_9], %9 {strides = array<i32>} : memref<8x128xf32, #tpu.memory_space<vmem>>, vector<8x128xf32>,
    return
  }
}

module attributes {stable_mosaic.version = 11 : i64} {
  func.func @_branches_att_kernel(%arg0: memref<6x8x1024xbf16, #tpu.memory_space<vmem>>, %arg1: memref<6x1024x256xbf16, #tpu.memory_space<vmem>>, %arg2: memref<6x1x256xf32, #tpu.memory_space<vmem>>, %arg3: memref<256x256xf32, #tpu.memory_space<vmem>>, %arg4: memref<1x256xf32, #tpu.memory_space<vmem>>, %arg5: memref<1x256xf32, #tpu.memory_space<vmem>>, %arg6: memref<256x7xf32, #tpu.memory_space<vmem>>, %arg7: memref<1x7xf32, #tpu.memory_space<vmem>>, %arg8: memref<8x7xf32, #tpu.memory_space<vmem>>) attributes {dimension_semantics = [], scalar_prefetch = 0 : i64, scratch_operands = 0 : i64, tpu.core_type = #tpu.core_type<tc>} {
    %c0 = arith.constant 0 : index
    %c0_0 = arith.constant 0 : index
    %c0_1 = arith.constant 0 : index
    %0 = vector.load %arg0[%c0, %c0_0, %c0_1] : memref<6x8x1024xbf16, #tpu.memory_space<vmem>>, vector<6x8x1024xbf16>
    %c0_2 = arith.constant 0 : index
    %c0_3 = arith.constant 0 : index
    %c0_4 = arith.constant 0 : index
    %1 = vector.load %arg1[%c0_2, %c0_3, %c0_4] : memref<6x1024x256xbf16, #tpu.memory_space<vmem>>, vector<6x1024x256xbf16>
    "tpu.trace_start"() <{level = 10 : i32, message = "gbk,gkn->gbn"}> : () -> ()
    %cst = arith.constant dense<0.000000e+00> : vector<6x8x256xf32>
    %2 = tpu.matmul %0, %1, %cst {dimension_numbers = #tpu.dot_dimension_numbers<[2], [1], [1], [2], [0, 0, 0, 1, 1, 2], [0], [0]>} : vector<6x8x1024xbf16>, vector<6x1024x256xbf16>, vector<6x8x256xf32> -> vector<6x8x256xf32>
    "tpu.trace_stop"() : () -> ()
    %c0_5 = arith.constant 0 : index
    %c0_6 = arith.constant 0 : index
    %c0_7 = arith.constant 0 : index
    %3 = vector.load %arg2[%c0_5, %c0_6, %c0_7] : memref<6x1x256xf32, #tpu.memory_space<vmem>>, vector<6x1x256xf32>
    %4 = vector.broadcast %3 : vector<6x1x256xf32> to vector<6x8x256xf32>
    %5 = arith.addf %2, %4 : vector<6x8x256xf32>
    %6 = vector.shape_cast %5 : vector<6x8x256xf32> to vector<48x256xf32>
    %c0_8 = arith.constant 0 : index
    %c0_9 = arith.constant 0 : index
    %7 = vector.load %arg3[%c0_8, %c0_9] : memref<256x256xf32, #tpu.memory_space<vmem>>, vector<256x256xf32>
    %cst_10 = arith.constant dense<0.000000e+00> : vector<48x256xf32>
    %8 = tpu.matmul %6, %7, %cst_10 {dimension_numbers = #tpu.dot_dimension_numbers<[1], [0], [0], [1], [0, 0, 1, 1], [], []>} : vector<48x256xf32>, vector<256x256xf32>, vector<48x256xf32> -> vector<48x256xf32>
    %c0_11 = arith.constant 0 : index
    %c0_12 = arith.constant 0 : index
    %9 = vector.load %arg4[%c0_11, %c0_12] : memref<1x256xf32, #tpu.memory_space<vmem>>, vector<1x256xf32>
    %10 = vector.broadcast %9 : vector<1x256xf32> to vector<48x256xf32>
    %11 = arith.addf %8, %10 : vector<48x256xf32>
    %12 = math.tanh %11 : vector<48x256xf32>
    %13 = vector.shape_cast %12 : vector<48x256xf32> to vector<6x8x256xf32>
    %c0_13 = arith.constant 0 : index
    %c0_14 = arith.constant 0 : index
    %14 = vector.load %arg5[%c0_13, %c0_14] : memref<1x256xf32, #tpu.memory_space<vmem>>, vector<1x256xf32>
    %15 = vector.shape_cast %14 : vector<1x256xf32> to vector<1x1x256xf32>
    %16 = vector.broadcast %15 : vector<1x1x256xf32> to vector<6x8x256xf32>
    %17 = arith.mulf %13, %16 : vector<6x8x256xf32>
    %cst_15 = arith.constant dense<0.000000e+00> : vector<6x8xf32>
    %18 = vector.multi_reduction <add>, %17, %cst_15 [2] : vector<6x8x256xf32> to vector<6x8xf32>
    %19 = vector.shape_cast %18 : vector<6x8xf32> to vector<6x8x1xf32>
    %cst_16 = arith.constant dense<0xFF800000> : vector<8x1xf32>
    %20 = vector.multi_reduction <maximumf>, %19, %cst_16 [0] : vector<6x8x1xf32> to vector<8x1xf32>
    %21 = vector.shape_cast %20 : vector<8x1xf32> to vector<1x8x1xf32>
    %22 = vector.broadcast %21 : vector<1x8x1xf32> to vector<6x8x1xf32>
    %23 = arith.subf %19, %22 : vector<6x8x1xf32>
    %24 = math.exp %23 : vector<6x8x1xf32>
    %cst_17 = arith.constant dense<0.000000e+00> : vector<8x1xf32>
    %25 = vector.multi_reduction <add>, %24, %cst_17 [0] : vector<6x8x1xf32> to vector<8x1xf32>
    %26 = vector.shape_cast %25 : vector<8x1xf32> to vector<1x8x1xf32>
    %27 = vector.broadcast %26 : vector<1x8x1xf32> to vector<6x8x1xf32>
    %28 = arith.divf %24, %27 : vector<6x8x1xf32>
    %29 = vector.broadcast %28 : vector<6x8x1xf32> to vector<6x8x256xf32>
    %30 = arith.mulf %29, %5 : vector<6x8x256xf32>
    %cst_18 = arith.constant dense<0.000000e+00> : vector<8x256xf32>
    %31 = vector.multi_reduction <add>, %30, %cst_18 [0] : vector<6x8x256xf32> to vector<8x256xf32>
    %c0_19 = arith.constant 0 : index
    %c0_20 = arith.constant 0 : index
    %32 = vector.load %arg6[%c0_19, %c0_20] : memref<256x7xf32, #tpu.memory_space<vmem>>, vector<256x7xf32>
    %cst_21 = arith.constant dense<0.000000e+00> : vector<8x7xf32>
    %33 = tpu.matmul %31, %32, %cst_21 {dimension_numbers = #tpu.dot_dimension_numbers<[1], [0], [0], [1], [0, 0, 1, 1], [], []>} : vector<8x256xf32>, vector<256x7xf32>, vector<8x7xf32> -> vector<8x7xf32>
    %c0_22 = arith.constant 0 : index
    %c0_23 = arith.constant 0 : index
    %34 = vector.load %arg7[%c0_22, %c0_23] : memref<1x7xf32, #tpu.memory_space<vmem>>, vector<1x7xf32>
    %35 = vector.broadcast %34 : vector<1x7xf32> to vector<8x7xf32>
    %36 = arith.addf %33, %35 : vector<8x7xf32>
    %c0_24 = arith.constant 0 : index
    %c0_25 = arith.constant 0 : index
    %37 = vector.load %arg8[%c0_24, %c0_25] : memref<8x7xf32, #tpu.memory_space<vmem>>, vector<8x7xf32>
    tpu.vector_store %arg8[%c0_24, %c0_25], %36 {strides = array<i32>} : memref<8x7xf32, #tpu.memory_space<vmem>>, vector<8x7xf32>,
    return
  }
}

</mosaic_0001>

<bundles_post_ra>
// kernel: forward.14
= control target key start
LH: loop header
LB: loop body
LE: loop exit
PB: predicated region body
PF: predicated region fallthrough
CT: control target
= control target key end

     0   :  { %v1182_v0 = vmov 0   ;;  %vm887_vm0 = vcmask 130048   ;;  %s1800_s1 = inlined_call_operand.vmem [shape: bf16[256,16], index: 1, kind: input, shape index: {}]   ;;  %s1801_s0 = inlined_call_operand.vmem [shape: bf16[512,256], index: 0, kind: input, shape index: {}]   ;;  %s1802_s2 = inlined_call_operand.vmem [shape: f32[1,16], index: 2, kind: input, shape index: {}]   ;;  %s1803_s3 = inlined_call_operand.vmem [shape: f32[512,16], index: 3, kind: output, shape index: {}]  }
   0x1   :  { %534 = vmatprep.subr.bf16.mxu0 %v1182_v0  ;;  %1037 = vmatprep.subr.bf16.mxu1 %v1182_v0  ;;  %v1070_v1 = vld [vmem:[%s1800_s1] sm:$0xff]   ;;  %v1071_v2 = vld [vmem:[%s1800_s1 + $0x8] sm:$0xff]   ;;  %v1072_v3 = vld [vmem:[%s1800_s1 + $0x10] sm:$0xff]  }
   0x2   :  { %535 = vmatpush1.bf16.msra.mxu0 %v1070_v1  ;;  %1053 = vmatpush1.bf16.msra.mxu1 %v1070_v1  ;;  %v1073_v4 = vld [vmem:[%s1800_s1 + $0x18] sm:$0xff]   ;;  %v1074_v5 = vld [vmem:[%s1800_s1 + $0x20] sm:$0xff]   ;;  %v1075_v7 = vld [vmem:[%s1800_s1 + $0x28] sm:$0xff]  }
   0x3   :  { %536 = vmatprep.subr.bf16.mxu0 %v1182_v0  ;;  %1038 = vmatprep.subr.bf16.mxu1 %v1182_v0  ;;  %v1088_v6 = vld [vmem:[%s1801_s0 + $0x4] ss:$8 sps:$4 sm:$0xff]   ;;  %v1076_v9 = vld [vmem:[%s1800_s1 + $0x30] sm:$0xff]   ;;  %v1077_v10 = vld [vmem:[%s1800_s1 + $0x38] sm:$0xff]  }
   0x4   :  { %v1091_v8 = vld [vmem:[%s1801_s0 + $0x104] ss:$8 sps:$4 sm:$0xff]   ;;  %566 = vmatprep.mubr.bf16.mxu0 %v1088_v6  ;;  %v1080_v13 = vld [vmem:[%s1800_s1 + $0x50] sm:$0xff]   ;;  %v1081_v14 = vld [vmem:[%s1800_s1 + $0x58] sm:$0xff]  }
   0x5   :  { %694 = vmatprep.mubr.bf16.mxu1 %v1091_v8  ;;  %v1078_v11 = vld [vmem:[%s1800_s1 + $0x40] sm:$0xff]   ;;  %v1079_v12 = vld [vmem:[%s1800_s1 + $0x48] sm:$0xff]   ;;  %v1084_v17 = vld [vmem:[%s1800_s1 + $0x70] sm:$0xff]  }
   0x6   :  { %537 = vmatpush1.bf16.msra.mxu0 %v1071_v2  ;;  %1054 = vmatpush1.bf16.msra.mxu1 %v1071_v2  ;;  %v1082_v15 = vld [vmem:[%s1800_s1 + $0x60] sm:$0xff]   ;;  %v1083_v16 = vld [vmem:[%s1800_s1 + $0x68] sm:$0xff]   ;;  %v1085_v18 = vld [vmem:[%s1800_s1 + $0x78] sm:$0xff]  }
   0x7   :  { %538 = vmatprep.subr.bf16.mxu0 %v1182_v0  ;;  %1039 = vmatprep.subr.bf16.mxu1 %v1182_v0  ;;  %v1086_v19 = vld [vmem:[%s1801_s0] ss:$8 sps:$4 sm:$0xff]   ;;  %v1092_v21 = vld [vmem:[%s1801_s0 + $0x14] ss:$8 sps:$4 sm:$0xff]   ;;  %v1096_v23 = vld [vmem:[%s1801_s0 + $0x10] ss:$8 sps:$4 sm:$0xff]  }
   0x8   :  { %v1089_v20 = vld [vmem:[%s1801_s0 + $0x100] ss:$8 sps:$4 sm:$0xff]   ;;  %v1094_v22 = vld [vmem:[%s1801_s0 + $0x114] ss:$8 sps:$4 sm:$0xff]   ;;  %v1097_v24 = vld [vmem:[%s1801_s0 + $0x110] ss:$8 sps:$4 sm:$0xff]  }
   0x9   :  { %v1098_v25 = vld [vmem:[%s1801_s0 + $0x24] ss:$8 sps:$4 sm:$0xff]   ;;  %v1102_v27 = vld [vmem:[%s1801_s0 + $0x20] ss:$8 sps:$4 sm:$0xff]   ;;  %v1104_v29 = vld [vmem:[%s1801_s0 + $0x34] ss:$8 sps:$4 sm:$0xff]  }
   0xa   :  { %539 = vmatpush1.bf16.msra.mxu0 %v1072_v3  ;;  %1055 = vmatpush1.bf16.msra.mxu1 %v1072_v3  ;;  %v1100_v26 = vld [vmem:[%s1801_s0 + $0x124] ss:$8 sps:$4 sm:$0xff]   ;;  %v1103_v28 = vld [vmem:[%s1801_s0 + $0x120] ss:$8 sps:$4 sm:$0xff]   ;;  %v1106_v30 = vld [vmem:[%s1801_s0 + $0x134] ss:$8 sps:$4 sm:$0xff]  }
   0xb   :  { %540 = vmatprep.subr.bf16.mxu0 %v1182_v0  ;;  %1040 = vmatprep.subr.bf16.mxu1 %v1182_v0  ;;  %v1108_v31 = vld [vmem:[%s1801_s0 + $0x30] ss:$8 sps:$4 sm:$0xff]   ;;  %v1110_v33 = vld [vmem:[%s1801_s0 + $0x44] ss:$8 sps:$4 sm:$0xff]   ;;  %v1114_v35 = vld [vmem:[%s1801_s0 + $0x40] ss:$8 sps:$4 sm:$0xff]  }
   0xc   :  { %v1109_v32 = vld [vmem:[%s1801_s0 + $0x130] ss:$8 sps:$4 sm:$0xff]   ;;  %v1112_v34 = vld [vmem:[%s1801_s0 + $0x144] ss:$8 sps:$4 sm:$0xff]   ;;  %v1115_v36 = vld [vmem:[%s1801_s0 + $0x140] ss:$8 sps:$4 sm:$0xff]  }
   0xd   :  { %v1116_v37 = vld [vmem:[%s1801_s0 + $0x54] ss:$8 sps:$4 sm:$0xff]   ;;  %v1120_v39 = vld [vmem:[%s1801_s0 + $0x50] ss:$8 sps:$4 sm:$0xff]   ;;  %v1122_v41 = vld [vmem:[%s1801_s0 + $0x64] ss:$8 sps:$4 sm:$0xff]  }
   0xe   :  { %541 = vmatpush1.bf16.msra.mxu0 %v1073_v4  ;;  %1056 = vmatpush1.bf16.msra.mxu1 %v1073_v4  ;;  %v1118_v38 = vld [vmem:[%s1801_s0 + $0x154] ss:$8 sps:$4 sm:$0xff]   ;;  %v1121_v40 = vld [vmem:[%s1801_s0 + $0x150] ss:$8 sps:$4 sm:$0xff]   ;;  %v1124_v42 = vld [vmem:[%s1801_s0 + $0x164] ss:$8 sps:$4 sm:$0xff]  }
   0xf   :  { %542 = vmatprep.subr.bf16.mxu0 %v1182_v0  ;;  %1041 = vmatprep.subr.bf16.mxu1 %v1182_v0  ;;  %v1126_v43 = vld [vmem:[%s1801_s0 + $0x60] ss:$8 sps:$4 sm:$0xff]   ;;  %v1128_v45 = vld [vmem:[%s1801_s0 + $0x74] ss:$8 sps:$4 sm:$0xff]   ;;  %v1132_v47 = vld [vmem:[%s1801_s0 + $0x70] ss:$8 sps:$4 sm:$0xff]  }
  0x10   :  { %v1127_v44 = vld [vmem:[%s1801_s0 + $0x160] ss:$8 sps:$4 sm:$0xff]   ;;  %v1130_v46 = vld [vmem:[%s1801_s0 + $0x174] ss:$8 sps:$4 sm:$0xff]   ;;  %v1133_v48 = vld [vmem:[%s1801_s0 + $0x170] ss:$8 sps:$4 sm:$0xff]  }
  0x11   :  { %v1134_v49 = vld [vmem:[%s1801_s0 + $0x84] ss:$8 sps:$4 sm:$0xff]   ;;  %v1138_v51 = vld [vmem:[%s1801_s0 + $0x80] ss:$8 sps:$4 sm:$0xff]   ;;  %v1140_v53 = vld [vmem:[%s1801_s0 + $0x94] ss:$8 sps:$4 sm:$0xff]  }
  0x12   :  { %543 = vmatpush1.bf16.msra.mxu0 %v1074_v5  ;;  %1057 = vmatpush1.bf16.msra.mxu1 %v1074_v5  ;;  %v1136_v50 = vld [vmem:[%s1801_s0 + $0x184] ss:$8 sps:$4 sm:$0xff]   ;;  %v1139_v52 = vld [vmem:[%s1801_s0 + $0x180] ss:$8 sps:$4 sm:$0xff]   ;;  %v1142_v54 = vld [vmem:[%s1801_s0 + $0x194] ss:$8 sps:$4 sm:$0xff]  }
  0x13   :  { %544 = vmatprep.subr.bf16.mxu0 %v1182_v0  ;;  %1042 = vmatprep.subr.bf16.mxu1 %v1182_v0  ;;  %v1144_v55 = vld [vmem:[%s1801_s0 + $0x90] ss:$8 sps:$4 sm:$0xff]   ;;  %v1146_v57 = vld [vmem:[%s1801_s0 + $0xa4] ss:$8 sps:$4 sm:$0xff]   ;;  %v1150_v59 = vld [vmem:[%s1801_s0 + $0xa0] ss:$8 sps:$4 sm:$0xff]  }
  0x14   :  { %v1145_v56 = vld [vmem:[%s1801_s0 + $0x190] ss:$8 sps:$4 sm:$0xff]   ;;  %v1148_v58 = vld [vmem:[%s1801_s0 + $0x1a4] ss:$8 sps:$4 sm:$0xff]   ;;  %v1151_v60 = vld [vmem:[%s1801_s0 + $0x1a0] ss:$8 sps:$4 sm:$0xff]  }
  0x15   :  { %v1152_v61 = vld [vmem:[%s1801_s0 + $0xb4] ss:$8 sps:$4 sm:$0xff]   ;;  %v1156_v63 = vld [vmem:[%s1801_s0 + $0xb0] ss:$8 sps:$4 sm:$0xff]   ;;  %v1158_v1 = vld [vmem:[%s1801_s0 + $0xc4] ss:$8 sps:$4 sm:$0xff]  }
  0x16   :  { %545 = vmatpush1.bf16.msra.mxu0 %v1075_v7  ;;  %1058 = vmatpush1.bf16.msra.mxu1 %v1075_v7  ;;  %v1154_v62 = vld [vmem:[%s1801_s0 + $0x1b4] ss:$8 sps:$4 sm:$0xff]   ;;  %v1160_v2 = vld [vmem:[%s1801_s0 + $0x1c4] ss:$8 sps:$4 sm:$0xff]   ;;  %v1162_v3 = vld [vmem:[%s1801_s0 + $0xc0] ss:$8 sps:$4 sm:$0xff]  }
  0x17   :  { %546 = vmatprep.subr.bf16.mxu0 %v1182_v0  ;;  %1043 = vmatprep.subr.bf16.mxu1 %v1182_v0  ;;  %v1163_v4 = vld [vmem:[%s1801_s0 + $0x1c0] ss:$8 sps:$4 sm:$0xff]   ;;  %v1164_v5 = vld [vmem:[%s1801_s0 + $0xd4] ss:$8 sps:$4 sm:$0xff]   ;;  %v1168_v7 = vld [vmem:[%s1801_s0 + $0xd0] ss:$8 sps:$4 sm:$0xff]  }
  0x18   :  { %v1166_v6 = vld [vmem:[%s1801_s0 + $0x1d4] ss:$8 sps:$4 sm:$0xff]   ;;  %v1169_v8 = vld [vmem:[%s1801_s0 + $0x1d0] ss:$8 sps:$4 sm:$0xff]  }
  0x1a   :  { %547 = vmatpush1.bf16.msra.mxu0 %v1076_v9  ;;  %1059 = vmatpush1.bf16.msra.mxu1 %v1076_v9  ;;  %v1170_v9 = vld [vmem:[%s1801_s0 + $0xe4] ss:$8 sps:$4 sm:$0xff]  }
  0x1b   :  { %548 = vmatprep.subr.bf16.mxu0 %v1182_v0  ;;  %1044 = vmatprep.subr.bf16.mxu1 %v1182_v0 }
  0x1e   :  { %549 = vmatpush1.bf16.msra.mxu0 %v1077_v10  ;;  %1060 = vmatpush1.bf16.msra.mxu1 %v1077_v10  ;;  %v1172_v10 = vld [vmem:[%s1801_s0 + $0x1e4] ss:$8 sps:$4 sm:$0xff]  }
  0x1f   :  { %550 = vmatprep.subr.bf16.mxu0 %v1182_v0  ;;  %1045 = vmatprep.subr.bf16.mxu1 %v1182_v0 }
  0x22   :  { %551 = vmatpush1.bf16.msra.mxu0 %v1078_v11  ;;  %1061 = vmatpush1.bf16.msra.mxu1 %v1078_v11  ;;  %v1174_v11 = vld [vmem:[%s1801_s0 + $0xe0] ss:$8 sps:$4 sm:$0xff]  }
  0x23   :  { %552 = vmatprep.subr.bf16.mxu0 %v1182_v0  ;;  %1046 = vmatprep.subr.bf16.mxu1 %v1182_v0 }
  0x26   :  { %553 = vmatpush1.bf16.msra.mxu0 %v1079_v12  ;;  %1062 = vmatpush1.bf16.msra.mxu1 %v1079_v12  ;;  %v1175_v12 = vld [vmem:[%s1801_s0 + $0x1e0] ss:$8 sps:$4 sm:$0xff]  }
  0x27   :  { %554 = vmatprep.subr.bf16.mxu0 %v1182_v0  ;;  %1047 = vmatprep.subr.bf16.mxu1 %v1182_v0 }
  0x2a   :  { %555 = vmatpush1.bf16.msra.mxu0 %v1080_v13  ;;  %1063 = vmatpush1.bf16.msra.mxu1 %v1080_v13  ;;  %v1176_v13 = vld [vmem:[%s1801_s0 + $0xf4] ss:$8 sps:$4 sm:$0xff]  }
  0x2b   :  { %556 = vmatprep.subr.bf16.mxu0 %v1182_v0  ;;  %1048 = vmatprep.subr.bf16.mxu1 %v1182_v0 }
  0x2e   :  { %557 = vmatpush1.bf16.msra.mxu0 %v1081_v14  ;;  %1064 = vmatpush1.bf16.msra.mxu1 %v1081_v14  ;;  %v1178_v14 = vld [vmem:[%s1801_s0 + $0x1f4] ss:$8 sps:$4 sm:$0xff]  }
  0x2f   :  { %558 = vmatprep.subr.bf16.mxu0 %v1182_v0  ;;  %1049 = vmatprep.subr.bf16.mxu1 %v1182_v0 }
  0x32   :  { %559 = vmatpush1.bf16.msra.mxu0 %v1082_v15  ;;  %1065 = vmatpush1.bf16.msra.mxu1 %v1082_v15  ;;  %v1180_v15 = vld [vmem:[%s1801_s0 + $0xf0] ss:$8 sps:$4 sm:$0xff]  }
  0x33   :  { %560 = vmatprep.subr.bf16.mxu0 %v1182_v0  ;;  %1050 = vmatprep.subr.bf16.mxu1 %v1182_v0 }
  0x36   :  { %561 = vmatpush1.bf16.msra.mxu0 %v1083_v16  ;;  %1066 = vmatpush1.bf16.msra.mxu1 %v1083_v16  ;;  %v1181_v16 = vld [vmem:[%s1801_s0 + $0x1f0] ss:$8 sps:$4 sm:$0xff]  }
  0x37   :  { %562 = vmatprep.subr.bf16.mxu0 %v1182_v0  ;;  %1051 = vmatprep.subr.bf16.mxu1 %v1182_v0 }
  0x3a   :  { %563 = vmatpush1.bf16.msra.mxu0 %v1084_v17  ;;  %1067 = vmatpush1.bf16.msra.mxu1 %v1084_v17  ;;  %v1478_v17 = vld [vmem:[%s1802_s2] ss:$0 sm:$0xff] }
  0x3b   :  { %564 = vmatprep.subr.bf16.mxu0 %v1182_v0  ;;  %1052 = vmatprep.subr.bf16.mxu1 %v1182_v0  ;;  %v1157_v0 = vld [vmem:[%s1801_s0 + $0x1b0] ss:$8 sps:$4 sm:$0xff]  }
  0x3e   :  { %565 = vmatpush1.bf16.msra.mxu0 %v1085_v18  ;;  %1068 = vmatpush1.bf16.msra.mxu1 %v1085_v18 }
  0x41   :  { %567 = vmatmul.mubr.bf16.vlgmr.msra.gmra.mrb[0].mxu0 %v1086_v19  ;;  %695 = vmatmul.mubr.bf16.vlgmr.msra.gmra.mrb[0].mxu1 %v1089_v20 }
  0x42   :  { %574 = vmatprep.mubr.bf16.mxu0 %v1092_v21  ;;  %702 = vmatprep.mubr.bf16.mxu1 %v1094_v22 }
  0x49   :  { %575 = vmatmul.mubr.bf16.gmra.mrb[4].mxu0 %v1096_v23  ;;  %703 = vmatmul.mubr.bf16.gmra.mrb[4].mxu1 %v1097_v24 }
  0x4a   :  { %582 = vmatprep.mubr.bf16.mxu0 %v1098_v25  ;;  %710 = vmatprep.mubr.bf16.mxu1 %v1100_v26 }
  0x51   :  { %583 = vmatmul.mubr.bf16.gmra.mrb[8].mxu0 %v1102_v27  ;;  %711 = vmatmul.mubr.bf16.gmra.mrb[8].mxu1 %v1103_v28 }
  0x52   :  { %590 = vmatprep.mubr.bf16.mxu0 %v1104_v29  ;;  %718 = vmatprep.mubr.bf16.mxu1 %v1106_v30 }
  0x59   :  { %591 = vmatmul.mubr.bf16.gmra.mrb[12].mxu0 %v1108_v31  ;;  %719 = vmatmul.mubr.bf16.gmra.mrb[12].mxu1 %v1109_v32 }
  0x5a   :  { %598 = vmatprep.mubr.bf16.mxu0 %v1110_v33  ;;  %726 = vmatprep.mubr.bf16.mxu1 %v1112_v34 }
  0x61   :  { %599 = vmatmul.mubr.bf16.gmra.mrb[16].mxu0 %v1114_v35  ;;  %727 = vmatmul.mubr.bf16.gmra.mrb[16].mxu1 %v1115_v36 }
  0x62   :  { %606 = vmatprep.mubr.bf16.mxu0 %v1116_v37  ;;  %734 = vmatprep.mubr.bf16.mxu1 %v1118_v38 }
  0x69   :  { %607 = vmatmul.mubr.bf16.gmra.mrb[20].mxu0 %v1120_v39  ;;  %735 = vmatmul.mubr.bf16.gmra.mrb[20].mxu1 %v1121_v40 }
  0x6a   :  { %614 = vmatprep.mubr.bf16.mxu0 %v1122_v41  ;;  %742 = vmatprep.mubr.bf16.mxu1 %v1124_v42 }
  0x71   :  { %615 = vmatmul.mubr.bf16.gmra.mrb[24].mxu0 %v1126_v43  ;;  %743 = vmatmul.mubr.bf16.gmra.mrb[24].mxu1 %v1127_v44 }
  0x72   :  { %622 = vmatprep.mubr.bf16.mxu0 %v1128_v45  ;;  %750 = vmatprep.mubr.bf16.mxu1 %v1130_v46 }
  0x79   :  { %623 = vmatmul.mubr.bf16.gmra.mrb[28].mxu0 %v1132_v47  ;;  %751 = vmatmul.mubr.bf16.gmra.mrb[28].mxu1 %v1133_v48 }
  0x7a   :  { %630 = vmatprep.mubr.bf16.mxu0 %v1134_v49  ;;  %758 = vmatprep.mubr.bf16.mxu1 %v1136_v50 }
  0x81   :  { %631 = vmatmul.mubr.bf16.gmra.mrb[32].mxu0 %v1138_v51  ;;  %759 = vmatmul.mubr.bf16.gmra.mrb[32].mxu1 %v1139_v52 }
  0x82   :  { %638 = vmatprep.mubr.bf16.mxu0 %v1140_v53  ;;  %766 = vmatprep.mubr.bf16.mxu1 %v1142_v54 }
  0x89   :  { %639 = vmatmul.mubr.bf16.gmra.mrb[36].mxu0 %v1144_v55  ;;  %767 = vmatmul.mubr.bf16.gmra.mrb[36].mxu1 %v1145_v56 }
  0x8a   :  { %646 = vmatprep.mubr.bf16.mxu0 %v1146_v57  ;;  %774 = vmatprep.mubr.bf16.mxu1 %v1148_v58 }
  0x91   :  { %647 = vmatmul.mubr.bf16.gmra.mrb[40].mxu0 %v1150_v59  ;;  %775 = vmatmul.mubr.bf16.gmra.mrb[40].mxu1 %v1151_v60 }
  0x92   :  { %654 = vmatprep.mubr.bf16.mxu0 %v1152_v61  ;;  %782 = vmatprep.mubr.bf16.mxu1 %v1154_v62 }
  0x99   :  { %655 = vmatmul.mubr.bf16.gmra.mrb[44].mxu0 %v1156_v63  ;;  %783 = vmatmul.mubr.bf16.gmra.mrb[44].mxu1 %v1157_v0 }
  0x9a   :  { %662 = vmatprep.mubr.bf16.mxu0 %v1158_v1  ;;  %790 = vmatprep.mubr.bf16.mxu1 %v1160_v2 }
  0xa1   :  { %663 = vmatmul.mubr.bf16.gmra.mrb[48].mxu0 %v1162_v3  ;;  %791 = vmatmul.mubr.bf16.gmra.mrb[48].mxu1 %v1163_v4 }
  0xa2   :  { %670 = vmatprep.mubr.bf16.mxu0 %v1164_v5  ;;  %798 = vmatprep.mubr.bf16.mxu1 %v1166_v6 }
  0xa9   :  { %671 = vmatmul.mubr.bf16.gmra.mrb[52].mxu0 %v1168_v7  ;;  %799 = vmatmul.mubr.bf16.gmra.mrb[52].mxu1 %v1169_v8 }
  0xaa   :  { %678 = vmatprep.mubr.bf16.mxu0 %v1170_v9  ;;  %806 = vmatprep.mubr.bf16.mxu1 %v1172_v10 }
  0xb1   :  { %679 = vmatmul.mubr.bf16.gmra.mrb[56].mxu0 %v1174_v11  ;;  %807 = vmatmul.mubr.bf16.gmra.mrb[56].mxu1 %v1175_v12 }
  0xb2   :  { %686 = vmatprep.mubr.bf16.mxu0 %v1176_v13  ;;  %814 = vmatprep.mubr.bf16.mxu1 %v1178_v14 }
  0xb9   :  { %687 = vmatmul.mubr.bf16.gmra.mrb[60].mxu0 %v1180_v15  ;;  %815 = vmatmul.mubr.bf16.gmra.mrb[60].mxu1 %v1181_v16 }
 0x114   :  { %v568_v18 = vpop.f32.mrb[0].mxu0  ;;  %v696_v19 = vpop.f32.mrb[0].mxu1 }
 0x115   :  { %v569_v20 = vadd.f32 %v1478_v17, %v568_v18  ;;  %v697_v21 = vadd.f32 %v1478_v17, %v696_v19  ;;  %v570_v22 = vpop.f32.mrb[1].mxu0  ;;  %v698_v23 = vpop.f32.mrb[1].mxu1 }
 0x116   :  { %v571_v24 = vpop.f32.mrb[2].mxu0  ;;  %v699_v25 = vpop.f32.mrb[2].mxu1 }
 0x117   :  { %v823_v26 = vmax.f32 %v569_v20, 0.0  ;;  %v855_v27 = vmax.f32 %v697_v21, 0.0  ;;  %v572_v28 = vadd.f32 %v1478_v17, %v571_v24  ;;  %v700_v29 = vadd.f32 %v1478_v17, %v699_v25  ;;  %v573_v30 = vpop.f32.mrb[3].mxu0  ;;  %v701_v31 = vpop.f32.mrb[3].mxu1 }
 0x119   :  { %888 = vst.msk [vmem:[%s1803_s3] sm:$0xff] %vm887_vm0, %v823_v26  ;;  %920 = vst.msk [vmem:[%s1803_s3 + $0x100] sm:$0xff] %vm887_vm0, %v855_v27  ;;  %v824_v32 = vmax.f32 %v572_v28, 0.0  ;;  %v856_v33 = vmax.f32 %v700_v29, 0.0 }
 0x11b   :  { %889 = vst.msk [vmem:[%s1803_s3 + $0x8] sm:$0xff] %vm887_vm0, %v824_v32  ;;  %921 = vst.msk [vmem:[%s1803_s3 + $0x108] sm:$0xff] %vm887_vm0, %v856_v33 }
 0x11c   :  { %v576_v34 = vpop.f32.mrb[4].mxu0  ;;  %v704_v35 = vpop.f32.mrb[4].mxu1 }
 0x11d   :  { %v577_v36 = vadd.f32 %v1478_v17, %v576_v34  ;;  %v705_v37 = vadd.f32 %v1478_v17, %v704_v35  ;;  %v578_v38 = vpop.f32.mrb[5].mxu0  ;;  %v706_v39 = vpop.f32.mrb[5].mxu1 }
 0x11e   :  { %v579_v40 = vpop.f32.mrb[6].mxu0  ;;  %v707_v41 = vpop.f32.mrb[6].mxu1 }
 0x11f   :  { %v825_v42 = vmax.f32 %v577_v36, 0.0  ;;  %v857_v43 = vmax.f32 %v705_v37, 0.0  ;;  %v580_v44 = vadd.f32 %v1478_v17, %v579_v40  ;;  %v708_v45 = vadd.f32 %v1478_v17, %v707_v41  ;;  %v581_v46 = vpop.f32.mrb[7].mxu0  ;;  %v709_v47 = vpop.f32.mrb[7].mxu1 }
 0x121   :  { %890 = vst.msk [vmem:[%s1803_s3 + $0x10] sm:$0xff] %vm887_vm0, %v825_v42  ;;  %922 = vst.msk [vmem:[%s1803_s3 + $0x110] sm:$0xff] %vm887_vm0, %v857_v43  ;;  %v826_v48 = vmax.f32 %v580_v44, 0.0  ;;  %v858_v49 = vmax.f32 %v708_v45, 0.0 }
 0x123   :  { %891 = vst.msk [vmem:[%s1803_s3 + $0x18] sm:$0xff] %vm887_vm0, %v826_v48  ;;  %923 = vst.msk [vmem:[%s1803_s3 + $0x118] sm:$0xff] %vm887_vm0, %v858_v49 }
 0x124   :  { %v584_v50 = vpop.f32.mrb[8].mxu0  ;;  %v712_v51 = vpop.f32.mrb[8].mxu1 }
 0x125   :  { %v585_v52 = vadd.f32 %v1478_v17, %v584_v50  ;;  %v713_v53 = vadd.f32 %v1478_v17, %v712_v51  ;;  %v586_v54 = vpop.f32.mrb[9].mxu0  ;;  %v714_v55 = vpop.f32.mrb[9].mxu1 }
 0x126   :  { %v587_v56 = vpop.f32.mrb[10].mxu0  ;;  %v715_v57 = vpop.f32.mrb[10].mxu1 }
 0x127   :  { %v827_v58 = vmax.f32 %v585_v52, 0.0  ;;  %v859_v59 = vmax.f32 %v713_v53, 0.0  ;;  %v588_v60 = vadd.f32 %v1478_v17, %v587_v56  ;;  %v716_v61 = vadd.f32 %v1478_v17, %v715_v57  ;;  %v589_v62 = vpop.f32.mrb[11].mxu0  ;;  %v717_v63 = vpop.f32.mrb[11].mxu1 }
 0x129   :  { %892 = vst.msk [vmem:[%s1803_s3 + $0x20] sm:$0xff] %vm887_vm0, %v827_v58  ;;  %924 = vst.msk [vmem:[%s1803_s3 + $0x120] sm:$0xff] %vm887_vm0, %v859_v59  ;;  %v828_v0 = vmax.f32 %v588_v60, 0.0  ;;  %v860_v1 = vmax.f32 %v716_v61, 0.0 }
 0x12b   :  { %893 = vst.msk [vmem:[%s1803_s3 + $0x28] sm:$0xff] %vm887_vm0, %v828_v0  ;;  %925 = vst.msk [vmem:[%s1803_s3 + $0x128] sm:$0xff] %vm887_vm0, %v860_v1 }
 0x12c   :  { %v592_v2 = vpop.f32.mrb[12].mxu0  ;;  %v720_v3 = vpop.f32.mrb[12].mxu1 }
 0x12d   :  { %v593_v4 = vadd.f32 %v1478_v17, %v592_v2  ;;  %v721_v5 = vadd.f32 %v1478_v17, %v720_v3  ;;  %v594_v6 = vpop.f32.mrb[13].mxu0  ;;  %v722_v7 = vpop.f32.mrb[13].mxu1 }
 0x12e   :  { %v595_v8 = vpop.f32.mrb[14].mxu0  ;;  %v723_v9 = vpop.f32.mrb[14].mxu1 }
 0x12f   :  { %v829_v10 = vmax.f32 %v593_v4, 0.0  ;;  %v861_v11 = vmax.f32 %v721_v5, 0.0  ;;  %v596_v12 = vadd.f32 %v1478_v17, %v595_v8  ;;  %v724_v13 = vadd.f32 %v1478_v17, %v723_v9  ;;  %v597_v14 = vpop.f32.mrb[15].mxu0  ;;  %v725_v15 = vpop.f32.mrb[15].mxu1 }
 0x131   :  { %894 = vst.msk [vmem:[%s1803_s3 + $0x30] sm:$0xff] %vm887_vm0, %v829_v10  ;;  %926 = vst.msk [vmem:[%s1803_s3 + $0x130] sm:$0xff] %vm887_vm0, %v861_v11  ;;  %v830_v16 = vmax.f32 %v596_v12, 0.0  ;;  %v862_v18 = vmax.f32 %v724_v13, 0.0 }
 0x133   :  { %895 = vst.msk [vmem:[%s1803_s3 + $0x38] sm:$0xff] %vm887_vm0, %v830_v16  ;;  %927 = vst.msk [vmem:[%s1803_s3 + $0x138] sm:$0xff] %vm887_vm0, %v862_v18 }
 0x134   :  { %v600_v19 = vpop.f32.mrb[16].mxu0  ;;  %v728_v20 = vpop.f32.mrb[16].mxu1 }
 0x135   :  { %v601_v21 = vadd.f32 %v1478_v17, %v600_v19  ;;  %v729_v22 = vadd.f32 %v1478_v17, %v728_v20  ;;  %v602_v23 = vpop.f32.mrb[17].mxu0  ;;  %v730_v24 = vpop.f32.mrb[17].mxu1 }
 0x136   :  { %v603_v25 = vpop.f32.mrb[18].mxu0  ;;  %v731_v26 = vpop.f32.mrb[18].mxu1 }
 0x137   :  { %v831_v27 = vmax.f32 %v601_v21, 0.0  ;;  %v863_v28 = vmax.f32 %v729_v22, 0.0  ;;  %v604_v29 = vadd.f32 %v1478_v17, %v603_v25  ;;  %v732_v30 = vadd.f32 %v1478_v17, %v731_v26  ;;  %v605_v31 = vpop.f32.mrb[19].mxu0  ;;  %v733_v32 = vpop.f32.mrb[19].mxu1 }
 0x139   :  { %896 = vst.msk [vmem:[%s1803_s3 + $0x40] sm:$0xff] %vm887_vm0, %v831_v27  ;;  %928 = vst.msk [vmem:[%s1803_s3 + $0x140] sm:$0xff] %vm887_vm0, %v863_v28  ;;  %v832_v33 = vmax.f32 %v604_v29, 0.0  ;;  %v864_v34 = vmax.f32 %v732_v30, 0.0 }
 0x13b   :  { %897 = vst.msk [vmem:[%s1803_s3 + $0x48] sm:$0xff] %vm887_vm0, %v832_v33  ;;  %929 = vst.msk [vmem:[%s1803_s3 + $0x148] sm:$0xff] %vm887_vm0, %v864_v34 }
 0x13c   :  { %v608_v35 = vpop.f32.mrb[20].mxu0  ;;  %v736_v36 = vpop.f32.mrb[20].mxu1 }
 0x13d   :  { %v609_v37 = vadd.f32 %v1478_v17, %v608_v35  ;;  %v737_v38 = vadd.f32 %v1478_v17, %v736_v36  ;;  %v610_v39 = vpop.f32.mrb[21].mxu0  ;;  %v738_v40 = vpop.f32.mrb[21].mxu1 }
 0x13e   :  { %v611_v41 = vpop.f32.mrb[22].mxu0  ;;  %v739_v42 = vpop.f32.mrb[22].mxu1 }
 0x13f   :  { %v833_v43 = vmax.f32 %v609_v37, 0.0  ;;  %v865_v44 = vmax.f32 %v737_v38, 0.0  ;;  %v612_v45 = vadd.f32 %v1478_v17, %v611_v41  ;;  %v740_v46 = vadd.f32 %v1478_v17, %v739_v42  ;;  %v613_v47 = vpop.f32.mrb[23].mxu0  ;;  %v741_v48 = vpop.f32.mrb[23].mxu1 }
 0x141   :  { %898 = vst.msk [vmem:[%s1803_s3 + $0x50] sm:$0xff] %vm887_vm0, %v833_v43  ;;  %930 = vst.msk [vmem:[%s1803_s3 + $0x150] sm:$0xff] %vm887_vm0, %v865_v44  ;;  %v834_v49 = vmax.f32 %v612_v45, 0.0  ;;  %v866_v50 = vmax.f32 %v740_v46, 0.0 }
 0x143   :  { %899 = vst.msk [vmem:[%s1803_s3 + $0x58] sm:$0xff] %vm887_vm0, %v834_v49  ;;  %931 = vst.msk [vmem:[%s1803_s3 + $0x158] sm:$0xff] %vm887_vm0, %v866_v50 }
 0x144   :  { %v616_v51 = vpop.f32.mrb[24].mxu0  ;;  %v744_v52 = vpop.f32.mrb[24].mxu1 }
 0x145   :  { %v617_v53 = vadd.f32 %v1478_v17, %v616_v51  ;;  %v745_v54 = vadd.f32 %v1478_v17, %v744_v52  ;;  %v618_v55 = vpop.f32.mrb[25].mxu0  ;;  %v746_v56 = vpop.f32.mrb[25].mxu1 }
 0x146   :  { %v619_v57 = vpop.f32.mrb[26].mxu0  ;;  %v747_v58 = vpop.f32.mrb[26].mxu1 }
 0x147   :  { %v835_v59 = vmax.f32 %v617_v53, 0.0  ;;  %v867_v60 = vmax.f32 %v745_v54, 0.0  ;;  %v620_v61 = vadd.f32 %v1478_v17, %v619_v57  ;;  %v748_v62 = vadd.f32 %v1478_v17, %v747_v58  ;;  %v621_v63 = vpop.f32.mrb[27].mxu0  ;;  %v749_v0 = vpop.f32.mrb[27].mxu1 }
 0x149   :  { %900 = vst.msk [vmem:[%s1803_s3 + $0x60] sm:$0xff] %vm887_vm0, %v835_v59  ;;  %932 = vst.msk [vmem:[%s1803_s3 + $0x160] sm:$0xff] %vm887_vm0, %v867_v60  ;;  %v836_v1 = vmax.f32 %v620_v61, 0.0  ;;  %v868_v2 = vmax.f32 %v748_v62, 0.0 }
 0x14b   :  { %901 = vst.msk [vmem:[%s1803_s3 + $0x68] sm:$0xff] %vm887_vm0, %v836_v1  ;;  %933 = vst.msk [vmem:[%s1803_s3 + $0x168] sm:$0xff] %vm887_vm0, %v868_v2 }
 0x14c   :  { %v624_v3 = vpop.f32.mrb[28].mxu0  ;;  %v752_v4 = vpop.f32.mrb[28].mxu1 }
 0x14d   :  { %v625_v5 = vadd.f32 %v1478_v17, %v624_v3  ;;  %v753_v6 = vadd.f32 %v1478_v17, %v752_v4  ;;  %v626_v7 = vpop.f32.mrb[29].mxu0  ;;  %v754_v8 = vpop.f32.mrb[29].mxu1 }
 0x14e   :  { %v627_v9 = vpop.f32.mrb[30].mxu0  ;;  %v755_v10 = vpop.f32.mrb[30].mxu1 }
 0x14f   :  { %v837_v11 = vmax.f32 %v625_v5, 0.0  ;;  %v869_v12 = vmax.f32 %v753_v6, 0.0  ;;  %v628_v13 = vadd.f32 %v1478_v17, %v627_v9  ;;  %v756_v14 = vadd.f32 %v1478_v17, %v755_v10  ;;  %v629_v15 = vpop.f32.mrb[31].mxu0  ;;  %v757_v16 = vpop.f32.mrb[31].mxu1 }
 0x151   :  { %902 = vst.msk [vmem:[%s1803_s3 + $0x70] sm:$0xff] %vm887_vm0, %v837_v11  ;;  %934 = vst.msk [vmem:[%s1803_s3 + $0x170] sm:$0xff] %vm887_vm0, %v869_v12  ;;  %v838_v18 = vmax.f32 %v628_v13, 0.0  ;;  %v870_v19 = vmax.f32 %v756_v14, 0.0 }
 0x153   :  { %903 = vst.msk [vmem:[%s1803_s3 + $0x78] sm:$0xff] %vm887_vm0, %v838_v18  ;;  %935 = vst.msk [vmem:[%s1803_s3 + $0x178] sm:$0xff] %vm887_vm0, %v870_v19 }
 0x154   :  { %v632_v20 = vpop.f32.mrb[32].mxu0  ;;  %v760_v21 = vpop.f32.mrb[32].mxu1 }
 0x155   :  { %v633_v22 = vadd.f32 %v1478_v17, %v632_v20  ;;  %v761_v23 = vadd.f32 %v1478_v17, %v760_v21  ;;  %v634_v24 = vpop.f32.mrb[33].mxu0  ;;  %v762_v25 = vpop.f32.mrb[33].mxu1 }
 0x156   :  { %v635_v26 = vpop.f32.mrb[34].mxu0  ;;  %v763_v27 = vpop.f32.mrb[34].mxu1 }
 0x157   :  { %v839_v28 = vmax.f32 %v633_v22, 0.0  ;;  %v871_v29 = vmax.f32 %v761_v23, 0.0  ;;  %v636_v30 = vadd.f32 %v1478_v17, %v635_v26  ;;  %v764_v31 = vadd.f32 %v1478_v17, %v763_v27  ;;  %v637_v32 = vpop.f32.mrb[35].mxu0  ;;  %v765_v33 = vpop.f32.mrb[35].mxu1 }
 0x159   :  { %904 = vst.msk [vmem:[%s1803_s3 + $0x80] sm:$0xff] %vm887_vm0, %v839_v28  ;;  %936 = vst.msk [vmem:[%s1803_s3 + $0x180] sm:$0xff] %vm887_vm0, %v871_v29  ;;  %v840_v34 = vmax.f32 %v636_v30, 0.0  ;;  %v872_v35 = vmax.f32 %v764_v31, 0.0 }
 0x15b   :  { %905 = vst.msk [vmem:[%s1803_s3 + $0x88] sm:$0xff] %vm887_vm0, %v840_v34  ;;  %937 = vst.msk [vmem:[%s1803_s3 + $0x188] sm:$0xff] %vm887_vm0, %v872_v35 }
 0x15c   :  { %v640_v36 = vpop.f32.mrb[36].mxu0  ;;  %v768_v37 = vpop.f32.mrb[36].mxu1 }
 0x15d   :  { %v641_v38 = vadd.f32 %v1478_v17, %v640_v36  ;;  %v769_v39 = vadd.f32 %v1478_v17, %v768_v37  ;;  %v642_v40 = vpop.f32.mrb[37].mxu0  ;;  %v770_v41 = vpop.f32.mrb[37].mxu1 }
 0x15e   :  { %v643_v42 = vpop.f32.mrb[38].mxu0  ;;  %v771_v43 = vpop.f32.mrb[38].mxu1 }
 0x15f   :  { %v841_v44 = vmax.f32 %v641_v38, 0.0  ;;  %v873_v45 = vmax.f32 %v769_v39, 0.0  ;;  %v644_v46 = vadd.f32 %v1478_v17, %v643_v42  ;;  %v772_v47 = vadd.f32 %v1478_v17, %v771_v43  ;;  %v645_v48 = vpop.f32.mrb[39].mxu0  ;;  %v773_v49 = vpop.f32.mrb[39].mxu1 }
 0x161   :  { %906 = vst.msk [vmem:[%s1803_s3 + $0x90] sm:$0xff] %vm887_vm0, %v841_v44  ;;  %938 = vst.msk [vmem:[%s1803_s3 + $0x190] sm:$0xff] %vm887_vm0, %v873_v45  ;;  %v842_v50 = vmax.f32 %v644_v46, 0.0  ;;  %v874_v51 = vmax.f32 %v772_v47, 0.0 }
 0x163   :  { %907 = vst.msk [vmem:[%s1803_s3 + $0x98] sm:$0xff] %vm887_vm0, %v842_v50  ;;  %939 = vst.msk [vmem:[%s1803_s3 + $0x198] sm:$0xff] %vm887_vm0, %v874_v51 }
 0x164   :  { %v648_v52 = vpop.f32.mrb[40].mxu0  ;;  %v776_v53 = vpop.f32.mrb[40].mxu1 }
 0x165   :  { %v649_v54 = vadd.f32 %v1478_v17, %v648_v52  ;;  %v777_v55 = vadd.f32 %v1478_v17, %v776_v53  ;;  %v650_v56 = vpop.f32.mrb[41].mxu0  ;;  %v778_v57 = vpop.f32.mrb[41].mxu1 }
 0x166   :  { %v651_v58 = vpop.f32.mrb[42].mxu0  ;;  %v779_v59 = vpop.f32.mrb[42].mxu1 }
 0x167   :  { %v843_v60 = vmax.f32 %v649_v54, 0.0  ;;  %v875_v61 = vmax.f32 %v777_v55, 0.0  ;;  %v652_v62 = vadd.f32 %v1478_v17, %v651_v58  ;;  %v780_v63 = vadd.f32 %v1478_v17, %v779_v59  ;;  %v653_v0 = vpop.f32.mrb[43].mxu0  ;;  %v781_v1 = vpop.f32.mrb[43].mxu1 }
 0x169   :  { %908 = vst.msk [vmem:[%s1803_s3 + $0xa0] sm:$0xff] %vm887_vm0, %v843_v60  ;;  %940 = vst.msk [vmem:[%s1803_s3 + $0x1a0] sm:$0xff] %vm887_vm0, %v875_v61  ;;  %v844_v2 = vmax.f32 %v652_v62, 0.0  ;;  %v876_v3 = vmax.f32 %v780_v63, 0.0 }
 0x16b   :  { %909 = vst.msk [vmem:[%s1803_s3 + $0xa8] sm:$0xff] %vm887_vm0, %v844_v2  ;;  %941 = vst.msk [vmem:[%s1803_s3 + $0x1a8] sm:$0xff] %vm887_vm0, %v876_v3 }
 0x16c   :  { %v656_v4 = vpop.f32.mrb[44].mxu0  ;;  %v784_v5 = vpop.f32.mrb[44].mxu1 }
 0x16d   :  { %v657_v6 = vadd.f32 %v1478_v17, %v656_v4  ;;  %v785_v7 = vadd.f32 %v1478_v17, %v784_v5  ;;  %v658_v8 = vpop.f32.mrb[45].mxu0  ;;  %v786_v9 = vpop.f32.mrb[45].mxu1 }
 0x16e   :  { %v659_v10 = vpop.f32.mrb[46].mxu0  ;;  %v787_v11 = vpop.f32.mrb[46].mxu1 }
 0x16f   :  { %v845_v12 = vmax.f32 %v657_v6, 0.0  ;;  %v877_v13 = vmax.f32 %v785_v7, 0.0  ;;  %v660_v14 = vadd.f32 %v1478_v17, %v659_v10  ;;  %v788_v15 = vadd.f32 %v1478_v17, %v787_v11  ;;  %v661_v16 = vpop.f32.mrb[47].mxu0  ;;  %v789_v18 = vpop.f32.mrb[47].mxu1 }
 0x171   :  { %910 = vst.msk [vmem:[%s1803_s3 + $0xb0] sm:$0xff] %vm887_vm0, %v845_v12  ;;  %942 = vst.msk [vmem:[%s1803_s3 + $0x1b0] sm:$0xff] %vm887_vm0, %v877_v13  ;;  %v846_v19 = vmax.f32 %v660_v14, 0.0  ;;  %v878_v20 = vmax.f32 %v788_v15, 0.0 }
 0x173   :  { %911 = vst.msk [vmem:[%s1803_s3 + $0xb8] sm:$0xff] %vm887_vm0, %v846_v19  ;;  %943 = vst.msk [vmem:[%s1803_s3 + $0x1b8] sm:$0xff] %vm887_vm0, %v878_v20 }
 0x174   :  { %v664_v21 = vpop.f32.mrb[48].mxu0  ;;  %v792_v22 = vpop.f32.mrb[48].mxu1 }
 0x175   :  { %v665_v23 = vadd.f32 %v1478_v17, %v664_v21  ;;  %v793_v24 = vadd.f32 %v1478_v17, %v792_v22  ;;  %v666_v25 = vpop.f32.mrb[49].mxu0  ;;  %v794_v26 = vpop.f32.mrb[49].mxu1 }
 0x176   :  { %v667_v27 = vpop.f32.mrb[50].mxu0  ;;  %v795_v28 = vpop.f32.mrb[50].mxu1 }
 0x177   :  { %v847_v29 = vmax.f32 %v665_v23, 0.0  ;;  %v879_v30 = vmax.f32 %v793_v24, 0.0  ;;  %v668_v31 = vadd.f32 %v1478_v17, %v667_v27  ;;  %v796_v32 = vadd.f32 %v1478_v17, %v795_v28  ;;  %v669_v33 = vpop.f32.mrb[51].mxu0  ;;  %v797_v34 = vpop.f32.mrb[51].mxu1 }
 0x179   :  { %912 = vst.msk [vmem:[%s1803_s3 + $0xc0] sm:$0xff] %vm887_vm0, %v847_v29  ;;  %944 = vst.msk [vmem:[%s1803_s3 + $0x1c0] sm:$0xff] %vm887_vm0, %v879_v30  ;;  %v848_v35 = vmax.f32 %v668_v31, 0.0  ;;  %v880_v36 = vmax.f32 %v796_v32, 0.0 }
 0x17b   :  { %913 = vst.msk [vmem:[%s1803_s3 + $0xc8] sm:$0xff] %vm887_vm0, %v848_v35  ;;  %945 = vst.msk [vmem:[%s1803_s3 + $0x1c8] sm:$0xff] %vm887_vm0, %v880_v36 }
 0x17c   :  { %v672_v37 = vpop.f32.mrb[52].mxu0  ;;  %v800_v38 = vpop.f32.mrb[52].mxu1 }
 0x17d   :  { %v673_v39 = vadd.f32 %v1478_v17, %v672_v37  ;;  %v801_v40 = vadd.f32 %v1478_v17, %v800_v38  ;;  %v674_v41 = vpop.f32.mrb[53].mxu0  ;;  %v802_v42 = vpop.f32.mrb[53].mxu1 }
 0x17e   :  { %v675_v43 = vpop.f32.mrb[54].mxu0  ;;  %v803_v44 = vpop.f32.mrb[54].mxu1 }
 0x17f   :  { %v849_v45 = vmax.f32 %v673_v39, 0.0  ;;  %v881_v46 = vmax.f32 %v801_v40, 0.0  ;;  %v676_v47 = vadd.f32 %v1478_v17, %v675_v43  ;;  %v804_v48 = vadd.f32 %v1478_v17, %v803_v44  ;;  %v677_v49 = vpop.f32.mrb[55].mxu0  ;;  %v805_v50 = vpop.f32.mrb[55].mxu1 }
 0x181   :  { %914 = vst.msk [vmem:[%s1803_s3 + $0xd0] sm:$0xff] %vm887_vm0, %v849_v45  ;;  %946 = vst.msk [vmem:[%s1803_s3 + $0x1d0] sm:$0xff] %vm887_vm0, %v881_v46  ;;  %v850_v51 = vmax.f32 %v676_v47, 0.0  ;;  %v882_v52 = vmax.f32 %v804_v48, 0.0 }
 0x183   :  { %915 = vst.msk [vmem:[%s1803_s3 + $0xd8] sm:$0xff] %vm887_vm0, %v850_v51  ;;  %947 = vst.msk [vmem:[%s1803_s3 + $0x1d8] sm:$0xff] %vm887_vm0, %v882_v52 }
 0x184   :  { %v680_v53 = vpop.f32.mrb[56].mxu0  ;;  %v808_v54 = vpop.f32.mrb[56].mxu1 }
 0x185   :  { %v681_v55 = vadd.f32 %v1478_v17, %v680_v53  ;;  %v809_v56 = vadd.f32 %v1478_v17, %v808_v54  ;;  %v682_v57 = vpop.f32.mrb[57].mxu0  ;;  %v810_v58 = vpop.f32.mrb[57].mxu1 }
 0x186   :  { %v683_v59 = vpop.f32.mrb[58].mxu0  ;;  %v811_v60 = vpop.f32.mrb[58].mxu1 }
 0x187   :  { %v851_v61 = vmax.f32 %v681_v55, 0.0  ;;  %v883_v62 = vmax.f32 %v809_v56, 0.0  ;;  %v684_v63 = vadd.f32 %v1478_v17, %v683_v59  ;;  %v812_v0 = vadd.f32 %v1478_v17, %v811_v60  ;;  %v685_v1 = vpop.f32.mrb[59].mxu0  ;;  %v813_v2 = vpop.f32.mrb[59].mxu1 }
 0x189   :  { %916 = vst.msk [vmem:[%s1803_s3 + $0xe0] sm:$0xff] %vm887_vm0, %v851_v61  ;;  %948 = vst.msk [vmem:[%s1803_s3 + $0x1e0] sm:$0xff] %vm887_vm0, %v883_v62  ;;  %v852_v3 = vmax.f32 %v684_v63, 0.0  ;;  %v884_v4 = vmax.f32 %v812_v0, 0.0 }
 0x18b   :  { %917 = vst.msk [vmem:[%s1803_s3 + $0xe8] sm:$0xff] %vm887_vm0, %v852_v3  ;;  %949 = vst.msk [vmem:[%s1803_s3 + $0x1e8] sm:$0xff] %vm887_vm0, %v884_v4 }
 0x18c   :  { %v688_v5 = vpop.f32.mrb[60].mxu0  ;;  %v816_v6 = vpop.f32.mrb[60].mxu1 }
 0x18d   :  { %v689_v7 = vadd.f32 %v1478_v17, %v688_v5  ;;  %v817_v8 = vadd.f32 %v1478_v17, %v816_v6  ;;  %v690_v9 = vpop.f32.mrb[61].mxu0  ;;  %v818_v10 = vpop.f32.mrb[61].mxu1 }
 0x18e   :  { %v691_v11 = vpop.f32.mrb[62].mxu0  ;;  %v819_v12 = vpop.f32.mrb[62].mxu1 }
 0x18f   :  { %v853_v13 = vmax.f32 %v689_v7, 0.0  ;;  %v885_v14 = vmax.f32 %v817_v8, 0.0  ;;  %v692_v15 = vadd.f32 %v1478_v17, %v691_v11  ;;  %v820_v16 = vadd.f32 %v1478_v17, %v819_v12  ;;  %v693_v18 = vpop.f32.mrb[63].mxu0  ;;  %v821_v19 = vpop.f32.mrb[63].mxu1 }
 0x191   :  { %918 = vst.msk [vmem:[%s1803_s3 + $0xf0] sm:$0xff] %vm887_vm0, %v853_v13  ;;  %950 = vst.msk [vmem:[%s1803_s3 + $0x1f0] sm:$0xff] %vm887_vm0, %v885_v14  ;;  %v854_v20 = vmax.f32 %v692_v15, 0.0  ;;  %v886_v21 = vmax.f32 %v820_v16, 0.0 }
 0x193   :  { %919 = vst.msk [vmem:[%s1803_s3 + $0xf8] sm:$0xff] %vm887_vm0, %v854_v20  ;;  %951 = vst.msk [vmem:[%s1803_s3 + $0x1f8] sm:$0xff] %vm887_vm0, %v886_v21 }

// kernel: forward.15
= control target key start
LH: loop header
LB: loop body
LE: loop exit
PB: predicated region body
PF: predicated region fallthrough
CT: control target
= control target key end

     0   :  { %vm264_vm0 = vcmask 1040384   ;;  %vm1417_vm1 = vcmask 1041409   ;;  %vm1419_vm2 = vcmask 1042434   ;;  %vm1421_vm3 = vcmask 1043459   ;;  %s3022_s0 = inlined_call_operand.vmem [shape: f32[128,9,128], index: 0, kind: input, shape index: {}]   ;;  %s3023_s1 = inlined_call_operand.vmem [shape: f32[128,128], index: 1, kind: output, shape index: {}]  }
   0x1   :  { %v9_v0 = vld [vmem:[%s3022_s0 + $0x8] sm:$0x1]  ;;  %v8_v1 = vld [vmem:[%s3022_s0] sm:$0xff]  ;;  %v11_v2 = vld [vmem:[%s3022_s0 + $0x18] sm:$0x1]  ;;  %vm1423_vm4 = vcmask 1044484  }
   0x2   :  { %v265_v3 = vsel %vm264_vm0, %v9_v0, -inf  ;;  %v13_v4 = vld [vmem:[%s3022_s0 + $0x28] sm:$0x1]  ;;  %v15_v5 = vld [vmem:[%s3022_s0 + $0x38] sm:$0x1]  ;;  %v10_v7 = vld [vmem:[%s3022_s0 + $0x10] sm:$0xff] }
   0x3   :  { %v17_v6 = vld [vmem:[%s3022_s0 + $0x48] sm:$0x1]  ;;  %v266_v8 = vmax.f32 %v8_v1, %v265_v3  ;;  %v273_v9 = vsel %vm264_vm0, %v11_v2, -inf  ;;  %v12_v10 = vld [vmem:[%s3022_s0 + $0x20] sm:$0xff]  ;;  %v281_v11 = vsel %vm264_vm0, %v13_v4, -inf  ;;  %v14_v12 = vld [vmem:[%s3022_s0 + $0x30] sm:$0xff] }
   0x4   :  { %v16_v13 = vld [vmem:[%s3022_s0 + $0x40] sm:$0xff]  ;;  %v289_v14 = vsel %vm264_vm0, %v15_v5, -inf  ;;  %v297_v15 = vsel %vm264_vm0, %v17_v6, -inf  ;;  %v274_v16 = vmax.f32 %v10_v7, %v273_v9  ;;  %v19_v17 = vld [vmem:[%s3022_s0 + $0x58] sm:$0x1]  ;;  %v282_v19 = vmax.f32 %v12_v10, %v281_v11  ;;  %v18_v22 = vld [vmem:[%s3022_s0 + $0x50] sm:$0xff] }
   0x5   :  { %v267_v18 = vrot.slane %v266_v8, 4  ;;  %v290_v20 = vmax.f32 %v14_v12, %v289_v14  ;;  %v298_v21 = vmax.f32 %v16_v13, %v297_v15  ;;  %v305_v24 = vsel %vm264_vm0, %v19_v17, -inf  ;;  %v21_v27 = vld [vmem:[%s3022_s0 + $0x68] sm:$0x1]  ;;  %v23_v28 = vld [vmem:[%s3022_s0 + $0x78] sm:$0x1] }
   0x6   :  { %v275_v23 = vrot.slane %v274_v16, 4  ;;  %v283_v26 = vrot.slane %v282_v19, 4  ;;  %v306_v31 = vmax.f32 %v18_v22, %v305_v24  ;;  %v20_v33 = vld [vmem:[%s3022_s0 + $0x60] sm:$0xff]  ;;  %v22_v34 = vld [vmem:[%s3022_s0 + $0x70] sm:$0xff]  ;;  %v313_v37 = vsel %vm264_vm0, %v21_v27, -inf }
   0x7   :  { %v268_v25 = vmax.f32 %v266_v8, %v267_v18  ;;  %v291_v29 = vrot.slane %v290_v20, 4  ;;  %v299_v30 = vrot.slane %v298_v21, 4  ;;  %v321_v38 = vsel %vm264_vm0, %v23_v28, -inf  ;;  %v25_v39 = vld [vmem:[%s3022_s0 + $0x88] sm:$0x1]  ;;  %v24_v47 = vld [vmem:[%s3022_s0 + $0x80] sm:$0xff] }
   0x8   :  { %v276_v32 = vmax.f32 %v274_v16, %v275_v23  ;;  %v284_v36 = vmax.f32 %v282_v19, %v283_v26  ;;  %v27_v42 = vld [vmem:[%s3022_s0 + $0x98] sm:$0x1]  ;;  %v29_v43 = vld [vmem:[%s3022_s0 + $0xa8] sm:$0x1]  ;;  %v307_v44 = vrot.slane %v306_v31, 4  ;;  %v314_v45 = vmax.f32 %v20_v33, %v313_v37  ;;  %v26_v52 = vld [vmem:[%s3022_s0 + $0x90] sm:$0xff] }
   0x9   :  { %v269_v35 = vrot.slane %v268_v25, 2  ;;  %v292_v40 = vmax.f32 %v290_v20, %v291_v29  ;;  %v300_v41 = vmax.f32 %v298_v21, %v299_v30  ;;  %v322_v46 = vmax.f32 %v22_v34, %v321_v38  ;;  %v28_v53 = vld [vmem:[%s3022_s0 + $0xa0] sm:$0xff]  ;;  %v31_v58 = vld [vmem:[%s3022_s0 + $0xb8] sm:$0x1]  ;;  %v33_v60 = vld [vmem:[%s3022_s0 + $0xc8] sm:$0x1] }
   0xa   :  { %v277_v49 = vrot.slane %v276_v32, 2  ;;  %v285_v50 = vrot.slane %v284_v36, 2  ;;  %v329_v51 = vsel %vm264_vm0, %v25_v39, -inf  ;;  %v337_v56 = vsel %vm264_vm0, %v27_v42, -inf  ;;  %v35_v61 = vld [vmem:[%s3022_s0 + $0xd8] sm:$0x1] }
   0xb   :  { %v270_v48 = vmax.f32 %v268_v25, %v269_v35  ;;  %v293_v54 = vrot.slane %v292_v40, 2  ;;  %v301_v55 = vrot.slane %v300_v41, 2  ;;  %v345_v57 = vsel %vm264_vm0, %v29_v43, -inf  ;;  %v37_v1 = vld [vmem:[%s3022_s0 + $0xe8] sm:$0x1]  ;;  %v30_v6 = vld [vmem:[%s3022_s0 + $0xb0] sm:$0xff] }
   0xc   :  { %v308_v59 = vmax.f32 %v306_v31, %v307_v44  ;;  %v315_v62 = vrot.slane %v314_v45, 4  ;;  %v323_v63 = vrot.slane %v322_v46, 4  ;;  %v330_v0 = vmax.f32 %v24_v47, %v329_v51  ;;  %v32_v10 = vld [vmem:[%s3022_s0 + $0xc0] sm:$0xff]  ;;  %v34_v11 = vld [vmem:[%s3022_s0 + $0xd0] sm:$0xff]  ;;  %v39_v17 = vld [vmem:[%s3022_s0 + $0xf8] sm:$0x1] }
   0xd   :  { %v278_v2 = vmax.f32 %v276_v32, %v277_v49  ;;  %v286_v3 = vmax.f32 %v284_v36, %v285_v50  ;;  %v338_v4 = vmax.f32 %v26_v52, %v337_v56  ;;  %v346_v5 = vmax.f32 %v28_v53, %v345_v57  ;;  %v36_v16 = vld [vmem:[%s3022_s0 + $0xe0] sm:$0xff]  ;;  %v38_v30 = vld [vmem:[%s3022_s0 + $0xf0] sm:$0xff]  ;;  %v41_v39 = vld [vmem:[%s3022_s0 + $0x108] sm:$0x1] }
   0xe   :  { %v271_v7 = vrot.slane %v270_v48, 1  ;;  %v294_v8 = vmax.f32 %v292_v40, %v293_v54  ;;  %v302_v9 = vmax.f32 %v300_v41, %v301_v55  ;;  %v309_v12 = vrot.slane %v308_v59, 2  ;;  %v43_v40 = vld [vmem:[%s3022_s0 + $0x118] sm:$0x1]  ;;  %v40_v54 = vld [vmem:[%s3022_s0 + $0x100] sm:$0xff]  ;;  %v42_v55 = vld [vmem:[%s3022_s0 + $0x110] sm:$0xff] }
   0xf   :  { %v353_v13 = vsel %vm264_vm0, %v31_v58, -inf  ;;  %v361_v14 = vsel %vm264_vm0, %v33_v60, -inf  ;;  %v369_v15 = vsel %vm264_vm0, %v35_v61, -inf  ;;  %v316_v18 = vmax.f32 %v314_v45, %v315_v62  ;;  %v45_v45 = vld [vmem:[%s3022_s0 + $0x128] sm:$0x1]  ;;  %v44_v61 = vld [vmem:[%s3022_s0 + $0x120] sm:$0xff] }
  0x10   :  { %v324_v19 = vmax.f32 %v322_v46, %v323_v63  ;;  %v331_v20 = vrot.slane %v330_v0, 4  ;;  %v377_v21 = vsel %vm264_vm0, %v37_v1, -inf  ;;  %v279_v22 = vrot.slane %v278_v2, 1  ;;  %v47_v56 = vld [vmem:[%s3022_s0 + $0x138] sm:$0x1]  ;;  %v46_v62 = vld [vmem:[%s3022_s0 + $0x130] sm:$0xff] }
  0x11   :  { %v287_v23 = vrot.slane %v286_v3, 1  ;;  %v339_v24 = vrot.slane %v338_v4, 4  ;;  %v347_v25 = vrot.slane %v346_v5, 4  ;;  %v295_v26 = vrot.slane %v294_v8, 1 }
  0x12   :  { %v354_v27 = vmax.f32 %v30_v6, %v353_v13  ;;  %v362_v28 = vmax.f32 %v32_v10, %v361_v14  ;;  %v370_v29 = vmax.f32 %v34_v11, %v369_v15  ;;  %v303_v31 = vrot.slane %v302_v9, 1  ;;  %v49_v11 = vld [vmem:[%s3022_s0 + $0x148] sm:$0x1] }
  0x13   :  { %v310_v32 = vmax.f32 %v308_v59, %v309_v12  ;;  %v378_v33 = vmax.f32 %v36_v16, %v377_v21  ;;  %v385_v34 = vsel %vm264_vm0, %v39_v17, -inf  ;;  %v1694_v35 = vmax.f32 %v270_v48, %v271_v7  ;;  %v51_v12 = vld [vmem:[%s3022_s0 + $0x158] sm:$0x1]  ;;  %v48_v21 = vld [vmem:[%s3022_s0 + $0x140] sm:$0xff] }
  0x14   :  { %v317_v36 = vrot.slane %v316_v18, 2  ;;  %v325_v37 = vrot.slane %v324_v19, 2  ;;  %v332_v38 = vmax.f32 %v330_v0, %v331_v20  ;;  %v1702_v41 = vmax.f32 %v278_v2, %v279_v22  ;;  %v50_v22 = vld [vmem:[%s3022_s0 + $0x150] sm:$0xff] }
  0x15   :  { %v1704_v42 = vmax.f32 %v286_v3, %v287_v23  ;;  %v340_v43 = vmax.f32 %v338_v4, %v339_v24  ;;  %v348_v44 = vmax.f32 %v346_v5, %v347_v25  ;;  %v355_v46 = vrot.slane %v354_v27, 4 }
  0x16   :  { %v363_v47 = vrot.slane %v362_v28, 4  ;;  %v371_v48 = vrot.slane %v370_v29, 4  ;;  %v386_v49 = vmax.f32 %v38_v30, %v385_v34  ;;  %v1709_v50 = vmax.f32 %v294_v8, %v295_v26 }
  0x17   :  { %v1711_v51 = vmax.f32 %v302_v9, %v303_v31  ;;  %v311_v52 = vrot.slane %v310_v32, 1  ;;  %v379_v53 = vrot.slane %v378_v33, 4  ;;  %v318_v57 = vmax.f32 %v316_v18, %v317_v36  ;;  %v53_v36 = vld [vmem:[%s3022_s0 + $0x168] sm:$0x1] }
  0x18   :  { %v326_v58 = vmax.f32 %v324_v19, %v325_v37  ;;  %v333_v59 = vrot.slane %v332_v38, 2  ;;  %v393_v60 = vsel %vm264_vm0, %v41_v39, -inf  ;;  %v341_v63 = vrot.slane %v340_v43, 2 }
  0x19   :  { %v349_v0 = vrot.slane %v348_v44, 2  ;;  %v401_v1 = vsel %vm264_vm0, %v43_v40, -inf  ;;  %v409_v2 = vsel %vm264_vm0, %v45_v45, -inf  ;;  %v356_v3 = vmax.f32 %v354_v27, %v355_v46 }
  0x1a   :  { %v364_v4 = vmax.f32 %v362_v28, %v363_v47  ;;  %v372_v5 = vmax.f32 %v370_v29, %v371_v48  ;;  %v387_v6 = vrot.slane %v386_v49, 4  ;;  %v1731_v7 = vmax.f32 %v310_v32, %v311_v52  ;;  %v52_v47 = vld [vmem:[%s3022_s0 + $0x160] sm:$0xff] }
  0x1b   :  { %v380_v8 = vmax.f32 %v378_v33, %v379_v53  ;;  %v394_v9 = vmax.f32 %v40_v54, %v393_v60  ;;  %v417_v10 = vsel %vm264_vm0, %v47_v56, -inf  ;;  %v319_v13 = vrot.slane %v318_v57, 1 }
  0x1c   :  { %v402_v14 = vmax.f32 %v42_v55, %v401_v1  ;;  %v410_v15 = vmax.f32 %v44_v61, %v409_v2  ;;  %v418_v16 = vmax.f32 %v46_v62, %v417_v10  ;;  %v327_v17 = vrot.slane %v326_v58, 1 }
  0x1d   :  { %v334_v18 = vmax.f32 %v332_v38, %v333_v59  ;;  %v342_v19 = vmax.f32 %v340_v43, %v341_v63  ;;  %v350_v20 = vmax.f32 %v348_v44, %v349_v0  ;;  %v357_v23 = vrot.slane %v356_v3, 2  ;;  %v55_v63 = vld [vmem:[%s3022_s0 + $0x178] sm:$0x1]  ;;  %v57_v0 = vld [vmem:[%s3022_s0 + $0x188] sm:$0x1] }
  0x1e   :  { %v365_v24 = vrot.slane %v364_v4, 2  ;;  %v373_v25 = vrot.slane %v372_v5, 2  ;;  %v388_v26 = vmax.f32 %v386_v49, %v387_v6  ;;  %v381_v27 = vrot.slane %v380_v8, 2  ;;  %v59_v6 = vld [vmem:[%s3022_s0 + $0x198] sm:$0x1] }
  0x1f   :  { %v395_v28 = vrot.slane %v394_v9, 4  ;;  %v425_v29 = vsel %vm264_vm0, %v49_v11, -inf  ;;  %v433_v30 = vsel %vm264_vm0, %v51_v12, -inf  ;;  %v1748_v31 = vmax.f32 %v318_v57, %v319_v13  ;;  %v58_v12 = vld [vmem:[%s3022_s0 + $0x190] sm:$0xff] }
  0x20   :  { %v403_v32 = vrot.slane %v402_v14, 4  ;;  %v411_v33 = vrot.slane %v410_v15, 4  ;;  %v419_v34 = vrot.slane %v418_v16, 4  ;;  %v335_v37 = vrot.slane %v334_v18, 1 }
  0x21   :  { %v343_v38 = vrot.slane %v342_v19, 1  ;;  %v426_v39 = vmax.f32 %v48_v21, %v425_v29  ;;  %v434_v40 = vmax.f32 %v50_v22, %v433_v30  ;;  %v1753_v43 = vmax.f32 %v326_v58, %v327_v17  ;;  %v54_v58 = vld [vmem:[%s3022_s0 + $0x170] sm:$0xff]  ;;  %v61_v29 = vld [vmem:[%s3022_s0 + $0x1a8] sm:$0x1]  ;;  %v63_v30 = vld [vmem:[%s3022_s0 + $0x1b8] sm:$0x1] }
  0x22   :  { %v351_v44 = vrot.slane %v350_v20, 1  ;;  %v358_v45 = vmax.f32 %v356_v3, %v357_v23  ;;  %v366_v46 = vmax.f32 %v364_v4, %v365_v24  ;;  %v374_v48 = vmax.f32 %v372_v5, %v373_v25  ;;  %v56_v5 = vld [vmem:[%s3022_s0 + $0x180] sm:$0xff] }
  0x23   :  { %v382_v49 = vmax.f32 %v380_v8, %v381_v27  ;;  %v389_v52 = vrot.slane %v388_v26, 2  ;;  %v396_v53 = vmax.f32 %v394_v9, %v395_v28  ;;  %v404_v54 = vmax.f32 %v402_v14, %v403_v32 }
  0x24   :  { %v412_v55 = vmax.f32 %v410_v15, %v411_v33  ;;  %v420_v56 = vmax.f32 %v418_v16, %v419_v34  ;;  %v441_v57 = vsel %vm264_vm0, %v53_v36, -inf  ;;  %v1762_v59 = vmax.f32 %v334_v18, %v335_v37  ;;  %v60_v37 = vld [vmem:[%s3022_s0 + $0x1a0] sm:$0xff] }
  0x25   :  { %v1764_v60 = vmax.f32 %v342_v19, %v343_v38  ;;  %v427_v61 = vrot.slane %v426_v39, 4  ;;  %v435_v62 = vrot.slane %v434_v40, 4  ;;  %v1772_v1 = vmax.f32 %v350_v20, %v351_v44  ;;  %v62_v38 = vld [vmem:[%s3022_s0 + $0x1b0] sm:$0xff] }
  0x26   :  { %v359_v2 = vrot.slane %v358_v45, 1  ;;  %v367_v3 = vrot.slane %v366_v46, 1  ;;  %v442_v4 = vmax.f32 %v52_v47, %v441_v57  ;;  %v375_v8 = vrot.slane %v374_v48, 1 }
  0x27   :  { %v383_v9 = vrot.slane %v382_v49, 1  ;;  %v390_v10 = vmax.f32 %v388_v26, %v389_v52  ;;  %v397_v11 = vrot.slane %v396_v53, 2  ;;  %v405_v13 = vrot.slane %v404_v54, 2 }
  0x28   :  { %v413_v14 = vrot.slane %v412_v55, 2  ;;  %v421_v15 = vrot.slane %v420_v56, 2  ;;  %v443_v16 = vrot.slane %v442_v4, 4  ;;  %v428_v17 = vmax.f32 %v426_v39, %v427_v61 }
  0x29   :  { %v436_v18 = vmax.f32 %v434_v40, %v435_v62  ;;  %v449_v19 = vsel %vm264_vm0, %v55_v63, -inf  ;;  %v457_v20 = vsel %vm264_vm0, %v57_v0, -inf  ;;  %v465_v24 = vsel %vm264_vm0, %v59_v6, -inf }
  0x2a   :  { %v444_v21 = vmax.f32 %v442_v4, %v443_v16  ;;  %v450_v22 = vmax.f32 %v54_v58, %v449_v19  ;;  %v458_v23 = vmax.f32 %v56_v5, %v457_v20  ;;  %v1786_v25 = vmax.f32 %v358_v45, %v359_v2  ;;  %v66_v20 = vld [vmem:[%s3022_s0 + $0x1d0] sm:$0xff] }
  0x2b   :  { %v1788_v26 = vmax.f32 %v366_v46, %v367_v3  ;;  %v1790_v27 = vmax.f32 %v374_v48, %v375_v8  ;;  %v466_v28 = vmax.f32 %v58_v12, %v465_v24  ;;  %v1798_v32 = vmax.f32 %v382_v49, %v383_v9  ;;  %v64_v9 = vld [vmem:[%s3022_s0 + $0x1c0] sm:$0xff] }
  0x2c   :  { %v391_v33 = vrot.slane %v390_v10, 1  ;;  %v398_v34 = vmax.f32 %v396_v53, %v397_v11  ;;  %v406_v36 = vmax.f32 %v404_v54, %v405_v13  ;;  %v414_v39 = vmax.f32 %v412_v55, %v413_v14  ;;  %v65_v55 = vld [vmem:[%s3022_s0 + $0x1c8] sm:$0x1] }
  0x2d   :  { %v422_v40 = vmax.f32 %v420_v56, %v421_v15  ;;  %v451_v44 = vrot.slane %v450_v22, 4  ;;  %v459_v45 = vrot.slane %v458_v23, 4  ;;  %v429_v46 = vrot.slane %v428_v17, 2 }
  0x2e   :  { %v437_v47 = vrot.slane %v436_v18, 2  ;;  %v445_v48 = vrot.slane %v444_v21, 2  ;;  %v467_v49 = vrot.slane %v466_v28, 4  ;;  %v473_v53 = vsel %vm264_vm0, %v61_v29, -inf }
  0x2f   :  { %v452_v52 = vmax.f32 %v450_v22, %v451_v44  ;;  %v460_v57 = vmax.f32 %v458_v23, %v459_v45  ;;  %v481_v54 = vsel %vm264_vm0, %v63_v30, -inf  ;;  %v1808_v58 = vmax.f32 %v390_v10, %v391_v33 }
  0x30   :  { %v468_v61 = vmax.f32 %v466_v28, %v467_v49  ;;  %v474_v62 = vmax.f32 %v60_v37, %v473_v53  ;;  %v482_v63 = vmax.f32 %v62_v38, %v481_v54  ;;  %v399_v56 = vrot.slane %v398_v34, 1  ;;  %v69_v28 = vld [vmem:[%s3022_s0 + $0x1e8] sm:$0x1] }
  0x31   :  { %v407_v0 = vrot.slane %v406_v36, 1  ;;  %v453_v2 = vrot.slane %v452_v52, 2  ;;  %v461_v3 = vrot.slane %v460_v57, 2  ;;  %v415_v4 = vrot.slane %v414_v39, 1 }
  0x32   :  { %v423_v5 = vrot.slane %v422_v40, 1  ;;  %v430_v6 = vmax.f32 %v428_v17, %v429_v46  ;;  %v469_v8 = vrot.slane %v468_v61, 2  ;;  %v438_v10 = vmax.f32 %v436_v18, %v437_v47  ;;  %v67_v18 = vld [vmem:[%s3022_s0 + $0x1d8] sm:$0x1]  ;;  %v70_v46 = vld [vmem:[%s3022_s0 + $0x1f0] sm:$0xff] }
  0x33   :  { %v446_v11 = vmax.f32 %v444_v21, %v445_v48  ;;  %v475_v12 = vrot.slane %v474_v62, 4  ;;  %v483_v13 = vrot.slane %v482_v63, 4  ;;  %v454_v14 = vmax.f32 %v452_v52, %v453_v2  ;;  %v68_v21 = vld [vmem:[%s3022_s0 + $0x1e0] sm:$0xff] }
  0x34   :  { %v462_v15 = vmax.f32 %v460_v57, %v461_v3  ;;  %v470_v16 = vmax.f32 %v468_v61, %v469_v8  ;;  %v489_v19 = vsel %vm264_vm0, %v65_v55, -inf  ;;  %v1820_v22 = vmax.f32 %v398_v34, %v399_v56  ;;  %v73_v3 = vld [vmem:[%s3022_s0 + $0x208] sm:$0x1] }
  0x35   :  { %v1822_v17 = vmax.f32 %v406_v36, %v407_v0  ;;  %v476_v23 = vmax.f32 %v474_v62, %v475_v12  ;;  %v484_v24 = vmax.f32 %v482_v63, %v483_v13  ;;  %v1833_v29 = vmax.f32 %v414_v39, %v415_v4  ;;  %v71_v36 = vld [vmem:[%s3022_s0 + $0x1f8] sm:$0x1]  ;;  %v74_v13 = vld [vmem:[%s3022_s0 + $0x210] sm:$0xff] }
  0x36   :  { %v1835_v30 = vmax.f32 %v422_v40, %v423_v5  ;;  %v431_v33 = vrot.slane %v430_v6, 1  ;;  %v490_v34 = vmax.f32 %v64_v9, %v489_v19  ;;  %v439_v37 = vrot.slane %v438_v10, 1  ;;  %v75_v4 = vld [vmem:[%s3022_s0 + $0x218] sm:$0x1] }
  0x37   :  { %v447_v38 = vrot.slane %v446_v11, 1  ;;  %v477_v44 = vrot.slane %v476_v23, 2  ;;  %v485_v45 = vrot.slane %v484_v24, 2  ;;  %v455_v47 = vrot.slane %v454_v14, 1 }
  0x38   :  { %v463_v48 = vrot.slane %v462_v15, 1  ;;  %v471_v39 = vrot.slane %v470_v16, 1  ;;  %v491_v49 = vrot.slane %v490_v34, 4  ;;  %v497_v57 = vsel %vm264_vm0, %v67_v18, -inf }
  0x39   :  { %v478_v40 = vmax.f32 %v476_v23, %v477_v44  ;;  %v486_v52 = vmax.f32 %v484_v24, %v485_v45  ;;  %v505_v53 = vsel %vm264_vm0, %v69_v28, -inf  ;;  %v498_v61 = vmax.f32 %v66_v20, %v497_v57 }
  0x3a   :  { %v492_v54 = vmax.f32 %v490_v34, %v491_v49  ;;  %v506_v62 = vmax.f32 %v68_v21, %v505_v53  ;;  %v513_v63 = vsel %vm264_vm0, %v71_v36, -inf  ;;  %v1846_v55 = vmax.f32 %v430_v6, %v431_v33  ;;  %v72_v6 = vld [vmem:[%s3022_s0 + $0x200] sm:$0xff] }
  0x3b   :  { %v479_v56 = vrot.slane %v478_v40, 1  ;;  %v487_v0 = vrot.slane %v486_v52, 1  ;;  %v514_v2 = vmax.f32 %v70_v46, %v513_v63  ;;  %v1854_v5 = vmax.f32 %v438_v10, %v439_v37  ;;  %v76_v36 = vld [vmem:[%s3022_s0 + $0x220] sm:$0xff]  ;;  %v78_v37 = vld [vmem:[%s3022_s0 + $0x230] sm:$0xff] }
  0x3c   :  { %v1856_v8 = vmax.f32 %v446_v11, %v447_v38  ;;  %v1858_v9 = vmax.f32 %v454_v14, %v455_v47  ;;  %v493_v12 = vrot.slane %v492_v54, 2  ;;  %v1866_v19 = vmax.f32 %v462_v15, %v463_v48  ;;  %v77_v11 = vld [vmem:[%s3022_s0 + $0x228] sm:$0x1]  ;;  %v79_v14 = vld [vmem:[%s3022_s0 + $0x238] sm:$0x1] }
  0x3d   :  { %v1868_v20 = vmax.f32 %v470_v16, %v471_v39  ;;  %v499_v23 = vrot.slane %v498_v61, 4  ;;  %v507_v10 = vrot.slane %v506_v62, 4  ;;  %v1876_v24 = vmax.f32 %v478_v40, %v479_v56  ;;  %v81_v47 = vld [vmem:[%s3022_s0 + $0x248] sm:$0x1] }
  0x3e   :  { %v1878_v18 = vmax.f32 %v486_v52, %v487_v0  ;;  %v494_v21 = vmax.f32 %v492_v54, %v493_v12  ;;  %v515_v28 = vrot.slane %v514_v2, 4  ;;  %v521_v16 = vsel %vm264_vm0, %v73_v3, -inf }
  0x3f   :  { %v500_v15 = vmax.f32 %v498_v61, %v499_v23  ;;  %v508_v33 = vmax.f32 %v506_v62, %v507_v10  ;;  %v529_v34 = vsel %vm264_vm0, %v75_v4, -inf  ;;  %v522_v45 = vmax.f32 %v72_v6, %v521_v16  ;;  %v80_v61 = vld [vmem:[%s3022_s0 + $0x240] sm:$0xff]  ;;  %v83_v6 = vld [vmem:[%s3022_s0 + $0x258] sm:$0x1]  ;;  %v82_v16 = vld [vmem:[%s3022_s0 + $0x250] sm:$0xff] }
  0x40   :  { %v495_v38 = vrot.slane %v494_v21, 1  ;;  %v516_v44 = vmax.f32 %v514_v2, %v515_v28  ;;  %v530_v46 = vmax.f32 %v74_v13, %v529_v34  ;;  %v537_v49 = vsel %vm264_vm0, %v77_v11, -inf }
  0x41   :  { %v501_v48 = vrot.slane %v500_v15, 2  ;;  %v509_v39 = vrot.slane %v508_v33, 2  ;;  %v545_v40 = vsel %vm264_vm0, %v79_v14, -inf  ;;  %v523_v53 = vrot.slane %v522_v45, 4  ;;  %v85_v14 = vld [vmem:[%s3022_s0 + $0x268] sm:$0x1] }
  0x42   :  { %v1893_v52 = vmax.f32 %v494_v21, %v495_v38  ;;  %v517_v57 = vrot.slane %v516_v44, 2  ;;  %v531_v54 = vrot.slane %v530_v46, 4  ;;  %v538_v56 = vmax.f32 %v76_v36, %v537_v49 }
  0x43   :  { %v502_v62 = vmax.f32 %v500_v15, %v501_v48  ;;  %v510_v63 = vmax.f32 %v508_v33, %v509_v39  ;;  %v546_v0 = vmax.f32 %v78_v37, %v545_v40  ;;  %v524_v3 = vmax.f32 %v522_v45, %v523_v53  ;;  %v87_v45 = vld [vmem:[%s3022_s0 + $0x278] sm:$0x1] }
  0x44   :  { %v518_v2 = vmax.f32 %v516_v44, %v517_v57  ;;  %v532_v4 = vmax.f32 %v530_v46, %v531_v54  ;;  %v553_v12 = vsel %vm264_vm0, %v81_v47, -inf  ;;  %v539_v10 = vrot.slane %v538_v56, 4  ;;  %v84_v44 = vld [vmem:[%s3022_s0 + $0x260] sm:$0xff]  ;;  %v86_v54 = vld [vmem:[%s3022_s0 + $0x270] sm:$0xff] }
  0x45   :  { %v503_v13 = vrot.slane %v502_v62, 1  ;;  %v511_v23 = vrot.slane %v510_v63, 1  ;;  %v547_v11 = vrot.slane %v546_v0, 4  ;;  %v525_v28 = vrot.slane %v524_v3, 2 }
  0x46   :  { %v519_v21 = vrot.slane %v518_v2, 1  ;;  %v533_v15 = vrot.slane %v532_v4, 2  ;;  %v554_v33 = vmax.f32 %v80_v61, %v553_v12  ;;  %v540_v37 = vmax.f32 %v538_v56, %v539_v10 }
  0x47   :  { %v1908_v34 = vmax.f32 %v502_v62, %v503_v13  ;;  %v1910_v36 = vmax.f32 %v510_v63, %v511_v23  ;;  %v548_v38 = vmax.f32 %v546_v0, %v547_v11  ;;  %v526_v47 = vmax.f32 %v524_v3, %v525_v28  ;;  %v89_v0 = vld [vmem:[%s3022_s0 + $0x288] sm:$0x1] }
  0x48   :  { %v1918_v46 = vmax.f32 %v518_v2, %v519_v21  ;;  %v534_v48 = vmax.f32 %v532_v4, %v533_v15  ;;  %v555_v39 = vrot.slane %v554_v33, 4  ;;  %v541_v49 = vrot.slane %v540_v37, 2  ;;  %v91_v2 = vld [vmem:[%s3022_s0 + $0x298] sm:$0x1]  ;;  %v90_v21 = vld [vmem:[%s3022_s0 + $0x290] sm:$0xff] }
  0x49   :  { %3024 = vst [vmem:[#allocation2_spill] sm:$0xff] %v1910_v36  ;;  %v549_v40 = vrot.slane %v548_v38, 2  ;;  %v561_v57 = vsel %vm264_vm0, %v83_v6, -inf  ;;  %v569_v53 = vsel %vm264_vm0, %v85_v14, -inf  ;;  %v527_v61 = vrot.slane %v526_v47, 1  ;;  %v88_v14 = vld [vmem:[%s3022_s0 + $0x280] sm:$0xff] }
  0x4a   :  { %3025 = vst [vmem:[#allocation3_spill] sm:$0xff] %v1918_v46  ;;  %v535_v62 = vrot.slane %v534_v48, 1  ;;  %v556_v63 = vmax.f32 %v554_v33, %v555_v39  ;;  %v562_v56 = vmax.f32 %v82_v16, %v561_v57  ;;  %v542_v3 = vmax.f32 %v540_v37, %v541_v49  ;;  %v93_v37 = vld [vmem:[%s3022_s0 + $0x2a8] sm:$0x1] }
  0x4b   :  { %v550_v4 = vmax.f32 %v548_v38, %v549_v40  ;;  %v570_v12 = vmax.f32 %v84_v44, %v569_v53  ;;  %v577_v6 = vsel %vm264_vm0, %v87_v45, -inf  ;;  %v1932_v13 = vmax.f32 %v526_v47, %v527_v61  ;;  %v95_v38 = vld [vmem:[%s3022_s0 + $0x2b8] sm:$0x1]  ;;  %v92_v53 = vld [vmem:[%s3022_s0 + $0x2a0] sm:$0xff] }
  0x4c   :  { %v1934_v23 = vmax.f32 %v534_v48, %v535_v62  ;;  %v557_v10 = vrot.slane %v556_v63, 2  ;;  %v563_v11 = vrot.slane %v562_v56, 4  ;;  %v543_v28 = vrot.slane %v542_v3, 1 }
  0x4d   :  { %v551_v15 = vrot.slane %v550_v4, 1  ;;  %v571_v33 = vrot.slane %v570_v12, 4  ;;  %v578_v16 = vmax.f32 %v86_v54, %v577_v6  ;;  %v585_v47 = vsel %vm264_vm0, %v89_v0, -inf  ;;  %v94_v54 = vld [vmem:[%s3022_s0 + $0x2b0] sm:$0xff]  ;;  %v97_v0 = vld [vmem:[%s3022_s0 + $0x2c8] sm:$0x1] }
  0x4e   :  { %v558_v44 = vmax.f32 %v556_v63, %v557_v10  ;;  %v564_v45 = vmax.f32 %v562_v56, %v563_v11  ;;  %v593_v48 = vsel %vm264_vm0, %v91_v2, -inf  ;;  %v1950_v39 = vmax.f32 %v542_v3, %v543_v28 }
  0x4f   :  { %v1952_v49 = vmax.f32 %v550_v4, %v551_v15  ;;  %v572_v40 = vmax.f32 %v570_v12, %v571_v33  ;;  %v579_v57 = vrot.slane %v578_v16, 4  ;;  %v586_v63 = vmax.f32 %v88_v14, %v585_v47  ;;  %v96_v14 = vld [vmem:[%s3022_s0 + $0x2c0] sm:$0xff] }
  0x50   :  { %v559_v61 = vrot.slane %v558_v44, 1  ;;  %v565_v62 = vrot.slane %v564_v45, 2  ;;  %v594_v56 = vmax.f32 %v90_v21, %v593_v48  ;;  %v601_v4 = vsel %vm264_vm0, %v93_v37, -inf }
  0x51   :  { %3026 = vst [vmem:[#allocation4_spill] sm:$0xff] %v1952_v49  ;;  %v573_v2 = vrot.slane %v572_v40, 2  ;;  %v580_v3 = vmax.f32 %v578_v16, %v579_v57  ;;  %v609_v12 = vsel %vm264_vm0, %v95_v38, -inf  ;;  %v587_v11 = vrot.slane %v586_v63, 4  ;;  %v99_v38 = vld [vmem:[%s3022_s0 + $0x2d8] sm:$0x1] }
  0x52   :  { %v1965_v6 = vmax.f32 %v558_v44, %v559_v61  ;;  %v566_v10 = vmax.f32 %v564_v45, %v565_v62  ;;  %v595_v28 = vrot.slane %v594_v56, 4  ;;  %v602_v33 = vmax.f32 %v92_v53, %v601_v4 }
  0x53   :  { %v574_v21 = vmax.f32 %v572_v40, %v573_v2  ;;  %v581_v15 = vrot.slane %v580_v3, 2  ;;  %v610_v47 = vmax.f32 %v94_v54, %v609_v12  ;;  %v588_v46 = vmax.f32 %v586_v63, %v587_v11  ;;  %v98_v40 = vld [vmem:[%s3022_s0 + $0x2d0] sm:$0xff]  ;;  %v100_v12 = vld [vmem:[%s3022_s0 + $0x2e0] sm:$0xff] }
  0x54   :  { %3027 = vst [vmem:[#allocation5_spill] sm:$0xff] %v1965_v6  ;;  %v567_v48 = vrot.slane %v566_v10, 1  ;;  %v596_v16 = vmax.f32 %v594_v56, %v595_v28  ;;  %v617_v37 = vsel %vm264_vm0, %v97_v0, -inf  ;;  %v603_v57 = vrot.slane %v602_v33, 4  ;;  %v101_v56 = vld [vmem:[%s3022_s0 + $0x2e8] sm:$0x1] }
  0x55   :  { %v575_v44 = vrot.slane %v574_v21, 1  ;;  %v582_v45 = vmax.f32 %v580_v3, %v581_v15  ;;  %v611_v61 = vrot.slane %v610_v47, 4  ;;  %v589_v53 = vrot.slane %v588_v46, 2  ;;  %v110_v6 = vld [vmem:[%s3022_s0 + $0x330] sm:$0xff] }
  0x56   :  { %v1977_v62 = vmax.f32 %v566_v10, %v567_v48  ;;  %v597_v54 = vrot.slane %v596_v16, 2  ;;  %v618_v63 = vmax.f32 %v96_v14, %v617_v37  ;;  %v604_v4 = vmax.f32 %v602_v33, %v603_v57  ;;  %v103_v14 = vld [vmem:[%s3022_s0 + $0x2f8] sm:$0x1] }
  0x57   :  { %v1982_v0 = vmax.f32 %v574_v21, %v575_v44  ;;  %v583_v2 = vrot.slane %v582_v45, 1  ;;  %v612_v3 = vmax.f32 %v610_v47, %v611_v61  ;;  %v590_v11 = vmax.f32 %v588_v46, %v589_v53  ;;  %v102_v46 = vld [vmem:[%s3022_s0 + $0x2f0] sm:$0xff] }
  0x58   :  { %3028 = vst [vmem:[#allocation6_spill] sm:$0xff] %v1977_v62  ;;  %v598_v28 = vmax.f32 %v596_v16, %v597_v54  ;;  %v619_v10 = vrot.slane %v618_v63, 4  ;;  %v625_v15 = vsel %vm264_vm0, %v99_v38, -inf  ;;  %v605_v21 = vrot.slane %v604_v4, 2  ;;  %v105_v16 = vld [vmem:[%s3022_s0 + $0x308] sm:$0x1] }
  0x59   :  { %3029 = vst [vmem:[#allocation7_spill] sm:$0xff] %v1982_v0  ;;  %v1991_v48 = vmax.f32 %v582_v45, %v583_v2  ;;  %v613_v37 = vrot.slane %v612_v3, 2  ;;  %v626_v44 = vmax.f32 %v98_v40, %v625_v15  ;;  %v591_v33 = vrot.slane %v590_v11, 1  ;;  %v107_v38 = vld [vmem:[%s3022_s0 + $0x318] sm:$0x1]  ;;  %v104_v15 = vld [vmem:[%s3022_s0 + $0x300] sm:$0xff] }
  0x5a   :  { %v599_v47 = vrot.slane %v598_v28, 1  ;;  %v620_v57 = vmax.f32 %v618_v63, %v619_v10  ;;  %v633_v61 = vsel %vm264_vm0, %v101_v56, -inf  ;;  %v606_v45 = vmax.f32 %v604_v4, %v605_v21  ;;  %v108_v62 = vld [vmem:[%s3022_s0 + $0x320] sm:$0xff] }
  0x5b   :  { %3030 = vst [vmem:[#allocation8_spill] sm:$0xff] %v1991_v48  ;;  %v614_v53 = vmax.f32 %v612_v3, %v613_v37  ;;  %v627_v40 = vrot.slane %v626_v44, 4  ;;  %v634_v54 = vmax.f32 %v100_v12, %v633_v61  ;;  %v2003_v2 = vmax.f32 %v590_v11, %v591_v33  ;;  %v106_v48 = vld [vmem:[%s3022_s0 + $0x310] sm:$0xff]  ;;  %v109_v12 = vld [vmem:[%s3022_s0 + $0x328] sm:$0x1] }
  0x5c   :  { %v2005_v63 = vmax.f32 %v598_v28, %v599_v47  ;;  %v621_v56 = vrot.slane %v620_v57, 2  ;;  %v641_v10 = vsel %vm264_vm0, %v103_v14, -inf  ;;  %v607_v0 = vrot.slane %v606_v45, 1  ;;  %v111_v11 = vld [vmem:[%s3022_s0 + $0x338] sm:$0x1] }
  0x5d   :  { %v615_v4 = vrot.slane %v614_v53, 1  ;;  %v628_v3 = vmax.f32 %v626_v44, %v627_v40  ;;  %v635_v21 = vrot.slane %v634_v54, 4  ;;  %v642_v14 = vmax.f32 %v102_v46, %v641_v10 }
  0x5e   :  { %v622_v28 = vmax.f32 %v620_v57, %v621_v56  ;;  %v649_v37 = vsel %vm264_vm0, %v105_v16, -inf  ;;  %v657_v33 = vsel %vm264_vm0, %v107_v38, -inf  ;;  %v2022_v47 = vmax.f32 %v606_v45, %v607_v0  ;;  %v113_v0 = vld [vmem:[%s3022_s0 + $0x348] sm:$0x1] }
  0x5f   :  { %v2024_v61 = vmax.f32 %v614_v53, %v615_v4  ;;  %v629_v44 = vrot.slane %v628_v3, 2  ;;  %v636_v40 = vmax.f32 %v634_v54, %v635_v21  ;;  %v643_v46 = vrot.slane %v642_v14, 4 }
  0x60   :  { %3031 = vst [vmem:[#allocation9_spill] sm:$0xff] %v2022_v47  ;;  %v623_v57 = vrot.slane %v622_v28, 1  ;;  %v650_v56 = vmax.f32 %v104_v15, %v649_v37  ;;  %v658_v16 = vmax.f32 %v106_v48, %v657_v33  ;;  %v665_v53 = vsel %vm264_vm0, %v109_v12, -inf  ;;  %v112_v15 = vld [vmem:[%s3022_s0 + $0x340] sm:$0xff] }
  0x61   :  { %3032 = vst [vmem:[#allocation10_spill] sm:$0xff] %v2024_v61  ;;  %v630_v38 = vmax.f32 %v628_v3, %v629_v44  ;;  %v637_v45 = vrot.slane %v636_v40, 2  ;;  %v673_v54 = vsel %vm264_vm0, %v111_v11, -inf  ;;  %v644_v4 = vmax.f32 %v642_v14, %v643_v46  ;;  %v115_v3 = vld [vmem:[%s3022_s0 + $0x358] sm:$0x1] }
  0x62   :  { %v2037_v10 = vmax.f32 %v622_v28, %v623_v57  ;;  %v651_v21 = vrot.slane %v650_v56, 4  ;;  %v659_v61 = vrot.slane %v658_v16, 4  ;;  %v666_v33 = vmax.f32 %v108_v62, %v665_v53 }
  0x63   :  { %v631_v48 = vrot.slane %v630_v38, 1  ;;  %v638_v37 = vmax.f32 %v636_v40, %v637_v45  ;;  %v674_v47 = vmax.f32 %v110_v6, %v673_v54  ;;  %v645_v12 = vrot.slane %v644_v4, 2  ;;  %v114_v40 = vld [vmem:[%s3022_s0 + $0x350] sm:$0xff]  ;;  %v117_v6 = vld [vmem:[%s3022_s0 + $0x368] sm:$0x1]  ;;  %v116_v54 = vld [vmem:[%s3022_s0 + $0x360] sm:$0xff] }
  0x64   :  { %3033 = vst [vmem:[#allocation11_spill] sm:$0xff] %v2037_v10  ;;  %v652_v44 = vmax.f32 %v650_v56, %v651_v21  ;;  %v660_v11 = vmax.f32 %v658_v16, %v659_v61  ;;  %v681_v28 = vsel %vm264_vm0, %v113_v0, -inf  ;;  %v667_v46 = vrot.slane %v666_v33, 4 }
  0x65   :  { %v2046_v14 = vmax.f32 %v630_v38, %v631_v48  ;;  %v639_v57 = vrot.slane %v638_v37, 1  ;;  %v675_v10 = vrot.slane %v674_v47, 4  ;;  %v646_v62 = vmax.f32 %v644_v4, %v645_v12  ;;  %v119_v4 = vld [vmem:[%s3022_s0 + $0x378] sm:$0x1] }
  0x66   :  { %v653_v45 = vrot.slane %v652_v44, 2  ;;  %v661_v53 = vrot.slane %v660_v11, 2  ;;  %v682_v56 = vmax.f32 %v112_v15, %v681_v28  ;;  %v668_v16 = vmax.f32 %v666_v33, %v667_v46 }
  0x67   :  { %3034 = vst [vmem:[#allocation12_spill] sm:$0xff] %v2046_v14  ;;  %v2054_v61 = vmax.f32 %v638_v37, %v639_v57  ;;  %v676_v0 = vmax.f32 %v674_v47, %v675_v10  ;;  %v689_v38 = vsel %vm264_vm0, %v115_v3, -inf  ;;  %v647_v21 = vrot.slane %v646_v62, 1  ;;  %v123_v57 = vld [vmem:[%s3022_s0 + $0x398] sm:$0x1] }
  0x68   :  { %v654_v48 = vmax.f32 %v652_v44, %v653_v45  ;;  %v662_v14 = vmax.f32 %v660_v11, %v661_v53  ;;  %v683_v49 = vrot.slane %v682_v56, 4  ;;  %v669_v12 = vrot.slane %v668_v16, 2  ;;  %v118_v44 = vld [vmem:[%s3022_s0 + $0x370] sm:$0xff]  ;;  %v121_v11 = vld [vmem:[%s3022_s0 + $0x388] sm:$0x1] }
  0x69   :  { %3035 = vst [vmem:[#allocation13_spill] sm:$0xff] %v2054_v61  ;;  %v677_v15 = vrot.slane %v676_v0, 2  ;;  %v690_v37 = vmax.f32 %v114_v40, %v689_v38  ;;  %v697_v33 = vsel %vm264_vm0, %v117_v6, -inf  ;;  %v2064_v47 = vmax.f32 %v646_v62, %v647_v21  ;;  %v120_v38 = vld [vmem:[%s3022_s0 + $0x380] sm:$0xff]  ;;  %v122_v21 = vld [vmem:[%s3022_s0 + $0x390] sm:$0xff] }
  0x6a   :  { %v655_v10 = vrot.slane %v654_v48, 1  ;;  %v663_v3 = vrot.slane %v662_v14, 1  ;;  %v684_v28 = vmax.f32 %v682_v56, %v683_v49  ;;  %v670_v46 = vmax.f32 %v668_v16, %v669_v12  ;;  %v124_v61 = vld [vmem:[%s3022_s0 + $0x3a0] sm:$0xff] }
  0x6b   :  { %3036 = vst [vmem:[#allocation14_spill] sm:$0xff] %v2064_v47  ;;  %v678_v40 = vmax.f32 %v676_v0, %v677_v15  ;;  %v691_v6 = vrot.slane %v690_v37, 4  ;;  %v698_v62 = vmax.f32 %v116_v54, %v697_v33  ;;  %v705_v56 = vsel %vm264_vm0, %v119_v4, -inf  ;;  %v127_v54 = vld [vmem:[%s3022_s0 + $0x3b8] sm:$0x1] }
  0x6c   :  { %v2075_v45 = vmax.f32 %v654_v48, %v655_v10  ;;  %v2077_v53 = vmax.f32 %v662_v14, %v663_v3  ;;  %v685_v49 = vrot.slane %v684_v28, 2  ;;  %v671_v47 = vrot.slane %v670_v46, 1  ;;  %v125_v14 = vld [vmem:[%s3022_s0 + $0x3a8] sm:$0x1] }
  0x6d   :  { %v679_v16 = vrot.slane %v678_v40, 1  ;;  %v692_v0 = vmax.f32 %v690_v37, %v691_v6  ;;  %v699_v12 = vrot.slane %v698_v62, 4  ;;  %v706_v4 = vmax.f32 %v118_v44, %v705_v56 }
  0x6e   :  { %3037 = vst [vmem:[#allocation15_spill] sm:$0xff] %v2075_v45  ;;  %3038 = vst [vmem:[#allocation16_spill] sm:$0xff] %v2077_v53  ;;  %v686_v48 = vmax.f32 %v684_v28, %v685_v49  ;;  %v713_v15 = vsel %vm264_vm0, %v121_v11, -inf  ;;  %v721_v33 = vsel %vm264_vm0, %v123_v57, -inf  ;;  %v2094_v10 = vmax.f32 %v670_v46, %v671_v47  ;;  %v126_v53 = vld [vmem:[%s3022_s0 + $0x3b0] sm:$0xff] }
  0x6f   :  { %v2096_v3 = vmax.f32 %v678_v40, %v679_v16  ;;  %v693_v37 = vrot.slane %v692_v0, 2  ;;  %v700_v6 = vmax.f32 %v698_v62, %v699_v12  ;;  %v707_v44 = vrot.slane %v706_v4, 4  ;;  %v129_v47 = vld [vmem:[%s3022_s0 + $0x3c8] sm:$0x1] }
  0x70   :  { %3039 = vst [vmem:[#allocation17_spill] sm:$0xff] %v2094_v10  ;;  %v687_v28 = vrot.slane %v686_v48, 1  ;;  %v714_v49 = vmax.f32 %v120_v38, %v713_v15  ;;  %v722_v11 = vmax.f32 %v122_v21, %v721_v33  ;;  %v729_v40 = vsel %vm264_vm0, %v125_v14, -inf  ;;  %v128_v38 = vld [vmem:[%s3022_s0 + $0x3c0] sm:$0xff] }
  0x71   :  { %3040 = vst [vmem:[#allocation18_spill] sm:$0xff] %v2096_v3  ;;  %v694_v57 = vmax.f32 %v692_v0, %v693_v37  ;;  %v701_v46 = vrot.slane %v700_v6, 2  ;;  %v737_v62 = vsel %vm264_vm0, %v127_v54, -inf  ;;  %v708_v16 = vmax.f32 %v706_v4, %v707_v44  ;;  %v131_v0 = vld [vmem:[%s3022_s0 + $0x3d8] sm:$0x1] }
  0x72   :  { %v2109_v56 = vmax.f32 %v686_v48, %v687_v28  ;;  %v715_v12 = vrot.slane %v714_v49, 4  ;;  %v723_v3 = vrot.slane %v722_v11, 4  ;;  %v730_v33 = vmax.f32 %v124_v61, %v729_v40  ;;  %v133_v61 = vld [vmem:[%s3022_s0 + $0x3e8] sm:$0x1] }
  0x73   :  { %v695_v21 = vrot.slane %v694_v57, 1  ;;  %v702_v15 = vmax.f32 %v700_v6, %v701_v46  ;;  %v738_v10 = vmax.f32 %v126_v53, %v737_v62  ;;  %v709_v14 = vrot.slane %v708_v16, 2  ;;  %v130_v6 = vld [vmem:[%s3022_s0 + $0x3d0] sm:$0xff]  ;;  %v132_v62 = vld [vmem:[%s3022_s0 + $0x3e0] sm:$0xff] }
  0x74   :  { %3041 = vst [vmem:[#allocation19_spill] sm:$0xff] %v2109_v56  ;;  %v716_v37 = vmax.f32 %v714_v49, %v715_v12  ;;  %v724_v54 = vmax.f32 %v722_v11, %v723_v3  ;;  %v745_v48 = vsel %vm264_vm0, %v129_v47, -inf  ;;  %v731_v44 = vrot.slane %v730_v33, 4 }
  0x75   :  { %v2118_v4 = vmax.f32 %v694_v57, %v695_v21  ;;  %v703_v28 = vrot.slane %v702_v15, 1  ;;  %v739_v56 = vrot.slane %v738_v10, 4  ;;  %v710_v53 = vmax.f32 %v708_v16, %v709_v14  ;;  %v135_v16 = vld [vmem:[%s3022_s0 + $0x3f8] sm:$0x1] }
  0x76   :  { %v717_v46 = vrot.slane %v716_v37, 2  ;;  %v725_v40 = vrot.slane %v724_v54, 2  ;;  %v746_v49 = vmax.f32 %v128_v38, %v745_v48  ;;  %v732_v11 = vmax.f32 %v730_v33, %v731_v44 }
  0x77   :  { %3042 = vst [vmem:[#allocation20_spill] sm:$0xff] %v2118_v4  ;;  %v2126_v3 = vmax.f32 %v702_v15, %v703_v28  ;;  %v740_v47 = vmax.f32 %v738_v10, %v739_v56  ;;  %v753_v57 = vsel %vm264_vm0, %v131_v0, -inf  ;;  %v711_v12 = vrot.slane %v710_v53, 1  ;;  %v139_v28 = vld [vmem:[%s3022_s0 + $0x418] sm:$0x1] }
  0x78   :  { %v718_v21 = vmax.f32 %v716_v37, %v717_v46  ;;  %v726_v4 = vmax.f32 %v724_v54, %v725_v40  ;;  %v747_v45 = vrot.slane %v746_v49, 4  ;;  %v733_v14 = vrot.slane %v732_v11, 2  ;;  %v134_v37 = vld [vmem:[%s3022_s0 + $0x3f0] sm:$0xff]  ;;  %v137_v54 = vld [vmem:[%s3022_s0 + $0x408] sm:$0x1] }
  0x79   :  { %3043 = vst [vmem:[#allocation21_spill] sm:$0xff] %v2126_v3  ;;  %v741_v38 = vrot.slane %v740_v47, 2  ;;  %v754_v15 = vmax.f32 %v130_v6, %v753_v57  ;;  %v761_v33 = vsel %vm264_vm0, %v133_v61, -inf  ;;  %v2136_v10 = vmax.f32 %v710_v53, %v711_v12  ;;  %v136_v57 = vld [vmem:[%s3022_s0 + $0x400] sm:$0xff]  ;;  %v138_v12 = vld [vmem:[%s3022_s0 + $0x410] sm:$0xff] }
  0x7a   :  { %v719_v56 = vrot.slane %v718_v21, 1  ;;  %v727_v0 = vrot.slane %v726_v4, 1  ;;  %v748_v48 = vmax.f32 %v746_v49, %v747_v45  ;;  %v734_v44 = vmax.f32 %v732_v11, %v733_v14  ;;  %v140_v3 = vld [vmem:[%s3022_s0 + $0x420] sm:$0xff] }
  0x7b   :  { %3044 = vst [vmem:[#allocation22_spill] sm:$0xff] %v2136_v10  ;;  %v742_v6 = vmax.f32 %v740_v47, %v741_v38  ;;  %v755_v61 = vrot.slane %v754_v15, 4  ;;  %v762_v53 = vmax.f32 %v132_v62, %v761_v33  ;;  %v769_v49 = vsel %vm264_vm0, %v135_v16, -inf  ;;  %v143_v62 = vld [vmem:[%s3022_s0 + $0x438] sm:$0x1] }
  0x7c   :  { %v2147_v46 = vmax.f32 %v718_v21, %v719_v56  ;;  %v2149_v40 = vmax.f32 %v726_v4, %v727_v0  ;;  %v749_v45 = vrot.slane %v748_v48, 2  ;;  %v735_v10 = vrot.slane %v734_v44, 1  ;;  %v141_v4 = vld [vmem:[%s3022_s0 + $0x428] sm:$0x1] }
  0x7d   :  { %v743_v11 = vrot.slane %v742_v6, 1  ;;  %v756_v47 = vmax.f32 %v754_v15, %v755_v61  ;;  %v763_v14 = vrot.slane %v762_v53, 4  ;;  %v770_v16 = vmax.f32 %v134_v37, %v769_v49 }
  0x7e   :  { %3045 = vst [vmem:[#allocation23_spill] sm:$0xff] %v2147_v46  ;;  %3046 = vst [vmem:[#allocation24_spill] sm:$0xff] %v2149_v40  ;;  %v750_v21 = vmax.f32 %v748_v48, %v749_v45  ;;  %v777_v38 = vsel %vm264_vm0, %v137_v54, -inf  ;;  %v785_v33 = vsel %vm264_vm0, %v139_v28, -inf  ;;  %v2166_v56 = vmax.f32 %v734_v44, %v735_v10  ;;  %v142_v40 = vld [vmem:[%s3022_s0 + $0x430] sm:$0xff] }
  0x7f   :  { %v2168_v0 = vmax.f32 %v742_v6, %v743_v11  ;;  %v757_v15 = vrot.slane %v756_v47, 2  ;;  %v764_v61 = vmax.f32 %v762_v53, %v763_v14  ;;  %v771_v37 = vrot.slane %v770_v16, 4  ;;  %v145_v10 = vld [vmem:[%s3022_s0 + $0x448] sm:$0x1] }
  0x80   :  { %3047 = vst [vmem:[#allocation25_spill] sm:$0xff] %v2166_v56  ;;  %v751_v48 = vrot.slane %v750_v21, 1  ;;  %v778_v45 = vmax.f32 %v136_v57, %v777_v38  ;;  %v786_v54 = vmax.f32 %v138_v12, %v785_v33  ;;  %v793_v6 = vsel %vm264_vm0, %v141_v4, -inf  ;;  %v144_v57 = vld [vmem:[%s3022_s0 + $0x440] sm:$0xff] }
  0x81   :  { %3048 = vst [vmem:[#allocation26_spill] sm:$0xff] %v2168_v0  ;;  %v758_v28 = vmax.f32 %v756_v47, %v757_v15  ;;  %v765_v44 = vrot.slane %v764_v61, 2  ;;  %v801_v53 = vsel %vm264_vm0, %v143_v62, -inf  ;;  %v772_v11 = vmax.f32 %v770_v16, %v771_v37  ;;  %v147_v47 = vld [vmem:[%s3022_s0 + $0x458] sm:$0x1] }
  0x82   :  { %v2181_v49 = vmax.f32 %v750_v21, %v751_v48  ;;  %v779_v14 = vrot.slane %v778_v45, 4  ;;  %v787_v0 = vrot.slane %v786_v54, 4  ;;  %v794_v33 = vmax.f32 %v140_v3, %v793_v6  ;;  %v149_v3 = vld [vmem:[%s3022_s0 + $0x468] sm:$0x1] }
  0x83   :  { %v759_v12 = vrot.slane %v758_v28, 1  ;;  %v766_v38 = vmax.f32 %v764_v61, %v765_v44  ;;  %v802_v56 = vmax.f32 %v142_v40, %v801_v53  ;;  %v773_v4 = vrot.slane %v772_v11, 2  ;;  %v146_v61 = vld [vmem:[%s3022_s0 + $0x450] sm:$0xff]  ;;  %v148_v53 = vld [vmem:[%s3022_s0 + $0x460] sm:$0xff] }
  0x84   :  { %3049 = vst [vmem:[#allocation27_spill] sm:$0xff] %v2181_v49  ;;  %v780_v15 = vmax.f32 %v778_v45, %v779_v14  ;;  %v788_v62 = vmax.f32 %v786_v54, %v787_v0  ;;  %v809_v21 = vsel %vm264_vm0, %v145_v10, -inf  ;;  %v795_v37 = vrot.slane %v794_v33, 4 }
  0x85   :  { %v2190_v16 = vmax.f32 %v758_v28, %v759_v12  ;;  %v767_v48 = vrot.slane %v766_v38, 1  ;;  %v803_v49 = vrot.slane %v802_v56, 4  ;;  %v774_v40 = vmax.f32 %v772_v11, %v773_v4  ;;  %v151_v11 = vld [vmem:[%s3022_s0 + $0x478] sm:$0x1] }
  0x86   :  { %v781_v44 = vrot.slane %v780_v15, 2  ;;  %v789_v6 = vrot.slane %v788_v62, 2  ;;  %v810_v45 = vmax.f32 %v144_v57, %v809_v21  ;;  %v796_v54 = vmax.f32 %v794_v33, %v795_v37 }
  0x87   :  { %3050 = vst [vmem:[#allocation28_spill] sm:$0xff] %v2190_v16  ;;  %v2198_v0 = vmax.f32 %v766_v38, %v767_v48  ;;  %v804_v10 = vmax.f32 %v802_v56, %v803_v49  ;;  %v817_v28 = vsel %vm264_vm0, %v147_v47, -inf  ;;  %v775_v14 = vrot.slane %v774_v40, 1  ;;  %v155_v48 = vld [vmem:[%s3022_s0 + $0x498] sm:$0x1] }
  0x88   :  { %v782_v12 = vmax.f32 %v780_v15, %v781_v44  ;;  %v790_v16 = vmax.f32 %v788_v62, %v789_v6  ;;  %v811_v46 = vrot.slane %v810_v45, 4  ;;  %v797_v4 = vrot.slane %v796_v54, 2  ;;  %v150_v15 = vld [vmem:[%s3022_s0 + $0x470] sm:$0xff]  ;;  %v153_v62 = vld [vmem:[%s3022_s0 + $0x488] sm:$0x1] }
  0x89   :  { %3051 = vst [vmem:[#allocation29_spill] sm:$0xff] %v2198_v0  ;;  %v805_v57 = vrot.slane %v804_v10, 2  ;;  %v818_v38 = vmax.f32 %v146_v61, %v817_v28  ;;  %v825_v33 = vsel %vm264_vm0, %v149_v3, -inf  ;;  %v2208_v56 = vmax.f32 %v774_v40, %v775_v14  ;;  %v152_v28 = vld [vmem:[%s3022_s0 + $0x480] sm:$0xff]  ;;  %v154_v14 = vld [vmem:[%s3022_s0 + $0x490] sm:$0xff] }
  0x8a   :  { %v783_v49 = vrot.slane %v782_v12, 1  ;;  %v791_v47 = vrot.slane %v790_v16, 1  ;;  %v812_v21 = vmax.f32 %v810_v45, %v811_v46  ;;  %v798_v37 = vmax.f32 %v796_v54, %v797_v4  ;;  %v156_v0 = vld [vmem:[%s3022_s0 + $0x4a0] sm:$0xff] }
  0x8b   :  { %3052 = vst [vmem:[#allocation30_spill] sm:$0xff] %v2208_v56  ;;  %v806_v61 = vmax.f32 %v804_v10, %v805_v57  ;;  %v819_v3 = vrot.slane %v818_v38, 4  ;;  %v826_v40 = vmax.f32 %v148_v53, %v825_v33  ;;  %v833_v45 = vsel %vm264_vm0, %v151_v11, -inf  ;;  %v159_v53 = vld [vmem:[%s3022_s0 + $0x4b8] sm:$0x1] }
  0x8c   :  { %v2219_v44 = vmax.f32 %v782_v12, %v783_v49  ;;  %v2221_v6 = vmax.f32 %v790_v16, %v791_v47  ;;  %v813_v46 = vrot.slane %v812_v21, 2  ;;  %v799_v56 = vrot.slane %v798_v37, 1  ;;  %v157_v16 = vld [vmem:[%s3022_s0 + $0x4a8] sm:$0x1] }
  0x8d   :  { %v807_v54 = vrot.slane %v806_v61, 1  ;;  %v820_v10 = vmax.f32 %v818_v38, %v819_v3  ;;  %v827_v4 = vrot.slane %v826_v40, 4  ;;  %v834_v11 = vmax.f32 %v150_v15, %v833_v45 }
  0x8e   :  { %3053 = vst [vmem:[#allocation31_spill] sm:$0xff] %v2219_v44  ;;  %3054 = vst [vmem:[#allocation32_spill] sm:$0xff] %v2221_v6  ;;  %v814_v12 = vmax.f32 %v812_v21, %v813_v46  ;;  %v841_v57 = vsel %vm264_vm0, %v153_v62, -inf  ;;  %v849_v33 = vsel %vm264_vm0, %v155_v48, -inf  ;;  %v2238_v49 = vmax.f32 %v798_v37, %v799_v56  ;;  %v158_v6 = vld [vmem:[%s3022_s0 + $0x4b0] sm:$0xff] }
  0x8f   :  { %v2240_v47 = vmax.f32 %v806_v61, %v807_v54  ;;  %v821_v38 = vrot.slane %v820_v10, 2  ;;  %v828_v3 = vmax.f32 %v826_v40, %v827_v4  ;;  %v835_v15 = vrot.slane %v834_v11, 4  ;;  %v161_v56 = vld [vmem:[%s3022_s0 + $0x4c8] sm:$0x1] }
  0x90   :  { %3055 = vst [vmem:[#allocation33_spill] sm:$0xff] %v2238_v49  ;;  %v815_v21 = vrot.slane %v814_v12, 1  ;;  %v842_v46 = vmax.f32 %v152_v28, %v841_v57  ;;  %v850_v62 = vmax.f32 %v154_v14, %v849_v33  ;;  %v857_v61 = vsel %vm264_vm0, %v157_v16, -inf  ;;  %v160_v28 = vld [vmem:[%s3022_s0 + $0x4c0] sm:$0xff] }
  0x91   :  { %3056 = vst [vmem:[#allocation34_spill] sm:$0xff] %v2240_v47  ;;  %v822_v48 = vmax.f32 %v820_v10, %v821_v38  ;;  %v829_v37 = vrot.slane %v828_v3, 2  ;;  %v865_v40 = vsel %vm264_vm0, %v159_v53, -inf  ;;  %v836_v54 = vmax.f32 %v834_v11, %v835_v15  ;;  %v163_v10 = vld [vmem:[%s3022_s0 + $0x4d8] sm:$0x1] }
  0x92   :  { %v2253_v45 = vmax.f32 %v814_v12, %v815_v21  ;;  %v843_v4 = vrot.slane %v842_v46, 4  ;;  %v851_v47 = vrot.slane %v850_v62, 4  ;;  %v858_v33 = vmax.f32 %v156_v0, %v857_v61  ;;  %v165_v0 = vld [vmem:[%s3022_s0 + $0x4e8] sm:$0x1] }
  0x93   :  { %v823_v14 = vrot.slane %v822_v48, 1  ;;  %v830_v57 = vmax.f32 %v828_v3, %v829_v37  ;;  %v866_v49 = vmax.f32 %v158_v6, %v865_v40  ;;  %v837_v16 = vrot.slane %v836_v54, 2  ;;  %v162_v3 = vld [vmem:[%s3022_s0 + $0x4d0] sm:$0xff]  ;;  %v164_v40 = vld [vmem:[%s3022_s0 + $0x4e0] sm:$0xff] }
  0x94   :  { %3057 = vst [vmem:[#allocation35_spill] sm:$0xff] %v2253_v45  ;;  %v844_v38 = vmax.f32 %v842_v46, %v843_v4  ;;  %v852_v53 = vmax.f32 %v850_v62, %v851_v47  ;;  %v873_v12 = vsel %vm264_vm0, %v161_v56, -inf  ;;  %v859_v15 = vrot.slane %v858_v33, 4 }
  0x95   :  { %v2262_v11 = vmax.f32 %v822_v48, %v823_v14  ;;  %v831_v21 = vrot.slane %v830_v57, 1  ;;  %v867_v45 = vrot.slane %v866_v49, 4  ;;  %v838_v6 = vmax.f32 %v836_v54, %v837_v16  ;;  %v167_v54 = vld [vmem:[%s3022_s0 + $0x4f8] sm:$0x1] }
  0x96   :  { %v845_v37 = vrot.slane %v844_v38, 2  ;;  %v853_v61 = vrot.slane %v852_v53, 2  ;;  %v874_v46 = vmax.f32 %v160_v28, %v873_v12  ;;  %v860_v62 = vmax.f32 %v858_v33, %v859_v15 }
  0x97   :  { %3058 = vst [vmem:[#allocation36_spill] sm:$0xff] %v2262_v11  ;;  %v2270_v47 = vmax.f32 %v830_v57, %v831_v21  ;;  %v868_v56 = vmax.f32 %v866_v49, %v867_v45  ;;  %v881_v48 = vsel %vm264_vm0, %v163_v10, -inf  ;;  %v839_v4 = vrot.slane %v838_v6, 1  ;;  %v171_v21 = vld [vmem:[%s3022_s0 + $0x518] sm:$0x1] }
  0x98   :  { %v846_v14 = vmax.f32 %v844_v38, %v845_v37  ;;  %v854_v11 = vmax.f32 %v852_v53, %v853_v61  ;;  %v875_v44 = vrot.slane %v874_v46, 4  ;;  %v861_v16 = vrot.slane %v860_v62, 2  ;;  %v166_v38 = vld [vmem:[%s3022_s0 + $0x4f0] sm:$0xff]  ;;  %v169_v53 = vld [vmem:[%s3022_s0 + $0x508] sm:$0x1] }
  0x99   :  { %3059 = vst [vmem:[#allocation37_spill] sm:$0xff] %v2270_v47  ;;  %v869_v28 = vrot.slane %v868_v56, 2  ;;  %v882_v57 = vmax.f32 %v162_v3, %v881_v48  ;;  %v889_v33 = vsel %vm264_vm0, %v165_v0, -inf  ;;  %v2280_v49 = vmax.f32 %v838_v6, %v839_v4  ;;  %v168_v48 = vld [vmem:[%s3022_s0 + $0x500] sm:$0xff]  ;;  %v170_v4 = vld [vmem:[%s3022_s0 + $0x510] sm:$0xff] }
  0x9a   :  { %v847_v45 = vrot.slane %v846_v14, 1  ;;  %v855_v10 = vrot.slane %v854_v11, 1  ;;  %v876_v12 = vmax.f32 %v874_v46, %v875_v44  ;;  %v862_v15 = vmax.f32 %v860_v62, %v861_v16  ;;  %v172_v47 = vld [vmem:[%s3022_s0 + $0x520] sm:$0xff] }
  0x9b   :  { %3060 = vst [vmem:[#allocation38_spill] sm:$0xff] %v2280_v49  ;;  %v870_v3 = vmax.f32 %v868_v56, %v869_v28  ;;  %v883_v0 = vrot.slane %v882_v57, 4  ;;  %v890_v6 = vmax.f32 %v164_v40, %v889_v33  ;;  %v897_v46 = vsel %vm264_vm0, %v167_v54, -inf  ;;  %v175_v40 = vld [vmem:[%s3022_s0 + $0x538] sm:$0x1] }
  0x9c   :  { %v2291_v37 = vmax.f32 %v846_v14, %v847_v45  ;;  %v2293_v61 = vmax.f32 %v854_v11, %v855_v10  ;;  %v877_v44 = vrot.slane %v876_v12, 2  ;;  %v863_v49 = vrot.slane %v862_v15, 1  ;;  %v173_v11 = vld [vmem:[%s3022_s0 + $0x528] sm:$0x1] }
  0x9d   :  { %v871_v62 = vrot.slane %v870_v3, 1  ;;  %v884_v56 = vmax.f32 %v882_v57, %v883_v0  ;;  %v891_v16 = vrot.slane %v890_v6, 4  ;;  %v898_v54 = vmax.f32 %v166_v38, %v897_v46 }
  0x9e   :  { %3061 = vst [vmem:[#allocation39_spill] sm:$0xff] %v2291_v37  ;;  %3062 = vst [vmem:[#allocation40_spill] sm:$0xff] %v2293_v61  ;;  %v878_v14 = vmax.f32 %v876_v12, %v877_v44  ;;  %v905_v28 = vsel %vm264_vm0, %v169_v53, -inf  ;;  %v913_v33 = vsel %vm264_vm0, %v171_v21, -inf  ;;  %v2310_v45 = vmax.f32 %v862_v15, %v863_v49  ;;  %v174_v61 = vld [vmem:[%s3022_s0 + $0x530] sm:$0xff] }
  0x9f   :  { %v2312_v10 = vmax.f32 %v870_v3, %v871_v62  ;;  %v885_v57 = vrot.slane %v884_v56, 2  ;;  %v892_v0 = vmax.f32 %v890_v6, %v891_v16  ;;  %v899_v38 = vrot.slane %v898_v54, 4  ;;  %v177_v49 = vld [vmem:[%s3022_s0 + $0x548] sm:$0x1] }
  0xa0   :  { %3063 = vst [vmem:[#allocation41_spill] sm:$0xff] %v2310_v45  ;;  %v879_v12 = vrot.slane %v878_v14, 1  ;;  %v906_v44 = vmax.f32 %v168_v48, %v905_v28  ;;  %v914_v53 = vmax.f32 %v170_v4, %v913_v33  ;;  %v921_v3 = vsel %vm264_vm0, %v173_v11, -inf  ;;  %v176_v48 = vld [vmem:[%s3022_s0 + $0x540] sm:$0xff] }
  0xa1   :  { %3064 = vst [vmem:[#allocation42_spill] sm:$0xff] %v2312_v10  ;;  %v886_v21 = vmax.f32 %v884_v56, %v885_v57  ;;  %v893_v15 = vrot.slane %v892_v0, 2  ;;  %v929_v6 = vsel %vm264_vm0, %v175_v40, -inf  ;;  %v900_v62 = vmax.f32 %v898_v54, %v899_v38  ;;  %v179_v56 = vld [vmem:[%s3022_s0 + $0x558] sm:$0x1] }
  0xa2   :  { %v2325_v46 = vmax.f32 %v878_v14, %v879_v12  ;;  %v907_v16 = vrot.slane %v906_v44, 4  ;;  %v915_v10 = vrot.slane %v914_v53, 4  ;;  %v922_v33 = vmax.f32 %v172_v47, %v921_v3  ;;  %v181_v47 = vld [vmem:[%s3022_s0 + $0x568] sm:$0x1] }
  0xa3   :  { %v887_v4 = vrot.slane %v886_v21, 1  ;;  %v894_v28 = vmax.f32 %v892_v0, %v893_v15  ;;  %v930_v45 = vmax.f32 %v174_v61, %v929_v6  ;;  %v901_v11 = vrot.slane %v900_v62, 2  ;;  %v178_v0 = vld [vmem:[%s3022_s0 + $0x550] sm:$0xff]  ;;  %v180_v6 = vld [vmem:[%s3022_s0 + $0x560] sm:$0xff] }
  0xa4   :  { %3065 = vst [vmem:[#allocation43_spill] sm:$0xff] %v2325_v46  ;;  %v908_v57 = vmax.f32 %v906_v44, %v907_v16  ;;  %v916_v40 = vmax.f32 %v914_v53, %v915_v10  ;;  %v937_v14 = vsel %vm264_vm0, %v177_v49, -inf  ;;  %v923_v38 = vrot.slane %v922_v33, 4 }
  0xa5   :  { %v2334_v54 = vmax.f32 %v886_v21, %v887_v4  ;;  %v895_v12 = vrot.slane %v894_v28, 1  ;;  %v931_v46 = vrot.slane %v930_v45, 4  ;;  %v902_v61 = vmax.f32 %v900_v62, %v901_v11  ;;  %v183_v62 = vld [vmem:[%s3022_s0 + $0x578] sm:$0x1] }
  0xa6   :  { %v909_v15 = vrot.slane %v908_v57, 2  ;;  %v917_v3 = vrot.slane %v916_v40, 2  ;;  %v938_v44 = vmax.f32 %v176_v48, %v937_v14  ;;  %v924_v53 = vmax.f32 %v922_v33, %v923_v38 }
  0xa7   :  { %3066 = vst [vmem:[#allocation44_spill] sm:$0xff] %v2334_v54  ;;  %v2342_v10 = vmax.f32 %v894_v28, %v895_v12  ;;  %v932_v49 = vmax.f32 %v930_v45, %v931_v46  ;;  %v945_v21 = vsel %vm264_vm0, %v179_v56, -inf  ;;  %v903_v16 = vrot.slane %v902_v61, 1  ;;  %v187_v12 = vld [vmem:[%s3022_s0 + $0x598] sm:$0x1] }
  0xa8   :  { %v910_v4 = vmax.f32 %v908_v57, %v909_v15  ;;  %v918_v54 = vmax.f32 %v916_v40, %v917_v3  ;;  %v939_v37 = vrot.slane %v938_v44, 4  ;;  %v925_v11 = vrot.slane %v924_v53, 2  ;;  %v182_v57 = vld [vmem:[%s3022_s0 + $0x570] sm:$0xff]  ;;  %v185_v40 = vld [vmem:[%s3022_s0 + $0x588] sm:$0x1] }
  0xa9   :  { %3067 = vst [vmem:[#allocation45_spill] sm:$0xff] %v2342_v10  ;;  %v933_v48 = vrot.slane %v932_v49, 2  ;;  %v946_v28 = vmax.f32 %v178_v0, %v945_v21  ;;  %v953_v33 = vsel %vm264_vm0, %v181_v47, -inf  ;;  %v2352_v45 = vmax.f32 %v902_v61, %v903_v16  ;;  %v184_v21 = vld [vmem:[%s3022_s0 + $0x580] sm:$0xff]  ;;  %v186_v16 = vld [vmem:[%s3022_s0 + $0x590] sm:$0xff] }
  0xaa   :  { %v911_v46 = vrot.slane %v910_v4, 1  ;;  %v919_v56 = vrot.slane %v918_v54, 1  ;;  %v940_v14 = vmax.f32 %v938_v44, %v939_v37  ;;  %v926_v38 = vmax.f32 %v924_v53, %v925_v11  ;;  %v188_v10 = vld [vmem:[%s3022_s0 + $0x5a0] sm:$0xff] }
  0xab   :  { %3068 = vst [vmem:[#allocation46_spill] sm:$0xff] %v2352_v45  ;;  %v934_v0 = vmax.f32 %v932_v49, %v933_v48  ;;  %v947_v47 = vrot.slane %v946_v28, 4  ;;  %v954_v61 = vmax.f32 %v180_v6, %v953_v33  ;;  %v961_v44 = vsel %vm264_vm0, %v183_v62, -inf  ;;  %v191_v6 = vld [vmem:[%s3022_s0 + $0x5b8] sm:$0x1] }
  0xac   :  { %v2363_v15 = vmax.f32 %v910_v4, %v911_v46  ;;  %v2365_v3 = vmax.f32 %v918_v54, %v919_v56  ;;  %v941_v37 = vrot.slane %v940_v14, 2  ;;  %v927_v45 = vrot.slane %v926_v38, 1  ;;  %v189_v54 = vld [vmem:[%s3022_s0 + $0x5a8] sm:$0x1] }
  0xad   :  { %v935_v53 = vrot.slane %v934_v0, 1  ;;  %v948_v49 = vmax.f32 %v946_v28, %v947_v47  ;;  %v955_v11 = vrot.slane %v954_v61, 4  ;;  %v962_v62 = vmax.f32 %v182_v57, %v961_v44 }
  0xae   :  { %3069 = vst [vmem:[#allocation47_spill] sm:$0xff] %v2363_v15  ;;  %3070 = vst [vmem:[#allocation48_spill] sm:$0xff] %v2365_v3  ;;  %v942_v4 = vmax.f32 %v940_v14, %v941_v37  ;;  %v969_v48 = vsel %vm264_vm0, %v185_v40, -inf  ;;  %v977_v33 = vsel %vm264_vm0, %v187_v12, -inf  ;;  %v2382_v46 = vmax.f32 %v926_v38, %v927_v45  ;;  %v190_v3 = vld [vmem:[%s3022_s0 + $0x5b0] sm:$0xff] }
  0xaf   :  { %v2384_v56 = vmax.f32 %v934_v0, %v935_v53  ;;  %v949_v28 = vrot.slane %v948_v49, 2  ;;  %v956_v47 = vmax.f32 %v954_v61, %v955_v11  ;;  %v963_v57 = vrot.slane %v962_v62, 4  ;;  %v193_v45 = vld [vmem:[%s3022_s0 + $0x5c8] sm:$0x1] }
  0xb0   :  { %3071 = vst [vmem:[#allocation49_spill] sm:$0xff] %v2382_v46  ;;  %v943_v14 = vrot.slane %v942_v4, 1  ;;  %v970_v37 = vmax.f32 %v184_v21, %v969_v48  ;;  %v978_v40 = vmax.f32 %v186_v16, %v977_v33  ;;  %v985_v0 = vsel %vm264_vm0, %v189_v54, -inf  ;;  %v192_v21 = vld [vmem:[%s3022_s0 + $0x5c0] sm:$0xff] }
  0xb1   :  { %3072 = vst [vmem:[#allocation50_spill] sm:$0xff] %v2384_v56  ;;  %v950_v12 = vmax.f32 %v948_v49, %v949_v28  ;;  %v957_v38 = vrot.slane %v956_v47, 2  ;;  %v993_v61 = vsel %vm264_vm0, %v191_v6, -inf  ;;  %v964_v53 = vmax.f32 %v962_v62, %v963_v57  ;;  %v195_v49 = vld [vmem:[%s3022_s0 + $0x5d8] sm:$0x1] }
  0xb2   :  { %v2397_v44 = vmax.f32 %v942_v4, %v943_v14  ;;  %v971_v11 = vrot.slane %v970_v37, 4  ;;  %v979_v56 = vrot.slane %v978_v40, 4  ;;  %v986_v33 = vmax.f32 %v188_v10, %v985_v0  ;;  %v197_v10 = vld [vmem:[%s3022_s0 + $0x5e8] sm:$0x1] }
  0xb3   :  { %v951_v16 = vrot.slane %v950_v12, 1  ;;  %v958_v48 = vmax.f32 %v956_v47, %v957_v38  ;;  %v994_v46 = vmax.f32 %v190_v3, %v993_v61  ;;  %v965_v54 = vrot.slane %v964_v53, 2  ;;  %v194_v47 = vld [vmem:[%s3022_s0 + $0x5d0] sm:$0xff]  ;;  %v196_v61 = vld [vmem:[%s3022_s0 + $0x5e0] sm:$0xff] }
  0xb4   :  { %3073 = vst [vmem:[#allocation51_spill] sm:$0xff] %v2397_v44  ;;  %v972_v28 = vmax.f32 %v970_v37, %v971_v11  ;;  %v980_v6 = vmax.f32 %v978_v40, %v979_v56  ;;  %v1001_v4 = vsel %vm264_vm0, %v193_v45, -inf  ;;  %v987_v57 = vrot.slane %v986_v33, 4 }
  0xb5   :  { %v2406_v62 = vmax.f32 %v950_v12, %v951_v16  ;;  %v959_v14 = vrot.slane %v958_v48, 1  ;;  %v995_v44 = vrot.slane %v994_v46, 4  ;;  %v966_v3 = vmax.f32 %v964_v53, %v965_v54  ;;  %v199_v53 = vld [vmem:[%s3022_s0 + $0x5f8] sm:$0x1] }
  0xb6   :  { %v973_v38 = vrot.slane %v972_v28, 2  ;;  %v981_v0 = vrot.slane %v980_v6, 2  ;;  %v1002_v37 = vmax.f32 %v192_v21, %v1001_v4  ;;  %v988_v40 = vmax.f32 %v986_v33, %v987_v57 }
  0xb7   :  { %3074 = vst [vmem:[#allocation52_spill] sm:$0xff] %v2406_v62  ;;  %v2414_v56 = vmax.f32 %v958_v48, %v959_v14  ;;  %v996_v45 = vmax.f32 %v994_v46, %v995_v44  ;;  %v1009_v12 = vsel %vm264_vm0, %v195_v49, -inf  ;;  %v967_v11 = vrot.slane %v966_v3, 1  ;;  %v203_v14 = vld [vmem:[%s3022_s0 + $0x618] sm:$0x1] }
  0xb8   :  { %v974_v16 = vmax.f32 %v972_v28, %v973_v38  ;;  %v982_v62 = vmax.f32 %v980_v6, %v981_v0  ;;  %v1003_v15 = vrot.slane %v1002_v37, 4  ;;  %v989_v54 = vrot.slane %v988_v40, 2  ;;  %v198_v28 = vld [vmem:[%s3022_s0 + $0x5f0] sm:$0xff]  ;;  %v201_v6 = vld [vmem:[%s3022_s0 + $0x608] sm:$0x1] }
  0xb9   :  { %3075 = vst [vmem:[#allocation53_spill] sm:$0xff] %v2414_v56  ;;  %v997_v21 = vrot.slane %v996_v45, 2  ;;  %v1010_v48 = vmax.f32 %v194_v47, %v1009_v12  ;;  %v1017_v33 = vsel %vm264_vm0, %v197_v10, -inf  ;;  %v2424_v46 = vmax.f32 %v966_v3, %v967_v11  ;;  %v200_v12 = vld [vmem:[%s3022_s0 + $0x600] sm:$0xff]  ;;  %v202_v11 = vld [vmem:[%s3022_s0 + $0x610] sm:$0xff] }
  0xba   :  { %v975_v44 = vrot.slane %v974_v16, 1  ;;  %v983_v49 = vrot.slane %v982_v62, 1  ;;  %v1004_v4 = vmax.f32 %v1002_v37, %v1003_v15  ;;  %v990_v57 = vmax.f32 %v988_v40, %v989_v54  ;;  %v204_v56 = vld [vmem:[%s3022_s0 + $0x620] sm:$0xff] }
  0xbb   :  { %3076 = vst [vmem:[#allocation54_spill] sm:$0xff] %v2424_v46  ;;  %v998_v47 = vmax.f32 %v996_v45, %v997_v21  ;;  %v1011_v10 = vrot.slane %v1010_v48, 4  ;;  %v1018_v3 = vmax.f32 %v196_v61, %v1017_v33  ;;  %v1025_v37 = vsel %vm264_vm0, %v199_v53, -inf  ;;  %v207_v61 = vld [vmem:[%s3022_s0 + $0x638] sm:$0x1] }
  0xbc   :  { %v2435_v38 = vmax.f32 %v974_v16, %v975_v44  ;;  %v2437_v0 = vmax.f32 %v982_v62, %v983_v49  ;;  %v1005_v15 = vrot.slane %v1004_v4, 2  ;;  %v991_v46 = vrot.slane %v990_v57, 1  ;;  %v205_v62 = vld [vmem:[%s3022_s0 + $0x628] sm:$0x1] }
  0xbd   :  { %v999_v40 = vrot.slane %v998_v47, 1  ;;  %v1012_v45 = vmax.f32 %v1010_v48, %v1011_v10  ;;  %v1019_v54 = vrot.slane %v1018_v3, 4  ;;  %v1026_v53 = vmax.f32 %v198_v28, %v1025_v37 }
  0xbe   :  { %3077 = vst [vmem:[#allocation55_spill] sm:$0xff] %v2435_v38  ;;  %3078 = vst [vmem:[#allocation56_spill] sm:$0xff] %v2437_v0  ;;  %v1006_v16 = vmax.f32 %v1004_v4, %v1005_v15  ;;  %v1033_v21 = vsel %vm264_vm0, %v201_v6, -inf  ;;  %v1041_v33 = vsel %vm264_vm0, %v203_v14, -inf  ;;  %v2454_v44 = vmax.f32 %v990_v57, %v991_v46  ;;  %v206_v0 = vld [vmem:[%s3022_s0 + $0x630] sm:$0xff] }
  0xbf   :  { %v2456_v49 = vmax.f32 %v998_v47, %v999_v40  ;;  %v1013_v48 = vrot.slane %v1012_v45, 2  ;;  %v1020_v10 = vmax.f32 %v1018_v3, %v1019_v54  ;;  %v1027_v28 = vrot.slane %v1026_v53, 4  ;;  %v209_v46 = vld [vmem:[%s3022_s0 + $0x648] sm:$0x1] }
  0xc0   :  { %3079 = vst [vmem:[#allocation57_spill] sm:$0xff] %v2454_v44  ;;  %v1007_v4 = vrot.slane %v1006_v16, 1  ;;  %v1034_v15 = vmax.f32 %v200_v12, %v1033_v21  ;;  %v1042_v6 = vmax.f32 %v202_v11, %v1041_v33  ;;  %v1049_v47 = vsel %vm264_vm0, %v205_v62, -inf  ;;  %v208_v12 = vld [vmem:[%s3022_s0 + $0x640] sm:$0xff] }
  0xc1   :  { %3080 = vst [vmem:[#allocation58_spill] sm:$0xff] %v2456_v49  ;;  %v1014_v14 = vmax.f32 %v1012_v45, %v1013_v48  ;;  %v1021_v57 = vrot.slane %v1020_v10, 2  ;;  %v1057_v3 = vsel %vm264_vm0, %v207_v61, -inf  ;;  %v1028_v40 = vmax.f32 %v1026_v53, %v1027_v28  ;;  %v211_v45 = vld [vmem:[%s3022_s0 + $0x658] sm:$0x1] }
  0xc2   :  { %v2469_v37 = vmax.f32 %v1006_v16, %v1007_v4  ;;  %v1035_v54 = vrot.slane %v1034_v15, 4  ;;  %v1043_v49 = vrot.slane %v1042_v6, 4  ;;  %v1050_v33 = vmax.f32 %v204_v56, %v1049_v47  ;;  %v213_v56 = vld [vmem:[%s3022_s0 + $0x668] sm:$0x1] }
  0xc3   :  { %v1015_v11 = vrot.slane %v1014_v14, 1  ;;  %v1022_v21 = vmax.f32 %v1020_v10, %v1021_v57  ;;  %v1058_v44 = vmax.f32 %v206_v0, %v1057_v3  ;;  %v1029_v62 = vrot.slane %v1028_v40, 2  ;;  %v210_v10 = vld [vmem:[%s3022_s0 + $0x650] sm:$0xff]  ;;  %v212_v3 = vld [vmem:[%s3022_s0 + $0x660] sm:$0xff] }
  0xc4   :  { %3081 = vst [vmem:[#allocation59_spill] sm:$0xff] %v2469_v37  ;;  %v1036_v48 = vmax.f32 %v1034_v15, %v1035_v54  ;;  %v1044_v61 = vmax.f32 %v1042_v6, %v1043_v49  ;;  %v1065_v16 = vsel %vm264_vm0, %v209_v46, -inf  ;;  %v1051_v28 = vrot.slane %v1050_v33, 4 }
  0xc5   :  { %v2478_v53 = vmax.f32 %v1014_v14, %v1015_v11  ;;  %v1023_v4 = vrot.slane %v1022_v21, 1  ;;  %v1059_v37 = vrot.slane %v1058_v44, 4  ;;  %v1030_v0 = vmax.f32 %v1028_v40, %v1029_v62  ;;  %v215_v40 = vld [vmem:[%s3022_s0 + $0x678] sm:$0x1] }
  0xc6   :  { %v1037_v57 = vrot.slane %v1036_v48, 2  ;;  %v1045_v47 = vrot.slane %v1044_v61, 2  ;;  %v1066_v15 = vmax.f32 %v208_v12, %v1065_v16  ;;  %v1052_v6 = vmax.f32 %v1050_v33, %v1051_v28 }
  0xc7   :  { %3082 = vst [vmem:[#allocation60_spill] sm:$0xff] %v2478_v53  ;;  %v2486_v49 = vmax.f32 %v1022_v21, %v1023_v4  ;;  %v1060_v46 = vmax.f32 %v1058_v44, %v1059_v37  ;;  %v1073_v14 = vsel %vm264_vm0, %v211_v45, -inf  ;;  %v1031_v54 = vrot.slane %v1030_v0, 1  ;;  %v219_v4 = vld [vmem:[%s3022_s0 + $0x698] sm:$0x1] }
  0xc8   :  { %v1038_v11 = vmax.f32 %v1036_v48, %v1037_v57  ;;  %v1046_v53 = vmax.f32 %v1044_v61, %v1045_v47  ;;  %v1067_v38 = vrot.slane %v1066_v15, 4  ;;  %v1053_v62 = vrot.slane %v1052_v6, 2  ;;  %v214_v48 = vld [vmem:[%s3022_s0 + $0x670] sm:$0xff]  ;;  %v217_v61 = vld [vmem:[%s3022_s0 + $0x688] sm:$0x1] }
  0xc9   :  { %3083 = vst [vmem:[#allocation61_spill] sm:$0xff] %v2486_v49  ;;  %v1061_v12 = vrot.slane %v1060_v46, 2  ;;  %v1074_v21 = vmax.f32 %v210_v10, %v1073_v14  ;;  %v1081_v33 = vsel %vm264_vm0, %v213_v56, -inf  ;;  %v2496_v44 = vmax.f32 %v1030_v0, %v1031_v54  ;;  %v216_v14 = vld [vmem:[%s3022_s0 + $0x680] sm:$0xff]  ;;  %v218_v54 = vld [vmem:[%s3022_s0 + $0x690] sm:$0xff] }
  0xca   :  { %v1039_v37 = vrot.slane %v1038_v11, 1  ;;  %v1047_v45 = vrot.slane %v1046_v53, 1  ;;  %v1068_v16 = vmax.f32 %v1066_v15, %v1067_v38  ;;  %v1054_v28 = vmax.f32 %v1052_v6, %v1053_v62  ;;  %v220_v49 = vld [vmem:[%s3022_s0 + $0x6a0] sm:$0xff] }
  0xcb   :  { %3084 = vst [vmem:[#allocation62_spill] sm:$0xff] %v2496_v44  ;;  %v1062_v10 = vmax.f32 %v1060_v46, %v1061_v12  ;;  %v1075_v56 = vrot.slane %v1074_v21, 4  ;;  %v1082_v0 = vmax.f32 %v212_v3, %v1081_v33  ;;  %v1089_v15 = vsel %vm264_vm0, %v215_v40, -inf  ;;  %v223_v3 = vld [vmem:[%s3022_s0 + $0x6b8] sm:$0x1] }
  0xcc   :  { %v2507_v57 = vmax.f32 %v1038_v11, %v1039_v37  ;;  %v2509_v47 = vmax.f32 %v1046_v53, %v1047_v45  ;;  %v1069_v38 = vrot.slane %v1068_v16, 2  ;;  %v1055_v44 = vrot.slane %v1054_v28, 1  ;;  %v221_v53 = vld [vmem:[%s3022_s0 + $0x6a8] sm:$0x1] }
  0xcd   :  { %v1063_v6 = vrot.slane %v1062_v10, 1  ;;  %v1076_v46 = vmax.f32 %v1074_v21, %v1075_v56  ;;  %v1083_v62 = vrot.slane %v1082_v0, 4  ;;  %v1090_v40 = vmax.f32 %v214_v48, %v1089_v15 }
  0xce   :  { %3085 = vst [vmem:[#allocation63_spill] sm:$0xff] %v2507_v57  ;;  %3086 = vst [vmem:[#allocation64_spill] sm:$0xff] %v2509_v47  ;;  %v1070_v11 = vmax.f32 %v1068_v16, %v1069_v38  ;;  %v1097_v12 = vsel %vm264_vm0, %v217_v61, -inf  ;;  %v1105_v33 = vsel %vm264_vm0, %v219_v4, -inf  ;;  %v2526_v37 = vmax.f32 %v1054_v28, %v1055_v44  ;;  %v222_v47 = vld [vmem:[%s3022_s0 + $0x6b0] sm:$0xff] }
  0xcf   :  { %v2528_v45 = vmax.f32 %v1062_v10, %v1063_v6  ;;  %v1077_v21 = vrot.slane %v1076_v46, 2  ;;  %v1084_v56 = vmax.f32 %v1082_v0, %v1083_v62  ;;  %v1091_v48 = vrot.slane %v1090_v40, 4  ;;  %v225_v44 = vld [vmem:[%s3022_s0 + $0x6c8] sm:$0x1] }
  0xd0   :  { %3087 = vst [vmem:[#allocation65_spill] sm:$0xff] %v2526_v37  ;;  %v1071_v16 = vrot.slane %v1070_v11, 1  ;;  %v1098_v38 = vmax.f32 %v216_v14, %v1097_v12  ;;  %v1106_v61 = vmax.f32 %v218_v54, %v1105_v33  ;;  %v1113_v10 = vsel %vm264_vm0, %v221_v53, -inf  ;;  %v224_v14 = vld [vmem:[%s3022_s0 + $0x6c0] sm:$0xff] }
  0xd1   :  { %3088 = vst [vmem:[#allocation66_spill] sm:$0xff] %v2528_v45  ;;  %v1078_v4 = vmax.f32 %v1076_v46, %v1077_v21  ;;  %v1085_v28 = vrot.slane %v1084_v56, 2  ;;  %v1121_v0 = vsel %vm264_vm0, %v223_v3, -inf  ;;  %v1092_v6 = vmax.f32 %v1090_v40, %v1091_v48  ;;  %v227_v46 = vld [vmem:[%s3022_s0 + $0x6d8] sm:$0x1] }
  0xd2   :  { %v2541_v15 = vmax.f32 %v1070_v11, %v1071_v16  ;;  %v1099_v62 = vrot.slane %v1098_v38, 4  ;;  %v1107_v45 = vrot.slane %v1106_v61, 4  ;;  %v1114_v33 = vmax.f32 %v220_v49, %v1113_v10  ;;  %v229_v49 = vld [vmem:[%s3022_s0 + $0x6e8] sm:$0x1] }
  0xd3   :  { %v1079_v54 = vrot.slane %v1078_v4, 1  ;;  %v1086_v12 = vmax.f32 %v1084_v56, %v1085_v28  ;;  %v1122_v37 = vmax.f32 %v222_v47, %v1121_v0  ;;  %v1093_v53 = vrot.slane %v1092_v6, 2  ;;  %v226_v56 = vld [vmem:[%s3022_s0 + $0x6d0] sm:$0xff]  ;;  %v228_v0 = vld [vmem:[%s3022_s0 + $0x6e0] sm:$0xff] }
  0xd4   :  { %3089 = vst [vmem:[#allocation67_spill] sm:$0xff] %v2541_v15  ;;  %v1100_v21 = vmax.f32 %v1098_v38, %v1099_v62  ;;  %v1108_v3 = vmax.f32 %v1106_v61, %v1107_v45  ;;  %v1129_v11 = vsel %vm264_vm0, %v225_v44, -inf  ;;  %v1115_v48 = vrot.slane %v1114_v33, 4 }
  0xd5   :  { %v2550_v40 = vmax.f32 %v1078_v4, %v1079_v54  ;;  %v1087_v16 = vrot.slane %v1086_v12, 1  ;;  %v1123_v15 = vrot.slane %v1122_v37, 4  ;;  %v1094_v47 = vmax.f32 %v1092_v6, %v1093_v53  ;;  %v231_v6 = vld [vmem:[%s3022_s0 + $0x6f8] sm:$0x1] }
  0xd6   :  { %v1101_v28 = vrot.slane %v1100_v21, 2  ;;  %v1109_v10 = vrot.slane %v1108_v3, 2  ;;  %v1130_v38 = vmax.f32 %v224_v14, %v1129_v11  ;;  %v1116_v61 = vmax.f32 %v1114_v33, %v1115_v48 }
  0xd7   :  { %3090 = vst [vmem:[#allocation68_spill] sm:$0xff] %v2550_v40  ;;  %v2558_v45 = vmax.f32 %v1086_v12, %v1087_v16  ;;  %v1124_v44 = vmax.f32 %v1122_v37, %v1123_v15  ;;  %v1137_v4 = vsel %vm264_vm0, %v227_v46, -inf  ;;  %v1095_v62 = vrot.slane %v1094_v47, 1  ;;  %v235_v16 = vld [vmem:[%s3022_s0 + $0x718] sm:$0x1] }
  0xd8   :  { %v1102_v54 = vmax.f32 %v1100_v21, %v1101_v28  ;;  %v1110_v40 = vmax.f32 %v1108_v3, %v1109_v10  ;;  %v1131_v57 = vrot.slane %v1130_v38, 4  ;;  %v1117_v53 = vrot.slane %v1116_v61, 2  ;;  %v230_v21 = vld [vmem:[%s3022_s0 + $0x6f0] sm:$0xff]  ;;  %v233_v3 = vld [vmem:[%s3022_s0 + $0x708] sm:$0x1] }
  0xd9   :  { %3091 = vst [vmem:[#allocation69_spill] sm:$0xff] %v2558_v45  ;;  %v1125_v14 = vrot.slane %v1124_v44, 2  ;;  %v1138_v12 = vmax.f32 %v226_v56, %v1137_v4  ;;  %v1145_v33 = vsel %vm264_vm0, %v229_v49, -inf  ;;  %v2568_v37 = vmax.f32 %v1094_v47, %v1095_v62  ;;  %v232_v4 = vld [vmem:[%s3022_s0 + $0x700] sm:$0xff]  ;;  %v234_v62 = vld [vmem:[%s3022_s0 + $0x710] sm:$0xff] }
  0xda   :  { %v1103_v15 = vrot.slane %v1102_v54, 1  ;;  %v1111_v46 = vrot.slane %v1110_v40, 1  ;;  %v1132_v11 = vmax.f32 %v1130_v38, %v1131_v57  ;;  %v1118_v48 = vmax.f32 %v1116_v61, %v1117_v53  ;;  %v236_v45 = vld [vmem:[%s3022_s0 + $0x720] sm:$0xff] }
  0xdb   :  { %3092 = vst [vmem:[#allocation70_spill] sm:$0xff] %v2568_v37  ;;  %v1126_v56 = vmax.f32 %v1124_v44, %v1125_v14  ;;  %v1139_v49 = vrot.slane %v1138_v12, 4  ;;  %v1146_v47 = vmax.f32 %v228_v0, %v1145_v33  ;;  %v1153_v38 = vsel %vm264_vm0, %v231_v6, -inf  ;;  %v239_v0 = vld [vmem:[%s3022_s0 + $0x738] sm:$0x1] }
  0xdc   :  { %v2579_v28 = vmax.f32 %v1102_v54, %v1103_v15  ;;  %v2581_v10 = vmax.f32 %v1110_v40, %v1111_v46  ;;  %v1133_v57 = vrot.slane %v1132_v11, 2  ;;  %v1119_v37 = vrot.slane %v1118_v48, 1  ;;  %v237_v40 = vld [vmem:[%s3022_s0 + $0x728] sm:$0x1] }
  0xdd   :  { %v1127_v61 = vrot.slane %v1126_v56, 1  ;;  %v1140_v44 = vmax.f32 %v1138_v12, %v1139_v49  ;;  %v1147_v53 = vrot.slane %v1146_v47, 4  ;;  %v1154_v6 = vmax.f32 %v230_v21, %v1153_v38 }
  0xde   :  { %3093 = vst [vmem:[#allocation71_spill] sm:$0xff] %v2579_v28  ;;  %3094 = vst [vmem:[#allocation72_spill] sm:$0xff] %v2581_v10  ;;  %v1134_v54 = vmax.f32 %v1132_v11, %v1133_v57  ;;  %v1161_v14 = vsel %vm264_vm0, %v233_v3, -inf  ;;  %v1169_v33 = vsel %vm264_vm0, %v235_v16, -inf  ;;  %v2598_v15 = vmax.f32 %v1118_v48, %v1119_v37  ;;  %v238_v10 = vld [vmem:[%s3022_s0 + $0x730] sm:$0xff] }
  0xdf   :  { %v2600_v46 = vmax.f32 %v1126_v56, %v1127_v61  ;;  %v1141_v12 = vrot.slane %v1140_v44, 2  ;;  %v1148_v49 = vmax.f32 %v1146_v47, %v1147_v53  ;;  %v1155_v21 = vrot.slane %v1154_v6, 4  ;;  %v241_v37 = vld [vmem:[%s3022_s0 + $0x748] sm:$0x1] }
  0xe0   :  { %3095 = vst [vmem:[#allocation73_spill] sm:$0xff] %v2598_v15  ;;  %v1135_v11 = vrot.slane %v1134_v54, 1  ;;  %v1162_v57 = vmax.f32 %v232_v4, %v1161_v14  ;;  %v1170_v3 = vmax.f32 %v234_v62, %v1169_v33  ;;  %v1177_v56 = vsel %vm264_vm0, %v237_v40, -inf  ;;  %v240_v4 = vld [vmem:[%s3022_s0 + $0x740] sm:$0xff] }
  0xe1   :  { %3096 = vst [vmem:[#allocation74_spill] sm:$0xff] %v2600_v46  ;;  %v1142_v16 = vmax.f32 %v1140_v44, %v1141_v12  ;;  %v1149_v48 = vrot.slane %v1148_v49, 2  ;;  %v1185_v47 = vsel %vm264_vm0, %v239_v0, -inf  ;;  %v1156_v61 = vmax.f32 %v1154_v6, %v1155_v21  ;;  %v243_v44 = vld [vmem:[%s3022_s0 + $0x758] sm:$0x1] }
  0xe2   :  { %v2613_v38 = vmax.f32 %v1134_v54, %v1135_v11  ;;  %v1163_v53 = vrot.slane %v1162_v57, 4  ;;  %v1171_v46 = vrot.slane %v1170_v3, 4  ;;  %v1178_v33 = vmax.f32 %v236_v45, %v1177_v56  ;;  %v245_v45 = vld [vmem:[%s3022_s0 + $0x768] sm:$0x1] }
  0xe3   :  { %v1143_v62 = vrot.slane %v1142_v16, 1  ;;  %v1150_v14 = vmax.f32 %v1148_v49, %v1149_v48  ;;  %v1186_v15 = vmax.f32 %v238_v10, %v1185_v47  ;;  %v1157_v40 = vrot.slane %v1156_v61, 2  ;;  %v242_v49 = vld [vmem:[%s3022_s0 + $0x750] sm:$0xff]  ;;  %v244_v47 = vld [vmem:[%s3022_s0 + $0x760] sm:$0xff] }
  0xe4   :  { %3097 = vst [vmem:[#allocation75_spill] sm:$0xff] %v2613_v38  ;;  %v1164_v12 = vmax.f32 %v1162_v57, %v1163_v53  ;;  %v1172_v0 = vmax.f32 %v1170_v3, %v1171_v46  ;;  %v1193_v54 = vsel %vm264_vm0, %v241_v37, -inf  ;;  %v1179_v21 = vrot.slane %v1178_v33, 4 }
  0xe5   :  { %v2622_v6 = vmax.f32 %v1142_v16, %v1143_v62  ;;  %v1151_v11 = vrot.slane %v1150_v14, 1  ;;  %v1187_v38 = vrot.slane %v1186_v15, 4  ;;  %v1158_v10 = vmax.f32 %v1156_v61, %v1157_v40  ;;  %v247_v61 = vld [vmem:[%s3022_s0 + $0x778] sm:$0x1] }
  0xe6   :  { %v1165_v48 = vrot.slane %v1164_v12, 2  ;;  %v1173_v56 = vrot.slane %v1172_v0, 2  ;;  %v1194_v57 = vmax.f32 %v240_v4, %v1193_v54  ;;  %v1180_v3 = vmax.f32 %v1178_v33, %v1179_v21 }
  0xe7   :  { %3098 = vst [vmem:[#allocation76_spill] sm:$0xff] %v2622_v6  ;;  %v2630_v46 = vmax.f32 %v1150_v14, %v1151_v11  ;;  %v1188_v37 = vmax.f32 %v1186_v15, %v1187_v38  ;;  %v1201_v16 = vsel %vm264_vm0, %v243_v44, -inf  ;;  %v1159_v53 = vrot.slane %v1158_v10, 1  ;;  %v251_v11 = vld [vmem:[%s3022_s0 + $0x798] sm:$0x1] }
  0xe8   :  { %v1166_v62 = vmax.f32 %v1164_v12, %v1165_v48  ;;  %v1174_v6 = vmax.f32 %v1172_v0, %v1173_v56  ;;  %v1195_v28 = vrot.slane %v1194_v57, 4  ;;  %v1181_v40 = vrot.slane %v1180_v3, 2  ;;  %v246_v12 = vld [vmem:[%s3022_s0 + $0x770] sm:$0xff]  ;;  %v249_v0 = vld [vmem:[%s3022_s0 + $0x788] sm:$0x1] }
  0xe9   :  { %3099 = vst [vmem:[#allocation77_spill] sm:$0xff] %v2630_v46  ;;  %v1189_v4 = vrot.slane %v1188_v37, 2  ;;  %v1202_v14 = vmax.f32 %v242_v49, %v1201_v16  ;;  %v1209_v33 = vsel %vm264_vm0, %v245_v45, -inf  ;;  %v2640_v15 = vmax.f32 %v1158_v10, %v1159_v53  ;;  %v248_v16 = vld [vmem:[%s3022_s0 + $0x780] sm:$0xff]  ;;  %v250_v53 = vld [vmem:[%s3022_s0 + $0x790] sm:$0xff] }
  0xea   :  { %v1167_v38 = vrot.slane %v1166_v62, 1  ;;  %v1175_v44 = vrot.slane %v1174_v6, 1  ;;  %v1196_v54 = vmax.f32 %v1194_v57, %v1195_v28  ;;  %v1182_v21 = vmax.f32 %v1180_v3, %v1181_v40  ;;  %v252_v46 = vld [vmem:[%s3022_s0 + $0x7a0] sm:$0xff] }
  0xeb   :  { %3100 = vst [vmem:[#allocation78_spill] sm:$0xff] %v2640_v15  ;;  %v1190_v49 = vmax.f32 %v1188_v37, %v1189_v4  ;;  %v1203_v45 = vrot.slane %v1202_v14, 4  ;;  %v1210_v10 = vmax.f32 %v244_v47, %v1209_v33  ;;  %v1217_v57 = vsel %vm264_vm0, %v247_v61, -inf  ;;  %v255_v47 = vld [vmem:[%s3022_s0 + $0x7b8] sm:$0x1] }
  0xec   :  { %v2651_v48 = vmax.f32 %v1166_v62, %v1167_v38  ;;  %v2653_v56 = vmax.f32 %v1174_v6, %v1175_v44  ;;  %v1197_v28 = vrot.slane %v1196_v54, 2  ;;  %v1183_v15 = vrot.slane %v1182_v21, 1  ;;  %v253_v6 = vld [vmem:[%s3022_s0 + $0x7a8] sm:$0x1] }
  0xed   :  { %v1191_v3 = vrot.slane %v1190_v49, 1  ;;  %v1204_v37 = vmax.f32 %v1202_v14, %v1203_v45  ;;  %v1211_v40 = vrot.slane %v1210_v10, 4  ;;  %v1218_v61 = vmax.f32 %v246_v12, %v1217_v57 }
  0xee   :  { %3101 = vst [vmem:[#allocation79_spill] sm:$0xff] %v2651_v48  ;;  %3102 = vst [vmem:[#allocation80_spill] sm:$0xff] %v2653_v56  ;;  %v1198_v62 = vmax.f32 %v1196_v54, %v1197_v28  ;;  %v1225_v4 = vsel %vm264_vm0, %v249_v0, -inf  ;;  %v1233_v33 = vsel %vm264_vm0, %v251_v11, -inf  ;;  %v2670_v38 = vmax.f32 %v1182_v21, %v1183_v15  ;;  %v254_v56 = vld [vmem:[%s3022_s0 + $0x7b0] sm:$0xff] }
  0xef   :  { %v2672_v44 = vmax.f32 %v1190_v49, %v1191_v3  ;;  %v1205_v14 = vrot.slane %v1204_v37, 2  ;;  %v1212_v45 = vmax.f32 %v1210_v10, %v1211_v40  ;;  %v1219_v12 = vrot.slane %v1218_v61, 4  ;;  %v257_v15 = vld [vmem:[%s3022_s0 + $0x7c8] sm:$0x1] }
  0xf0   :  { %3103 = vst [vmem:[#allocation81_spill] sm:$0xff] %v2670_v38  ;;  %v1199_v54 = vrot.slane %v1198_v62, 1  ;;  %v1226_v28 = vmax.f32 %v248_v16, %v1225_v4  ;;  %v1234_v0 = vmax.f32 %v250_v53, %v1233_v33  ;;  %v1241_v49 = vsel %vm264_vm0, %v253_v6, -inf  ;;  %v256_v16 = vld [vmem:[%s3022_s0 + $0x7c0] sm:$0xff] }
  0xf1   :  { %3104 = vst [vmem:[#allocation82_spill] sm:$0xff] %v2672_v44  ;;  %v1206_v11 = vmax.f32 %v1204_v37, %v1205_v14  ;;  %v1213_v21 = vrot.slane %v1212_v45, 2  ;;  %v1249_v10 = vsel %vm264_vm0, %v255_v47, -inf  ;;  %v1220_v3 = vmax.f32 %v1218_v61, %v1219_v12  ;;  %v259_v37 = vld [vmem:[%s3022_s0 + $0x7d8] sm:$0x1] }
  0xf2   :  { %v2685_v57 = vmax.f32 %v1198_v62, %v1199_v54  ;;  %v1227_v40 = vrot.slane %v1226_v28, 4  ;;  %v1235_v44 = vrot.slane %v1234_v0, 4  ;;  %v1242_v33 = vmax.f32 %v252_v46, %v1241_v49  ;;  %v261_v46 = vld [vmem:[%s3022_s0 + $0x7e8] sm:$0x1] }
  0xf3   :  { %v1207_v53 = vrot.slane %v1206_v11, 1  ;;  %v1214_v4 = vmax.f32 %v1212_v45, %v1213_v21  ;;  %v1250_v38 = vmax.f32 %v254_v56, %v1249_v10  ;;  %v1221_v6 = vrot.slane %v1220_v3, 2  ;;  %v258_v45 = vld [vmem:[%s3022_s0 + $0x7d0] sm:$0xff]  ;;  %v260_v10 = vld [vmem:[%s3022_s0 + $0x7e0] sm:$0xff] }
  0xf4   :  { %3105 = vst [vmem:[#allocation83_spill] sm:$0xff] %v2685_v57  ;;  %v1228_v14 = vmax.f32 %v1226_v28, %v1227_v40  ;;  %v1236_v47 = vmax.f32 %v1234_v0, %v1235_v44  ;;  %v1257_v62 = vsel %vm264_vm0, %v257_v15, -inf  ;;  %v1243_v12 = vrot.slane %v1242_v33, 4 }
  0xf5   :  { %v2694_v61 = vmax.f32 %v1206_v11, %v1207_v53  ;;  %v1215_v54 = vrot.slane %v1214_v4, 1  ;;  %v1251_v57 = vrot.slane %v1250_v38, 4  ;;  %v1222_v56 = vmax.f32 %v1220_v3, %v1221_v6  ;;  %v263_v3 = vld [vmem:[%s3022_s0 + $0x7f8] sm:$0x1] }
  0xf6   :  { %v1229_v21 = vrot.slane %v1228_v14, 2  ;;  %v1237_v49 = vrot.slane %v1236_v47, 2  ;;  %v1258_v28 = vmax.f32 %v256_v16, %v1257_v62  ;;  %v1244_v0 = vmax.f32 %v1242_v33, %v1243_v12 }
  0xf7   :  { %3106 = vst [vmem:[#allocation84_spill] sm:$0xff] %v2694_v61  ;;  %v2702_v44 = vmax.f32 %v1214_v4, %v1215_v54  ;;  %v1252_v15 = vmax.f32 %v1250_v38, %v1251_v57  ;;  %v1265_v11 = vsel %vm264_vm0, %v259_v37, -inf  ;;  %v1223_v40 = vrot.slane %v1222_v56, 1 }
  0xf8   :  { %v1230_v53 = vmax.f32 %v1228_v14, %v1229_v21  ;;  %v1238_v61 = vmax.f32 %v1236_v47, %v1237_v49  ;;  %v1259_v48 = vrot.slane %v1258_v28, 4  ;;  %v1245_v6 = vrot.slane %v1244_v0, 2  ;;  %v262_v14 = vld [vmem:[%s3022_s0 + $0x7f0] sm:$0xff] }
  0xf9   :  { %3107 = vst [vmem:[#allocation85_spill] sm:$0xff] %v2702_v44  ;;  %v1253_v16 = vrot.slane %v1252_v15, 2  ;;  %v1266_v4 = vmax.f32 %v258_v45, %v1265_v11  ;;  %v1273_v33 = vsel %vm264_vm0, %v261_v46, -inf  ;;  %v2712_v38 = vmax.f32 %v1222_v56, %v1223_v40 }
  0xfa   :  { %v1231_v57 = vrot.slane %v1230_v53, 1  ;;  %v1239_v37 = vrot.slane %v1238_v61, 1  ;;  %v1260_v62 = vmax.f32 %v1258_v28, %v1259_v48  ;;  %v1246_v47 = vmax.f32 %v1244_v0, %v1245_v6 }
  0xfb   :  { %3108 = vst [vmem:[#allocation86_spill] sm:$0xff] %v2712_v38  ;;  %v1254_v54 = vmax.f32 %v1252_v15, %v1253_v16  ;;  %v1267_v12 = vrot.slane %v1266_v4, 4  ;;  %v1274_v21 = vmax.f32 %v260_v10, %v1273_v33  ;;  %v1281_v46 = vsel %vm264_vm0, %v263_v3, -inf }
  0xfc   :  { %v2717_v49 = vmax.f32 %v1230_v53, %v1231_v57  ;;  %v2719_v44 = vmax.f32 %v1238_v61, %v1239_v37  ;;  %v1261_v45 = vrot.slane %v1260_v62, 2  ;;  %v1247_v56 = vrot.slane %v1246_v47, 1 }
  0xfd   :  { %v1255_v11 = vrot.slane %v1254_v54, 1  ;;  %v1268_v40 = vmax.f32 %v1266_v4, %v1267_v12  ;;  %v1275_v38 = vrot.slane %v1274_v21, 4  ;;  %v1282_v28 = vmax.f32 %v262_v14, %v1281_v46  ;;  %v3111_v46 = vld [vmem:[#allocation9_spill] sm:$0xff] }
  0xfe   :  { %v1262_v48 = vmax.f32 %v1260_v62, %v1261_v45  ;;  %v2722_v36 = vmax.f32 %v1246_v47, %v1247_v56  ;;  %v1418_v3 = vsel %vm1417_vm1, %v1702_v41, %v1694_v35  ;;  %vm1425_vm5 = vcmask 1045509   ;;  %v3112_v56 = vld [vmem:[#allocation3_spill] sm:$0xff] }
  0xff   :  { %v2724_v0 = vmax.f32 %v1254_v54, %v1255_v11  ;;  %v1269_v15 = vrot.slane %v1268_v40, 2  ;;  %v1276_v10 = vmax.f32 %v1274_v21, %v1275_v38  ;;  %v1283_v61 = vrot.slane %v1282_v28, 4 }
 0x100   :  { %v1263_v53 = vrot.slane %v1262_v48, 1  ;;  %v1420_v4 = vsel %vm1419_vm2, %v1704_v42, %v1418_v3  ;;  %vm1427_vm6 = vcmask 1046534   ;;  %vm1429_vm7 = vcmask 1047559  }
 0x101   :  { %v1270_v6 = vmax.f32 %v1268_v40, %v1269_v15  ;;  %v1277_v16 = vrot.slane %v1276_v10, 2  ;;  %v1284_v57 = vmax.f32 %v1282_v28, %v1283_v61  ;;  %v1422_v37 = vsel %vm1421_vm3, %v1709_v50, %v1420_v4  ;;  %v3114_v40 = vld [vmem:[#allocation10_spill] sm:$0xff]  ;;  %v3115_v28 = vld [vmem:[#allocation15_spill] sm:$0xff] }
 0x102   :  { %v2731_v33 = vmax.f32 %v1262_v48, %v1263_v53  ;;  %v1424_v14 = vsel %vm1423_vm4, %v1711_v51, %v1422_v37  ;;  %v1431_v42 = vsel %vm1417_vm1, %v1764_v60, %v1762_v59  ;;  %v1438_v59 = vsel %vm1417_vm1, %v1822_v17, %v1820_v22  ;;  %v3118_v61 = vld [vmem:[#allocation11_spill] sm:$0xff] }
 0x103   :  { %v1271_v38 = vrot.slane %v1270_v6, 1  ;;  %v1278_v62 = vmax.f32 %v1276_v10, %v1277_v16  ;;  %v1285_v35 = vrot.slane %v1284_v57, 2  ;;  %v1426_v41 = vsel %vm1425_vm5, %v1731_v7, %v1424_v14  ;;  %v3117_v10 = vld [vmem:[#allocation6_spill] sm:$0xff]  ;;  %v3120_v4 = vld [vmem:[#allocation23_spill] sm:$0xff]  ;;  %v3123_v14 = vld [vmem:[#allocation12_spill] sm:$0xff] }
 0x104   :  { %v1428_v50 = vsel %vm1427_vm6, %v1748_v31, %v1426_v41  ;;  %v1432_v12 = vsel %vm1419_vm2, %v1772_v1, %v1431_v42  ;;  %v1439_v31 = vsel %vm1419_vm2, %v1833_v29, %v1438_v59  ;;  %v1445_v1 = vsel %vm1417_vm1, %v1868_v20, %v1866_v19  ;;  %v3124_v41 = vld [vmem:[#allocation18_spill] sm:$0xff]  ;;  %v3128_v59 = vld [vmem:[#allocation19_spill] sm:$0xff] }
 0x105   :  { %v2742_v47 = vmax.f32 %v1270_v6, %v1271_v38  ;;  %v1279_v54 = vrot.slane %v1278_v62, 1  ;;  %v1286_v51 = vmax.f32 %v1284_v57, %v1285_v35  ;;  %v1430_v21 = vsel %vm1429_vm7, %v1753_v43, %v1428_v50  ;;  %v3119_v6 = vld [vmem:[#allocation17_spill] sm:$0xff]  ;;  %v3121_v57 = vld [vmem:[#allocation24_spill] sm:$0xff]  ;;  %v3122_v38 = vld [vmem:[#allocation7_spill] sm:$0xff] }
 0x106   :  { %v1433_v7 = vsel %vm1421_vm3, %v1786_v25, %v1432_v12  ;;  %1552 = vst [vmem:[%s3023_s1] sm:$0xff] %v1430_v21  ;;  %v1440_v22 = vsel %vm1421_vm3, %v1835_v30, %v1439_v31  ;;  %v1452_v20 = vsel %vm1417_vm1, %v1934_v23, %v1932_v13  ;;  %v1459_v23 = vsel %vm1417_vm1, %v2005_v63, %v2003_v2  ;;  %v3113_v2 = vld [vmem:[#allocation5_spill] sm:$0xff]  ;;  %v3126_v12 = vld [vmem:[#allocation8_spill] sm:$0xff]  ;;  %v3129_v31 = vld [vmem:[#allocation26_spill] sm:$0xff] }
 0x107   :  { %v2755_v60 = vmax.f32 %v1278_v62, %v1279_v54  ;;  %v1434_v45 = vsel %vm1423_vm4, %v1788_v26, %v1433_v7  ;;  %v1287_v43 = vrot.slane %v1286_v51, 1  ;;  %v1446_v26 = vsel %vm1419_vm2, %v1876_v24, %v1445_v1  ;;  %v3125_v54 = vld [vmem:[#allocation25_spill] sm:$0xff] }
 0x108   :  { %v1435_v25 = vsel %vm1425_vm5, %v1790_v27, %v1434_v45  ;;  %v1441_v29 = vsel %vm1423_vm4, %v1846_v55, %v1440_v22  ;;  %v1447_v19 = vsel %vm1421_vm3, %v1878_v18, %v1446_v26  ;;  %v1453_v13 = vsel %vm1419_vm2, %v1950_v39, %v1452_v20  ;;  %v3127_v21 = vld [vmem:[#allocation13_spill] sm:$0xff]  ;;  %v3131_v22 = vld [vmem:[#allocation20_spill] sm:$0xff] }
 0x109   :  { %v1436_v17 = vsel %vm1427_vm6, %v1798_v32, %v1435_v25  ;;  %v2782_v27 = vmax.f32 %v1286_v51, %v1287_v43  ;;  %v1442_v24 = vsel %vm1425_vm5, %v1854_v5, %v1441_v29  ;;  %v1448_v32 = vsel %vm1423_vm4, %v1893_v52, %v1447_v19  ;;  %v3109_v5 = vld [vmem:[#allocation2_spill] sm:$0xff]  ;;  %v3110_v52 = vld [vmem:[#allocation4_spill] sm:$0xff]  ;;  %v3133_v19 = vld [vmem:[#allocation31_spill] sm:$0xff] }
 0x10a   :  { %v1437_v30 = vsel %vm1429_vm7, %v1808_v58, %v1436_v17  ;;  %v1443_v55 = vsel %vm1427_vm6, %v1856_v8, %v1442_v24  ;;  %v1449_v18 = vsel %vm1425_vm5, %v1908_v34, %v1448_v32  ;;  %v1454_v34 = vsel %vm1421_vm3, %v3110_v52, %v1453_v13  ;;  %v3130_v43 = vld [vmem:[#allocation14_spill] sm:$0xff]  ;;  %v3132_v17 = vld [vmem:[#allocation27_spill] sm:$0xff]  ;;  %v3134_v20 = vld [vmem:[#allocation32_spill] sm:$0xff] }
 0x10b   :  { %1553 = vst [vmem:[%s3023_s1 + $0x8] sm:$0xff] %v1437_v30  ;;  %v1444_v58 = vsel %vm1429_vm7, %v1858_v9, %v1443_v55  ;;  %v1450_v8 = vsel %vm1427_vm6, %v3109_v5, %v1449_v18  ;;  %v1460_v39 = vsel %vm1419_vm2, %v3111_v46, %v1459_v23  ;;  %v1455_v63 = vsel %vm1423_vm4, %v3113_v2, %v1454_v34  ;;  %v3116_v9 = vld [vmem:[#allocation16_spill] sm:$0xff]  ;;  %v3135_v24 = vld [vmem:[#allocation21_spill] sm:$0xff]  ;;  %v3140_v52 = vld [vmem:[#allocation22_spill] sm:$0xff] }
 0x10c   :  { %v1451_v11 = vsel %vm1429_vm7, %v3112_v56, %v1450_v8  ;;  %v1461_v48 = vsel %vm1421_vm3, %v3114_v40, %v1460_v39  ;;  %v1466_v15 = vsel %vm1417_vm1, %v3116_v9, %v3115_v28  ;;  %1554 = vst [vmem:[%s3023_s1 + $0x10] sm:$0xff] %v1444_v58  ;;  %v1456_v53 = vsel %vm1425_vm5, %v3117_v10, %v1455_v63  ;;  %v3136_v55 = vld [vmem:[#allocation28_spill] sm:$0xff]  ;;  %v3137_v13 = vld [vmem:[#allocation33_spill] sm:$0xff]  ;;  %v3138_v58 = vld [vmem:[#allocation39_spill] sm:$0xff] }
 0x10d   :  { %v1462_v3 = vsel %vm1423_vm4, %v3118_v61, %v1461_v48  ;;  %v1467_v16 = vsel %vm1419_vm2, %v3119_v6, %v1466_v15  ;;  %v1473_v37 = vsel %vm1417_vm1, %v3121_v57, %v3120_v4  ;;  %1555 = vst [vmem:[%s3023_s1 + $0x18] sm:$0xff] %v1451_v11  ;;  %v1457_v62 = vsel %vm1427_vm6, %v3122_v38, %v1456_v53  ;;  %v3139_v5 = vld [vmem:[#allocation40_spill] sm:$0xff]  ;;  %v3141_v46 = vld [vmem:[#allocation29_spill] sm:$0xff]  ;;  %v3142_v56 = vld [vmem:[#allocation34_spill] sm:$0xff] }
 0x10e   :  { %v1463_v35 = vsel %vm1425_vm5, %v3123_v14, %v1462_v3  ;;  %v1468_v42 = vsel %vm1421_vm3, %v3124_v41, %v1467_v16  ;;  %v1474_v50 = vsel %vm1419_vm2, %v3125_v54, %v1473_v37  ;;  %v1458_v51 = vsel %vm1429_vm7, %v3126_v12, %v1457_v62  ;;  %v3143_v2 = vld [vmem:[#allocation41_spill] sm:$0xff]  ;;  %v3144_v40 = vld [vmem:[#allocation30_spill] sm:$0xff]  ;;  %v3145_v28 = vld [vmem:[#allocation35_spill] sm:$0xff] }
 0x10f   :  { %v1464_v7 = vsel %vm1427_vm6, %v3127_v21, %v1463_v35  ;;  %v1469_v45 = vsel %vm1423_vm4, %v3128_v59, %v1468_v42  ;;  %v1475_v1 = vsel %vm1421_vm3, %v3129_v31, %v1474_v50  ;;  %v1480_v30 = vsel %vm1417_vm1, %v3134_v20, %v3133_v19  ;;  %1556 = vst [vmem:[%s3023_s1 + $0x20] sm:$0xff] %v1458_v51  ;;  %v3146_v15 = vld [vmem:[#allocation42_spill] sm:$0xff]  ;;  %v3147_v53 = vld [vmem:[#allocation47_spill] sm:$0xff]  ;;  %v3148_v61 = vld [vmem:[#allocation48_spill] sm:$0xff] }
 0x110   :  { %v1465_v25 = vsel %vm1429_vm7, %v3130_v43, %v1464_v7  ;;  %v1470_v26 = vsel %vm1425_vm5, %v3131_v22, %v1469_v45  ;;  %v1476_v29 = vsel %vm1423_vm4, %v3132_v17, %v1475_v1  ;;  %v1481_v23 = vsel %vm1419_vm2, %v3137_v13, %v1480_v30  ;;  %v3149_v6 = vld [vmem:[#allocation36_spill] sm:$0xff]  ;;  %v3150_v4 = vld [vmem:[#allocation43_spill] sm:$0xff]  ;;  %v3151_v37 = vld [vmem:[#allocation49_spill] sm:$0xff] }
 0x111   :  { %v1471_v32 = vsel %vm1427_vm6, %v3135_v24, %v1470_v26  ;;  %v1477_v18 = vsel %vm1425_vm5, %v3136_v55, %v1476_v29  ;;  %v1487_v8 = vsel %vm1417_vm1, %v3139_v5, %v3138_v58  ;;  %1557 = vst [vmem:[%s3023_s1 + $0x28] sm:$0xff] %v1465_v25  ;;  %v1482_v11 = vsel %vm1421_vm3, %v3142_v56, %v1481_v23  ;;  %v3152_v62 = vld [vmem:[#allocation55_spill] sm:$0xff]  ;;  %v3153_v14 = vld [vmem:[#allocation56_spill] sm:$0xff]  ;;  %v3154_v41 = vld [vmem:[#allocation37_spill] sm:$0xff] }
 0x112   :  { %v1472_v34 = vsel %vm1429_vm7, %v3140_v52, %v1471_v32  ;;  %v1478_v39 = vsel %vm1427_vm6, %v3141_v46, %v1477_v18  ;;  %v1488_v63 = vsel %vm1419_vm2, %v3143_v2, %v1487_v8  ;;  %v1483_v9 = vsel %vm1423_vm4, %v3145_v28, %v1482_v11  ;;  %v3155_v54 = vld [vmem:[#allocation44_spill] sm:$0xff]  ;;  %v3156_v12 = vld [vmem:[#allocation50_spill] sm:$0xff]  ;;  %v3157_v21 = vld [vmem:[#allocation57_spill] sm:$0xff] }
 0x113   :  { %v1479_v48 = vsel %vm1429_vm7, %v3144_v40, %v1478_v39  ;;  %v1489_v10 = vsel %vm1421_vm3, %v3146_v15, %v1488_v63  ;;  %v1494_v3 = vsel %vm1417_vm1, %v3148_v61, %v3147_v53  ;;  %1558 = vst [vmem:[%s3023_s1 + $0x30] sm:$0xff] %v1472_v34  ;;  %v1484_v16 = vsel %vm1425_vm5, %v3149_v6, %v1483_v9  ;;  %v3158_v59 = vld [vmem:[#allocation38_spill] sm:$0xff]  ;;  %v3159_v31 = vld [vmem:[#allocation45_spill] sm:$0xff]  ;;  %v3160_v43 = vld [vmem:[#allocation51_spill] sm:$0xff] }
 0x114   :  { %v1490_v57 = vsel %vm1423_vm4, %v3150_v4, %v1489_v10  ;;  %v1495_v38 = vsel %vm1419_vm2, %v3151_v37, %v1494_v3  ;;  %v1501_v35 = vsel %vm1417_vm1, %v3153_v14, %v3152_v62  ;;  %1559 = vst [vmem:[%s3023_s1 + $0x38] sm:$0xff] %v1479_v48  ;;  %v1485_v42 = vsel %vm1427_vm6, %v3154_v41, %v1484_v16  ;;  %v3161_v22 = vld [vmem:[#allocation58_spill] sm:$0xff]  ;;  %v3163_v19 = vld [vmem:[#allocation52_spill] sm:$0xff]  ;;  %v3164_v30 = vld [vmem:[#allocation59_spill] sm:$0xff] }
 0x115   :  { %v1491_v50 = vsel %vm1425_vm5, %v3155_v54, %v1490_v57  ;;  %v1496_v51 = vsel %vm1421_vm3, %v3156_v12, %v1495_v38  ;;  %v1502_v7 = vsel %vm1419_vm2, %v3157_v21, %v1501_v35  ;;  %v1486_v45 = vsel %vm1429_vm7, %v3158_v59, %v1485_v42  ;;  %v3162_v17 = vld [vmem:[#allocation46_spill] sm:$0xff]  ;;  %v3165_v32 = vld [vmem:[#allocation63_spill] sm:$0xff]  ;;  %v3166_v55 = vld [vmem:[#allocation64_spill] sm:$0xff] }
 0x116   :  { %v1492_v1 = vsel %vm1427_vm6, %v3159_v31, %v1491_v50  ;;  %v1497_v25 = vsel %vm1423_vm4, %v3160_v43, %v1496_v51  ;;  %v1503_v26 = vsel %vm1421_vm3, %v3161_v22, %v1502_v7  ;;  %v1508_v18 = vsel %vm1417_vm1, %v3166_v55, %v3165_v32  ;;  %1560 = vst [vmem:[%s3023_s1 + $0x40] sm:$0xff] %v1486_v45  ;;  %v3167_v13 = vld [vmem:[#allocation53_spill] sm:$0xff]  ;;  %v3168_v58 = vld [vmem:[#allocation60_spill] sm:$0xff]  ;;  %v3170_v34 = vld [vmem:[#allocation71_spill] sm:$0xff] }
 0x117   :  { %v1493_v29 = vsel %vm1429_vm7, %v3162_v17, %v1492_v1  ;;  %v1498_v20 = vsel %vm1425_vm5, %v3163_v19, %v1497_v25  ;;  %v1504_v24 = vsel %vm1423_vm4, %v3164_v30, %v1503_v26  ;;  %v3169_v8 = vld [vmem:[#allocation65_spill] sm:$0xff]  ;;  %v3171_v46 = vld [vmem:[#allocation72_spill] sm:$0xff]  ;;  %v3172_v56 = vld [vmem:[#allocation54_spill] sm:$0xff]  ;;  %v1529_v42 = vsel %vm1417_vm1, %v2719_v44, %v2717_v49 }
 0x118   :  { %v1499_v23 = vsel %vm1427_vm6, %v3167_v13, %v1498_v20  ;;  %v1505_v5 = vsel %vm1425_vm5, %v3168_v58, %v1504_v24  ;;  %v1509_v52 = vsel %vm1419_vm2, %v3169_v8, %v1508_v18  ;;  %v1515_v39 = vsel %vm1417_vm1, %v3171_v46, %v3170_v34  ;;  %1561 = vst [vmem:[%s3023_s1 + $0x48] sm:$0xff] %v1493_v29  ;;  %v3173_v2 = vld [vmem:[#allocation61_spill] sm:$0xff]  ;;  %v3174_v40 = vld [vmem:[#allocation66_spill] sm:$0xff]  ;;  %v3177_v53 = vld [vmem:[#allocation67_spill] sm:$0xff] }
 0x119   :  { %v1500_v11 = vsel %vm1429_vm7, %v3172_v56, %v1499_v23  ;;  %v1506_v63 = vsel %vm1427_vm6, %v3173_v2, %v1505_v5  ;;  %v1510_v48 = vsel %vm1421_vm3, %v3174_v40, %v1509_v52  ;;  %v3175_v28 = vld [vmem:[#allocation73_spill] sm:$0xff]  ;;  %v3176_v15 = vld [vmem:[#allocation62_spill] sm:$0xff]  ;;  %v3179_v16 = vld [vmem:[#allocation79_spill] sm:$0xff]  ;;  %v1530_v59 = vsel %vm1419_vm2, %v2722_v36, %v1529_v42 }
 0x11a   :  { %v1516_v9 = vsel %vm1419_vm2, %v3175_v28, %v1515_v39  ;;  %v1507_v10 = vsel %vm1429_vm7, %v3176_v15, %v1506_v63  ;;  %v1511_v61 = vsel %vm1423_vm4, %v3177_v53, %v1510_v48  ;;  %v3178_v3 = vld [vmem:[#allocation74_spill] sm:$0xff]  ;;  %v3180_v4 = vld [vmem:[#allocation80_spill] sm:$0xff]  ;;  %1562 = vst [vmem:[%s3023_s1 + $0x50] sm:$0xff] %v1500_v11  ;;  %v3182_v62 = vld [vmem:[#allocation75_spill] sm:$0xff]  ;;  %v1531_v25 = vsel %vm1421_vm3, %v2724_v0, %v1530_v59 }
 0x11b   :  { %v1517_v6 = vsel %vm1421_vm3, %v3178_v3, %v1516_v9  ;;  %v1522_v57 = vsel %vm1417_vm1, %v3180_v4, %v3179_v16  ;;  %v3181_v37 = vld [vmem:[#allocation68_spill] sm:$0xff]  ;;  %v3183_v35 = vld [vmem:[#allocation81_spill] sm:$0xff]  ;;  %1563 = vst [vmem:[%s3023_s1 + $0x58] sm:$0xff] %v1507_v10  ;;  %v3186_v21 = vld [vmem:[#allocation82_spill] sm:$0xff]  ;;  %v1532_v36 = vsel %vm1423_vm4, %v2731_v33, %v1531_v25 }
 0x11c   :  { %v1512_v38 = vsel %vm1425_vm5, %v3181_v37, %v1511_v61  ;;  %v1518_v14 = vsel %vm1423_vm4, %v3182_v62, %v1517_v6  ;;  %v1523_v41 = vsel %vm1419_vm2, %v3183_v35, %v1522_v57  ;;  %v3184_v54 = vld [vmem:[#allocation69_spill] sm:$0xff]  ;;  %v3185_v12 = vld [vmem:[#allocation76_spill] sm:$0xff]  ;;  %v3187_v45 = vld [vmem:[#allocation70_spill] sm:$0xff]  ;;  %v1533_v30 = vsel %vm1425_vm5, %v2742_v47, %v1532_v36 }
 0x11d   :  { %v1513_v50 = vsel %vm1427_vm6, %v3184_v54, %v1512_v38  ;;  %v1519_v51 = vsel %vm1425_vm5, %v3185_v12, %v1518_v14  ;;  %v1524_v7 = vsel %vm1421_vm3, %v3186_v21, %v1523_v41  ;;  %v3188_v44 = vld [vmem:[#allocation77_spill] sm:$0xff]  ;;  %v3189_v1 = vld [vmem:[#allocation83_spill] sm:$0xff]  ;;  %v3190_v22 = vld [vmem:[#allocation78_spill] sm:$0xff]  ;;  %v1534_v33 = vsel %vm1427_vm6, %v2755_v60, %v1533_v30 }
 0x11e   :  { %v1514_v31 = vsel %vm1429_vm7, %v3187_v45, %v1513_v50  ;;  %v1520_v49 = vsel %vm1427_vm6, %v3188_v44, %v1519_v51  ;;  %v1525_v43 = vsel %vm1423_vm4, %v3189_v1, %v1524_v7  ;;  %v3191_v17 = vld [vmem:[#allocation84_spill] sm:$0xff]  ;;  %v3192_v19 = vld [vmem:[#allocation85_spill] sm:$0xff]  ;;  %v3193_v0 = vld [vmem:[#allocation86_spill] sm:$0xff]  ;;  %v1535_v32 = vsel %vm1429_vm7, %v2782_v27, %v1534_v33 }
 0x11f   :  { %v1521_v26 = vsel %vm1429_vm7, %v3190_v22, %v1520_v49  ;;  %v1526_v29 = vsel %vm1425_vm5, %v3191_v17, %v1525_v43  ;;  %1564 = vst [vmem:[%s3023_s1 + $0x60] sm:$0xff] %v1514_v31  ;;  %1567 = vst [vmem:[%s3023_s1 + $0x78] sm:$0xff] %v1535_v32 }
 0x120   :  { %v1527_v20 = vsel %vm1427_vm6, %v3192_v19, %v1526_v29  ;;  %1565 = vst [vmem:[%s3023_s1 + $0x68] sm:$0xff] %v1521_v26 }
 0x121   :  { %v1528_v24 = vsel %vm1429_vm7, %v3193_v0, %v1527_v20 }
 0x122   :  { %1566 = vst [vmem:[%s3023_s1 + $0x70] sm:$0xff] %v1528_v24 }

// kernel: forward.16
= control target key start
LH: loop header
LB: loop body
LE: loop exit
PB: predicated region body
PF: predicated region fallthrough
CT: control target
= control target key end

     0   :  { %vm359_vm0 = vcmask 130048   ;;  %s734_s1 = inlined_call_operand.vmem [shape: bf16[256,16], index: 1, kind: input, shape index: {}]   ;;  %s735_s0 = inlined_call_operand.vmem [shape: bf16[128,256], index: 0, kind: input, shape index: {}]   ;;  %s736_s2 = inlined_call_operand.vmem [shape: f32[1,16], index: 2, kind: input, shape index: {}]   ;;  %s737_s3 = inlined_call_operand.vmem [shape: f32[128,16], index: 3, kind: output, shape index: {}]  }
   0x1   :  { %v493_v0 = vld [vmem:[%s734_s1 + $0x40] sm:$0xff]   ;;  %v495_v2 = vld [vmem:[%s734_s1 + $0x48] sm:$0xff]   ;;  %v497_v4 = vld [vmem:[%s734_s1 + $0x50] sm:$0xff]  }
   0x2   :  { %v494_v1 = vld [vmem:[%s734_s1] sm:$0xff]   ;;  %413 = vmatprep.subr.bf16.mxu0 %v493_v0  ;;  %477 = vmatprep.subr.bf16.mxu1 %v493_v0  ;;  %v496_v3 = vld [vmem:[%s734_s1 + $0x8] sm:$0xff]   ;;  %v498_v5 = vld [vmem:[%s734_s1 + $0x10] sm:$0xff]  }
   0x3   :  { %414 = vmatpush3.bf16.msra.mxu0 %v494_v1  ;;  %485 = vmatpush3.bf16.msra.mxu1 %v494_v1  ;;  %v499_v6 = vld [vmem:[%s734_s1 + $0x58] sm:$0xff]   ;;  %v501_v8 = vld [vmem:[%s734_s1 + $0x60] sm:$0xff]   ;;  %v503_v10 = vld [vmem:[%s734_s1 + $0x68] sm:$0xff]  }
   0x4   :  { %415 = vmatprep.subr.bf16.mxu0 %v495_v2  ;;  %478 = vmatprep.subr.bf16.mxu1 %v495_v2  ;;  %v500_v7 = vld [vmem:[%s734_s1 + $0x18] sm:$0xff]   ;;  %v502_v9 = vld [vmem:[%s734_s1 + $0x20] sm:$0xff]   ;;  %v504_v13 = vld [vmem:[%s734_s1 + $0x28] sm:$0xff]  }
   0x5   :  { %v511_v11 = vld [vmem:[%s735_s0 + $0x4] ss:$8 sps:$4 sm:$0xff]   ;;  %v505_v14 = vld [vmem:[%s734_s1 + $0x70] sm:$0xff]   ;;  %v507_v16 = vld [vmem:[%s734_s1 + $0x78] sm:$0xff]  }
   0x6   :  { %v514_v12 = vld [vmem:[%s735_s0 + $0x44] ss:$8 sps:$4 sm:$0xff]   ;;  %278 = vmatprep.mubr.bf16.mxu0 %v511_v11  ;;  %v506_v15 = vld [vmem:[%s734_s1 + $0x30] sm:$0xff]   ;;  %v508_v17 = vld [vmem:[%s734_s1 + $0x38] sm:$0xff]  }
   0x7   :  { %416 = vmatpush3.bf16.msra.mxu0 %v496_v3  ;;  %486 = vmatpush3.bf16.msra.mxu1 %v496_v3  ;;  %v509_v18 = vld [vmem:[%s735_s0] ss:$8 sps:$4 sm:$0xff]   ;;  %v515_v20 = vld [vmem:[%s735_s0 + $0x14] ss:$8 sps:$4 sm:$0xff]   ;;  %v519_v22 = vld [vmem:[%s735_s0 + $0x10] ss:$8 sps:$4 sm:$0xff]  }
   0x8   :  { %417 = vmatprep.subr.bf16.mxu0 %v497_v4  ;;  %479 = vmatprep.subr.bf16.mxu1 %v497_v4  ;;  %v512_v19 = vld [vmem:[%s735_s0 + $0x40] ss:$8 sps:$4 sm:$0xff]   ;;  %v517_v21 = vld [vmem:[%s735_s0 + $0x54] ss:$8 sps:$4 sm:$0xff]   ;;  %v520_v23 = vld [vmem:[%s735_s0 + $0x50] ss:$8 sps:$4 sm:$0xff]  }
   0x9   :  { %310 = vmatprep.mubr.bf16.mxu1 %v514_v12  ;;  %v521_v24 = vld [vmem:[%s735_s0 + $0x24] ss:$8 sps:$4 sm:$0xff]   ;;  %v525_v26 = vld [vmem:[%s735_s0 + $0x20] ss:$8 sps:$4 sm:$0xff]   ;;  %v527_v28 = vld [vmem:[%s735_s0 + $0x34] ss:$8 sps:$4 sm:$0xff]  }
   0xa   :  { %v523_v25 = vld [vmem:[%s735_s0 + $0x64] ss:$8 sps:$4 sm:$0xff]   ;;  %v526_v27 = vld [vmem:[%s735_s0 + $0x60] ss:$8 sps:$4 sm:$0xff]   ;;  %v529_v29 = vld [vmem:[%s735_s0 + $0x74] ss:$8 sps:$4 sm:$0xff]  }
   0xb   :  { %418 = vmatpush3.bf16.msra.mxu0 %v498_v5  ;;  %487 = vmatpush3.bf16.msra.mxu1 %v498_v5  ;;  %v531_v30 = vld [vmem:[%s735_s0 + $0x30] ss:$8 sps:$4 sm:$0xff]   ;;  %v652_v34 = vld [vmem:[%s736_s2] ss:$0 sm:$0xff] }
   0xc   :  { %419 = vmatprep.subr.bf16.mxu0 %v499_v6  ;;  %480 = vmatprep.subr.bf16.mxu1 %v499_v6  ;;  %v532_v31 = vld [vmem:[%s735_s0 + $0x70] ss:$8 sps:$4 sm:$0xff]  }
   0xf   :  { %420 = vmatpush3.bf16.msra.mxu0 %v500_v7  ;;  %488 = vmatpush3.bf16.msra.mxu1 %v500_v7 }
  0x10   :  { %421 = vmatprep.subr.bf16.mxu0 %v501_v8  ;;  %481 = vmatprep.subr.bf16.mxu1 %v501_v8 }
  0x13   :  { %422 = vmatpush3.bf16.msra.mxu0 %v502_v9  ;;  %489 = vmatpush3.bf16.msra.mxu1 %v502_v9 }
  0x14   :  { %423 = vmatprep.subr.bf16.mxu0 %v503_v10  ;;  %482 = vmatprep.subr.bf16.mxu1 %v503_v10 }
  0x17   :  { %424 = vmatpush3.bf16.msra.mxu0 %v504_v13  ;;  %490 = vmatpush3.bf16.msra.mxu1 %v504_v13 }
  0x18   :  { %425 = vmatprep.subr.bf16.mxu0 %v505_v14  ;;  %483 = vmatprep.subr.bf16.mxu1 %v505_v14 }
  0x1b   :  { %426 = vmatpush3.bf16.msra.mxu0 %v506_v15  ;;  %491 = vmatpush3.bf16.msra.mxu1 %v506_v15 }
  0x1c   :  { %427 = vmatprep.subr.bf16.mxu0 %v507_v16  ;;  %484 = vmatprep.subr.bf16.mxu1 %v507_v16 }
  0x1f   :  { %428 = vmatpush3.bf16.msra.mxu0 %v508_v17  ;;  %492 = vmatpush3.bf16.msra.mxu1 %v508_v17 }
  0x22   :  { %279 = vmatmul.mubr.bf16.vlgmr.msra.gmra.mrb[0].mxu0 %v509_v18  ;;  %311 = vmatmul.mubr.bf16.vlgmr.msra.gmra.mrb[0].mxu1 %v512_v19 }
  0x23   :  { %286 = vmatprep.mubr.bf16.mxu0 %v515_v20  ;;  %318 = vmatprep.mubr.bf16.mxu1 %v517_v21 }
  0x2a   :  { %287 = vmatmul.mubr.bf16.gmra.mrb[4].mxu0 %v519_v22  ;;  %319 = vmatmul.mubr.bf16.gmra.mrb[4].mxu1 %v520_v23 }
  0x2b   :  { %294 = vmatprep.mubr.bf16.mxu0 %v521_v24  ;;  %326 = vmatprep.mubr.bf16.mxu1 %v523_v25 }
  0x32   :  { %295 = vmatmul.mubr.bf16.gmra.mrb[8].mxu0 %v525_v26  ;;  %327 = vmatmul.mubr.bf16.gmra.mrb[8].mxu1 %v526_v27 }
  0x33   :  { %302 = vmatprep.mubr.bf16.mxu0 %v527_v28  ;;  %334 = vmatprep.mubr.bf16.mxu1 %v529_v29 }
  0x3a   :  { %303 = vmatmul.mubr.bf16.gmra.mrb[12].mxu0 %v531_v30  ;;  %335 = vmatmul.mubr.bf16.gmra.mrb[12].mxu1 %v532_v31 }
  0xf5   :  { %v429_v32 = vpop.f32.mrb[0].mxu0  ;;  %v453_v33 = vpop.f32.mrb[0].mxu1 }
  0xf6   :  { %v430_v35 = vpop.f32.mrb[1].mxu0  ;;  %v454_v36 = vpop.f32.mrb[1].mxu1 }
  0xf7   :  { %v431_v37 = vadd.f32 %v430_v35, %v429_v32  ;;  %v455_v38 = vadd.f32 %v454_v36, %v453_v33  ;;  %v432_v39 = vpop.f32.mrb[2].mxu0  ;;  %v456_v40 = vpop.f32.mrb[2].mxu1 }
  0xf8   :  { %v433_v41 = vpop.f32.mrb[3].mxu0  ;;  %v457_v42 = vpop.f32.mrb[3].mxu1 }
  0xf9   :  { %v281_v43 = vadd.f32 %v431_v37, %v652_v34  ;;  %v313_v44 = vadd.f32 %v455_v38, %v652_v34  ;;  %v434_v45 = vadd.f32 %v433_v41, %v432_v39  ;;  %v458_v46 = vadd.f32 %v457_v42, %v456_v40 }
  0xfb   :  { %v343_v47 = vmax.f32 %v281_v43, 0.0  ;;  %v351_v48 = vmax.f32 %v313_v44, 0.0  ;;  %v284_v49 = vadd.f32 %v434_v45, %v652_v34  ;;  %v316_v50 = vadd.f32 %v458_v46, %v652_v34 }
  0xfd   :  { %360 = vst.msk [vmem:[%s737_s3] sm:$0xff] %vm359_vm0, %v343_v47  ;;  %368 = vst.msk [vmem:[%s737_s3 + $0x40] sm:$0xff] %vm359_vm0, %v351_v48  ;;  %v344_v51 = vmax.f32 %v284_v49, 0.0  ;;  %v352_v52 = vmax.f32 %v316_v50, 0.0  ;;  %v435_v53 = vpop.f32.mrb[4].mxu0  ;;  %v459_v54 = vpop.f32.mrb[4].mxu1 }
  0xfe   :  { %v436_v55 = vpop.f32.mrb[5].mxu0  ;;  %v460_v56 = vpop.f32.mrb[5].mxu1 }
  0xff   :  { %361 = vst.msk [vmem:[%s737_s3 + $0x8] sm:$0xff] %vm359_vm0, %v344_v51  ;;  %369 = vst.msk [vmem:[%s737_s3 + $0x48] sm:$0xff] %vm359_vm0, %v352_v52  ;;  %v437_v57 = vadd.f32 %v436_v55, %v435_v53  ;;  %v461_v58 = vadd.f32 %v460_v56, %v459_v54  ;;  %v438_v59 = vpop.f32.mrb[6].mxu0  ;;  %v462_v60 = vpop.f32.mrb[6].mxu1 }
 0x100   :  { %v439_v61 = vpop.f32.mrb[7].mxu0  ;;  %v463_v62 = vpop.f32.mrb[7].mxu1 }
 0x101   :  { %v289_v63 = vadd.f32 %v437_v57, %v652_v34  ;;  %v321_v0 = vadd.f32 %v461_v58, %v652_v34  ;;  %v440_v1 = vadd.f32 %v439_v61, %v438_v59  ;;  %v464_v2 = vadd.f32 %v463_v62, %v462_v60 }
 0x103   :  { %v345_v3 = vmax.f32 %v289_v63, 0.0  ;;  %v353_v4 = vmax.f32 %v321_v0, 0.0  ;;  %v292_v5 = vadd.f32 %v440_v1, %v652_v34  ;;  %v324_v6 = vadd.f32 %v464_v2, %v652_v34 }
 0x105   :  { %362 = vst.msk [vmem:[%s737_s3 + $0x10] sm:$0xff] %vm359_vm0, %v345_v3  ;;  %370 = vst.msk [vmem:[%s737_s3 + $0x50] sm:$0xff] %vm359_vm0, %v353_v4  ;;  %v346_v7 = vmax.f32 %v292_v5, 0.0  ;;  %v354_v8 = vmax.f32 %v324_v6, 0.0  ;;  %v441_v9 = vpop.f32.mrb[8].mxu0  ;;  %v465_v10 = vpop.f32.mrb[8].mxu1 }
 0x106   :  { %v442_v11 = vpop.f32.mrb[9].mxu0  ;;  %v466_v12 = vpop.f32.mrb[9].mxu1 }
 0x107   :  { %363 = vst.msk [vmem:[%s737_s3 + $0x18] sm:$0xff] %vm359_vm0, %v346_v7  ;;  %371 = vst.msk [vmem:[%s737_s3 + $0x58] sm:$0xff] %vm359_vm0, %v354_v8  ;;  %v443_v13 = vadd.f32 %v442_v11, %v441_v9  ;;  %v467_v14 = vadd.f32 %v466_v12, %v465_v10  ;;  %v444_v15 = vpop.f32.mrb[10].mxu0  ;;  %v468_v16 = vpop.f32.mrb[10].mxu1 }
 0x108   :  { %v445_v17 = vpop.f32.mrb[11].mxu0  ;;  %v469_v18 = vpop.f32.mrb[11].mxu1 }
 0x109   :  { %v297_v19 = vadd.f32 %v443_v13, %v652_v34  ;;  %v329_v20 = vadd.f32 %v467_v14, %v652_v34  ;;  %v446_v21 = vadd.f32 %v445_v17, %v444_v15  ;;  %v470_v22 = vadd.f32 %v469_v18, %v468_v16 }
 0x10b   :  { %v347_v23 = vmax.f32 %v297_v19, 0.0  ;;  %v355_v24 = vmax.f32 %v329_v20, 0.0  ;;  %v300_v25 = vadd.f32 %v446_v21, %v652_v34  ;;  %v332_v26 = vadd.f32 %v470_v22, %v652_v34 }
 0x10d   :  { %364 = vst.msk [vmem:[%s737_s3 + $0x20] sm:$0xff] %vm359_vm0, %v347_v23  ;;  %372 = vst.msk [vmem:[%s737_s3 + $0x60] sm:$0xff] %vm359_vm0, %v355_v24  ;;  %v348_v27 = vmax.f32 %v300_v25, 0.0  ;;  %v356_v28 = vmax.f32 %v332_v26, 0.0  ;;  %v447_v29 = vpop.f32.mrb[12].mxu0  ;;  %v471_v30 = vpop.f32.mrb[12].mxu1 }
 0x10e   :  { %v448_v31 = vpop.f32.mrb[13].mxu0  ;;  %v472_v32 = vpop.f32.mrb[13].mxu1 }
 0x10f   :  { %365 = vst.msk [vmem:[%s737_s3 + $0x28] sm:$0xff] %vm359_vm0, %v348_v27  ;;  %373 = vst.msk [vmem:[%s737_s3 + $0x68] sm:$0xff] %vm359_vm0, %v356_v28  ;;  %v449_v33 = vadd.f32 %v448_v31, %v447_v29  ;;  %v473_v35 = vadd.f32 %v472_v32, %v471_v30  ;;  %v450_v36 = vpop.f32.mrb[14].mxu0  ;;  %v474_v37 = vpop.f32.mrb[14].mxu1 }
 0x110   :  { %v451_v38 = vpop.f32.mrb[15].mxu0  ;;  %v475_v39 = vpop.f32.mrb[15].mxu1 }
 0x111   :  { %v305_v40 = vadd.f32 %v449_v33, %v652_v34  ;;  %v337_v41 = vadd.f32 %v473_v35, %v652_v34  ;;  %v452_v42 = vadd.f32 %v451_v38, %v450_v36  ;;  %v476_v43 = vadd.f32 %v475_v39, %v474_v37 }
 0x113   :  { %v349_v44 = vmax.f32 %v305_v40, 0.0  ;;  %v357_v45 = vmax.f32 %v337_v41, 0.0  ;;  %v308_v46 = vadd.f32 %v452_v42, %v652_v34  ;;  %v340_v47 = vadd.f32 %v476_v43, %v652_v34 }
 0x115   :  { %366 = vst.msk [vmem:[%s737_s3 + $0x30] sm:$0xff] %vm359_vm0, %v349_v44  ;;  %374 = vst.msk [vmem:[%s737_s3 + $0x70] sm:$0xff] %vm359_vm0, %v357_v45  ;;  %v350_v48 = vmax.f32 %v308_v46, 0.0  ;;  %v358_v49 = vmax.f32 %v340_v47, 0.0 }
 0x117   :  { %367 = vst.msk [vmem:[%s737_s3 + $0x38] sm:$0xff] %vm359_vm0, %v350_v48  ;;  %375 = vst.msk [vmem:[%s737_s3 + $0x78] sm:$0xff] %vm359_vm0, %v358_v49 }

// kernel: forward.17
= control target key start
LH: loop header
LB: loop body
LE: loop exit
PB: predicated region body
PF: predicated region fallthrough
CT: control target
= control target key end

     0   :  { %vm394_vm0 = vcmask 130048   ;;  %s822_s1 = inlined_call_operand.vmem [shape: bf16[256,16], index: 1, kind: input, shape index: {}]   ;;  %s823_s0 = inlined_call_operand.vmem [shape: bf16[128,256], index: 0, kind: input, shape index: {}]   ;;  %s824_s2 = inlined_call_operand.vmem [shape: f32[1,16], index: 2, kind: input, shape index: {}]   ;;  %s825_s3 = inlined_call_operand.vmem [shape: f32[128,16], index: 3, kind: input, shape index: {}]   ;;  %s826_s4 = inlined_call_operand.vmem [shape: f32[128,16], index: 4, kind: output, shape index: {}]  }
   0x1   :  { %v528_v0 = vld [vmem:[%s822_s1 + $0x40] sm:$0xff]   ;;  %v530_v2 = vld [vmem:[%s822_s1 + $0x48] sm:$0xff]   ;;  %v532_v4 = vld [vmem:[%s822_s1 + $0x50] sm:$0xff]  }
   0x2   :  { %v529_v1 = vld [vmem:[%s822_s1] sm:$0xff]   ;;  %448 = vmatprep.subr.bf16.mxu0 %v528_v0  ;;  %512 = vmatprep.subr.bf16.mxu1 %v528_v0  ;;  %v531_v3 = vld [vmem:[%s822_s1 + $0x8] sm:$0xff]   ;;  %v533_v5 = vld [vmem:[%s822_s1 + $0x10] sm:$0xff]  }
   0x3   :  { %449 = vmatpush3.bf16.msra.mxu0 %v529_v1  ;;  %520 = vmatpush3.bf16.msra.mxu1 %v529_v1  ;;  %v534_v6 = vld [vmem:[%s822_s1 + $0x58] sm:$0xff]   ;;  %v536_v8 = vld [vmem:[%s822_s1 + $0x60] sm:$0xff]   ;;  %v538_v10 = vld [vmem:[%s822_s1 + $0x68] sm:$0xff]  }
   0x4   :  { %450 = vmatprep.subr.bf16.mxu0 %v530_v2  ;;  %513 = vmatprep.subr.bf16.mxu1 %v530_v2  ;;  %v535_v7 = vld [vmem:[%s822_s1 + $0x18] sm:$0xff]   ;;  %v537_v9 = vld [vmem:[%s822_s1 + $0x20] sm:$0xff]   ;;  %v539_v13 = vld [vmem:[%s822_s1 + $0x28] sm:$0xff]  }
   0x5   :  { %v546_v11 = vld [vmem:[%s823_s0 + $0x4] ss:$8 sps:$4 sm:$0xff]   ;;  %v540_v14 = vld [vmem:[%s822_s1 + $0x70] sm:$0xff]   ;;  %v542_v16 = vld [vmem:[%s822_s1 + $0x78] sm:$0xff]  }
   0x6   :  { %v549_v12 = vld [vmem:[%s823_s0 + $0x44] ss:$8 sps:$4 sm:$0xff]   ;;  %281 = vmatprep.mubr.bf16.mxu0 %v546_v11  ;;  %v541_v15 = vld [vmem:[%s822_s1 + $0x30] sm:$0xff]   ;;  %v543_v17 = vld [vmem:[%s822_s1 + $0x38] sm:$0xff]  }
   0x7   :  { %451 = vmatpush3.bf16.msra.mxu0 %v531_v3  ;;  %521 = vmatpush3.bf16.msra.mxu1 %v531_v3  ;;  %v544_v18 = vld [vmem:[%s823_s0] ss:$8 sps:$4 sm:$0xff]   ;;  %v550_v20 = vld [vmem:[%s823_s0 + $0x14] ss:$8 sps:$4 sm:$0xff]   ;;  %v554_v22 = vld [vmem:[%s823_s0 + $0x10] ss:$8 sps:$4 sm:$0xff]  }
   0x8   :  { %452 = vmatprep.subr.bf16.mxu0 %v532_v4  ;;  %514 = vmatprep.subr.bf16.mxu1 %v532_v4  ;;  %v547_v19 = vld [vmem:[%s823_s0 + $0x40] ss:$8 sps:$4 sm:$0xff]   ;;  %v552_v21 = vld [vmem:[%s823_s0 + $0x54] ss:$8 sps:$4 sm:$0xff]   ;;  %v555_v23 = vld [vmem:[%s823_s0 + $0x50] ss:$8 sps:$4 sm:$0xff]  }
   0x9   :  { %313 = vmatprep.mubr.bf16.mxu1 %v549_v12  ;;  %v556_v24 = vld [vmem:[%s823_s0 + $0x24] ss:$8 sps:$4 sm:$0xff]   ;;  %v560_v26 = vld [vmem:[%s823_s0 + $0x20] ss:$8 sps:$4 sm:$0xff]   ;;  %v562_v28 = vld [vmem:[%s823_s0 + $0x34] ss:$8 sps:$4 sm:$0xff]  }
   0xa   :  { %v558_v25 = vld [vmem:[%s823_s0 + $0x64] ss:$8 sps:$4 sm:$0xff]   ;;  %v561_v27 = vld [vmem:[%s823_s0 + $0x60] ss:$8 sps:$4 sm:$0xff]   ;;  %v564_v29 = vld [vmem:[%s823_s0 + $0x74] ss:$8 sps:$4 sm:$0xff]  }
   0xb   :  { %453 = vmatpush3.bf16.msra.mxu0 %v533_v5  ;;  %522 = vmatpush3.bf16.msra.mxu1 %v533_v5  ;;  %v566_v30 = vld [vmem:[%s823_s0 + $0x30] ss:$8 sps:$4 sm:$0xff]   ;;  %v692_v34 = vld [vmem:[%s824_s2] ss:$0 sm:$0xff]  ;;  %v347_v49 = vld [vmem:[%s825_s3 + $0x8] sm:$0xff] }
   0xc   :  { %454 = vmatprep.subr.bf16.mxu0 %v534_v6  ;;  %515 = vmatprep.subr.bf16.mxu1 %v534_v6  ;;  %v567_v31 = vld [vmem:[%s823_s0 + $0x70] ss:$8 sps:$4 sm:$0xff]   ;;  %v346_v41 = vld [vmem:[%s825_s3] sm:$0xff]  ;;  %v355_v50 = vld [vmem:[%s825_s3 + $0x48] sm:$0xff] }
   0xd   :  { %v354_v42 = vld [vmem:[%s825_s3 + $0x40] sm:$0xff]  ;;  %v348_v5 = vld [vmem:[%s825_s3 + $0x10] sm:$0xff] }
   0xe   :  { %v356_v6 = vld [vmem:[%s825_s3 + $0x50] sm:$0xff] }
   0xf   :  { %455 = vmatpush3.bf16.msra.mxu0 %v535_v7  ;;  %523 = vmatpush3.bf16.msra.mxu1 %v535_v7 }
  0x10   :  { %456 = vmatprep.subr.bf16.mxu0 %v536_v8  ;;  %516 = vmatprep.subr.bf16.mxu1 %v536_v8 }
  0x13   :  { %457 = vmatpush3.bf16.msra.mxu0 %v537_v9  ;;  %524 = vmatpush3.bf16.msra.mxu1 %v537_v9 }
  0x14   :  { %458 = vmatprep.subr.bf16.mxu0 %v538_v10  ;;  %517 = vmatprep.subr.bf16.mxu1 %v538_v10 }
  0x17   :  { %459 = vmatpush3.bf16.msra.mxu0 %v539_v13  ;;  %525 = vmatpush3.bf16.msra.mxu1 %v539_v13  ;;  %v349_v13 = vld [vmem:[%s825_s3 + $0x18] sm:$0xff] }
  0x18   :  { %460 = vmatprep.subr.bf16.mxu0 %v540_v14  ;;  %518 = vmatprep.subr.bf16.mxu1 %v540_v14  ;;  %v357_v14 = vld [vmem:[%s825_s3 + $0x58] sm:$0xff] }
  0x1b   :  { %461 = vmatpush3.bf16.msra.mxu0 %v541_v15  ;;  %526 = vmatpush3.bf16.msra.mxu1 %v541_v15 }
  0x1c   :  { %462 = vmatprep.subr.bf16.mxu0 %v542_v16  ;;  %519 = vmatprep.subr.bf16.mxu1 %v542_v16 }
  0x1f   :  { %463 = vmatpush3.bf16.msra.mxu0 %v543_v17  ;;  %527 = vmatpush3.bf16.msra.mxu1 %v543_v17 }
  0x22   :  { %282 = vmatmul.mubr.bf16.vlgmr.msra.gmra.mrb[0].mxu0 %v544_v18  ;;  %314 = vmatmul.mubr.bf16.vlgmr.msra.gmra.mrb[0].mxu1 %v547_v19 }
  0x23   :  { %289 = vmatprep.mubr.bf16.mxu0 %v550_v20  ;;  %321 = vmatprep.mubr.bf16.mxu1 %v552_v21 }
  0x2a   :  { %290 = vmatmul.mubr.bf16.gmra.mrb[4].mxu0 %v554_v22  ;;  %322 = vmatmul.mubr.bf16.gmra.mrb[4].mxu1 %v555_v23 }
  0x2b   :  { %297 = vmatprep.mubr.bf16.mxu0 %v556_v24  ;;  %329 = vmatprep.mubr.bf16.mxu1 %v558_v25 }
  0x32   :  { %298 = vmatmul.mubr.bf16.gmra.mrb[8].mxu0 %v560_v26  ;;  %330 = vmatmul.mubr.bf16.gmra.mrb[8].mxu1 %v561_v27 }
  0x33   :  { %305 = vmatprep.mubr.bf16.mxu0 %v562_v28  ;;  %337 = vmatprep.mubr.bf16.mxu1 %v564_v29 }
  0x3a   :  { %306 = vmatmul.mubr.bf16.gmra.mrb[12].mxu0 %v566_v30  ;;  %338 = vmatmul.mubr.bf16.gmra.mrb[12].mxu1 %v567_v31 }
  0xf5   :  { %v464_v32 = vpop.f32.mrb[0].mxu0  ;;  %v488_v33 = vpop.f32.mrb[0].mxu1 }
  0xf6   :  { %v465_v35 = vpop.f32.mrb[1].mxu0  ;;  %v489_v36 = vpop.f32.mrb[1].mxu1 }
  0xf7   :  { %v466_v37 = vadd.f32 %v465_v35, %v464_v32  ;;  %v490_v38 = vadd.f32 %v489_v36, %v488_v33  ;;  %v467_v39 = vpop.f32.mrb[2].mxu0  ;;  %v491_v40 = vpop.f32.mrb[2].mxu1  ;;  %v350_v33 = vld [vmem:[%s825_s3 + $0x20] sm:$0xff] }
  0xf8   :  { %v468_v43 = vpop.f32.mrb[3].mxu0  ;;  %v492_v44 = vpop.f32.mrb[3].mxu1  ;;  %v358_v35 = vld [vmem:[%s825_s3 + $0x60] sm:$0xff] }
  0xf9   :  { %v284_v45 = vadd.f32 %v466_v37, %v692_v34  ;;  %v316_v46 = vadd.f32 %v490_v38, %v692_v34  ;;  %v469_v47 = vadd.f32 %v468_v43, %v467_v39  ;;  %v493_v48 = vadd.f32 %v492_v44, %v491_v40  ;;  %v359_v43 = vld [vmem:[%s825_s3 + $0x68] sm:$0xff] }
  0xfb   :  { %v362_v51 = vadd.f32 %v346_v41, %v284_v45  ;;  %v370_v52 = vadd.f32 %v354_v42, %v316_v46  ;;  %v287_v53 = vadd.f32 %v469_v47, %v692_v34  ;;  %v319_v54 = vadd.f32 %v493_v48, %v692_v34  ;;  %v351_v42 = vld [vmem:[%s825_s3 + $0x28] sm:$0xff] }
  0xfd   :  { %v378_v55 = vmax.f32 %v362_v51, 0.0  ;;  %v386_v56 = vmax.f32 %v370_v52, 0.0  ;;  %v363_v57 = vadd.f32 %v347_v49, %v287_v53  ;;  %v371_v58 = vadd.f32 %v355_v50, %v319_v54  ;;  %v470_v59 = vpop.f32.mrb[4].mxu0  ;;  %v494_v60 = vpop.f32.mrb[4].mxu1 }
  0xfe   :  { %v471_v61 = vpop.f32.mrb[5].mxu0  ;;  %v495_v62 = vpop.f32.mrb[5].mxu1 }
  0xff   :  { %395 = vst.msk [vmem:[%s826_s4] sm:$0xff] %vm394_vm0, %v378_v55  ;;  %403 = vst.msk [vmem:[%s826_s4 + $0x40] sm:$0xff] %vm394_vm0, %v386_v56  ;;  %v379_v63 = vmax.f32 %v363_v57, 0.0  ;;  %v387_v0 = vmax.f32 %v371_v58, 0.0  ;;  %v472_v1 = vadd.f32 %v471_v61, %v470_v59  ;;  %v496_v2 = vadd.f32 %v495_v62, %v494_v60  ;;  %v473_v3 = vpop.f32.mrb[6].mxu0  ;;  %v497_v4 = vpop.f32.mrb[6].mxu1 }
 0x100   :  { %v474_v7 = vpop.f32.mrb[7].mxu0  ;;  %v498_v8 = vpop.f32.mrb[7].mxu1  ;;  %v352_v62 = vld [vmem:[%s825_s3 + $0x30] sm:$0xff] }
 0x101   :  { %396 = vst.msk [vmem:[%s826_s4 + $0x8] sm:$0xff] %vm394_vm0, %v379_v63  ;;  %404 = vst.msk [vmem:[%s826_s4 + $0x48] sm:$0xff] %vm394_vm0, %v387_v0  ;;  %v292_v9 = vadd.f32 %v472_v1, %v692_v34  ;;  %v324_v10 = vadd.f32 %v496_v2, %v692_v34  ;;  %v475_v11 = vadd.f32 %v474_v7, %v473_v3  ;;  %v360_v63 = vld [vmem:[%s825_s3 + $0x70] sm:$0xff]  ;;  %v361_v7 = vld [vmem:[%s825_s3 + $0x78] sm:$0xff] }
 0x102   :  { %v499_v12 = vadd.f32 %v498_v8, %v497_v4 }
 0x103   :  { %v364_v15 = vadd.f32 %v348_v5, %v292_v9  ;;  %v372_v16 = vadd.f32 %v356_v6, %v324_v10  ;;  %v295_v17 = vadd.f32 %v475_v11, %v692_v34  ;;  %v353_v6 = vld [vmem:[%s825_s3 + $0x38] sm:$0xff] }
 0x104   :  { %v327_v18 = vadd.f32 %v499_v12, %v692_v34 }
 0x105   :  { %v380_v19 = vmax.f32 %v364_v15, 0.0  ;;  %v388_v20 = vmax.f32 %v372_v16, 0.0  ;;  %v365_v21 = vadd.f32 %v349_v13, %v295_v17  ;;  %v476_v23 = vpop.f32.mrb[8].mxu0  ;;  %v500_v24 = vpop.f32.mrb[8].mxu1 }
 0x106   :  { %v373_v22 = vadd.f32 %v357_v14, %v327_v18  ;;  %v477_v25 = vpop.f32.mrb[9].mxu0  ;;  %v501_v26 = vpop.f32.mrb[9].mxu1 }
 0x107   :  { %397 = vst.msk [vmem:[%s826_s4 + $0x10] sm:$0xff] %vm394_vm0, %v380_v19  ;;  %405 = vst.msk [vmem:[%s826_s4 + $0x50] sm:$0xff] %vm394_vm0, %v388_v20  ;;  %v381_v27 = vmax.f32 %v365_v21, 0.0  ;;  %v478_v29 = vadd.f32 %v477_v25, %v476_v23  ;;  %v502_v30 = vadd.f32 %v501_v26, %v500_v24  ;;  %v479_v31 = vpop.f32.mrb[10].mxu0  ;;  %v503_v32 = vpop.f32.mrb[10].mxu1 }
 0x108   :  { %v389_v28 = vmax.f32 %v373_v22, 0.0  ;;  %v480_v36 = vpop.f32.mrb[11].mxu0  ;;  %v504_v37 = vpop.f32.mrb[11].mxu1 }
 0x109   :  { %398 = vst.msk [vmem:[%s826_s4 + $0x18] sm:$0xff] %vm394_vm0, %v381_v27  ;;  %v300_v38 = vadd.f32 %v478_v29, %v692_v34  ;;  %v332_v39 = vadd.f32 %v502_v30, %v692_v34  ;;  %v481_v40 = vadd.f32 %v480_v36, %v479_v31  ;;  %v505_v41 = vadd.f32 %v504_v37, %v503_v32 }
 0x10a   :  { %406 = vst.msk [vmem:[%s826_s4 + $0x58] sm:$0xff] %vm394_vm0, %v389_v28 }
 0x10b   :  { %v366_v44 = vadd.f32 %v350_v33, %v300_v38  ;;  %v374_v45 = vadd.f32 %v358_v35, %v332_v39  ;;  %v303_v46 = vadd.f32 %v481_v40, %v692_v34  ;;  %v335_v47 = vadd.f32 %v505_v41, %v692_v34 }
 0x10d   :  { %v382_v48 = vmax.f32 %v366_v44, 0.0  ;;  %v390_v49 = vmax.f32 %v374_v45, 0.0  ;;  %v367_v50 = vadd.f32 %v351_v42, %v303_v46  ;;  %v375_v51 = vadd.f32 %v359_v43, %v335_v47  ;;  %v482_v52 = vpop.f32.mrb[12].mxu0  ;;  %v506_v53 = vpop.f32.mrb[12].mxu1 }
 0x10e   :  { %v483_v54 = vpop.f32.mrb[13].mxu0  ;;  %v507_v55 = vpop.f32.mrb[13].mxu1 }
 0x10f   :  { %399 = vst.msk [vmem:[%s826_s4 + $0x20] sm:$0xff] %vm394_vm0, %v382_v48  ;;  %407 = vst.msk [vmem:[%s826_s4 + $0x60] sm:$0xff] %vm394_vm0, %v390_v49  ;;  %v383_v56 = vmax.f32 %v367_v50, 0.0  ;;  %v391_v57 = vmax.f32 %v375_v51, 0.0  ;;  %v484_v58 = vadd.f32 %v483_v54, %v482_v52  ;;  %v508_v59 = vadd.f32 %v507_v55, %v506_v53  ;;  %v485_v60 = vpop.f32.mrb[14].mxu0  ;;  %v509_v61 = vpop.f32.mrb[14].mxu1 }
 0x110   :  { %v486_v0 = vpop.f32.mrb[15].mxu0  ;;  %v510_v1 = vpop.f32.mrb[15].mxu1 }
 0x111   :  { %400 = vst.msk [vmem:[%s826_s4 + $0x28] sm:$0xff] %vm394_vm0, %v383_v56  ;;  %408 = vst.msk [vmem:[%s826_s4 + $0x68] sm:$0xff] %vm394_vm0, %v391_v57  ;;  %v308_v2 = vadd.f32 %v484_v58, %v692_v34  ;;  %v340_v3 = vadd.f32 %v508_v59, %v692_v34  ;;  %v487_v4 = vadd.f32 %v486_v0, %v485_v60 }
 0x112   :  { %v511_v5 = vadd.f32 %v510_v1, %v509_v61 }
 0x113   :  { %v368_v8 = vadd.f32 %v352_v62, %v308_v2  ;;  %v376_v9 = vadd.f32 %v360_v63, %v340_v3  ;;  %v311_v10 = vadd.f32 %v487_v4, %v692_v34 }
 0x114   :  { %v343_v11 = vadd.f32 %v511_v5, %v692_v34 }
 0x115   :  { %v384_v12 = vmax.f32 %v368_v8, 0.0  ;;  %v392_v13 = vmax.f32 %v376_v9, 0.0  ;;  %v369_v14 = vadd.f32 %v353_v6, %v311_v10 }
 0x116   :  { %v377_v15 = vadd.f32 %v361_v7, %v343_v11 }
 0x117   :  { %401 = vst.msk [vmem:[%s826_s4 + $0x30] sm:$0xff] %vm394_vm0, %v384_v12  ;;  %409 = vst.msk [vmem:[%s826_s4 + $0x70] sm:$0xff] %vm394_vm0, %v392_v13  ;;  %v385_v16 = vmax.f32 %v369_v14, 0.0 }
 0x118   :  { %v393_v17 = vmax.f32 %v377_v15, 0.0 }
 0x119   :  { %402 = vst.msk [vmem:[%s826_s4 + $0x38] sm:$0xff] %vm394_vm0, %v385_v16 }
 0x11a   :  { %410 = vst.msk [vmem:[%s826_s4 + $0x78] sm:$0xff] %vm394_vm0, %v393_v17 }

// kernel: forward.18
= control target key start
LH: loop header
LB: loop body
LE: loop exit
PB: predicated region body
PF: predicated region fallthrough
CT: control target
= control target key end

     0   :  { %vm227_vm0 = vcmask 261120   ;;  %s418_s1 = inlined_call_operand.vmem [shape: bf16[256,32], index: 1, kind: input, shape index: {}]   ;;  %s419_s0 = inlined_call_operand.vmem [shape: bf16[32,256], index: 0, kind: input, shape index: {}]   ;;  %s420_s2 = inlined_call_operand.vmem [shape: f32[1,32], index: 2, kind: input, shape index: {}]   ;;  %s421_s3 = inlined_call_operand.vmem [shape: f32[32,32], index: 3, kind: output, shape index: {}]  }
   0x1   :  { %v301_v0 = vld [vmem:[%s418_s1 + $0x40] sm:$0xff]   ;;  %v303_v2 = vld [vmem:[%s418_s1 + $0x48] sm:$0xff]   ;;  %v305_v4 = vld [vmem:[%s418_s1 + $0x50] sm:$0xff]  }
   0x2   :  { %v302_v1 = vld [vmem:[%s418_s1] sm:$0xff]   ;;  %257 = vmatprep.subr.bf16.mxu0 %v301_v0  ;;  %285 = vmatprep.subr.bf16.mxu1 %v301_v0  ;;  %v304_v3 = vld [vmem:[%s418_s1 + $0x8] sm:$0xff]   ;;  %v306_v5 = vld [vmem:[%s418_s1 + $0x10] sm:$0xff]  }
   0x3   :  { %258 = vmatpush3.bf16.msra.mxu0 %v302_v1  ;;  %293 = vmatpush3.bf16.msra.mxu1 %v302_v1  ;;  %v307_v6 = vld [vmem:[%s418_s1 + $0x58] sm:$0xff]   ;;  %v309_v8 = vld [vmem:[%s418_s1 + $0x60] sm:$0xff]   ;;  %v311_v10 = vld [vmem:[%s418_s1 + $0x68] sm:$0xff]  }
   0x4   :  { %259 = vmatprep.subr.bf16.mxu0 %v303_v2  ;;  %286 = vmatprep.subr.bf16.mxu1 %v303_v2  ;;  %v308_v7 = vld [vmem:[%s418_s1 + $0x18] sm:$0xff]   ;;  %v310_v9 = vld [vmem:[%s418_s1 + $0x20] sm:$0xff]   ;;  %v312_v13 = vld [vmem:[%s418_s1 + $0x28] sm:$0xff]  }
   0x5   :  { %v319_v11 = vld [vmem:[%s419_s0 + $0x4] ss:$8 sps:$4 sm:$0xff]   ;;  %v322_v12 = vld [vmem:[%s419_s0 + $0x14] ss:$8 sps:$4 sm:$0xff]   ;;  %v317_v18 = vld [vmem:[%s419_s0] ss:$8 sps:$4 sm:$0xff]  }
   0x6   :  { %v313_v14 = vld [vmem:[%s418_s1 + $0x70] sm:$0xff]   ;;  %206 = vmatprep.mubr.bf16.mxu0 %v319_v11  ;;  %214 = vmatprep.mubr.bf16.mxu1 %v322_v12  ;;  %v315_v16 = vld [vmem:[%s418_s1 + $0x78] sm:$0xff]   ;;  %v236_v22 = vld [vmem:[%s420_s2] ss:$0 sm:$0xff] }
   0x7   :  { %260 = vmatpush3.bf16.msra.mxu0 %v304_v3  ;;  %294 = vmatpush3.bf16.msra.mxu1 %v304_v3  ;;  %v314_v15 = vld [vmem:[%s418_s1 + $0x30] sm:$0xff]   ;;  %v316_v17 = vld [vmem:[%s418_s1 + $0x38] sm:$0xff]  }
   0x8   :  { %261 = vmatprep.subr.bf16.mxu0 %v305_v4  ;;  %287 = vmatprep.subr.bf16.mxu1 %v305_v4  ;;  %v320_v19 = vld [vmem:[%s419_s0 + $0x10] ss:$8 sps:$4 sm:$0xff]  }
   0xb   :  { %262 = vmatpush3.bf16.msra.mxu0 %v306_v5  ;;  %295 = vmatpush3.bf16.msra.mxu1 %v306_v5 }
   0xc   :  { %263 = vmatprep.subr.bf16.mxu0 %v307_v6  ;;  %288 = vmatprep.subr.bf16.mxu1 %v307_v6 }
   0xf   :  { %264 = vmatpush3.bf16.msra.mxu0 %v308_v7  ;;  %296 = vmatpush3.bf16.msra.mxu1 %v308_v7 }
  0x10   :  { %265 = vmatprep.subr.bf16.mxu0 %v309_v8  ;;  %289 = vmatprep.subr.bf16.mxu1 %v309_v8 }
  0x13   :  { %266 = vmatpush3.bf16.msra.mxu0 %v310_v9  ;;  %297 = vmatpush3.bf16.msra.mxu1 %v310_v9 }
  0x14   :  { %267 = vmatprep.subr.bf16.mxu0 %v311_v10  ;;  %290 = vmatprep.subr.bf16.mxu1 %v311_v10 }
  0x17   :  { %268 = vmatpush3.bf16.msra.mxu0 %v312_v13  ;;  %298 = vmatpush3.bf16.msra.mxu1 %v312_v13 }
  0x18   :  { %269 = vmatprep.subr.bf16.mxu0 %v313_v14  ;;  %291 = vmatprep.subr.bf16.mxu1 %v313_v14 }
  0x1b   :  { %270 = vmatpush3.bf16.msra.mxu0 %v314_v15  ;;  %299 = vmatpush3.bf16.msra.mxu1 %v314_v15 }
  0x1c   :  { %271 = vmatprep.subr.bf16.mxu0 %v315_v16  ;;  %292 = vmatprep.subr.bf16.mxu1 %v315_v16 }
  0x1f   :  { %272 = vmatpush3.bf16.msra.mxu0 %v316_v17  ;;  %300 = vmatpush3.bf16.msra.mxu1 %v316_v17 }
  0x22   :  { %207 = vmatmul.mubr.bf16.vlgmr.msra.gmra.mrb[0].mxu0 %v317_v18  ;;  %215 = vmatmul.mubr.bf16.vlgmr.msra.gmra.mrb[0].mxu1 %v320_v19 }
  0xf5   :  { %v273_v20 = vpop.f32.mrb[0].mxu0  ;;  %v279_v21 = vpop.f32.mrb[0].mxu1 }
  0xf6   :  { %v274_v23 = vpop.f32.mrb[1].mxu0  ;;  %v280_v24 = vpop.f32.mrb[1].mxu1 }
  0xf7   :  { %v275_v25 = vadd.f32 %v274_v23, %v273_v20  ;;  %v281_v26 = vadd.f32 %v280_v24, %v279_v21  ;;  %v276_v27 = vpop.f32.mrb[2].mxu0  ;;  %v282_v28 = vpop.f32.mrb[2].mxu1 }
  0xf8   :  { %v277_v29 = vpop.f32.mrb[3].mxu0  ;;  %v283_v30 = vpop.f32.mrb[3].mxu1 }
  0xf9   :  { %v209_v31 = vadd.f32 %v275_v25, %v236_v22  ;;  %v217_v32 = vadd.f32 %v281_v26, %v236_v22  ;;  %v278_v33 = vadd.f32 %v277_v29, %v276_v27  ;;  %v284_v34 = vadd.f32 %v283_v30, %v282_v28 }
  0xfb   :  { %v223_v35 = vmax.f32 %v209_v31, 0.0  ;;  %v225_v36 = vmax.f32 %v217_v32, 0.0  ;;  %v212_v37 = vadd.f32 %v278_v33, %v236_v22  ;;  %v220_v38 = vadd.f32 %v284_v34, %v236_v22 }
  0xfd   :  { %228 = vst.msk [vmem:[%s421_s3] sm:$0xff] %vm227_vm0, %v223_v35  ;;  %230 = vst.msk [vmem:[%s421_s3 + $0x10] sm:$0xff] %vm227_vm0, %v225_v36  ;;  %v224_v39 = vmax.f32 %v212_v37, 0.0  ;;  %v226_v40 = vmax.f32 %v220_v38, 0.0 }
  0xff   :  { %229 = vst.msk [vmem:[%s421_s3 + $0x8] sm:$0xff] %vm227_vm0, %v224_v39  ;;  %231 = vst.msk [vmem:[%s421_s3 + $0x18] sm:$0xff] %vm227_vm0, %v226_v40 }

// kernel: forward.19
= control target key start
LH: loop header
LB: loop body
LE: loop exit
PB: predicated region body
PF: predicated region fallthrough
CT: control target
= control target key end

     0   :  { %vm151_vm0 = vcmask 261120   ;;  %s276_s1 = inlined_call_operand.vmem [shape: bf16[128,32], index: 1, kind: input, shape index: {}]   ;;  %s277_s0 = inlined_call_operand.vmem [shape: bf16[32,128], index: 0, kind: input, shape index: {}]   ;;  %s278_s2 = inlined_call_operand.vmem [shape: f32[1,32], index: 2, kind: input, shape index: {}]   ;;  %s279_s3 = inlined_call_operand.vmem [shape: f32[32,32], index: 3, kind: output, shape index: {}]  }
   0x1   :  { %v201_v0 = vld [vmem:[%s276_s1] sm:$0xff]   ;;  %v202_v1 = vld [vmem:[%s276_s1 + $0x8] sm:$0xff]   ;;  %v203_v2 = vld [vmem:[%s276_s1 + $0x10] sm:$0xff]  }
   0x2   :  { %181 = vmatprep.subr.bf16.mxu0 %v201_v0  ;;  %v204_v3 = vld [vmem:[%s276_s1 + $0x18] sm:$0xff]   ;;  %v209_v4 = vld [vmem:[%s277_s0] sm:$0xff]   ;;  %v206_v6 = vld [vmem:[%s276_s1 + $0x28] sm:$0xff]  }
   0x3   :  { %182 = vmatpush3.bf16.msra.mxu0 %v201_v0  ;;  %197 = vmatprep.mubr.bf16.mxu0 %v209_v4  ;;  %v205_v5 = vld [vmem:[%s276_s1 + $0x20] sm:$0xff]   ;;  %v207_v7 = vld [vmem:[%s276_s1 + $0x30] sm:$0xff]   ;;  %v208_v8 = vld [vmem:[%s276_s1 + $0x38] sm:$0xff]  }
   0x4   :  { %183 = vmatprep.subr.bf16.mxu0 %v202_v1  ;;  %v210_v9 = vld [vmem:[%s277_s0 + $0x8] sm:$0xff]   ;;  %v160_v10 = vld [vmem:[%s278_s2] ss:$0 sm:$0xff] }
   0x7   :  { %184 = vmatpush3.bf16.msra.mxu0 %v202_v1 }
   0x8   :  { %185 = vmatprep.subr.bf16.mxu0 %v203_v2 }
   0xb   :  { %186 = vmatpush3.bf16.msra.mxu0 %v203_v2 }
   0xc   :  { %187 = vmatprep.subr.bf16.mxu0 %v204_v3 }
   0xf   :  { %188 = vmatpush3.bf16.msra.mxu0 %v204_v3 }
  0x10   :  { %189 = vmatprep.subr.bf16.mxu0 %v205_v5 }
  0x13   :  { %190 = vmatpush3.bf16.msra.mxu0 %v205_v5 }
  0x14   :  { %191 = vmatprep.subr.bf16.mxu0 %v206_v6 }
  0x17   :  { %192 = vmatpush3.bf16.msra.mxu0 %v206_v6 }
  0x18   :  { %193 = vmatprep.subr.bf16.mxu0 %v207_v7 }
  0x1b   :  { %194 = vmatpush3.bf16.msra.mxu0 %v207_v7 }
  0x1c   :  { %195 = vmatprep.subr.bf16.mxu0 %v208_v8 }
  0x1f   :  { %196 = vmatpush3.bf16.msra.mxu0 %v208_v8 }
  0x22   :  { %198 = vmatmul.mubr.bf16.vlgmr.msra.gmra.mrb[0].mxu0 %v210_v9 }
  0xf5   :  { %v199_v11 = vpop.f32.mrb[0].mxu0 }
  0xf6   :  { %v145_v12 = vadd.f32 %v199_v11, %v160_v10  ;;  %v136_v13 = vpop.f32.mrb[1].mxu0 }
  0xf7   :  { %v137_v14 = vadd.f32 %v160_v10, %v136_v13  ;;  %v200_v15 = vpop.f32.mrb[2].mxu0 }
  0xf8   :  { %154 = vst.msk [vmem:[%s279_s3 + $0x10] sm:$0xff] %vm151_vm0, %v145_v12  ;;  %v148_v16 = vadd.f32 %v200_v15, %v160_v10  ;;  %v139_v17 = vpop.f32.mrb[3].mxu0 }
  0xf9   :  { %152 = vst.msk [vmem:[%s279_s3] sm:$0xff] %vm151_vm0, %v137_v14  ;;  %v140_v18 = vadd.f32 %v160_v10, %v139_v17 }
  0xfa   :  { %155 = vst.msk [vmem:[%s279_s3 + $0x18] sm:$0xff] %vm151_vm0, %v148_v16 }
  0xfb   :  { %153 = vst.msk [vmem:[%s279_s3 + $0x8] sm:$0xff] %vm151_vm0, %v140_v18 }

// kernel: forward.20
= control target key start
LH: loop header
LB: loop body
LE: loop exit
PB: predicated region body
PF: predicated region fallthrough
CT: control target
= control target key end

     0   :  { %vm367_vm0 = vcmask 261120   ;;  %s643_s1 = inlined_call_operand.vmem [shape: bf16[384,32], index: 1, kind: input, shape index: {}]   ;;  %s644_s0 = inlined_call_operand.vmem [shape: bf16[32,384], index: 0, kind: input, shape index: {}]   ;;  %s645_s2 = inlined_call_operand.vmem [shape: f32[1,32], index: 2, kind: input, shape index: {}]   ;;  %s646_s3 = inlined_call_operand.vmem [shape: f32[32,32], index: 3, kind: input, shape index: {}]   ;;  %s647_s4 = inlined_call_operand.vmem [shape: f32[32,32], index: 4, kind: output, shape index: {}]  }
   0x1   :  { %v465_v0 = vld [vmem:[%s643_s1 + $0x40] sm:$0xff]   ;;  %v467_v2 = vld [vmem:[%s643_s1 + $0x48] sm:$0xff]   ;;  %v470_v5 = vld [vmem:[%s643_s1 + $0x50] sm:$0xff]  }
   0x2   :  { %v466_v1 = vld [vmem:[%s643_s1] sm:$0xff]   ;;  %407 = vmatprep.subr.bf16.mxu0 %v465_v0  ;;  %v469_v4 = vld [vmem:[%s643_s1 + $0x8] sm:$0xff]   ;;  %v472_v7 = vld [vmem:[%s643_s1 + $0x10] sm:$0xff]  }
   0x3   :  { %408 = vmatpush3.bf16.msra.mxu0 %v466_v1  ;;  %v468_v3 = vld [vmem:[%s643_s1 + $0x80] sm:$0xff]   ;;  %v471_v6 = vld [vmem:[%s643_s1 + $0x88] sm:$0xff]   ;;  %v473_v8 = vld [vmem:[%s643_s1 + $0x58] sm:$0xff]  }
   0x4   :  { %409 = vmatprep.subr.bf16.mxu0 %v467_v2  ;;  %445 = vmatprep.subr.bf16.mxu1 %v468_v3  ;;  %v474_v9 = vld [vmem:[%s643_s1 + $0x90] sm:$0xff]   ;;  %v475_v10 = vld [vmem:[%s643_s1 + $0x18] sm:$0xff]   ;;  %v476_v11 = vld [vmem:[%s643_s1 + $0x60] sm:$0xff]  }
   0x5   :  { %446 = vmatpush3.bf16.msra.mxu1 %v468_v3  ;;  %v477_v12 = vld [vmem:[%s643_s1 + $0x98] sm:$0xff]   ;;  %v478_v13 = vld [vmem:[%s643_s1 + $0x20] sm:$0xff]   ;;  %v479_v15 = vld [vmem:[%s643_s1 + $0x68] sm:$0xff]  }
   0x6   :  { %447 = vmatprep.subr.bf16.mxu1 %v471_v6  ;;  %v480_v14 = vld [vmem:[%s643_s1 + $0xa0] sm:$0xff]   ;;  %v481_v16 = vld [vmem:[%s643_s1 + $0x28] sm:$0xff]   ;;  %v482_v18 = vld [vmem:[%s643_s1 + $0x70] sm:$0xff]  }
   0x7   :  { %410 = vmatpush3.bf16.msra.mxu0 %v469_v4  ;;  %v483_v17 = vld [vmem:[%s643_s1 + $0xa8] sm:$0xff]   ;;  %v484_v19 = vld [vmem:[%s643_s1 + $0x30] sm:$0xff]   ;;  %v485_v20 = vld [vmem:[%s643_s1 + $0x78] sm:$0xff]  }
   0x8   :  { %411 = vmatprep.subr.bf16.mxu0 %v470_v5  ;;  %v486_v21 = vld [vmem:[%s643_s1 + $0xb0] sm:$0xff]   ;;  %v487_v23 = vld [vmem:[%s643_s1 + $0x38] sm:$0xff]   ;;  %v488_v26 = vld [vmem:[%s644_s0] ss:$12 sps:$4 sm:$0xff]  }
   0x9   :  { %448 = vmatpush3.bf16.msra.mxu1 %v471_v6  ;;  %v490_v22 = vld [vmem:[%s644_s0 + $0x4] ss:$12 sps:$4 sm:$0xff]   ;;  %v492_v24 = vld [vmem:[%s644_s0 + $0x8] ss:$12 sps:$4 sm:$0xff]   ;;  %v491_v25 = vld [vmem:[%s643_s1 + $0xb8] sm:$0xff]  }
   0xa   :  { %449 = vmatprep.subr.bf16.mxu1 %v474_v9  ;;  %289 = vmatprep.mubr.bf16.mxu0 %v490_v22  ;;  %v494_v27 = vld [vmem:[%s644_s0 + $0x1c] ss:$12 sps:$4 sm:$0xff]   ;;  %v493_v28 = vld [vmem:[%s644_s0 + $0x20] ss:$12 sps:$4 sm:$0xff]   ;;  %v496_v29 = vld [vmem:[%s644_s0 + $0x18] ss:$12 sps:$4 sm:$0xff]  }
   0xb   :  { %412 = vmatpush3.bf16.msra.mxu0 %v472_v7  ;;  %461 = vmatprep.mubr.bf16.mxu1 %v492_v24  ;;  %v376_v32 = vld [vmem:[%s645_s2] ss:$0 sm:$0xff]  ;;  %v356_v45 = vld [vmem:[%s646_s3 + $0x8] sm:$0xff]  ;;  %v357_v58 = vld [vmem:[%s646_s3 + $0x10] sm:$0xff] }
   0xc   :  { %413 = vmatprep.subr.bf16.mxu0 %v473_v8  ;;  %v355_v40 = vld [vmem:[%s646_s3] sm:$0xff]  ;;  %v358_v61 = vld [vmem:[%s646_s3 + $0x18] sm:$0xff] }
   0xd   :  { %450 = vmatpush3.bf16.msra.mxu1 %v474_v9 }
   0xe   :  { %451 = vmatprep.subr.bf16.mxu1 %v477_v12 }
   0xf   :  { %414 = vmatpush3.bf16.msra.mxu0 %v475_v10 }
  0x10   :  { %415 = vmatprep.subr.bf16.mxu0 %v476_v11 }
  0x11   :  { %452 = vmatpush3.bf16.msra.mxu1 %v477_v12 }
  0x12   :  { %453 = vmatprep.subr.bf16.mxu1 %v480_v14 }
  0x13   :  { %416 = vmatpush3.bf16.msra.mxu0 %v478_v13 }
  0x14   :  { %417 = vmatprep.subr.bf16.mxu0 %v479_v15 }
  0x15   :  { %454 = vmatpush3.bf16.msra.mxu1 %v480_v14 }
  0x16   :  { %455 = vmatprep.subr.bf16.mxu1 %v483_v17 }
  0x17   :  { %418 = vmatpush3.bf16.msra.mxu0 %v481_v16 }
  0x18   :  { %419 = vmatprep.subr.bf16.mxu0 %v482_v18 }
  0x19   :  { %456 = vmatpush3.bf16.msra.mxu1 %v483_v17 }
  0x1a   :  { %457 = vmatprep.subr.bf16.mxu1 %v486_v21 }
  0x1b   :  { %420 = vmatpush3.bf16.msra.mxu0 %v484_v19 }
  0x1c   :  { %421 = vmatprep.subr.bf16.mxu0 %v485_v20 }
  0x1d   :  { %458 = vmatpush3.bf16.msra.mxu1 %v486_v21 }
  0x1e   :  { %459 = vmatprep.subr.bf16.mxu1 %v491_v25 }
  0x1f   :  { %422 = vmatpush3.bf16.msra.mxu0 %v487_v23 }
  0x21   :  { %460 = vmatpush3.bf16.msra.mxu1 %v491_v25 }
  0x22   :  { %290 = vmatmul.mubr.bf16.vlgmr.msra.gmra.mrb[0].mxu0 %v488_v26 }
  0x23   :  { %297 = vmatprep.mubr.bf16.mxu0 %v494_v27 }
  0x24   :  { %462 = vmatmul.mubr.bf16.vlgmr.msra.gmra.mrb[0].mxu1 %v493_v28 }
  0x2a   :  { %298 = vmatmul.mubr.bf16.gmra.mrb[4].mxu0 %v496_v29 }
  0xf5   :  { %v423_v30 = vpop.f32.mrb[0].mxu0 }
  0xf6   :  { %v424_v31 = vpop.f32.mrb[1].mxu0 }
  0xf7   :  { %v425_v33 = vadd.f32 %v424_v31, %v423_v30  ;;  %v426_v34 = vpop.f32.mrb[2].mxu0  ;;  %v463_v36 = vpop.f32.mrb[0].mxu1 }
  0xf8   :  { %v427_v35 = vpop.f32.mrb[3].mxu0  ;;  %v340_v39 = vpop.f32.mrb[1].mxu1 }
  0xf9   :  { %v428_v37 = vadd.f32 %v427_v35, %v426_v34  ;;  %v292_v38 = vadd.f32 %v425_v33, %v376_v32  ;;  %v464_v41 = vpop.f32.mrb[2].mxu1 }
  0xfa   :  { %v343_v44 = vpop.f32.mrb[3].mxu1 }
  0xfb   :  { %v341_v42 = vadd.f32 %v340_v39, %v292_v38  ;;  %v295_v43 = vadd.f32 %v428_v37, %v376_v32 }
  0xfd   :  { %v359_v46 = vadd.f32 %v355_v40, %v341_v42  ;;  %v344_v47 = vadd.f32 %v343_v44, %v295_v43  ;;  %v429_v48 = vpop.f32.mrb[4].mxu0 }
  0xfe   :  { %v430_v49 = vpop.f32.mrb[5].mxu0 }
  0xff   :  { %v363_v50 = vmax.f32 %v359_v46, 0.0  ;;  %v360_v51 = vadd.f32 %v356_v45, %v344_v47  ;;  %v431_v52 = vadd.f32 %v430_v49, %v429_v48  ;;  %v432_v53 = vpop.f32.mrb[6].mxu0 }
 0x100   :  { %v433_v54 = vpop.f32.mrb[7].mxu0 }
 0x101   :  { %368 = vst.msk [vmem:[%s647_s4] sm:$0xff] %vm367_vm0, %v363_v50  ;;  %v364_v55 = vmax.f32 %v360_v51, 0.0  ;;  %v300_v56 = vadd.f32 %v431_v52, %v376_v32  ;;  %v434_v57 = vadd.f32 %v433_v54, %v432_v53 }
 0x103   :  { %369 = vst.msk [vmem:[%s647_s4 + $0x8] sm:$0xff] %vm367_vm0, %v364_v55  ;;  %v349_v59 = vadd.f32 %v463_v36, %v300_v56  ;;  %v303_v60 = vadd.f32 %v434_v57, %v376_v32 }
 0x105   :  { %v361_v62 = vadd.f32 %v357_v58, %v349_v59  ;;  %v352_v63 = vadd.f32 %v464_v41, %v303_v60 }
 0x107   :  { %v365_v0 = vmax.f32 %v361_v62, 0.0  ;;  %v362_v1 = vadd.f32 %v358_v61, %v352_v63 }
 0x109   :  { %370 = vst.msk [vmem:[%s647_s4 + $0x10] sm:$0xff] %vm367_vm0, %v365_v0  ;;  %v366_v2 = vmax.f32 %v362_v1, 0.0 }
 0x10b   :  { %371 = vst.msk [vmem:[%s647_s4 + $0x18] sm:$0xff] %vm367_vm0, %v366_v2 }

// kernel: forward.21
= control target key start
LH: loop header
LB: loop body
LE: loop exit
PB: predicated region body
PF: predicated region fallthrough
CT: control target
= control target key end

     0   :  { %v422_v1 = vmov 0.0   ;;  %vm423_vm0 = vmmov 0   ;;  %vm308_vm1 = vcmask 523264   ;;  %s528_s1 = inlined_call_operand.vmem [shape: bf16[384,64], index: 1, kind: input, shape index: {}]   ;;  %s529_s0 = inlined_call_operand.vmem [shape: bf16[8,384], index: 0, kind: input, shape index: {}]   ;;  %s530_s2 = inlined_call_operand.vmem [shape: f32[1,64], index: 2, kind: input, shape index: {}]   ;;  %s531_s3 = inlined_call_operand.vmem [shape: f32[8,64], index: 3, kind: output, shape index: {}]  }
   0x1   :  { %v395_v0 = vld [vmem:[%s528_s1 + $0x40] sm:$0xff]   ;;  %373 = vmatprep.subr.bf16.mxu1 %v422_v1  ;;  %389 = vmatprep.mubr.msk.bf16.mxu1 %vm423_vm0, %v422_v1  ;;  %v398_v4 = vld [vmem:[%s528_s1 + $0x48] sm:$0xff]   ;;  %v401_v7 = vld [vmem:[%s528_s1 + $0x50] sm:$0xff]  }
   0x2   :  { %v396_v2 = vld [vmem:[%s528_s1] sm:$0xff]   ;;  %342 = vmatprep.subr.bf16.mxu0 %v395_v0  ;;  %v399_v5 = vld [vmem:[%s528_s1 + $0x8] sm:$0xff]   ;;  %v402_v8 = vld [vmem:[%s528_s1 + $0x10] sm:$0xff]  }
   0x3   :  { %v397_v3 = vld [vmem:[%s528_s1 + $0x80] sm:$0xff]   ;;  %343 = vmatpush3.bf16.msra.mxu0 %v396_v2  ;;  %v400_v6 = vld [vmem:[%s528_s1 + $0x88] sm:$0xff]   ;;  %v403_v9 = vld [vmem:[%s528_s1 + $0x90] sm:$0xff]  }
   0x4   :  { %374 = vmatpush3.bf16.msra.mxu1 %v397_v3  ;;  %344 = vmatprep.subr.bf16.mxu0 %v398_v4  ;;  %v404_v10 = vld [vmem:[%s528_s1 + $0x58] sm:$0xff]   ;;  %v407_v13 = vld [vmem:[%s528_s1 + $0x60] sm:$0xff]   ;;  %v410_v16 = vld [vmem:[%s528_s1 + $0x68] sm:$0xff]  }
   0x5   :  { %375 = vmatprep.subr.bf16.mxu1 %v422_v1  ;;  %v405_v11 = vld [vmem:[%s528_s1 + $0x18] sm:$0xff]   ;;  %v408_v14 = vld [vmem:[%s528_s1 + $0x20] sm:$0xff]   ;;  %v411_v17 = vld [vmem:[%s528_s1 + $0x28] sm:$0xff]  }
   0x6   :  { %v406_v12 = vld [vmem:[%s528_s1 + $0x98] sm:$0xff]   ;;  %v409_v15 = vld [vmem:[%s528_s1 + $0xa0] sm:$0xff]   ;;  %v412_v18 = vld [vmem:[%s528_s1 + $0xa8] sm:$0xff]  }
   0x7   :  { %345 = vmatpush3.bf16.msra.mxu0 %v399_v5  ;;  %v413_v19 = vld [vmem:[%s528_s1 + $0x70] sm:$0xff]   ;;  %v15_v22 = vld [vmem:[%s529_s0] sm:$0xff]  ;;  %v416_v23 = vld [vmem:[%s528_s1 + $0x78] sm:$0xff]  }
   0x8   :  { %376 = vmatpush3.bf16.msra.mxu1 %v400_v6  ;;  %346 = vmatprep.subr.bf16.mxu0 %v401_v7  ;;  %v414_v20 = vld [vmem:[%s528_s1 + $0x30] sm:$0xff]   ;;  %v316_v24 = vcombine.high %v15_v22, %v15_v22  ;;  %v417_v25 = vld [vmem:[%s528_s1 + $0x38] sm:$0xff]   ;;  %v315_v27 = vcombine.low %v15_v22, %v15_v22  ;;  %v420_v28 = vld [vmem:[%s529_s0 + $0x8] ss:$0 sps:$4 sm:$0xff]  }
   0x9   :  { %377 = vmatprep.subr.bf16.mxu1 %v422_v1  ;;  %v415_v21 = vld [vmem:[%s528_s1 + $0xb0] sm:$0xff]   ;;  %v421_v26 = vld [vmem:[%s528_s1 + $0xb8] sm:$0xff]   ;;  %v314_v31 = vld [vmem:[%s530_s2] ss:$0 sm:$0xff] }
   0xa   :  { %259 = vmatprep.mubr.bf16.mxu0 %v316_v24 }
   0xb   :  { %347 = vmatpush3.bf16.msra.mxu0 %v402_v8 }
   0xc   :  { %378 = vmatpush3.bf16.msra.mxu1 %v403_v9  ;;  %348 = vmatprep.subr.bf16.mxu0 %v404_v10 }
   0xd   :  { %379 = vmatprep.subr.bf16.mxu1 %v422_v1 }
   0xf   :  { %349 = vmatpush3.bf16.msra.mxu0 %v405_v11 }
  0x10   :  { %380 = vmatpush3.bf16.msra.mxu1 %v406_v12  ;;  %350 = vmatprep.subr.bf16.mxu0 %v407_v13 }
  0x11   :  { %381 = vmatprep.subr.bf16.mxu1 %v422_v1 }
  0x13   :  { %351 = vmatpush3.bf16.msra.mxu0 %v408_v14 }
  0x14   :  { %382 = vmatpush3.bf16.msra.mxu1 %v409_v15  ;;  %352 = vmatprep.subr.bf16.mxu0 %v410_v16 }
  0x15   :  { %383 = vmatprep.subr.bf16.mxu1 %v422_v1 }
  0x17   :  { %353 = vmatpush3.bf16.msra.mxu0 %v411_v17 }
  0x18   :  { %384 = vmatpush3.bf16.msra.mxu1 %v412_v18  ;;  %354 = vmatprep.subr.bf16.mxu0 %v413_v19 }
  0x19   :  { %385 = vmatprep.subr.bf16.mxu1 %v422_v1 }
  0x1b   :  { %355 = vmatpush3.bf16.msra.mxu0 %v414_v20 }
  0x1c   :  { %386 = vmatpush3.bf16.msra.mxu1 %v415_v21  ;;  %356 = vmatprep.subr.bf16.mxu0 %v416_v23 }
  0x1d   :  { %387 = vmatprep.subr.bf16.mxu1 %v422_v1 }
  0x1f   :  { %357 = vmatpush3.bf16.msra.mxu0 %v417_v25 }
  0x20   :  { %388 = vmatpush3.bf16.msra.mxu1 %v421_v26 }
  0x22   :  { %260 = vmatmul.mubr.bf16.vlgmr.msra.gmra.mrb[0].mxu0 %v315_v27 }
  0x23   :  { %390 = vmatmul.mubr.bf16.vlgmr.msra.gmra.mrb[0].mxu1 %v420_v28 }
  0xf5   :  { %v358_v29 = vpop.f32.mrb[0].mxu0 }
  0xf6   :  { %v359_v30 = vpop.f32.mrb[1].mxu0  ;;  %v301_v32 = vpop.f32.mrb[0].mxu1 }
  0xf7   :  { %v360_v33 = vadd.f32 %v359_v30, %v358_v29  ;;  %v361_v34 = vpop.f32.mrb[2].mxu0  ;;  %v391_v35 = vpop.f32.mrb[1].mxu1 }
  0xf8   :  { %v362_v36 = vpop.f32.mrb[3].mxu0  ;;  %v304_v37 = vpop.f32.mrb[2].mxu1 }
  0xf9   :  { %v262_v38 = vadd.f32 %v360_v33, %v314_v31  ;;  %v392_v39 = vpop.f32.mrb[3].mxu1 }
  0xfb   :  { %v302_v40 = vadd.f32 %v301_v32, %v262_v38 }
  0xfd   :  { %v307_v41 = vmax.f32 %v302_v40, 0.0 }
  0xff   :  { %309 = vst.msk [vmem:[%s531_s3] sm:$0xff] %vm308_vm1, %v307_v41 }

// kernel: forward.22
= control target key start
LH: loop header
LB: loop body
LE: loop exit
PB: predicated region body
PF: predicated region fallthrough
CT: control target
= control target key end

     0   :  { %v181_v0 = vmov 0.0   ;;  %vm182_vm0 = vmmov 0   ;;  %vm127_vm1 = vcmask 523264   ;;  %s236_s1 = inlined_call_operand.vmem [shape: bf16[128,64], index: 1, kind: input, shape index: {}]   ;;  %s237_s0 = inlined_call_operand.vmem [shape: bf16[8,128], index: 0, kind: input, shape index: {}]   ;;  %s238_s2 = inlined_call_operand.vmem [shape: f32[1,64], index: 2, kind: input, shape index: {}]   ;;  %s239_s3 = inlined_call_operand.vmem [shape: f32[8,64], index: 3, kind: output, shape index: {}]  }
   0x1   :  { %151 = vmatprep.subr.bf16.mxu0 %v181_v0  ;;  %v173_v1 = vld [vmem:[%s236_s1] sm:$0xff]   ;;  %167 = vmatprep.mubr.msk.bf16.mxu0 %vm182_vm0, %v181_v0  ;;  %v174_v2 = vld [vmem:[%s236_s1 + $0x8] sm:$0xff]   ;;  %v175_v3 = vld [vmem:[%s236_s1 + $0x10] sm:$0xff]  }
   0x2   :  { %152 = vmatpush3.bf16.msra.mxu0 %v173_v1  ;;  %v176_v4 = vld [vmem:[%s236_s1 + $0x18] sm:$0xff]   ;;  %v177_v5 = vld [vmem:[%s236_s1 + $0x20] sm:$0xff]   ;;  %v178_v6 = vld [vmem:[%s236_s1 + $0x28] sm:$0xff]  }
   0x3   :  { %153 = vmatprep.subr.bf16.mxu0 %v181_v0  ;;  %v179_v7 = vld [vmem:[%s236_s1 + $0x30] sm:$0xff]   ;;  %v180_v8 = vld [vmem:[%s236_s1 + $0x38] sm:$0xff]   ;;  %v15_v9 = vld [vmem:[%s237_s0] sm:$0xf] }
   0x4   :  { %v133_v10 = vld [vmem:[%s238_s2] ss:$0 sm:$0xff] }
   0x6   :  { %154 = vmatpush3.bf16.msra.mxu0 %v174_v2 }
   0x7   :  { %155 = vmatprep.subr.bf16.mxu0 %v181_v0 }
   0xa   :  { %156 = vmatpush3.bf16.msra.mxu0 %v175_v3 }
   0xb   :  { %157 = vmatprep.subr.bf16.mxu0 %v181_v0 }
   0xe   :  { %158 = vmatpush3.bf16.msra.mxu0 %v176_v4 }
   0xf   :  { %159 = vmatprep.subr.bf16.mxu0 %v181_v0 }
  0x12   :  { %160 = vmatpush3.bf16.msra.mxu0 %v177_v5 }
  0x13   :  { %161 = vmatprep.subr.bf16.mxu0 %v181_v0 }
  0x16   :  { %162 = vmatpush3.bf16.msra.mxu0 %v178_v6 }
  0x17   :  { %163 = vmatprep.subr.bf16.mxu0 %v181_v0 }
  0x1a   :  { %164 = vmatpush3.bf16.msra.mxu0 %v179_v7 }
  0x1b   :  { %165 = vmatprep.subr.bf16.mxu0 %v181_v0 }
  0x1e   :  { %166 = vmatpush3.bf16.msra.mxu0 %v180_v8 }
  0x21   :  { %168 = vmatmul.mubr.bf16.vlgmr.msra.gmra.mrb[0].mxu0 %v15_v9 }
  0xf4   :  { %v121_v11 = vpop.f32.mrb[0].mxu0 }
  0xf5   :  { %v122_v12 = vadd.f32 %v133_v10, %v121_v11  ;;  %v169_v13 = vpop.f32.mrb[1].mxu0 }
  0xf6   :  { %v124_v14 = vpop.f32.mrb[2].mxu0 }
  0xf7   :  { %128 = vst.msk [vmem:[%s239_s3] sm:$0xff] %vm127_vm1, %v122_v12  ;;  %v170_v15 = vpop.f32.mrb[3].mxu0 }

// kernel: forward.23
= control target key start
LH: loop header
LB: loop body
LE: loop exit
PB: predicated region body
PF: predicated region fallthrough
CT: control target
= control target key end

     0   :  { %v661_v35 = vmov 0.0   ;;  %vm662_vm0 = vmmov 0   ;;  %vm489_vm1 = vcmask 523264   ;;  %s826_s1 = inlined_call_operand.vmem [shape: bf16[640,64], index: 1, kind: input, shape index: {}]   ;;  %s827_s0 = inlined_call_operand.vmem [shape: bf16[8,640], index: 0, kind: input, shape index: {}]   ;;  %s828_s2 = inlined_call_operand.vmem [shape: f32[1,64], index: 2, kind: input, shape index: {}]   ;;  %s829_s3 = inlined_call_operand.vmem [shape: f32[8,64], index: 3, kind: input, shape index: {}]   ;;  %s830_s4 = inlined_call_operand.vmem [shape: f32[8,64], index: 4, kind: output, shape index: {}]  }
   0x1   :  { %v616_v0 = vld [vmem:[%s826_s1 + $0x40] sm:$0xff]   ;;  %v620_v4 = vld [vmem:[%s826_s1 + $0x48] sm:$0xff]   ;;  %v624_v8 = vld [vmem:[%s826_s1 + $0x50] sm:$0xff]  }
   0x2   :  { %v617_v1 = vld [vmem:[%s826_s1] sm:$0xff]   ;;  %541 = vmatprep.subr.bf16.mxu0 %v616_v0  ;;  %v621_v5 = vld [vmem:[%s826_s1 + $0x8] sm:$0xff]   ;;  %v625_v9 = vld [vmem:[%s826_s1 + $0x10] sm:$0xff]  }
   0x3   :  { %v618_v2 = vld [vmem:[%s826_s1 + $0xc0] sm:$0xff]   ;;  %542 = vmatpush3.bf16.msra.mxu0 %v617_v1  ;;  %v622_v6 = vld [vmem:[%s826_s1 + $0xc8] sm:$0xff]   ;;  %v626_v10 = vld [vmem:[%s826_s1 + $0xd0] sm:$0xff]  }
   0x4   :  { %v619_v3 = vld [vmem:[%s826_s1 + $0x80] sm:$0xff]   ;;  %563 = vmatprep.subr.bf16.mxu1 %v618_v2  ;;  %543 = vmatprep.subr.bf16.mxu0 %v620_v4  ;;  %v623_v7 = vld [vmem:[%s826_s1 + $0x88] sm:$0xff]   ;;  %v627_v11 = vld [vmem:[%s826_s1 + $0x90] sm:$0xff]  }
   0x5   :  { %564 = vmatpush3.bf16.msra.mxu1 %v619_v3  ;;  %v628_v12 = vld [vmem:[%s826_s1 + $0x58] sm:$0xff]   ;;  %v632_v16 = vld [vmem:[%s826_s1 + $0x60] sm:$0xff]   ;;  %v636_v20 = vld [vmem:[%s826_s1 + $0x68] sm:$0xff]  }
   0x6   :  { %565 = vmatprep.subr.bf16.mxu1 %v622_v6  ;;  %v629_v13 = vld [vmem:[%s826_s1 + $0x18] sm:$0xff]   ;;  %v633_v17 = vld [vmem:[%s826_s1 + $0x20] sm:$0xff]   ;;  %v637_v21 = vld [vmem:[%s826_s1 + $0x28] sm:$0xff]  }
   0x7   :  { %544 = vmatpush3.bf16.msra.mxu0 %v621_v5  ;;  %v630_v14 = vld [vmem:[%s826_s1 + $0xd8] sm:$0xff]   ;;  %v634_v18 = vld [vmem:[%s826_s1 + $0xe0] sm:$0xff]   ;;  %v638_v22 = vld [vmem:[%s826_s1 + $0xe8] sm:$0xff]  }
   0x8   :  { %545 = vmatprep.subr.bf16.mxu0 %v624_v8  ;;  %v631_v15 = vld [vmem:[%s826_s1 + $0x98] sm:$0xff]   ;;  %v635_v19 = vld [vmem:[%s826_s1 + $0xa0] sm:$0xff]   ;;  %v639_v23 = vld [vmem:[%s826_s1 + $0xa8] sm:$0xff]  }
   0x9   :  { %566 = vmatpush3.bf16.msra.mxu1 %v623_v7  ;;  %v640_v24 = vld [vmem:[%s826_s1 + $0x70] sm:$0xff]   ;;  %v644_v28 = vld [vmem:[%s826_s1 + $0x78] sm:$0xff]   ;;  %v18_v31 = vld [vmem:[%s827_s0] sm:$0xff] }
   0xa   :  { %567 = vmatprep.subr.bf16.mxu1 %v626_v10  ;;  %v641_v25 = vld [vmem:[%s826_s1 + $0x30] sm:$0xff]   ;;  %v645_v29 = vld [vmem:[%s826_s1 + $0x38] sm:$0xff]   ;;  %v496_v32 = vcombine.low %v18_v31, %v18_v31  ;;  %v497_v33 = vcombine.high %v18_v31, %v18_v31  ;;  %v19_v36 = vld [vmem:[%s827_s0 + $0x8] sm:$0xff] }
   0xb   :  { %546 = vmatpush3.bf16.msra.mxu0 %v625_v9  ;;  %v642_v26 = vld [vmem:[%s826_s1 + $0xf0] sm:$0xff]   ;;  %v646_v30 = vld [vmem:[%s826_s1 + $0xf8] sm:$0xff]   ;;  %v498_v37 = vcombine.low %v19_v36, %v19_v36  ;;  %v499_v38 = vcombine.high %v19_v36, %v19_v36  ;;  %v653_v39 = vld [vmem:[%s826_s1 + $0x100] sm:$0xff]  }
   0xc   :  { %547 = vmatprep.subr.bf16.mxu0 %v628_v12  ;;  %v643_v27 = vld [vmem:[%s826_s1 + $0xb0] sm:$0xff]   ;;  %v650_v34 = vld [vmem:[%s826_s1 + $0xb8] sm:$0xff]   ;;  %398 = vmatprep.mubr.bf16.mxu0 %v497_v33  ;;  %v654_v40 = vld [vmem:[%s826_s1 + $0x108] sm:$0xff]  }
   0xd   :  { %568 = vmatpush3.bf16.msra.mxu1 %v627_v11  ;;  %438 = vmatprep.mubr.bf16.mxu1 %v499_v38  ;;  %v655_v41 = vld [vmem:[%s826_s1 + $0x110] sm:$0xff]   ;;  %v656_v42 = vld [vmem:[%s826_s1 + $0x118] sm:$0xff]   ;;  %v657_v43 = vld [vmem:[%s826_s1 + $0x120] sm:$0xff]  }
   0xe   :  { %569 = vmatprep.subr.bf16.mxu1 %v630_v14  ;;  %v658_v44 = vld [vmem:[%s826_s1 + $0x128] sm:$0xff]   ;;  %v659_v45 = vld [vmem:[%s826_s1 + $0x130] sm:$0xff]   ;;  %v660_v46 = vld [vmem:[%s826_s1 + $0x138] sm:$0xff]  }
   0xf   :  { %548 = vmatpush3.bf16.msra.mxu0 %v629_v13  ;;  %v649_v47 = vld [vmem:[%s827_s0 + $0x10] ss:$0 sps:$4 sm:$0xff]   ;;  %v495_v49 = vld [vmem:[%s828_s2] ss:$0 sm:$0xff] }
  0x10   :  { %549 = vmatprep.subr.bf16.mxu0 %v632_v16  ;;  %v486_v62 = vld [vmem:[%s829_s3] sm:$0xff] }
  0x11   :  { %570 = vmatpush3.bf16.msra.mxu1 %v631_v15 }
  0x12   :  { %571 = vmatprep.subr.bf16.mxu1 %v634_v18 }
  0x13   :  { %550 = vmatpush3.bf16.msra.mxu0 %v633_v17 }
  0x14   :  { %551 = vmatprep.subr.bf16.mxu0 %v636_v20 }
  0x15   :  { %572 = vmatpush3.bf16.msra.mxu1 %v635_v19 }
  0x16   :  { %573 = vmatprep.subr.bf16.mxu1 %v638_v22 }
  0x17   :  { %552 = vmatpush3.bf16.msra.mxu0 %v637_v21 }
  0x18   :  { %553 = vmatprep.subr.bf16.mxu0 %v640_v24 }
  0x19   :  { %574 = vmatpush3.bf16.msra.mxu1 %v639_v23 }
  0x1a   :  { %575 = vmatprep.subr.bf16.mxu1 %v642_v26 }
  0x1b   :  { %554 = vmatpush3.bf16.msra.mxu0 %v641_v25 }
  0x1c   :  { %555 = vmatprep.subr.bf16.mxu0 %v644_v28 }
  0x1d   :  { %576 = vmatpush3.bf16.msra.mxu1 %v643_v27 }
  0x1e   :  { %577 = vmatprep.subr.bf16.mxu1 %v646_v30 }
  0x1f   :  { %556 = vmatpush3.bf16.msra.mxu0 %v645_v29 }
  0x20   :  { %594 = vmatprep.subr.bf16.mxu0 %v661_v35 }
  0x21   :  { %578 = vmatpush3.bf16.msra.mxu1 %v650_v34 }
  0x22   :  { %399 = vmatmul.mubr.bf16.vlgmr.msra.gmra.mrb[0].mxu0 %v496_v32 }
  0x23   :  { %595 = vmatpush3.bf16.msra.mxu0 %v653_v39  ;;  %610 = vmatprep.mubr.msk.bf16.mxu0 %vm662_vm0, %v661_v35 }
  0x24   :  { %439 = vmatmul.mubr.bf16.vlgmr.msra.gmra.mrb[0].mxu1 %v498_v37  ;;  %596 = vmatprep.subr.bf16.mxu0 %v661_v35 }
  0x27   :  { %597 = vmatpush3.bf16.msra.mxu0 %v654_v40 }
  0x28   :  { %598 = vmatprep.subr.bf16.mxu0 %v661_v35 }
  0x2b   :  { %599 = vmatpush3.bf16.msra.mxu0 %v655_v41 }
  0x2c   :  { %600 = vmatprep.subr.bf16.mxu0 %v661_v35 }
  0x2f   :  { %601 = vmatpush3.bf16.msra.mxu0 %v656_v42 }
  0x30   :  { %602 = vmatprep.subr.bf16.mxu0 %v661_v35 }
  0x33   :  { %603 = vmatpush3.bf16.msra.mxu0 %v657_v43 }
  0x34   :  { %604 = vmatprep.subr.bf16.mxu0 %v661_v35 }
  0x37   :  { %605 = vmatpush3.bf16.msra.mxu0 %v658_v44 }
  0x38   :  { %606 = vmatprep.subr.bf16.mxu0 %v661_v35 }
  0x3b   :  { %607 = vmatpush3.bf16.msra.mxu0 %v659_v45 }
  0x3c   :  { %608 = vmatprep.subr.bf16.mxu0 %v661_v35 }
  0x3f   :  { %609 = vmatpush3.bf16.msra.mxu0 %v660_v46 }
  0x42   :  { %611 = vmatmul.mubr.bf16.vlgmr.msra.gmra.mrb[4].mxu0 %v649_v47 }
  0xf5   :  { %v557_v48 = vpop.f32.mrb[0].mxu0 }
  0xf6   :  { %v558_v50 = vpop.f32.mrb[1].mxu0 }
  0xf7   :  { %v559_v51 = vadd.f32 %v558_v50, %v557_v48  ;;  %v560_v52 = vpop.f32.mrb[2].mxu0  ;;  %v579_v53 = vpop.f32.mrb[0].mxu1 }
  0xf8   :  { %v561_v54 = vpop.f32.mrb[3].mxu0  ;;  %v580_v55 = vpop.f32.mrb[1].mxu1 }
  0xf9   :  { %v401_v56 = vadd.f32 %v559_v51, %v495_v49  ;;  %v581_v57 = vadd.f32 %v580_v55, %v579_v53  ;;  %v582_v58 = vpop.f32.mrb[2].mxu1 }
  0xfa   :  { %v583_v59 = vpop.f32.mrb[3].mxu1 }
  0xfb   :  { %v441_v60 = vadd.f32 %v581_v57, %v401_v56 }
 0x115   :  { %v480_v61 = vpop.f32.mrb[4].mxu0 }
 0x116   :  { %v481_v63 = vadd.f32 %v480_v61, %v441_v60  ;;  %v612_v0 = vpop.f32.mrb[5].mxu0 }
 0x117   :  { %v483_v1 = vpop.f32.mrb[6].mxu0 }
 0x118   :  { %v487_v2 = vadd.f32 %v486_v62, %v481_v63  ;;  %v613_v3 = vpop.f32.mrb[7].mxu0 }
 0x11a   :  { %v488_v4 = vmax.f32 %v487_v2, 0.0 }
 0x11c   :  { %490 = vst.msk [vmem:[%s830_s4] sm:$0xff] %vm489_vm1, %v488_v4 }

// kernel: forward.25
= control target key start
LH: loop header
LB: loop body
LE: loop exit
PB: predicated region body
PF: predicated region fallthrough
CT: control target
= control target key end

     0   :  { %v180_v0 = vmov 0.0   ;;  %vm181_vm0 = vmmov 0   ;;  %s235_s1 = inlined_call_operand.vmem [shape: bf16[128,128], index: 1, kind: input, shape index: {}]   ;;  %s236_s0 = inlined_call_operand.vmem [shape: bf16[8,128], index: 0, kind: input, shape index: {}]   ;;  %s237_s2 = inlined_call_operand.vmem [shape: f32[1,128], index: 2, kind: input, shape index: {}]   ;;  %s238_s3 = inlined_call_operand.vmem [shape: f32[8,128], index: 3, kind: output, shape index: {}]  }
   0x1   :  { %150 = vmatprep.subr.bf16.mxu0 %v180_v0  ;;  %v172_v1 = vld [vmem:[%s235_s1] sm:$0xff]   ;;  %166 = vmatprep.mubr.msk.bf16.mxu0 %vm181_vm0, %v180_v0  ;;  %v173_v2 = vld [vmem:[%s235_s1 + $0x8] sm:$0xff]   ;;  %v174_v3 = vld [vmem:[%s235_s1 + $0x10] sm:$0xff]  }
   0x2   :  { %151 = vmatpush3.bf16.msra.mxu0 %v172_v1  ;;  %v175_v4 = vld [vmem:[%s235_s1 + $0x18] sm:$0xff]   ;;  %v176_v5 = vld [vmem:[%s235_s1 + $0x20] sm:$0xff]   ;;  %v177_v6 = vld [vmem:[%s235_s1 + $0x28] sm:$0xff]  }
   0x3   :  { %152 = vmatprep.subr.bf16.mxu0 %v180_v0  ;;  %v178_v7 = vld [vmem:[%s235_s1 + $0x30] sm:$0xff]   ;;  %v179_v8 = vld [vmem:[%s235_s1 + $0x38] sm:$0xff]   ;;  %v15_v9 = vld [vmem:[%s236_s0] sm:$0xf] }
   0x4   :  { %v132_v10 = vld [vmem:[%s237_s2] ss:$0 sm:$0xff] }
   0x6   :  { %153 = vmatpush3.bf16.msra.mxu0 %v173_v2 }
   0x7   :  { %154 = vmatprep.subr.bf16.mxu0 %v180_v0 }
   0xa   :  { %155 = vmatpush3.bf16.msra.mxu0 %v174_v3 }
   0xb   :  { %156 = vmatprep.subr.bf16.mxu0 %v180_v0 }
   0xe   :  { %157 = vmatpush3.bf16.msra.mxu0 %v175_v4 }
   0xf   :  { %158 = vmatprep.subr.bf16.mxu0 %v180_v0 }
  0x12   :  { %159 = vmatpush3.bf16.msra.mxu0 %v176_v5 }
  0x13   :  { %160 = vmatprep.subr.bf16.mxu0 %v180_v0 }
  0x16   :  { %161 = vmatpush3.bf16.msra.mxu0 %v177_v6 }
  0x17   :  { %162 = vmatprep.subr.bf16.mxu0 %v180_v0 }
  0x1a   :  { %163 = vmatpush3.bf16.msra.mxu0 %v178_v7 }
  0x1b   :  { %164 = vmatprep.subr.bf16.mxu0 %v180_v0 }
  0x1e   :  { %165 = vmatpush3.bf16.msra.mxu0 %v179_v8 }
  0x21   :  { %167 = vmatmul.mubr.bf16.vlgmr.msra.gmra.mrb[0].mxu0 %v15_v9 }
  0xf4   :  { %v121_v11 = vpop.f32.mrb[0].mxu0 }
  0xf5   :  { %v122_v12 = vadd.f32 %v132_v10, %v121_v11  ;;  %v168_v13 = vpop.f32.mrb[1].mxu0 }
  0xf6   :  { %v124_v14 = vpop.f32.mrb[2].mxu0 }
  0xf7   :  { %127 = vst [vmem:[%s238_s3] sm:$0xff] %v122_v12  ;;  %v169_v15 = vpop.f32.mrb[3].mxu0 }

// kernel: forward.24
= control target key start
LH: loop header
LB: loop body
LE: loop exit
PB: predicated region body
PF: predicated region fallthrough
CT: control target
= control target key end

     0   :  { %v655_v35 = vmov 0.0   ;;  %vm656_vm0 = vmmov 0   ;;  %s812_s1 = inlined_call_operand.vmem [shape: bf16[640,128], index: 1, kind: input, shape index: {}]   ;;  %s813_s0 = inlined_call_operand.vmem [shape: bf16[8,640], index: 0, kind: input, shape index: {}]   ;;  %s814_s2 = inlined_call_operand.vmem [shape: f32[1,128], index: 2, kind: input, shape index: {}]   ;;  %s815_s3 = inlined_call_operand.vmem [shape: f32[8,128], index: 3, kind: output, shape index: {}]  }
   0x1   :  { %v610_v0 = vld [vmem:[%s812_s1 + $0x40] sm:$0xff]   ;;  %v614_v4 = vld [vmem:[%s812_s1 + $0x48] sm:$0xff]   ;;  %v618_v8 = vld [vmem:[%s812_s1 + $0x50] sm:$0xff]  }
   0x2   :  { %v611_v1 = vld [vmem:[%s812_s1] sm:$0xff]   ;;  %535 = vmatprep.subr.bf16.mxu0 %v610_v0  ;;  %v615_v5 = vld [vmem:[%s812_s1 + $0x8] sm:$0xff]   ;;  %v619_v9 = vld [vmem:[%s812_s1 + $0x10] sm:$0xff]  }
   0x3   :  { %v612_v2 = vld [vmem:[%s812_s1 + $0xc0] sm:$0xff]   ;;  %536 = vmatpush3.bf16.msra.mxu0 %v611_v1  ;;  %v616_v6 = vld [vmem:[%s812_s1 + $0xc8] sm:$0xff]   ;;  %v620_v10 = vld [vmem:[%s812_s1 + $0xd0] sm:$0xff]  }
   0x4   :  { %v613_v3 = vld [vmem:[%s812_s1 + $0x80] sm:$0xff]   ;;  %557 = vmatprep.subr.bf16.mxu1 %v612_v2  ;;  %537 = vmatprep.subr.bf16.mxu0 %v614_v4  ;;  %v617_v7 = vld [vmem:[%s812_s1 + $0x88] sm:$0xff]   ;;  %v621_v11 = vld [vmem:[%s812_s1 + $0x90] sm:$0xff]  }
   0x5   :  { %558 = vmatpush3.bf16.msra.mxu1 %v613_v3  ;;  %v622_v12 = vld [vmem:[%s812_s1 + $0x58] sm:$0xff]   ;;  %v626_v16 = vld [vmem:[%s812_s1 + $0x60] sm:$0xff]   ;;  %v630_v20 = vld [vmem:[%s812_s1 + $0x68] sm:$0xff]  }
   0x6   :  { %559 = vmatprep.subr.bf16.mxu1 %v616_v6  ;;  %v623_v13 = vld [vmem:[%s812_s1 + $0x18] sm:$0xff]   ;;  %v627_v17 = vld [vmem:[%s812_s1 + $0x20] sm:$0xff]   ;;  %v631_v21 = vld [vmem:[%s812_s1 + $0x28] sm:$0xff]  }
   0x7   :  { %538 = vmatpush3.bf16.msra.mxu0 %v615_v5  ;;  %v624_v14 = vld [vmem:[%s812_s1 + $0xd8] sm:$0xff]   ;;  %v628_v18 = vld [vmem:[%s812_s1 + $0xe0] sm:$0xff]   ;;  %v632_v22 = vld [vmem:[%s812_s1 + $0xe8] sm:$0xff]  }
   0x8   :  { %539 = vmatprep.subr.bf16.mxu0 %v618_v8  ;;  %v625_v15 = vld [vmem:[%s812_s1 + $0x98] sm:$0xff]   ;;  %v629_v19 = vld [vmem:[%s812_s1 + $0xa0] sm:$0xff]   ;;  %v633_v23 = vld [vmem:[%s812_s1 + $0xa8] sm:$0xff]  }
   0x9   :  { %560 = vmatpush3.bf16.msra.mxu1 %v617_v7  ;;  %v634_v24 = vld [vmem:[%s812_s1 + $0x70] sm:$0xff]   ;;  %v638_v28 = vld [vmem:[%s812_s1 + $0x78] sm:$0xff]   ;;  %v15_v31 = vld [vmem:[%s813_s0] sm:$0xff] }
   0xa   :  { %561 = vmatprep.subr.bf16.mxu1 %v620_v10  ;;  %v635_v25 = vld [vmem:[%s812_s1 + $0x30] sm:$0xff]   ;;  %v639_v29 = vld [vmem:[%s812_s1 + $0x38] sm:$0xff]   ;;  %v490_v32 = vcombine.low %v15_v31, %v15_v31  ;;  %v491_v33 = vcombine.high %v15_v31, %v15_v31  ;;  %v16_v36 = vld [vmem:[%s813_s0 + $0x8] sm:$0xff] }
   0xb   :  { %540 = vmatpush3.bf16.msra.mxu0 %v619_v9  ;;  %v636_v26 = vld [vmem:[%s812_s1 + $0xf0] sm:$0xff]   ;;  %v640_v30 = vld [vmem:[%s812_s1 + $0xf8] sm:$0xff]   ;;  %v492_v37 = vcombine.low %v16_v36, %v16_v36  ;;  %v493_v38 = vcombine.high %v16_v36, %v16_v36  ;;  %v647_v39 = vld [vmem:[%s812_s1 + $0x100] sm:$0xff]  }
   0xc   :  { %541 = vmatprep.subr.bf16.mxu0 %v622_v12  ;;  %v637_v27 = vld [vmem:[%s812_s1 + $0xb0] sm:$0xff]   ;;  %v644_v34 = vld [vmem:[%s812_s1 + $0xb8] sm:$0xff]   ;;  %395 = vmatprep.mubr.bf16.mxu0 %v491_v33  ;;  %v648_v40 = vld [vmem:[%s812_s1 + $0x108] sm:$0xff]  }
   0xd   :  { %562 = vmatpush3.bf16.msra.mxu1 %v621_v11  ;;  %435 = vmatprep.mubr.bf16.mxu1 %v493_v38  ;;  %v649_v41 = vld [vmem:[%s812_s1 + $0x110] sm:$0xff]   ;;  %v650_v42 = vld [vmem:[%s812_s1 + $0x118] sm:$0xff]   ;;  %v651_v43 = vld [vmem:[%s812_s1 + $0x120] sm:$0xff]  }
   0xe   :  { %563 = vmatprep.subr.bf16.mxu1 %v624_v14  ;;  %v652_v44 = vld [vmem:[%s812_s1 + $0x128] sm:$0xff]   ;;  %v653_v45 = vld [vmem:[%s812_s1 + $0x130] sm:$0xff]   ;;  %v654_v46 = vld [vmem:[%s812_s1 + $0x138] sm:$0xff]  }
   0xf   :  { %542 = vmatpush3.bf16.msra.mxu0 %v623_v13  ;;  %v643_v47 = vld [vmem:[%s813_s0 + $0x10] ss:$0 sps:$4 sm:$0xff]   ;;  %v489_v49 = vld [vmem:[%s814_s2] ss:$0 sm:$0xff] }
  0x10   :  { %543 = vmatprep.subr.bf16.mxu0 %v626_v16 }
  0x11   :  { %564 = vmatpush3.bf16.msra.mxu1 %v625_v15 }
  0x12   :  { %565 = vmatprep.subr.bf16.mxu1 %v628_v18 }
  0x13   :  { %544 = vmatpush3.bf16.msra.mxu0 %v627_v17 }
  0x14   :  { %545 = vmatprep.subr.bf16.mxu0 %v630_v20 }
  0x15   :  { %566 = vmatpush3.bf16.msra.mxu1 %v629_v19 }
  0x16   :  { %567 = vmatprep.subr.bf16.mxu1 %v632_v22 }
  0x17   :  { %546 = vmatpush3.bf16.msra.mxu0 %v631_v21 }
  0x18   :  { %547 = vmatprep.subr.bf16.mxu0 %v634_v24 }
  0x19   :  { %568 = vmatpush3.bf16.msra.mxu1 %v633_v23 }
  0x1a   :  { %569 = vmatprep.subr.bf16.mxu1 %v636_v26 }
  0x1b   :  { %548 = vmatpush3.bf16.msra.mxu0 %v635_v25 }
  0x1c   :  { %549 = vmatprep.subr.bf16.mxu0 %v638_v28 }
  0x1d   :  { %570 = vmatpush3.bf16.msra.mxu1 %v637_v27 }
  0x1e   :  { %571 = vmatprep.subr.bf16.mxu1 %v640_v30 }
  0x1f   :  { %550 = vmatpush3.bf16.msra.mxu0 %v639_v29 }
  0x20   :  { %588 = vmatprep.subr.bf16.mxu0 %v655_v35 }
  0x21   :  { %572 = vmatpush3.bf16.msra.mxu1 %v644_v34 }
  0x22   :  { %396 = vmatmul.mubr.bf16.vlgmr.msra.gmra.mrb[0].mxu0 %v490_v32 }
  0x23   :  { %589 = vmatpush3.bf16.msra.mxu0 %v647_v39  ;;  %604 = vmatprep.mubr.msk.bf16.mxu0 %vm656_vm0, %v655_v35 }
  0x24   :  { %436 = vmatmul.mubr.bf16.vlgmr.msra.gmra.mrb[0].mxu1 %v492_v37  ;;  %590 = vmatprep.subr.bf16.mxu0 %v655_v35 }
  0x27   :  { %591 = vmatpush3.bf16.msra.mxu0 %v648_v40 }
  0x28   :  { %592 = vmatprep.subr.bf16.mxu0 %v655_v35 }
  0x2b   :  { %593 = vmatpush3.bf16.msra.mxu0 %v649_v41 }
  0x2c   :  { %594 = vmatprep.subr.bf16.mxu0 %v655_v35 }
  0x2f   :  { %595 = vmatpush3.bf16.msra.mxu0 %v650_v42 }
  0x30   :  { %596 = vmatprep.subr.bf16.mxu0 %v655_v35 }
  0x33   :  { %597 = vmatpush3.bf16.msra.mxu0 %v651_v43 }
  0x34   :  { %598 = vmatprep.subr.bf16.mxu0 %v655_v35 }
  0x37   :  { %599 = vmatpush3.bf16.msra.mxu0 %v652_v44 }
  0x38   :  { %600 = vmatprep.subr.bf16.mxu0 %v655_v35 }
  0x3b   :  { %601 = vmatpush3.bf16.msra.mxu0 %v653_v45 }
  0x3c   :  { %602 = vmatprep.subr.bf16.mxu0 %v655_v35 }
  0x3f   :  { %603 = vmatpush3.bf16.msra.mxu0 %v654_v46 }
  0x42   :  { %605 = vmatmul.mubr.bf16.vlgmr.msra.gmra.mrb[4].mxu0 %v643_v47 }
  0xf5   :  { %v551_v48 = vpop.f32.mrb[0].mxu0 }
  0xf6   :  { %v552_v50 = vpop.f32.mrb[1].mxu0 }
  0xf7   :  { %v553_v51 = vadd.f32 %v552_v50, %v551_v48  ;;  %v554_v52 = vpop.f32.mrb[2].mxu0  ;;  %v573_v53 = vpop.f32.mrb[0].mxu1 }
  0xf8   :  { %v555_v54 = vpop.f32.mrb[3].mxu0  ;;  %v574_v55 = vpop.f32.mrb[1].mxu1 }
  0xf9   :  { %v398_v56 = vadd.f32 %v553_v51, %v489_v49  ;;  %v575_v57 = vadd.f32 %v574_v55, %v573_v53  ;;  %v576_v58 = vpop.f32.mrb[2].mxu1 }
  0xfa   :  { %v577_v59 = vpop.f32.mrb[3].mxu1 }
  0xfb   :  { %v438_v60 = vadd.f32 %v575_v57, %v398_v56 }
 0x115   :  { %v477_v61 = vpop.f32.mrb[4].mxu0 }
 0x116   :  { %v478_v62 = vadd.f32 %v477_v61, %v438_v60  ;;  %v606_v63 = vpop.f32.mrb[5].mxu0 }
 0x117   :  { %v480_v0 = vpop.f32.mrb[6].mxu0 }
 0x118   :  { %v483_v1 = vmax.f32 %v478_v62, 0.0  ;;  %v607_v2 = vpop.f32.mrb[7].mxu0 }
 0x11a   :  { %484 = vst [vmem:[%s815_s3] sm:$0xff] %v483_v1 }

// kernel: forward.26
= control target key start
LH: loop header
LB: loop body
LE: loop exit
PB: predicated region body
PF: predicated region fallthrough
CT: control target
= control target key end

     0   :  { %vm1129_vm0 = vmmov 0   ;;  %s1395_s1 = inlined_call_operand.vmem [shape: bf16[1152,128], index: 1, kind: input, shape index: {}]   ;;  %s1396_s0 = inlined_call_operand.vmem [shape: bf16[8,1152], index: 0, kind: input, shape index: {}]   ;;  %s1397_s2 = inlined_call_operand.vmem [shape: f32[1,128], index: 2, kind: input, shape index: {}]   ;;  %s1398_s3 = inlined_call_operand.vmem [shape: f32[8,128], index: 3, kind: input, shape index: {}]   ;;  %s1399_s4 = inlined_call_operand.vmem [shape: f32[8,128], index: 4, kind: output, shape index: {}]  }
   0x1   :  { %v1047_v0 = vld [vmem:[%s1395_s1 + $0x40] sm:$0xff]   ;;  %v1051_v4 = vld [vmem:[%s1395_s1 + $0x48] sm:$0xff]   ;;  %v1055_v8 = vld [vmem:[%s1395_s1 + $0x50] sm:$0xff]  }
   0x2   :  { %v1048_v1 = vld [vmem:[%s1395_s1] sm:$0xff]   ;;  %928 = vmatprep.subr.bf16.mxu0 %v1047_v0  ;;  %v1052_v5 = vld [vmem:[%s1395_s1 + $0x8] sm:$0xff]   ;;  %v1056_v9 = vld [vmem:[%s1395_s1 + $0x10] sm:$0xff]  }
   0x3   :  { %v1049_v2 = vld [vmem:[%s1395_s1 + $0xc0] sm:$0xff]   ;;  %929 = vmatpush3.bf16.msra.mxu0 %v1048_v1  ;;  %v1053_v6 = vld [vmem:[%s1395_s1 + $0xc8] sm:$0xff]   ;;  %v1057_v10 = vld [vmem:[%s1395_s1 + $0xd0] sm:$0xff]  }
   0x4   :  { %v1050_v3 = vld [vmem:[%s1395_s1 + $0x80] sm:$0xff]   ;;  %950 = vmatprep.subr.bf16.mxu1 %v1049_v2  ;;  %930 = vmatprep.subr.bf16.mxu0 %v1051_v4  ;;  %v1054_v7 = vld [vmem:[%s1395_s1 + $0x88] sm:$0xff]   ;;  %v1058_v11 = vld [vmem:[%s1395_s1 + $0x90] sm:$0xff]  }
   0x5   :  { %951 = vmatpush3.bf16.msra.mxu1 %v1050_v3  ;;  %v1059_v12 = vld [vmem:[%s1395_s1 + $0x58] sm:$0xff]   ;;  %v1063_v16 = vld [vmem:[%s1395_s1 + $0x60] sm:$0xff]   ;;  %v1067_v20 = vld [vmem:[%s1395_s1 + $0x68] sm:$0xff]  }
   0x6   :  { %952 = vmatprep.subr.bf16.mxu1 %v1053_v6  ;;  %v1060_v13 = vld [vmem:[%s1395_s1 + $0x18] sm:$0xff]   ;;  %v1064_v17 = vld [vmem:[%s1395_s1 + $0x20] sm:$0xff]   ;;  %v1068_v21 = vld [vmem:[%s1395_s1 + $0x28] sm:$0xff]  }
   0x7   :  { %931 = vmatpush3.bf16.msra.mxu0 %v1052_v5  ;;  %v1061_v14 = vld [vmem:[%s1395_s1 + $0xd8] sm:$0xff]   ;;  %v1065_v18 = vld [vmem:[%s1395_s1 + $0xe0] sm:$0xff]   ;;  %v1069_v22 = vld [vmem:[%s1395_s1 + $0xe8] sm:$0xff]  }
   0x8   :  { %932 = vmatprep.subr.bf16.mxu0 %v1055_v8  ;;  %v1062_v15 = vld [vmem:[%s1395_s1 + $0x98] sm:$0xff]   ;;  %v1066_v19 = vld [vmem:[%s1395_s1 + $0xa0] sm:$0xff]   ;;  %v1070_v23 = vld [vmem:[%s1395_s1 + $0xa8] sm:$0xff]  }
   0x9   :  { %953 = vmatpush3.bf16.msra.mxu1 %v1054_v7  ;;  %v1071_v24 = vld [vmem:[%s1395_s1 + $0x70] sm:$0xff]   ;;  %v1075_v28 = vld [vmem:[%s1395_s1 + $0x78] sm:$0xff]   ;;  %v18_v31 = vld [vmem:[%s1396_s0] sm:$0xff] }
   0xa   :  { %954 = vmatprep.subr.bf16.mxu1 %v1057_v10  ;;  %v1072_v25 = vld [vmem:[%s1395_s1 + $0x30] sm:$0xff]   ;;  %v1076_v29 = vld [vmem:[%s1395_s1 + $0x38] sm:$0xff]   ;;  %v847_v32 = vcombine.low %v18_v31, %v18_v31  ;;  %v848_v33 = vcombine.high %v18_v31, %v18_v31  ;;  %v1081_v35 = vld [vmem:[%s1395_s1 + $0x140] sm:$0xff]  }
   0xb   :  { %933 = vmatpush3.bf16.msra.mxu0 %v1056_v9  ;;  %v1073_v26 = vld [vmem:[%s1395_s1 + $0xf0] sm:$0xff]   ;;  %v1077_v30 = vld [vmem:[%s1395_s1 + $0xf8] sm:$0xff]   ;;  %v19_v36 = vld [vmem:[%s1396_s0 + $0x8] sm:$0xff]  ;;  %v1128_v9 = vmov 0.0  }
   0xc   :  { %934 = vmatprep.subr.bf16.mxu0 %v1059_v12  ;;  %v1074_v27 = vld [vmem:[%s1395_s1 + $0xb0] sm:$0xff]   ;;  %v1080_v34 = vld [vmem:[%s1395_s1 + $0xb8] sm:$0xff]   ;;  %670 = vmatprep.mubr.bf16.mxu0 %v848_v33  ;;  %v849_v37 = vcombine.low %v19_v36, %v19_v36  ;;  %v850_v38 = vcombine.high %v19_v36, %v19_v36  ;;  %v1084_v39 = vld [vmem:[%s1395_s1 + $0x100] sm:$0xff]  }
   0xd   :  { %955 = vmatpush3.bf16.msra.mxu1 %v1058_v11  ;;  %v1085_v40 = vld [vmem:[%s1395_s1 + $0x1c0] sm:$0xff]   ;;  %v1087_v42 = vld [vmem:[%s1395_s1 + $0x148] sm:$0xff]   ;;  %v1091_v46 = vld [vmem:[%s1395_s1 + $0x150] sm:$0xff]  }
   0xe   :  { %956 = vmatprep.subr.bf16.mxu1 %v1061_v14  ;;  %710 = vmatprep.mubr.bf16.mxu1 %v850_v38  ;;  %v1086_v41 = vld [vmem:[%s1395_s1 + $0x180] sm:$0xff]   ;;  %v1088_v43 = vld [vmem:[%s1395_s1 + $0x108] sm:$0xff]   ;;  %v1092_v47 = vld [vmem:[%s1395_s1 + $0x110] sm:$0xff]  }
   0xf   :  { %935 = vmatpush3.bf16.msra.mxu0 %v1060_v13  ;;  %v1089_v44 = vld [vmem:[%s1395_s1 + $0x1c8] sm:$0xff]   ;;  %v1093_v48 = vld [vmem:[%s1395_s1 + $0x1d0] sm:$0xff]   ;;  %v1095_v50 = vld [vmem:[%s1395_s1 + $0x158] sm:$0xff]  }
  0x10   :  { %936 = vmatprep.subr.bf16.mxu0 %v1063_v16  ;;  %v1090_v45 = vld [vmem:[%s1395_s1 + $0x188] sm:$0xff]   ;;  %v1094_v49 = vld [vmem:[%s1395_s1 + $0x190] sm:$0xff]   ;;  %v1096_v51 = vld [vmem:[%s1395_s1 + $0x118] sm:$0xff]  }
  0x11   :  { %957 = vmatpush3.bf16.msra.mxu1 %v1062_v15  ;;  %v1097_v52 = vld [vmem:[%s1395_s1 + $0x1d8] sm:$0xff]   ;;  %v1099_v54 = vld [vmem:[%s1395_s1 + $0x160] sm:$0xff]   ;;  %v1103_v58 = vld [vmem:[%s1395_s1 + $0x168] sm:$0xff]  }
  0x12   :  { %958 = vmatprep.subr.bf16.mxu1 %v1065_v18  ;;  %v1098_v53 = vld [vmem:[%s1395_s1 + $0x198] sm:$0xff]   ;;  %v1100_v55 = vld [vmem:[%s1395_s1 + $0x120] sm:$0xff]   ;;  %v1104_v59 = vld [vmem:[%s1395_s1 + $0x128] sm:$0xff]  }
  0x13   :  { %937 = vmatpush3.bf16.msra.mxu0 %v1064_v17  ;;  %v1101_v56 = vld [vmem:[%s1395_s1 + $0x1e0] sm:$0xff]   ;;  %v1105_v60 = vld [vmem:[%s1395_s1 + $0x1e8] sm:$0xff]   ;;  %v1107_v62 = vld [vmem:[%s1395_s1 + $0x170] sm:$0xff]  }
  0x14   :  { %938 = vmatprep.subr.bf16.mxu0 %v1067_v20  ;;  %v1102_v57 = vld [vmem:[%s1395_s1 + $0x1a0] sm:$0xff]   ;;  %v1106_v61 = vld [vmem:[%s1395_s1 + $0x1a8] sm:$0xff]   ;;  %v1108_v63 = vld [vmem:[%s1395_s1 + $0x130] sm:$0xff]  }
  0x15   :  { %959 = vmatpush3.bf16.msra.mxu1 %v1066_v19  ;;  %v1109_v0 = vld [vmem:[%s1395_s1 + $0x1f0] sm:$0xff]   ;;  %v1111_v2 = vld [vmem:[%s1395_s1 + $0x178] sm:$0xff]   ;;  %v1119_v13 = vld [vmem:[%s1395_s1 + $0x200] sm:$0xff]  }
  0x16   :  { %960 = vmatprep.subr.bf16.mxu1 %v1069_v22  ;;  %v1110_v1 = vld [vmem:[%s1395_s1 + $0x1b0] sm:$0xff]   ;;  %v1112_v3 = vld [vmem:[%s1395_s1 + $0x138] sm:$0xff]   ;;  %v1120_v14 = vld [vmem:[%s1395_s1 + $0x208] sm:$0xff]  }
  0x17   :  { %939 = vmatpush3.bf16.msra.mxu0 %v1068_v21  ;;  %v1113_v4 = vld [vmem:[%s1395_s1 + $0x1f8] sm:$0xff]   ;;  %v20_v5 = vld [vmem:[%s1396_s0 + $0x10] sm:$0xff]  ;;  %v1123_v17 = vld [vmem:[%s1395_s1 + $0x220] sm:$0xff]  }
  0x18   :  { %940 = vmatprep.subr.bf16.mxu0 %v1071_v24  ;;  %v851_v6 = vcombine.low %v20_v5, %v20_v5  ;;  %v852_v7 = vcombine.high %v20_v5, %v20_v5  ;;  %v1116_v8 = vld [vmem:[%s1395_s1 + $0x1b8] sm:$0xff]   ;;  %v1121_v15 = vld [vmem:[%s1395_s1 + $0x210] sm:$0xff]   ;;  %v1124_v18 = vld [vmem:[%s1395_s1 + $0x228] sm:$0xff]  }
  0x19   :  { %961 = vmatpush3.bf16.msra.mxu1 %v1070_v23  ;;  %v21_v10 = vld [vmem:[%s1396_s0 + $0x18] sm:$0xff]  ;;  %v1125_v19 = vld [vmem:[%s1395_s1 + $0x230] sm:$0xff]   ;;  %v1127_v21 = vld [vmem:[%s1396_s0 + $0x20] ss:$0 sps:$4 sm:$0xff]  }
  0x1a   :  { %962 = vmatprep.subr.bf16.mxu1 %v1073_v26  ;;  %v853_v11 = vcombine.low %v21_v10, %v21_v10  ;;  %v854_v12 = vcombine.high %v21_v10, %v21_v10  ;;  %v1122_v16 = vld [vmem:[%s1395_s1 + $0x218] sm:$0xff]   ;;  %v846_v23 = vld [vmem:[%s1397_s2] ss:$0 sm:$0xff] }
  0x1b   :  { %941 = vmatpush3.bf16.msra.mxu0 %v1072_v25  ;;  %v1126_v20 = vld [vmem:[%s1395_s1 + $0x238] sm:$0xff]  }
  0x1c   :  { %942 = vmatprep.subr.bf16.mxu0 %v1075_v28 }
  0x1d   :  { %963 = vmatpush3.bf16.msra.mxu1 %v1074_v27 }
  0x1e   :  { %964 = vmatprep.subr.bf16.mxu1 %v1077_v30 }
  0x1f   :  { %943 = vmatpush3.bf16.msra.mxu0 %v1076_v29 }
  0x20   :  { %972 = vmatprep.subr.bf16.mxu0 %v1081_v35 }
  0x21   :  { %965 = vmatpush3.bf16.msra.mxu1 %v1080_v34 }
  0x22   :  { %671 = vmatmul.mubr.bf16.vlgmr.msra.gmra.mrb[0].mxu0 %v847_v32  ;;  %994 = vmatprep.subr.bf16.mxu1 %v1085_v40 }
  0x23   :  { %973 = vmatpush3.bf16.msra.mxu0 %v1084_v39  ;;  %750 = vmatprep.mubr.bf16.mxu0 %v852_v7 }
  0x24   :  { %711 = vmatmul.mubr.bf16.vlgmr.msra.gmra.mrb[0].mxu1 %v849_v37  ;;  %974 = vmatprep.subr.bf16.mxu0 %v1087_v42 }
  0x25   :  { %995 = vmatpush3.bf16.msra.mxu1 %v1086_v41  ;;  %790 = vmatprep.mubr.bf16.mxu1 %v854_v12 }
  0x26   :  { %996 = vmatprep.subr.bf16.mxu1 %v1089_v44 }
  0x27   :  { %975 = vmatpush3.bf16.msra.mxu0 %v1088_v43 }
  0x28   :  { %976 = vmatprep.subr.bf16.mxu0 %v1091_v46 }
  0x29   :  { %997 = vmatpush3.bf16.msra.mxu1 %v1090_v45 }
  0x2a   :  { %998 = vmatprep.subr.bf16.mxu1 %v1093_v48  ;;  %v838_v48 = vld [vmem:[%s1398_s3] sm:$0xff] }
  0x2b   :  { %977 = vmatpush3.bf16.msra.mxu0 %v1092_v47 }
  0x2c   :  { %978 = vmatprep.subr.bf16.mxu0 %v1095_v50 }
  0x2d   :  { %999 = vmatpush3.bf16.msra.mxu1 %v1094_v49 }
  0x2e   :  { %1000 = vmatprep.subr.bf16.mxu1 %v1097_v52 }
  0x2f   :  { %979 = vmatpush3.bf16.msra.mxu0 %v1096_v51 }
  0x30   :  { %980 = vmatprep.subr.bf16.mxu0 %v1099_v54 }
  0x31   :  { %1001 = vmatpush3.bf16.msra.mxu1 %v1098_v53 }
  0x32   :  { %1002 = vmatprep.subr.bf16.mxu1 %v1101_v56 }
  0x33   :  { %981 = vmatpush3.bf16.msra.mxu0 %v1100_v55 }
  0x34   :  { %982 = vmatprep.subr.bf16.mxu0 %v1103_v58 }
  0x35   :  { %1003 = vmatpush3.bf16.msra.mxu1 %v1102_v57 }
  0x36   :  { %1004 = vmatprep.subr.bf16.mxu1 %v1105_v60 }
  0x37   :  { %983 = vmatpush3.bf16.msra.mxu0 %v1104_v59 }
  0x38   :  { %984 = vmatprep.subr.bf16.mxu0 %v1107_v62 }
  0x39   :  { %1005 = vmatpush3.bf16.msra.mxu1 %v1106_v61 }
  0x3a   :  { %1006 = vmatprep.subr.bf16.mxu1 %v1109_v0 }
  0x3b   :  { %985 = vmatpush3.bf16.msra.mxu0 %v1108_v63 }
  0x3c   :  { %986 = vmatprep.subr.bf16.mxu0 %v1111_v2 }
  0x3d   :  { %1007 = vmatpush3.bf16.msra.mxu1 %v1110_v1 }
  0x3e   :  { %1008 = vmatprep.subr.bf16.mxu1 %v1113_v4 }
  0x3f   :  { %987 = vmatpush3.bf16.msra.mxu0 %v1112_v3 }
  0x40   :  { %1025 = vmatprep.subr.bf16.mxu0 %v1128_v9 }
  0x41   :  { %1009 = vmatpush3.bf16.msra.mxu1 %v1116_v8 }
  0x42   :  { %751 = vmatmul.mubr.bf16.vlgmr.msra.gmra.mrb[4].mxu0 %v851_v6 }
  0x43   :  { %1026 = vmatpush3.bf16.msra.mxu0 %v1119_v13  ;;  %1041 = vmatprep.mubr.msk.bf16.mxu0 %vm1129_vm0, %v1128_v9 }
  0x44   :  { %791 = vmatmul.mubr.bf16.vlgmr.msra.gmra.mrb[4].mxu1 %v853_v11  ;;  %1027 = vmatprep.subr.bf16.mxu0 %v1128_v9 }
  0x47   :  { %1028 = vmatpush3.bf16.msra.mxu0 %v1120_v14 }
  0x48   :  { %1029 = vmatprep.subr.bf16.mxu0 %v1128_v9 }
  0x4b   :  { %1030 = vmatpush3.bf16.msra.mxu0 %v1121_v15 }
  0x4c   :  { %1031 = vmatprep.subr.bf16.mxu0 %v1128_v9 }
  0x4f   :  { %1032 = vmatpush3.bf16.msra.mxu0 %v1122_v16 }
  0x50   :  { %1033 = vmatprep.subr.bf16.mxu0 %v1128_v9 }
  0x53   :  { %1034 = vmatpush3.bf16.msra.mxu0 %v1123_v17 }
  0x54   :  { %1035 = vmatprep.subr.bf16.mxu0 %v1128_v9 }
  0x57   :  { %1036 = vmatpush3.bf16.msra.mxu0 %v1124_v18 }
  0x58   :  { %1037 = vmatprep.subr.bf16.mxu0 %v1128_v9 }
  0x5b   :  { %1038 = vmatpush3.bf16.msra.mxu0 %v1125_v19 }
  0x5c   :  { %1039 = vmatprep.subr.bf16.mxu0 %v1128_v9 }
  0x5f   :  { %1040 = vmatpush3.bf16.msra.mxu0 %v1126_v20 }
  0x62   :  { %1042 = vmatmul.mubr.bf16.vlgmr.msra.gmra.mrb[8].mxu0 %v1127_v21 }
  0xf5   :  { %v944_v22 = vpop.f32.mrb[0].mxu0 }
  0xf6   :  { %v945_v24 = vpop.f32.mrb[1].mxu0 }
  0xf7   :  { %v946_v25 = vadd.f32 %v945_v24, %v944_v22  ;;  %v947_v26 = vpop.f32.mrb[2].mxu0  ;;  %v966_v27 = vpop.f32.mrb[0].mxu1 }
  0xf8   :  { %v948_v28 = vpop.f32.mrb[3].mxu0  ;;  %v967_v29 = vpop.f32.mrb[1].mxu1 }
  0xf9   :  { %v673_v30 = vadd.f32 %v946_v25, %v846_v23  ;;  %v968_v31 = vadd.f32 %v967_v29, %v966_v27  ;;  %v969_v32 = vpop.f32.mrb[2].mxu1 }
  0xfa   :  { %v970_v33 = vpop.f32.mrb[3].mxu1 }
  0xfb   :  { %v713_v34 = vadd.f32 %v968_v31, %v673_v30 }
 0x115   :  { %v988_v35 = vpop.f32.mrb[4].mxu0 }
 0x116   :  { %v989_v36 = vpop.f32.mrb[5].mxu0 }
 0x117   :  { %v990_v37 = vadd.f32 %v989_v36, %v988_v35  ;;  %v991_v38 = vpop.f32.mrb[6].mxu0  ;;  %v1010_v39 = vpop.f32.mrb[4].mxu1 }
 0x118   :  { %v992_v40 = vpop.f32.mrb[7].mxu0  ;;  %v1011_v41 = vpop.f32.mrb[5].mxu1 }
 0x119   :  { %v753_v42 = vadd.f32 %v990_v37, %v713_v34  ;;  %v1012_v43 = vadd.f32 %v1011_v41, %v1010_v39  ;;  %v1013_v44 = vpop.f32.mrb[6].mxu1 }
 0x11a   :  { %v1014_v45 = vpop.f32.mrb[7].mxu1 }
 0x11b   :  { %v793_v46 = vadd.f32 %v1012_v43, %v753_v42 }
 0x135   :  { %v832_v47 = vpop.f32.mrb[8].mxu0 }
 0x136   :  { %v833_v49 = vadd.f32 %v832_v47, %v793_v46  ;;  %v1043_v50 = vpop.f32.mrb[9].mxu0 }
 0x137   :  { %v835_v51 = vpop.f32.mrb[10].mxu0 }
 0x138   :  { %v839_v52 = vadd.f32 %v838_v48, %v833_v49  ;;  %v1044_v53 = vpop.f32.mrb[11].mxu0 }
 0x13a   :  { %v840_v54 = vmax.f32 %v839_v52, 0.0 }
 0x13c   :  { %841 = vst [vmem:[%s1399_s4] sm:$0xff] %v840_v54 }

// kernel: forward.27
= control target key start
LH: loop header
LB: loop body
LE: loop exit
PB: predicated region body
PF: predicated region fallthrough
CT: control target
= control target key end

     0   :  { %vm6282_vm0 = vcmask 56320   ;;  %s11529_s1 = inlined_call_operand.vmem [shape: bf16[6,1024,256], index: 1, kind: input, shape index: {}]   ;;  %s11530_s0 = inlined_call_operand.vmem [shape: bf16[6,8,1024], index: 0, kind: input, shape index: {}]   ;;  %s11531_s3 = inlined_call_operand.vmem [shape: f32[256,256], index: 3, kind: input, shape index: {}]   ;;  %s11532_s2 = inlined_call_operand.vmem [shape: f32[6,1,256], index: 2, kind: input, shape index: {}]   ;;  %s11533_s4 = inlined_call_operand.vmem [shape: f32[1,256], index: 4, kind: input, shape index: {}]   ;;  %s11534_s5 = inlined_call_operand.vmem [shape: f32[1,256], index: 5, kind: input, shape index: {}]   ;;  %s11535_s6 = inlined_call_operand.vmem [shape: f32[256,7], index: 6, kind: input, shape index: {}]   ;;  %s11536_s7 = inlined_call_operand.vmem [shape: f32[1,7], index: 7, kind: input, shape index: {}]   ;;  %s11537_s8 = inlined_call_operand.vmem [shape: f32[8,7], index: 8, kind: output, shape index: {}]  }
   0x1   :  { %v7320_v0 = vld [vmem:[%s11529_s1 + $0x4] ss:$8 sps:$4 sm:$0xff]   ;;  %v7324_v2 = vld [vmem:[%s11529_s1] ss:$8 sps:$4 sm:$0xff]   ;;  %v7326_v4 = vld [vmem:[%s11529_s1 + $0x14] ss:$8 sps:$4 sm:$0xff]  }
   0x2   :  { %v7322_v1 = vld [vmem:[%s11529_s1 + $0x404] ss:$8 sps:$4 sm:$0xff]   ;;  %1561 = vmatprep.subr.bf16.mxu0 %v7320_v0  ;;  %v7325_v3 = vld [vmem:[%s11529_s1 + $0x400] ss:$8 sps:$4 sm:$0xff]   ;;  %v7328_v5 = vld [vmem:[%s11529_s1 + $0x414] ss:$8 sps:$4 sm:$0xff]  }
   0x3   :  { %2393 = vmatprep.subr.bf16.mxu1 %v7322_v1  ;;  %1562 = vmatpush1.bf16.msra.mxu0 %v7324_v2  ;;  %v7330_v6 = vld [vmem:[%s11529_s1 + $0x10] ss:$8 sps:$4 sm:$0xff]   ;;  %v7332_v8 = vld [vmem:[%s11529_s1 + $0x24] ss:$8 sps:$4 sm:$0xff]   ;;  %v7336_v10 = vld [vmem:[%s11529_s1 + $0x20] ss:$8 sps:$4 sm:$0xff]  }
   0x4   :  { %2394 = vmatpush1.bf16.msra.mxu1 %v7325_v3  ;;  %1563 = vmatprep.subr.bf16.mxu0 %v7326_v4  ;;  %v7331_v7 = vld [vmem:[%s11529_s1 + $0x410] ss:$8 sps:$4 sm:$0xff]   ;;  %v7334_v9 = vld [vmem:[%s11529_s1 + $0x424] ss:$8 sps:$4 sm:$0xff]   ;;  %v7337_v11 = vld [vmem:[%s11529_s1 + $0x420] ss:$8 sps:$4 sm:$0xff]  }
   0x5   :  { %2395 = vmatprep.subr.bf16.mxu1 %v7328_v5  ;;  %v7338_v12 = vld [vmem:[%s11529_s1 + $0x34] ss:$8 sps:$4 sm:$0xff]   ;;  %v7342_v14 = vld [vmem:[%s11529_s1 + $0x30] ss:$8 sps:$4 sm:$0xff]   ;;  %v7344_v16 = vld [vmem:[%s11529_s1 + $0x44] ss:$8 sps:$4 sm:$0xff]  }
   0x6   :  { %v7340_v13 = vld [vmem:[%s11529_s1 + $0x434] ss:$8 sps:$4 sm:$0xff]   ;;  %v7343_v15 = vld [vmem:[%s11529_s1 + $0x430] ss:$8 sps:$4 sm:$0xff]   ;;  %v7346_v17 = vld [vmem:[%s11529_s1 + $0x444] ss:$8 sps:$4 sm:$0xff]  }
   0x7   :  { %1564 = vmatpush1.bf16.msra.mxu0 %v7330_v6  ;;  %v7348_v18 = vld [vmem:[%s11529_s1 + $0x40] ss:$8 sps:$4 sm:$0xff]   ;;  %v7350_v20 = vld [vmem:[%s11529_s1 + $0x54] ss:$8 sps:$4 sm:$0xff]   ;;  %v7354_v22 = vld [vmem:[%s11529_s1 + $0x50] ss:$8 sps:$4 sm:$0xff]  }
   0x8   :  { %2396 = vmatpush1.bf16.msra.mxu1 %v7331_v7  ;;  %1565 = vmatprep.subr.bf16.mxu0 %v7332_v8  ;;  %v7349_v19 = vld [vmem:[%s11529_s1 + $0x440] ss:$8 sps:$4 sm:$0xff]   ;;  %v7352_v21 = vld [vmem:[%s11529_s1 + $0x454] ss:$8 sps:$4 sm:$0xff]   ;;  %v7355_v23 = vld [vmem:[%s11529_s1 + $0x450] ss:$8 sps:$4 sm:$0xff]  }
   0x9   :  { %2397 = vmatprep.subr.bf16.mxu1 %v7334_v9  ;;  %v7356_v24 = vld [vmem:[%s11529_s1 + $0x64] ss:$8 sps:$4 sm:$0xff]   ;;  %v7360_v26 = vld [vmem:[%s11529_s1 + $0x60] ss:$8 sps:$4 sm:$0xff]   ;;  %v7362_v28 = vld [vmem:[%s11529_s1 + $0x74] ss:$8 sps:$4 sm:$0xff]  }
   0xa   :  { %v7358_v25 = vld [vmem:[%s11529_s1 + $0x464] ss:$8 sps:$4 sm:$0xff]   ;;  %v7361_v27 = vld [vmem:[%s11529_s1 + $0x460] ss:$8 sps:$4 sm:$0xff]   ;;  %v7364_v29 = vld [vmem:[%s11529_s1 + $0x474] ss:$8 sps:$4 sm:$0xff]  }
   0xb   :  { %1566 = vmatpush1.bf16.msra.mxu0 %v7336_v10  ;;  %v7366_v30 = vld [vmem:[%s11529_s1 + $0x70] ss:$8 sps:$4 sm:$0xff]   ;;  %v7368_v32 = vld [vmem:[%s11529_s1 + $0x84] ss:$8 sps:$4 sm:$0xff]   ;;  %v7372_v34 = vld [vmem:[%s11529_s1 + $0x80] ss:$8 sps:$4 sm:$0xff]  }
   0xc   :  { %2398 = vmatpush1.bf16.msra.mxu1 %v7337_v11  ;;  %1567 = vmatprep.subr.bf16.mxu0 %v7338_v12  ;;  %v7367_v31 = vld [vmem:[%s11529_s1 + $0x470] ss:$8 sps:$4 sm:$0xff]   ;;  %v7370_v33 = vld [vmem:[%s11529_s1 + $0x484] ss:$8 sps:$4 sm:$0xff]   ;;  %v7373_v35 = vld [vmem:[%s11529_s1 + $0x480] ss:$8 sps:$4 sm:$0xff]  }
   0xd   :  { %2399 = vmatprep.subr.bf16.mxu1 %v7340_v13  ;;  %v7374_v36 = vld [vmem:[%s11529_s1 + $0x94] ss:$8 sps:$4 sm:$0xff]   ;;  %v7378_v38 = vld [vmem:[%s11529_s1 + $0x90] ss:$8 sps:$4 sm:$0xff]   ;;  %v7380_v40 = vld [vmem:[%s11529_s1 + $0xa4] ss:$8 sps:$4 sm:$0xff]  }
   0xe   :  { %v7376_v37 = vld [vmem:[%s11529_s1 + $0x494] ss:$8 sps:$4 sm:$0xff]   ;;  %v7379_v39 = vld [vmem:[%s11529_s1 + $0x490] ss:$8 sps:$4 sm:$0xff]   ;;  %v7382_v41 = vld [vmem:[%s11529_s1 + $0x4a4] ss:$8 sps:$4 sm:$0xff]  }
   0xf   :  { %1568 = vmatpush1.bf16.msra.mxu0 %v7342_v14  ;;  %v7384_v42 = vld [vmem:[%s11529_s1 + $0xa0] ss:$8 sps:$4 sm:$0xff]   ;;  %v7386_v44 = vld [vmem:[%s11529_s1 + $0xb4] ss:$8 sps:$4 sm:$0xff]   ;;  %v7390_v47 = vld [vmem:[%s11529_s1 + $0xb0] ss:$8 sps:$4 sm:$0xff]  }
  0x10   :  { %2400 = vmatpush1.bf16.msra.mxu1 %v7343_v15  ;;  %1569 = vmatprep.subr.bf16.mxu0 %v7344_v16  ;;  %v7385_v43 = vld [vmem:[%s11529_s1 + $0x4a0] ss:$8 sps:$4 sm:$0xff]   ;;  %v7388_v45 = vld [vmem:[%s11529_s1 + $0x4b4] ss:$8 sps:$4 sm:$0xff]   ;;  %v7391_v49 = vld [vmem:[%s11529_s1 + $0x4b0] ss:$8 sps:$4 sm:$0xff]  }
  0x11   :  { %2401 = vmatprep.subr.bf16.mxu1 %v7346_v17  ;;  %v29_v46 = vld [vmem:[%s11530_s0] sm:$0xff]  ;;  %v7398_v56 = vld [vmem:[%s11529_s1 + $0xd4] ss:$8 sps:$4 sm:$0xff]   ;;  %v7402_v58 = vld [vmem:[%s11529_s1 + $0xd0] ss:$8 sps:$4 sm:$0xff]  }
  0x12   :  { %v6289_v48 = vcombine.high %v29_v46, %v29_v46  ;;  %v33_v50 = vld [vmem:[%s11530_s0 + $0x20] sm:$0xff]  ;;  %v7400_v57 = vld [vmem:[%s11529_s1 + $0x4d4] ss:$8 sps:$4 sm:$0xff]   ;;  %v7403_v59 = vld [vmem:[%s11529_s1 + $0x4d0] ss:$8 sps:$4 sm:$0xff]   ;;  %v6288_v6 = vcombine.low %v29_v46, %v29_v46 }
  0x13   :  { %1570 = vmatpush1.bf16.msra.mxu0 %v7348_v18  ;;  %v7392_v51 = vld [vmem:[%s11529_s1 + $0xc4] ss:$8 sps:$4 sm:$0xff]   ;;  %v6425_v53 = vcombine.high %v33_v50, %v33_v50  ;;  %v7396_v54 = vld [vmem:[%s11529_s1 + $0xc0] ss:$8 sps:$4 sm:$0xff]   ;;  %v7410_v0 = vld [vmem:[%s11529_s1 + $0xf4] ss:$8 sps:$4 sm:$0xff]   ;;  %v6424_v7 = vcombine.low %v33_v50, %v33_v50 }
  0x14   :  { %2402 = vmatpush1.bf16.msra.mxu1 %v7349_v19  ;;  %1571 = vmatprep.subr.bf16.mxu0 %v7350_v20  ;;  %v7394_v52 = vld [vmem:[%s11529_s1 + $0x4c4] ss:$8 sps:$4 sm:$0xff]   ;;  %v7397_v55 = vld [vmem:[%s11529_s1 + $0x4c0] ss:$8 sps:$4 sm:$0xff]   ;;  %v7412_v1 = vld [vmem:[%s11529_s1 + $0x4f4] ss:$8 sps:$4 sm:$0xff]  }
  0x15   :  { %2403 = vmatprep.subr.bf16.mxu1 %v7352_v21  ;;  %1593 = vmatprep.mubr.bf16.mxu0 %v6289_v48  ;;  %v7404_v60 = vld [vmem:[%s11529_s1 + $0xe4] ss:$8 sps:$4 sm:$0xff]   ;;  %v7408_v62 = vld [vmem:[%s11529_s1 + $0xe0] ss:$8 sps:$4 sm:$0xff]   ;;  %v7414_v2 = vld [vmem:[%s11529_s1 + $0xf0] ss:$8 sps:$4 sm:$0xff]  }
  0x16   :  { %2425 = vmatprep.mubr.bf16.mxu1 %v6425_v53  ;;  %v7406_v61 = vld [vmem:[%s11529_s1 + $0x4e4] ss:$8 sps:$4 sm:$0xff]   ;;  %v7409_v63 = vld [vmem:[%s11529_s1 + $0x4e0] ss:$8 sps:$4 sm:$0xff]   ;;  %v7415_v3 = vld [vmem:[%s11529_s1 + $0x4f0] ss:$8 sps:$4 sm:$0xff]  }
  0x17   :  { %1572 = vmatpush1.bf16.msra.mxu0 %v7354_v22  ;;  %v7420_v4 = vld [vmem:[%s11529_s1 + $0x104] ss:$8 sps:$4 sm:$0xff]   ;;  %v7418_v8 = vld [vmem:[%s11529_s1 + $0x100] ss:$8 sps:$4 sm:$0xff]   ;;  %v7428_v10 = vld [vmem:[%s11529_s1 + $0x114] ss:$8 sps:$4 sm:$0xff]  }
  0x18   :  { %2404 = vmatpush1.bf16.msra.mxu1 %v7355_v23  ;;  %1573 = vmatprep.subr.bf16.mxu0 %v7356_v24  ;;  %v7425_v5 = vld [vmem:[%s11529_s1 + $0x504] ss:$8 sps:$4 sm:$0xff]   ;;  %v7423_v9 = vld [vmem:[%s11529_s1 + $0x500] ss:$8 sps:$4 sm:$0xff]   ;;  %v7431_v11 = vld [vmem:[%s11529_s1 + $0x514] ss:$8 sps:$4 sm:$0xff]  }
  0x19   :  { %2405 = vmatprep.subr.bf16.mxu1 %v7358_v25  ;;  %v7426_v12 = vld [vmem:[%s11529_s1 + $0x110] ss:$8 sps:$4 sm:$0xff]   ;;  %v7434_v14 = vld [vmem:[%s11529_s1 + $0x124] ss:$8 sps:$4 sm:$0xff]   ;;  %v7432_v16 = vld [vmem:[%s11529_s1 + $0x120] ss:$8 sps:$4 sm:$0xff]  }
  0x1a   :  { %v7429_v13 = vld [vmem:[%s11529_s1 + $0x510] ss:$8 sps:$4 sm:$0xff]   ;;  %v7437_v15 = vld [vmem:[%s11529_s1 + $0x524] ss:$8 sps:$4 sm:$0xff]   ;;  %v7435_v17 = vld [vmem:[%s11529_s1 + $0x520] ss:$8 sps:$4 sm:$0xff]  }
  0x1b   :  { %1574 = vmatpush1.bf16.msra.mxu0 %v7360_v26  ;;  %v7440_v18 = vld [vmem:[%s11529_s1 + $0x134] ss:$8 sps:$4 sm:$0xff]   ;;  %v7438_v20 = vld [vmem:[%s11529_s1 + $0x130] ss:$8 sps:$4 sm:$0xff]   ;;  %v7446_v22 = vld [vmem:[%s11529_s1 + $0x144] ss:$8 sps:$4 sm:$0xff]  }
  0x1c   :  { %2406 = vmatpush1.bf16.msra.mxu1 %v7361_v27  ;;  %1575 = vmatprep.subr.bf16.mxu0 %v7362_v28  ;;  %v7443_v19 = vld [vmem:[%s11529_s1 + $0x534] ss:$8 sps:$4 sm:$0xff]   ;;  %v7441_v21 = vld [vmem:[%s11529_s1 + $0x530] ss:$8 sps:$4 sm:$0xff]   ;;  %v7449_v23 = vld [vmem:[%s11529_s1 + $0x544] ss:$8 sps:$4 sm:$0xff]  }
  0x1d   :  { %2407 = vmatprep.subr.bf16.mxu1 %v7364_v29  ;;  %v7444_v24 = vld [vmem:[%s11529_s1 + $0x140] ss:$8 sps:$4 sm:$0xff]   ;;  %v7452_v26 = vld [vmem:[%s11529_s1 + $0x154] ss:$8 sps:$4 sm:$0xff]   ;;  %v7450_v28 = vld [vmem:[%s11529_s1 + $0x150] ss:$8 sps:$4 sm:$0xff]  }
  0x1e   :  { %v7447_v25 = vld [vmem:[%s11529_s1 + $0x540] ss:$8 sps:$4 sm:$0xff]   ;;  %v7455_v27 = vld [vmem:[%s11529_s1 + $0x554] ss:$8 sps:$4 sm:$0xff]   ;;  %v7453_v29 = vld [vmem:[%s11529_s1 + $0x550] ss:$8 sps:$4 sm:$0xff]  }
  0x1f   :  { %1576 = vmatpush1.bf16.msra.mxu0 %v7366_v30  ;;  %v7458_v30 = vld [vmem:[%s11529_s1 + $0x164] ss:$8 sps:$4 sm:$0xff]   ;;  %v7476_v46 = vld [vmem:[%s11529_s1 + $0x194] ss:$8 sps:$4 sm:$0xff]   ;;  %v7474_v48 = vld [vmem:[%s11529_s1 + $0x190] ss:$8 sps:$4 sm:$0xff]  }
  0x20   :  { %2408 = vmatpush1.bf16.msra.mxu1 %v7367_v31  ;;  %1577 = vmatprep.subr.bf16.mxu0 %v7368_v32  ;;  %v7461_v31 = vld [vmem:[%s11529_s1 + $0x564] ss:$8 sps:$4 sm:$0xff]   ;;  %v7483_v53 = vld [vmem:[%s11529_s1 + $0x5a0] ss:$8 sps:$4 sm:$0xff]  }
  0x21   :  { %2409 = vmatprep.subr.bf16.mxu1 %v7370_v33  ;;  %v8882_v32 = vld [vmem:[%s11530_s0 + $0x8] sm:$0xff] }
  0x22   :  { %v7456_v33 = vld [vmem:[%s11529_s1 + $0x160] ss:$8 sps:$4 sm:$0xff]   ;;  %v7482_v50 = vld [vmem:[%s11529_s1 + $0x1a4] ss:$8 sps:$4 sm:$0xff]  }
  0x23   :  { %1578 = vmatpush1.bf16.msra.mxu0 %v7372_v34  ;;  %v7459_v34 = vld [vmem:[%s11529_s1 + $0x560] ss:$8 sps:$4 sm:$0xff]  }
  0x24   :  { %2410 = vmatpush1.bf16.msra.mxu1 %v7373_v35  ;;  %1579 = vmatprep.subr.bf16.mxu0 %v7374_v36  ;;  %v6291_v35 = vcombine.high %v8882_v32, %v8882_v32  ;;  %v8895_v36 = vld [vmem:[%s11530_s0 + $0x28] sm:$0xff] }
  0x25   :  { %2411 = vmatprep.subr.bf16.mxu1 %v7376_v37  ;;  %v7464_v37 = vld [vmem:[%s11529_s1 + $0x174] ss:$8 sps:$4 sm:$0xff]  }
  0x27   :  { %1580 = vmatpush1.bf16.msra.mxu0 %v7378_v38  ;;  %v6427_v38 = vcombine.high %v8895_v36, %v8895_v36 }
  0x28   :  { %2412 = vmatpush1.bf16.msra.mxu1 %v7379_v39  ;;  %1581 = vmatprep.subr.bf16.mxu0 %v7380_v40  ;;  %v7467_v39 = vld [vmem:[%s11529_s1 + $0x574] ss:$8 sps:$4 sm:$0xff]   ;;  %v7462_v40 = vld [vmem:[%s11529_s1 + $0x170] ss:$8 sps:$4 sm:$0xff]  }
  0x29   :  { %2413 = vmatprep.subr.bf16.mxu1 %v7382_v41  ;;  %v7465_v41 = vld [vmem:[%s11529_s1 + $0x570] ss:$8 sps:$4 sm:$0xff]  }
  0x2b   :  { %1582 = vmatpush1.bf16.msra.mxu0 %v7384_v42  ;;  %v7470_v42 = vld [vmem:[%s11529_s1 + $0x184] ss:$8 sps:$4 sm:$0xff]  }
  0x2c   :  { %2414 = vmatpush1.bf16.msra.mxu1 %v7385_v43  ;;  %1583 = vmatprep.subr.bf16.mxu0 %v7386_v44  ;;  %v7473_v43 = vld [vmem:[%s11529_s1 + $0x584] ss:$8 sps:$4 sm:$0xff]   ;;  %v7468_v44 = vld [vmem:[%s11529_s1 + $0x180] ss:$8 sps:$4 sm:$0xff]  }
  0x2d   :  { %2415 = vmatprep.subr.bf16.mxu1 %v7388_v45  ;;  %v7471_v45 = vld [vmem:[%s11529_s1 + $0x580] ss:$8 sps:$4 sm:$0xff]  }
  0x2f   :  { %1584 = vmatpush1.bf16.msra.mxu0 %v7390_v47  ;;  %v7479_v47 = vld [vmem:[%s11529_s1 + $0x594] ss:$8 sps:$4 sm:$0xff]  }
  0x30   :  { %2416 = vmatpush1.bf16.msra.mxu1 %v7391_v49  ;;  %1585 = vmatprep.subr.bf16.mxu0 %v7392_v51  ;;  %v7477_v49 = vld [vmem:[%s11529_s1 + $0x590] ss:$8 sps:$4 sm:$0xff]   ;;  %v7485_v51 = vld [vmem:[%s11529_s1 + $0x5a4] ss:$8 sps:$4 sm:$0xff]  }
  0x31   :  { %2417 = vmatprep.subr.bf16.mxu1 %v7394_v52  ;;  %v7480_v52 = vld [vmem:[%s11529_s1 + $0x1a0] ss:$8 sps:$4 sm:$0xff]  }
  0x33   :  { %1586 = vmatpush1.bf16.msra.mxu0 %v7396_v54  ;;  %v7488_v54 = vld [vmem:[%s11529_s1 + $0x1b4] ss:$8 sps:$4 sm:$0xff]  }
  0x34   :  { %2418 = vmatpush1.bf16.msra.mxu1 %v7397_v55  ;;  %1587 = vmatprep.subr.bf16.mxu0 %v7398_v56  ;;  %v7491_v55 = vld [vmem:[%s11529_s1 + $0x5b4] ss:$8 sps:$4 sm:$0xff]   ;;  %v7486_v56 = vld [vmem:[%s11529_s1 + $0x1b0] ss:$8 sps:$4 sm:$0xff]  }
  0x35   :  { %2419 = vmatprep.subr.bf16.mxu1 %v7400_v57  ;;  %v7489_v57 = vld [vmem:[%s11529_s1 + $0x5b0] ss:$8 sps:$4 sm:$0xff]  }
  0x37   :  { %1588 = vmatpush1.bf16.msra.mxu0 %v7402_v58  ;;  %v7494_v58 = vld [vmem:[%s11529_s1 + $0x1c4] ss:$8 sps:$4 sm:$0xff]  }
  0x38   :  { %2420 = vmatpush1.bf16.msra.mxu1 %v7403_v59  ;;  %1589 = vmatprep.subr.bf16.mxu0 %v7404_v60  ;;  %v7497_v59 = vld [vmem:[%s11529_s1 + $0x5c4] ss:$8 sps:$4 sm:$0xff]   ;;  %v7492_v60 = vld [vmem:[%s11529_s1 + $0x1c0] ss:$8 sps:$4 sm:$0xff]  }
  0x39   :  { %2421 = vmatprep.subr.bf16.mxu1 %v7406_v61  ;;  %v7495_v61 = vld [vmem:[%s11529_s1 + $0x5c0] ss:$8 sps:$4 sm:$0xff]  }
  0x3b   :  { %1590 = vmatpush1.bf16.msra.mxu0 %v7408_v62  ;;  %v7500_v62 = vld [vmem:[%s11529_s1 + $0x1d4] ss:$8 sps:$4 sm:$0xff]  }
  0x3c   :  { %2422 = vmatpush1.bf16.msra.mxu1 %v7409_v63  ;;  %1591 = vmatprep.subr.bf16.mxu0 %v7410_v0  ;;  %v7503_v63 = vld [vmem:[%s11529_s1 + $0x5d4] ss:$8 sps:$4 sm:$0xff]   ;;  %v7498_v0 = vld [vmem:[%s11529_s1 + $0x1d0] ss:$8 sps:$4 sm:$0xff]  }
  0x3d   :  { %2423 = vmatprep.subr.bf16.mxu1 %v7412_v1  ;;  %v7501_v1 = vld [vmem:[%s11529_s1 + $0x5d0] ss:$8 sps:$4 sm:$0xff]  }
  0x3f   :  { %1592 = vmatpush1.bf16.msra.mxu0 %v7414_v2  ;;  %v7506_v2 = vld [vmem:[%s11529_s1 + $0x1e4] ss:$8 sps:$4 sm:$0xff]  }
  0x40   :  { %2424 = vmatpush1.bf16.msra.mxu1 %v7415_v3  ;;  %1602 = vmatprep.subr.bf16.mxu0 %v7420_v4  ;;  %v7509_v3 = vld [vmem:[%s11529_s1 + $0x5e4] ss:$8 sps:$4 sm:$0xff]   ;;  %v7504_v4 = vld [vmem:[%s11529_s1 + $0x1e0] ss:$8 sps:$4 sm:$0xff]  }
  0x41   :  { %2434 = vmatprep.subr.bf16.mxu1 %v7425_v5  ;;  %v7507_v5 = vld [vmem:[%s11529_s1 + $0x5e0] ss:$8 sps:$4 sm:$0xff]  }
  0x42   :  { %1594 = vmatmul.mubr.bf16.vlgmr.msra.gmra.mrb[0].mxu0 %v6288_v6  ;;  %v7512_v6 = vld [vmem:[%s11529_s1 + $0x1f4] ss:$8 sps:$4 sm:$0xff]  }
  0x43   :  { %2426 = vmatmul.mubr.bf16.vlgmr.msra.gmra.mrb[0].mxu1 %v6424_v7  ;;  %1603 = vmatpush1.bf16.msra.mxu0 %v7418_v8  ;;  %v7515_v7 = vld [vmem:[%s11529_s1 + $0x5f4] ss:$8 sps:$4 sm:$0xff]   ;;  %v7510_v8 = vld [vmem:[%s11529_s1 + $0x1f0] ss:$8 sps:$4 sm:$0xff]  }
  0x44   :  { %2435 = vmatpush1.bf16.msra.mxu1 %v7423_v9  ;;  %1604 = vmatprep.subr.bf16.mxu0 %v7428_v10  ;;  %v7513_v9 = vld [vmem:[%s11529_s1 + $0x5f0] ss:$8 sps:$4 sm:$0xff]   ;;  %v7520_v10 = vld [vmem:[%s11529_s1 + $0x204] ss:$8 sps:$4 sm:$0xff]  }
  0x45   :  { %2436 = vmatprep.subr.bf16.mxu1 %v7431_v11  ;;  %1634 = vmatprep.mubr.bf16.mxu0 %v6291_v35  ;;  %v7525_v11 = vld [vmem:[%s11529_s1 + $0x604] ss:$8 sps:$4 sm:$0xff]   ;;  %v7547_v35 = vld [vmem:[%s11529_s1 + $0x640] ss:$8 sps:$4 sm:$0xff]  }
  0x46   :  { %2466 = vmatprep.mubr.bf16.mxu1 %v6427_v38  ;;  %v7550_v38 = vld [vmem:[%s11529_s1 + $0x250] ss:$8 sps:$4 sm:$0xff]  }
  0x47   :  { %1605 = vmatpush1.bf16.msra.mxu0 %v7426_v12  ;;  %v6290_v12 = vcombine.low %v8882_v32, %v8882_v32  ;;  %v7546_v32 = vld [vmem:[%s11529_s1 + $0x244] ss:$8 sps:$4 sm:$0xff]  }
  0x48   :  { %2437 = vmatpush1.bf16.msra.mxu1 %v7429_v13  ;;  %1606 = vmatprep.subr.bf16.mxu0 %v7434_v14  ;;  %v7518_v13 = vld [vmem:[%s11529_s1 + $0x200] ss:$8 sps:$4 sm:$0xff]   ;;  %v6426_v14 = vcombine.low %v8895_v36, %v8895_v36  ;;  %v7552_v36 = vld [vmem:[%s11529_s1 + $0x254] ss:$8 sps:$4 sm:$0xff]  }
  0x49   :  { %2438 = vmatprep.subr.bf16.mxu1 %v7437_v15  ;;  %v7523_v15 = vld [vmem:[%s11529_s1 + $0x600] ss:$8 sps:$4 sm:$0xff]  }
  0x4b   :  { %1607 = vmatpush1.bf16.msra.mxu0 %v7432_v16  ;;  %v7528_v16 = vld [vmem:[%s11529_s1 + $0x214] ss:$8 sps:$4 sm:$0xff]  }
  0x4c   :  { %2439 = vmatpush1.bf16.msra.mxu1 %v7435_v17  ;;  %1608 = vmatprep.subr.bf16.mxu0 %v7440_v18  ;;  %v7531_v17 = vld [vmem:[%s11529_s1 + $0x614] ss:$8 sps:$4 sm:$0xff]  }
  0x4d   :  { %2440 = vmatprep.subr.bf16.mxu1 %v7443_v19  ;;  %v9032_v18 = vld [vmem:[%s11530_s0 + $0x10] sm:$0xff] }
  0x4e   :  { %v6293_v19 = vcombine.high %v9032_v18, %v9032_v18 }
  0x4f   :  { %1609 = vmatpush1.bf16.msra.mxu0 %v7438_v20  ;;  %v9039_v20 = vld [vmem:[%s11530_s0 + $0x30] sm:$0xff] }
  0x50   :  { %2441 = vmatpush1.bf16.msra.mxu1 %v7441_v21  ;;  %1610 = vmatprep.subr.bf16.mxu0 %v7446_v22  ;;  %v7526_v21 = vld [vmem:[%s11529_s1 + $0x210] ss:$8 sps:$4 sm:$0xff]  }
  0x51   :  { %2442 = vmatprep.subr.bf16.mxu1 %v7449_v23  ;;  %v7529_v22 = vld [vmem:[%s11529_s1 + $0x610] ss:$8 sps:$4 sm:$0xff]   ;;  %v6429_v23 = vcombine.high %v9039_v20, %v9039_v20 }
  0x53   :  { %1611 = vmatpush1.bf16.msra.mxu0 %v7444_v24  ;;  %v7534_v24 = vld [vmem:[%s11529_s1 + $0x224] ss:$8 sps:$4 sm:$0xff]  }
  0x54   :  { %2443 = vmatpush1.bf16.msra.mxu1 %v7447_v25  ;;  %1612 = vmatprep.subr.bf16.mxu0 %v7452_v26  ;;  %v7537_v25 = vld [vmem:[%s11529_s1 + $0x624] ss:$8 sps:$4 sm:$0xff]   ;;  %v7532_v26 = vld [vmem:[%s11529_s1 + $0x220] ss:$8 sps:$4 sm:$0xff]  }
  0x55   :  { %2444 = vmatprep.subr.bf16.mxu1 %v7455_v27  ;;  %v7535_v27 = vld [vmem:[%s11529_s1 + $0x620] ss:$8 sps:$4 sm:$0xff]  }
  0x57   :  { %1613 = vmatpush1.bf16.msra.mxu0 %v7450_v28  ;;  %v7540_v28 = vld [vmem:[%s11529_s1 + $0x234] ss:$8 sps:$4 sm:$0xff]  }
  0x58   :  { %2445 = vmatpush1.bf16.msra.mxu1 %v7453_v29  ;;  %1614 = vmatprep.subr.bf16.mxu0 %v7458_v30  ;;  %v7543_v29 = vld [vmem:[%s11529_s1 + $0x634] ss:$8 sps:$4 sm:$0xff]   ;;  %v7538_v30 = vld [vmem:[%s11529_s1 + $0x230] ss:$8 sps:$4 sm:$0xff]  }
  0x59   :  { %2446 = vmatprep.subr.bf16.mxu1 %v7461_v31  ;;  %v7541_v31 = vld [vmem:[%s11529_s1 + $0x630] ss:$8 sps:$4 sm:$0xff]  }
  0x5b   :  { %1615 = vmatpush1.bf16.msra.mxu0 %v7456_v33  ;;  %v7549_v33 = vld [vmem:[%s11529_s1 + $0x644] ss:$8 sps:$4 sm:$0xff]  }
  0x5c   :  { %2447 = vmatpush1.bf16.msra.mxu1 %v7459_v34  ;;  %1616 = vmatprep.subr.bf16.mxu0 %v7464_v37  ;;  %v7544_v34 = vld [vmem:[%s11529_s1 + $0x240] ss:$8 sps:$4 sm:$0xff]   ;;  %v7555_v37 = vld [vmem:[%s11529_s1 + $0x654] ss:$8 sps:$4 sm:$0xff]  }
  0x5d   :  { %2448 = vmatprep.subr.bf16.mxu1 %v7467_v39  ;;  %v7553_v39 = vld [vmem:[%s11529_s1 + $0x650] ss:$8 sps:$4 sm:$0xff]  }
  0x5f   :  { %1617 = vmatpush1.bf16.msra.mxu0 %v7462_v40  ;;  %v7558_v40 = vld [vmem:[%s11529_s1 + $0x264] ss:$8 sps:$4 sm:$0xff]  }
  0x60   :  { %2449 = vmatpush1.bf16.msra.mxu1 %v7465_v41  ;;  %1618 = vmatprep.subr.bf16.mxu0 %v7470_v42  ;;  %v7561_v41 = vld [vmem:[%s11529_s1 + $0x664] ss:$8 sps:$4 sm:$0xff]   ;;  %v7556_v42 = vld [vmem:[%s11529_s1 + $0x260] ss:$8 sps:$4 sm:$0xff]  }
  0x61   :  { %2450 = vmatprep.subr.bf16.mxu1 %v7473_v43  ;;  %v7559_v43 = vld [vmem:[%s11529_s1 + $0x660] ss:$8 sps:$4 sm:$0xff]  }
  0x63   :  { %1619 = vmatpush1.bf16.msra.mxu0 %v7468_v44  ;;  %v7564_v44 = vld [vmem:[%s11529_s1 + $0x274] ss:$8 sps:$4 sm:$0xff]  }
  0x64   :  { %2451 = vmatpush1.bf16.msra.mxu1 %v7471_v45  ;;  %1620 = vmatprep.subr.bf16.mxu0 %v7476_v46  ;;  %v7567_v45 = vld [vmem:[%s11529_s1 + $0x674] ss:$8 sps:$4 sm:$0xff]   ;;  %v7562_v46 = vld [vmem:[%s11529_s1 + $0x270] ss:$8 sps:$4 sm:$0xff]  }
  0x65   :  { %2452 = vmatprep.subr.bf16.mxu1 %v7479_v47  ;;  %v7565_v47 = vld [vmem:[%s11529_s1 + $0x670] ss:$8 sps:$4 sm:$0xff]  }
  0x67   :  { %1621 = vmatpush1.bf16.msra.mxu0 %v7474_v48  ;;  %v7570_v48 = vld [vmem:[%s11529_s1 + $0x284] ss:$8 sps:$4 sm:$0xff]  }
  0x68   :  { %2453 = vmatpush1.bf16.msra.mxu1 %v7477_v49  ;;  %1622 = vmatprep.subr.bf16.mxu0 %v7482_v50  ;;  %v7573_v49 = vld [vmem:[%s11529_s1 + $0x684] ss:$8 sps:$4 sm:$0xff]   ;;  %v7568_v50 = vld [vmem:[%s11529_s1 + $0x280] ss:$8 sps:$4 sm:$0xff]  }
  0x69   :  { %2454 = vmatprep.subr.bf16.mxu1 %v7485_v51  ;;  %v7571_v51 = vld [vmem:[%s11529_s1 + $0x680] ss:$8 sps:$4 sm:$0xff]  }
  0x6b   :  { %1623 = vmatpush1.bf16.msra.mxu0 %v7480_v52  ;;  %v7576_v52 = vld [vmem:[%s11529_s1 + $0x294] ss:$8 sps:$4 sm:$0xff]  }
  0x6c   :  { %2455 = vmatpush1.bf16.msra.mxu1 %v7483_v53  ;;  %1624 = vmatprep.subr.bf16.mxu0 %v7488_v54  ;;  %v7579_v53 = vld [vmem:[%s11529_s1 + $0x694] ss:$8 sps:$4 sm:$0xff]   ;;  %v7574_v54 = vld [vmem:[%s11529_s1 + $0x290] ss:$8 sps:$4 sm:$0xff]  }
  0x6d   :  { %2456 = vmatprep.subr.bf16.mxu1 %v7491_v55  ;;  %v7577_v55 = vld [vmem:[%s11529_s1 + $0x690] ss:$8 sps:$4 sm:$0xff]  }
  0x6f   :  { %1625 = vmatpush1.bf16.msra.mxu0 %v7486_v56  ;;  %v7582_v56 = vld [vmem:[%s11529_s1 + $0x2a4] ss:$8 sps:$4 sm:$0xff]  }
  0x70   :  { %2457 = vmatpush1.bf16.msra.mxu1 %v7489_v57  ;;  %1626 = vmatprep.subr.bf16.mxu0 %v7494_v58  ;;  %v7585_v57 = vld [vmem:[%s11529_s1 + $0x6a4] ss:$8 sps:$4 sm:$0xff]   ;;  %v7580_v58 = vld [vmem:[%s11529_s1 + $0x2a0] ss:$8 sps:$4 sm:$0xff]  }
  0x71   :  { %2458 = vmatprep.subr.bf16.mxu1 %v7497_v59  ;;  %v7583_v59 = vld [vmem:[%s11529_s1 + $0x6a0] ss:$8 sps:$4 sm:$0xff]  }
  0x73   :  { %1627 = vmatpush1.bf16.msra.mxu0 %v7492_v60  ;;  %v7588_v60 = vld [vmem:[%s11529_s1 + $0x2b4] ss:$8 sps:$4 sm:$0xff]  }
  0x74   :  { %2459 = vmatpush1.bf16.msra.mxu1 %v7495_v61  ;;  %1628 = vmatprep.subr.bf16.mxu0 %v7500_v62  ;;  %v7591_v61 = vld [vmem:[%s11529_s1 + $0x6b4] ss:$8 sps:$4 sm:$0xff]   ;;  %v7586_v62 = vld [vmem:[%s11529_s1 + $0x2b0] ss:$8 sps:$4 sm:$0xff]  }
  0x75   :  { %2460 = vmatprep.subr.bf16.mxu1 %v7503_v63  ;;  %v7589_v63 = vld [vmem:[%s11529_s1 + $0x6b0] ss:$8 sps:$4 sm:$0xff]  }
  0x77   :  { %1629 = vmatpush1.bf16.msra.mxu0 %v7498_v0  ;;  %v7594_v0 = vld [vmem:[%s11529_s1 + $0x2c4] ss:$8 sps:$4 sm:$0xff]  }
  0x78   :  { %2461 = vmatpush1.bf16.msra.mxu1 %v7501_v1  ;;  %1630 = vmatprep.subr.bf16.mxu0 %v7506_v2  ;;  %v7597_v1 = vld [vmem:[%s11529_s1 + $0x6c4] ss:$8 sps:$4 sm:$0xff]   ;;  %v7592_v2 = vld [vmem:[%s11529_s1 + $0x2c0] ss:$8 sps:$4 sm:$0xff]  }
  0x79   :  { %2462 = vmatprep.subr.bf16.mxu1 %v7509_v3  ;;  %v7595_v3 = vld [vmem:[%s11529_s1 + $0x6c0] ss:$8 sps:$4 sm:$0xff]  }
  0x7b   :  { %1631 = vmatpush1.bf16.msra.mxu0 %v7504_v4  ;;  %v7600_v4 = vld [vmem:[%s11529_s1 + $0x2d4] ss:$8 sps:$4 sm:$0xff]  }
  0x7c   :  { %2463 = vmatpush1.bf16.msra.mxu1 %v7507_v5  ;;  %1632 = vmatprep.subr.bf16.mxu0 %v7512_v6  ;;  %v7603_v5 = vld [vmem:[%s11529_s1 + $0x6d4] ss:$8 sps:$4 sm:$0xff]   ;;  %v7598_v6 = vld [vmem:[%s11529_s1 + $0x2d0] ss:$8 sps:$4 sm:$0xff]  }
  0x7d   :  { %2464 = vmatprep.subr.bf16.mxu1 %v7515_v7  ;;  %v7601_v7 = vld [vmem:[%s11529_s1 + $0x6d0] ss:$8 sps:$4 sm:$0xff]  }
  0x7f   :  { %1633 = vmatpush1.bf16.msra.mxu0 %v7510_v8  ;;  %v7606_v8 = vld [vmem:[%s11529_s1 + $0x2e4] ss:$8 sps:$4 sm:$0xff]  }
  0x80   :  { %2465 = vmatpush1.bf16.msra.mxu1 %v7513_v9  ;;  %1643 = vmatprep.subr.bf16.mxu0 %v7520_v10  ;;  %v7609_v9 = vld [vmem:[%s11529_s1 + $0x6e4] ss:$8 sps:$4 sm:$0xff]   ;;  %v7604_v10 = vld [vmem:[%s11529_s1 + $0x2e0] ss:$8 sps:$4 sm:$0xff]  }
  0x81   :  { %2475 = vmatprep.subr.bf16.mxu1 %v7525_v11  ;;  %v7607_v11 = vld [vmem:[%s11529_s1 + $0x6e0] ss:$8 sps:$4 sm:$0xff]  }
  0x82   :  { %1635 = vmatmul.mubr.bf16.vlgmr.msra.gmra.mrb[0].mxu0 %v6290_v12  ;;  %v7612_v12 = vld [vmem:[%s11529_s1 + $0x2f4] ss:$8 sps:$4 sm:$0xff]  }
  0x83   :  { %2467 = vmatmul.mubr.bf16.vlgmr.msra.gmra.mrb[0].mxu1 %v6426_v14  ;;  %1644 = vmatpush1.bf16.msra.mxu0 %v7518_v13  ;;  %v7615_v13 = vld [vmem:[%s11529_s1 + $0x6f4] ss:$8 sps:$4 sm:$0xff]   ;;  %v7610_v14 = vld [vmem:[%s11529_s1 + $0x2f0] ss:$8 sps:$4 sm:$0xff]  }
  0x84   :  { %2476 = vmatpush1.bf16.msra.mxu1 %v7523_v15  ;;  %1645 = vmatprep.subr.bf16.mxu0 %v7528_v16  ;;  %v7613_v15 = vld [vmem:[%s11529_s1 + $0x6f0] ss:$8 sps:$4 sm:$0xff]   ;;  %v7620_v16 = vld [vmem:[%s11529_s1 + $0x304] ss:$8 sps:$4 sm:$0xff]  }
  0x85   :  { %2477 = vmatprep.subr.bf16.mxu1 %v7531_v17  ;;  %1675 = vmatprep.mubr.bf16.mxu0 %v6293_v19  ;;  %v7625_v17 = vld [vmem:[%s11529_s1 + $0x704] ss:$8 sps:$4 sm:$0xff]   ;;  %v7618_v19 = vld [vmem:[%s11529_s1 + $0x300] ss:$8 sps:$4 sm:$0xff]  }
  0x86   :  { %2507 = vmatprep.mubr.bf16.mxu1 %v6429_v23  ;;  %v6428_v23 = vcombine.low %v9039_v20, %v9039_v20 }
  0x87   :  { %1646 = vmatpush1.bf16.msra.mxu0 %v7526_v21  ;;  %v7623_v21 = vld [vmem:[%s11529_s1 + $0x700] ss:$8 sps:$4 sm:$0xff]  }
  0x88   :  { %2478 = vmatpush1.bf16.msra.mxu1 %v7529_v22  ;;  %1647 = vmatprep.subr.bf16.mxu0 %v7534_v24  ;;  %v6292_v22 = vcombine.low %v9032_v18, %v9032_v18  ;;  %v9236_v24 = vld [vmem:[%s11530_s0 + $0x18] sm:$0xff] }
  0x89   :  { %2479 = vmatprep.subr.bf16.mxu1 %v7537_v25  ;;  %v9241_v25 = vld [vmem:[%s11530_s0 + $0x38] sm:$0xff]  ;;  %v6295_v20 = vcombine.high %v9236_v24, %v9236_v24 }
  0x8a   :  { %v7631_v18 = vld [vmem:[%s11529_s1 + $0x714] ss:$8 sps:$4 sm:$0xff]  }
  0x8b   :  { %1648 = vmatpush1.bf16.msra.mxu0 %v7532_v26  ;;  %v7628_v26 = vld [vmem:[%s11529_s1 + $0x314] ss:$8 sps:$4 sm:$0xff]  }
  0x8c   :  { %2480 = vmatpush1.bf16.msra.mxu1 %v7535_v27  ;;  %1649 = vmatprep.subr.bf16.mxu0 %v7540_v28  ;;  %v6431_v27 = vcombine.high %v9241_v25, %v9241_v25  ;;  %v7626_v28 = vld [vmem:[%s11529_s1 + $0x310] ss:$8 sps:$4 sm:$0xff]  }
  0x8d   :  { %2481 = vmatprep.subr.bf16.mxu1 %v7543_v29  ;;  %v7629_v29 = vld [vmem:[%s11529_s1 + $0x710] ss:$8 sps:$4 sm:$0xff]  }
  0x8f   :  { %1650 = vmatpush1.bf16.msra.mxu0 %v7538_v30  ;;  %v7634_v30 = vld [vmem:[%s11529_s1 + $0x324] ss:$8 sps:$4 sm:$0xff]  }
  0x90   :  { %2482 = vmatpush1.bf16.msra.mxu1 %v7541_v31  ;;  %1651 = vmatprep.subr.bf16.mxu0 %v7546_v32  ;;  %v7637_v31 = vld [vmem:[%s11529_s1 + $0x724] ss:$8 sps:$4 sm:$0xff]   ;;  %v7632_v32 = vld [vmem:[%s11529_s1 + $0x320] ss:$8 sps:$4 sm:$0xff]  }
  0x91   :  { %2483 = vmatprep.subr.bf16.mxu1 %v7549_v33  ;;  %v7635_v33 = vld [vmem:[%s11529_s1 + $0x720] ss:$8 sps:$4 sm:$0xff]  }
  0x93   :  { %1652 = vmatpush1.bf16.msra.mxu0 %v7544_v34  ;;  %v7640_v34 = vld [vmem:[%s11529_s1 + $0x334] ss:$8 sps:$4 sm:$0xff]  }
  0x94   :  { %2484 = vmatpush1.bf16.msra.mxu1 %v7547_v35  ;;  %1653 = vmatprep.subr.bf16.mxu0 %v7552_v36  ;;  %v7643_v35 = vld [vmem:[%s11529_s1 + $0x734] ss:$8 sps:$4 sm:$0xff]   ;;  %v7638_v36 = vld [vmem:[%s11529_s1 + $0x330] ss:$8 sps:$4 sm:$0xff]  }
  0x95   :  { %2485 = vmatprep.subr.bf16.mxu1 %v7555_v37  ;;  %v7641_v37 = vld [vmem:[%s11529_s1 + $0x730] ss:$8 sps:$4 sm:$0xff]  }
  0x97   :  { %1654 = vmatpush1.bf16.msra.mxu0 %v7550_v38  ;;  %v7646_v38 = vld [vmem:[%s11529_s1 + $0x344] ss:$8 sps:$4 sm:$0xff]  }
  0x98   :  { %2486 = vmatpush1.bf16.msra.mxu1 %v7553_v39  ;;  %1655 = vmatprep.subr.bf16.mxu0 %v7558_v40  ;;  %v7649_v39 = vld [vmem:[%s11529_s1 + $0x744] ss:$8 sps:$4 sm:$0xff]   ;;  %v7644_v40 = vld [vmem:[%s11529_s1 + $0x340] ss:$8 sps:$4 sm:$0xff]  }
  0x99   :  { %2487 = vmatprep.subr.bf16.mxu1 %v7561_v41  ;;  %v7647_v41 = vld [vmem:[%s11529_s1 + $0x740] ss:$8 sps:$4 sm:$0xff]  }
  0x9b   :  { %1656 = vmatpush1.bf16.msra.mxu0 %v7556_v42  ;;  %v7652_v42 = vld [vmem:[%s11529_s1 + $0x354] ss:$8 sps:$4 sm:$0xff]  }
  0x9c   :  { %2488 = vmatpush1.bf16.msra.mxu1 %v7559_v43  ;;  %1657 = vmatprep.subr.bf16.mxu0 %v7564_v44  ;;  %v7655_v43 = vld [vmem:[%s11529_s1 + $0x754] ss:$8 sps:$4 sm:$0xff]   ;;  %v7650_v44 = vld [vmem:[%s11529_s1 + $0x350] ss:$8 sps:$4 sm:$0xff]  }
  0x9d   :  { %2489 = vmatprep.subr.bf16.mxu1 %v7567_v45  ;;  %v7653_v45 = vld [vmem:[%s11529_s1 + $0x750] ss:$8 sps:$4 sm:$0xff]  }
  0x9f   :  { %1658 = vmatpush1.bf16.msra.mxu0 %v7562_v46  ;;  %v7658_v46 = vld [vmem:[%s11529_s1 + $0x364] ss:$8 sps:$4 sm:$0xff]  }
  0xa0   :  { %2490 = vmatpush1.bf16.msra.mxu1 %v7565_v47  ;;  %1659 = vmatprep.subr.bf16.mxu0 %v7570_v48  ;;  %v7661_v47 = vld [vmem:[%s11529_s1 + $0x764] ss:$8 sps:$4 sm:$0xff]   ;;  %v7656_v48 = vld [vmem:[%s11529_s1 + $0x360] ss:$8 sps:$4 sm:$0xff]  }
  0xa1   :  { %2491 = vmatprep.subr.bf16.mxu1 %v7573_v49  ;;  %v7659_v49 = vld [vmem:[%s11529_s1 + $0x760] ss:$8 sps:$4 sm:$0xff]  }
  0xa3   :  { %1660 = vmatpush1.bf16.msra.mxu0 %v7568_v50  ;;  %v7664_v50 = vld [vmem:[%s11529_s1 + $0x374] ss:$8 sps:$4 sm:$0xff]  }
  0xa4   :  { %2492 = vmatpush1.bf16.msra.mxu1 %v7571_v51  ;;  %1661 = vmatprep.subr.bf16.mxu0 %v7576_v52  ;;  %v7667_v51 = vld [vmem:[%s11529_s1 + $0x774] ss:$8 sps:$4 sm:$0xff]   ;;  %v7662_v52 = vld [vmem:[%s11529_s1 + $0x370] ss:$8 sps:$4 sm:$0xff]  }
  0xa5   :  { %2493 = vmatprep.subr.bf16.mxu1 %v7579_v53  ;;  %v7665_v53 = vld [vmem:[%s11529_s1 + $0x770] ss:$8 sps:$4 sm:$0xff]  }
  0xa7   :  { %1662 = vmatpush1.bf16.msra.mxu0 %v7574_v54  ;;  %v7670_v54 = vld [vmem:[%s11529_s1 + $0x384] ss:$8 sps:$4 sm:$0xff]  }
  0xa8   :  { %2494 = vmatpush1.bf16.msra.mxu1 %v7577_v55  ;;  %1663 = vmatprep.subr.bf16.mxu0 %v7582_v56  ;;  %v7673_v55 = vld [vmem:[%s11529_s1 + $0x784] ss:$8 sps:$4 sm:$0xff]   ;;  %v7668_v56 = vld [vmem:[%s11529_s1 + $0x380] ss:$8 sps:$4 sm:$0xff]  }
  0xa9   :  { %2495 = vmatprep.subr.bf16.mxu1 %v7585_v57  ;;  %v7671_v57 = vld [vmem:[%s11529_s1 + $0x780] ss:$8 sps:$4 sm:$0xff]  }
  0xab   :  { %1664 = vmatpush1.bf16.msra.mxu0 %v7580_v58  ;;  %v7676_v58 = vld [vmem:[%s11529_s1 + $0x394] ss:$8 sps:$4 sm:$0xff]  }
  0xac   :  { %2496 = vmatpush1.bf16.msra.mxu1 %v7583_v59  ;;  %1665 = vmatprep.subr.bf16.mxu0 %v7588_v60  ;;  %v7679_v59 = vld [vmem:[%s11529_s1 + $0x794] ss:$8 sps:$4 sm:$0xff]   ;;  %v7674_v60 = vld [vmem:[%s11529_s1 + $0x390] ss:$8 sps:$4 sm:$0xff]  }
  0xad   :  { %2497 = vmatprep.subr.bf16.mxu1 %v7591_v61  ;;  %v7677_v61 = vld [vmem:[%s11529_s1 + $0x790] ss:$8 sps:$4 sm:$0xff]  }
  0xaf   :  { %1666 = vmatpush1.bf16.msra.mxu0 %v7586_v62  ;;  %v7682_v62 = vld [vmem:[%s11529_s1 + $0x3a4] ss:$8 sps:$4 sm:$0xff]  }
  0xb0   :  { %2498 = vmatpush1.bf16.msra.mxu1 %v7589_v63  ;;  %1667 = vmatprep.subr.bf16.mxu0 %v7594_v0  ;;  %v7685_v63 = vld [vmem:[%s11529_s1 + $0x7a4] ss:$8 sps:$4 sm:$0xff]   ;;  %v7680_v0 = vld [vmem:[%s11529_s1 + $0x3a0] ss:$8 sps:$4 sm:$0xff]  }
  0xb1   :  { %2499 = vmatprep.subr.bf16.mxu1 %v7597_v1  ;;  %v7683_v1 = vld [vmem:[%s11529_s1 + $0x7a0] ss:$8 sps:$4 sm:$0xff]  }
  0xb3   :  { %1668 = vmatpush1.bf16.msra.mxu0 %v7592_v2  ;;  %v7688_v2 = vld [vmem:[%s11529_s1 + $0x3b4] ss:$8 sps:$4 sm:$0xff]  }
  0xb4   :  { %2500 = vmatpush1.bf16.msra.mxu1 %v7595_v3  ;;  %1669 = vmatprep.subr.bf16.mxu0 %v7600_v4  ;;  %v7691_v3 = vld [vmem:[%s11529_s1 + $0x7b4] ss:$8 sps:$4 sm:$0xff]   ;;  %v7686_v4 = vld [vmem:[%s11529_s1 + $0x3b0] ss:$8 sps:$4 sm:$0xff]  }
  0xb5   :  { %2501 = vmatprep.subr.bf16.mxu1 %v7603_v5  ;;  %v7689_v5 = vld [vmem:[%s11529_s1 + $0x7b0] ss:$8 sps:$4 sm:$0xff]  }
  0xb7   :  { %1670 = vmatpush1.bf16.msra.mxu0 %v7598_v6  ;;  %v7694_v6 = vld [vmem:[%s11529_s1 + $0x3c4] ss:$8 sps:$4 sm:$0xff]  }
  0xb8   :  { %2502 = vmatpush1.bf16.msra.mxu1 %v7601_v7  ;;  %1671 = vmatprep.subr.bf16.mxu0 %v7606_v8  ;;  %v7697_v7 = vld [vmem:[%s11529_s1 + $0x7c4] ss:$8 sps:$4 sm:$0xff]   ;;  %v7692_v8 = vld [vmem:[%s11529_s1 + $0x3c0] ss:$8 sps:$4 sm:$0xff]  }
  0xb9   :  { %2503 = vmatprep.subr.bf16.mxu1 %v7609_v9  ;;  %v7695_v9 = vld [vmem:[%s11529_s1 + $0x7c0] ss:$8 sps:$4 sm:$0xff]  }
  0xbb   :  { %1672 = vmatpush1.bf16.msra.mxu0 %v7604_v10  ;;  %v7700_v10 = vld [vmem:[%s11529_s1 + $0x3d4] ss:$8 sps:$4 sm:$0xff]  }
  0xbc   :  { %2504 = vmatpush1.bf16.msra.mxu1 %v7607_v11  ;;  %1673 = vmatprep.subr.bf16.mxu0 %v7612_v12  ;;  %v7703_v11 = vld [vmem:[%s11529_s1 + $0x7d4] ss:$8 sps:$4 sm:$0xff]   ;;  %v7698_v12 = vld [vmem:[%s11529_s1 + $0x3d0] ss:$8 sps:$4 sm:$0xff]  }
  0xbd   :  { %2505 = vmatprep.subr.bf16.mxu1 %v7615_v13  ;;  %v7701_v13 = vld [vmem:[%s11529_s1 + $0x7d0] ss:$8 sps:$4 sm:$0xff]  }
  0xbf   :  { %1674 = vmatpush1.bf16.msra.mxu0 %v7610_v14  ;;  %v7706_v14 = vld [vmem:[%s11529_s1 + $0x3e4] ss:$8 sps:$4 sm:$0xff]  }
  0xc0   :  { %2506 = vmatpush1.bf16.msra.mxu1 %v7613_v15  ;;  %1684 = vmatprep.subr.bf16.mxu0 %v7620_v16  ;;  %v7709_v15 = vld [vmem:[%s11529_s1 + $0x7e4] ss:$8 sps:$4 sm:$0xff]   ;;  %v7704_v16 = vld [vmem:[%s11529_s1 + $0x3e0] ss:$8 sps:$4 sm:$0xff]  }
  0xc1   :  { %2516 = vmatprep.subr.bf16.mxu1 %v7625_v17  ;;  %v7707_v17 = vld [vmem:[%s11529_s1 + $0x7e0] ss:$8 sps:$4 sm:$0xff]  }
  0xc2   :  { %1676 = vmatmul.mubr.bf16.vlgmr.msra.gmra.mrb[0].mxu0 %v6292_v22  ;;  %v7710_v22 = vld [vmem:[%s11529_s1 + $0x3f0] ss:$8 sps:$4 sm:$0xff]  }
  0xc3   :  { %2508 = vmatmul.mubr.bf16.vlgmr.msra.gmra.mrb[0].mxu1 %v6428_v23  ;;  %1685 = vmatpush1.bf16.msra.mxu0 %v7618_v19  ;;  %v7712_v19 = vld [vmem:[%s11529_s1 + $0x3f4] ss:$8 sps:$4 sm:$0xff]   ;;  %v7713_v23 = vld [vmem:[%s11529_s1 + $0x7f0] ss:$8 sps:$4 sm:$0xff]  }
  0xc4   :  { %2517 = vmatpush1.bf16.msra.mxu1 %v7623_v21  ;;  %1686 = vmatprep.subr.bf16.mxu0 %v7628_v26  ;;  %v7715_v21 = vld [vmem:[%s11529_s1 + $0x7f4] ss:$8 sps:$4 sm:$0xff]   ;;  %v7722_v26 = vld [vmem:[%s11529_s1 + $0x804] ss:$8 sps:$4 sm:$0xff]  }
  0xc5   :  { %2518 = vmatprep.subr.bf16.mxu1 %v7631_v18  ;;  %1716 = vmatprep.mubr.bf16.mxu0 %v6295_v20  ;;  %v7725_v18 = vld [vmem:[%s11529_s1 + $0xc04] ss:$8 sps:$4 sm:$0xff]  }
  0xc6   :  { %2548 = vmatprep.mubr.bf16.mxu1 %v6431_v27  ;;  %v9436_v20 = vld [vmem:[%s11530_s0 + $0x40] sm:$0xff]  ;;  %v6294_v27 = vcombine.low %v9236_v24, %v9236_v24  ;;  %v7728_v24 = vld [vmem:[%s11529_s1 + $0x814] ss:$8 sps:$4 sm:$0xff]  }
  0xc7   :  { %1687 = vmatpush1.bf16.msra.mxu0 %v7626_v28  ;;  %v6430_v28 = vcombine.low %v9241_v25, %v9241_v25  ;;  %v7731_v25 = vld [vmem:[%s11529_s1 + $0xc14] ss:$8 sps:$4 sm:$0xff]  }
  0xc8   :  { %2519 = vmatpush1.bf16.msra.mxu1 %v7629_v29  ;;  %1688 = vmatprep.subr.bf16.mxu0 %v7634_v30  ;;  %v9445_v29 = vld [vmem:[%s11530_s0 + $0x60] sm:$0xff] }
  0xc9   :  { %2520 = vmatprep.subr.bf16.mxu1 %v7637_v31  ;;  %v7720_v30 = vld [vmem:[%s11529_s1 + $0x800] ss:$8 sps:$4 sm:$0xff]  }
  0xca   :  { %v7723_v31 = vld [vmem:[%s11529_s1 + $0xc00] ss:$8 sps:$4 sm:$0xff]  }
  0xcb   :  { %1689 = vmatpush1.bf16.msra.mxu0 %v7632_v32  ;;  %v6561_v32 = vcombine.high %v9436_v20, %v9436_v20 }
  0xcc   :  { %2521 = vmatpush1.bf16.msra.mxu1 %v7635_v33  ;;  %1690 = vmatprep.subr.bf16.mxu0 %v7640_v34  ;;  %v6697_v33 = vcombine.high %v9445_v29, %v9445_v29  ;;  %v7726_v34 = vld [vmem:[%s11529_s1 + $0x810] ss:$8 sps:$4 sm:$0xff]  }
  0xcd   :  { %2522 = vmatprep.subr.bf16.mxu1 %v7643_v35  ;;  %v7729_v35 = vld [vmem:[%s11529_s1 + $0xc10] ss:$8 sps:$4 sm:$0xff]  }
  0xcf   :  { %1691 = vmatpush1.bf16.msra.mxu0 %v7638_v36  ;;  %v7734_v36 = vld [vmem:[%s11529_s1 + $0x824] ss:$8 sps:$4 sm:$0xff]  }
  0xd0   :  { %2523 = vmatpush1.bf16.msra.mxu1 %v7641_v37  ;;  %1692 = vmatprep.subr.bf16.mxu0 %v7646_v38  ;;  %v7737_v37 = vld [vmem:[%s11529_s1 + $0xc24] ss:$8 sps:$4 sm:$0xff]   ;;  %v7732_v38 = vld [vmem:[%s11529_s1 + $0x820] ss:$8 sps:$4 sm:$0xff]  }
  0xd1   :  { %2524 = vmatprep.subr.bf16.mxu1 %v7649_v39  ;;  %v7735_v39 = vld [vmem:[%s11529_s1 + $0xc20] ss:$8 sps:$4 sm:$0xff]  }
  0xd3   :  { %1693 = vmatpush1.bf16.msra.mxu0 %v7644_v40  ;;  %v7740_v40 = vld [vmem:[%s11529_s1 + $0x834] ss:$8 sps:$4 sm:$0xff]  }
  0xd4   :  { %2525 = vmatpush1.bf16.msra.mxu1 %v7647_v41  ;;  %1694 = vmatprep.subr.bf16.mxu0 %v7652_v42  ;;  %v7743_v41 = vld [vmem:[%s11529_s1 + $0xc34] ss:$8 sps:$4 sm:$0xff]   ;;  %v7738_v42 = vld [vmem:[%s11529_s1 + $0x830] ss:$8 sps:$4 sm:$0xff]  }
  0xd5   :  { %2526 = vmatprep.subr.bf16.mxu1 %v7655_v43  ;;  %v7741_v43 = vld [vmem:[%s11529_s1 + $0xc30] ss:$8 sps:$4 sm:$0xff]  }
  0xd7   :  { %1695 = vmatpush1.bf16.msra.mxu0 %v7650_v44  ;;  %v7746_v44 = vld [vmem:[%s11529_s1 + $0x844] ss:$8 sps:$4 sm:$0xff]  }
  0xd8   :  { %2527 = vmatpush1.bf16.msra.mxu1 %v7653_v45  ;;  %1696 = vmatprep.subr.bf16.mxu0 %v7658_v46  ;;  %v7749_v45 = vld [vmem:[%s11529_s1 + $0xc44] ss:$8 sps:$4 sm:$0xff]   ;;  %v7744_v46 = vld [vmem:[%s11529_s1 + $0x840] ss:$8 sps:$4 sm:$0xff]  }
  0xd9   :  { %2528 = vmatprep.subr.bf16.mxu1 %v7661_v47  ;;  %v7747_v47 = vld [vmem:[%s11529_s1 + $0xc40] ss:$8 sps:$4 sm:$0xff]  }
  0xdb   :  { %1697 = vmatpush1.bf16.msra.mxu0 %v7656_v48  ;;  %v7752_v48 = vld [vmem:[%s11529_s1 + $0x854] ss:$8 sps:$4 sm:$0xff]  }
  0xdc   :  { %2529 = vmatpush1.bf16.msra.mxu1 %v7659_v49  ;;  %1698 = vmatprep.subr.bf16.mxu0 %v7664_v50  ;;  %v7755_v49 = vld [vmem:[%s11529_s1 + $0xc54] ss:$8 sps:$4 sm:$0xff]   ;;  %v7750_v50 = vld [vmem:[%s11529_s1 + $0x850] ss:$8 sps:$4 sm:$0xff]  }
  0xdd   :  { %2530 = vmatprep.subr.bf16.mxu1 %v7667_v51  ;;  %v7753_v51 = vld [vmem:[%s11529_s1 + $0xc50] ss:$8 sps:$4 sm:$0xff]  }
  0xdf   :  { %1699 = vmatpush1.bf16.msra.mxu0 %v7662_v52  ;;  %v7758_v52 = vld [vmem:[%s11529_s1 + $0x864] ss:$8 sps:$4 sm:$0xff]  }
  0xe0   :  { %2531 = vmatpush1.bf16.msra.mxu1 %v7665_v53  ;;  %1700 = vmatprep.subr.bf16.mxu0 %v7670_v54  ;;  %v7761_v53 = vld [vmem:[%s11529_s1 + $0xc64] ss:$8 sps:$4 sm:$0xff]   ;;  %v7756_v54 = vld [vmem:[%s11529_s1 + $0x860] ss:$8 sps:$4 sm:$0xff]  }
  0xe1   :  { %2532 = vmatprep.subr.bf16.mxu1 %v7673_v55  ;;  %v7759_v55 = vld [vmem:[%s11529_s1 + $0xc60] ss:$8 sps:$4 sm:$0xff]  }
  0xe3   :  { %1701 = vmatpush1.bf16.msra.mxu0 %v7668_v56  ;;  %v7764_v56 = vld [vmem:[%s11529_s1 + $0x874] ss:$8 sps:$4 sm:$0xff]  }
  0xe4   :  { %2533 = vmatpush1.bf16.msra.mxu1 %v7671_v57  ;;  %1702 = vmatprep.subr.bf16.mxu0 %v7676_v58  ;;  %v7767_v57 = vld [vmem:[%s11529_s1 + $0xc74] ss:$8 sps:$4 sm:$0xff]   ;;  %v7762_v58 = vld [vmem:[%s11529_s1 + $0x870] ss:$8 sps:$4 sm:$0xff]  }
  0xe5   :  { %2534 = vmatprep.subr.bf16.mxu1 %v7679_v59  ;;  %v7765_v59 = vld [vmem:[%s11529_s1 + $0xc70] ss:$8 sps:$4 sm:$0xff]  }
  0xe7   :  { %1703 = vmatpush1.bf16.msra.mxu0 %v7674_v60  ;;  %v7770_v60 = vld [vmem:[%s11529_s1 + $0x884] ss:$8 sps:$4 sm:$0xff]  }
  0xe8   :  { %2535 = vmatpush1.bf16.msra.mxu1 %v7677_v61  ;;  %1704 = vmatprep.subr.bf16.mxu0 %v7682_v62  ;;  %v7773_v61 = vld [vmem:[%s11529_s1 + $0xc84] ss:$8 sps:$4 sm:$0xff]   ;;  %v7768_v62 = vld [vmem:[%s11529_s1 + $0x880] ss:$8 sps:$4 sm:$0xff]  }
  0xe9   :  { %2536 = vmatprep.subr.bf16.mxu1 %v7685_v63  ;;  %v7771_v63 = vld [vmem:[%s11529_s1 + $0xc80] ss:$8 sps:$4 sm:$0xff]  }
  0xeb   :  { %1705 = vmatpush1.bf16.msra.mxu0 %v7680_v0  ;;  %v7776_v0 = vld [vmem:[%s11529_s1 + $0x894] ss:$8 sps:$4 sm:$0xff]  }
  0xec   :  { %2537 = vmatpush1.bf16.msra.mxu1 %v7683_v1  ;;  %1706 = vmatprep.subr.bf16.mxu0 %v7688_v2  ;;  %v7779_v1 = vld [vmem:[%s11529_s1 + $0xc94] ss:$8 sps:$4 sm:$0xff]   ;;  %v7774_v2 = vld [vmem:[%s11529_s1 + $0x890] ss:$8 sps:$4 sm:$0xff]  }
  0xed   :  { %2538 = vmatprep.subr.bf16.mxu1 %v7691_v3  ;;  %v7777_v3 = vld [vmem:[%s11529_s1 + $0xc90] ss:$8 sps:$4 sm:$0xff]  }
  0xef   :  { %1707 = vmatpush1.bf16.msra.mxu0 %v7686_v4  ;;  %v7782_v4 = vld [vmem:[%s11529_s1 + $0x8a4] ss:$8 sps:$4 sm:$0xff]  }
  0xf0   :  { %2539 = vmatpush1.bf16.msra.mxu1 %v7689_v5  ;;  %1708 = vmatprep.subr.bf16.mxu0 %v7694_v6  ;;  %v7785_v5 = vld [vmem:[%s11529_s1 + $0xca4] ss:$8 sps:$4 sm:$0xff]   ;;  %v7780_v6 = vld [vmem:[%s11529_s1 + $0x8a0] ss:$8 sps:$4 sm:$0xff]  }
  0xf1   :  { %2540 = vmatprep.subr.bf16.mxu1 %v7697_v7  ;;  %v7783_v7 = vld [vmem:[%s11529_s1 + $0xca0] ss:$8 sps:$4 sm:$0xff]  }
  0xf3   :  { %1709 = vmatpush1.bf16.msra.mxu0 %v7692_v8  ;;  %v7788_v8 = vld [vmem:[%s11529_s1 + $0x8b4] ss:$8 sps:$4 sm:$0xff]  }
  0xf4   :  { %2541 = vmatpush1.bf16.msra.mxu1 %v7695_v9  ;;  %1710 = vmatprep.subr.bf16.mxu0 %v7700_v10  ;;  %v7791_v9 = vld [vmem:[%s11529_s1 + $0xcb4] ss:$8 sps:$4 sm:$0xff]   ;;  %v7786_v10 = vld [vmem:[%s11529_s1 + $0x8b0] ss:$8 sps:$4 sm:$0xff]  }
  0xf5   :  { %2542 = vmatprep.subr.bf16.mxu1 %v7703_v11  ;;  %v7789_v11 = vld [vmem:[%s11529_s1 + $0xcb0] ss:$8 sps:$4 sm:$0xff]  }
  0xf7   :  { %1711 = vmatpush1.bf16.msra.mxu0 %v7698_v12  ;;  %v7794_v12 = vld [vmem:[%s11529_s1 + $0x8c4] ss:$8 sps:$4 sm:$0xff]  }
  0xf8   :  { %2543 = vmatpush1.bf16.msra.mxu1 %v7701_v13  ;;  %1712 = vmatprep.subr.bf16.mxu0 %v7706_v14  ;;  %v7797_v13 = vld [vmem:[%s11529_s1 + $0xcc4] ss:$8 sps:$4 sm:$0xff]   ;;  %v7792_v14 = vld [vmem:[%s11529_s1 + $0x8c0] ss:$8 sps:$4 sm:$0xff]  }
  0xf9   :  { %2544 = vmatprep.subr.bf16.mxu1 %v7709_v15  ;;  %v7795_v15 = vld [vmem:[%s11529_s1 + $0xcc0] ss:$8 sps:$4 sm:$0xff]  }
  0xfb   :  { %1713 = vmatpush1.bf16.msra.mxu0 %v7704_v16  ;;  %v7800_v16 = vld [vmem:[%s11529_s1 + $0x8d4] ss:$8 sps:$4 sm:$0xff]  }
  0xfc   :  { %2545 = vmatpush1.bf16.msra.mxu1 %v7707_v17  ;;  %1714 = vmatprep.subr.bf16.mxu0 %v7712_v19  ;;  %v7803_v17 = vld [vmem:[%s11529_s1 + $0xcd4] ss:$8 sps:$4 sm:$0xff]   ;;  %v7798_v19 = vld [vmem:[%s11529_s1 + $0x8d0] ss:$8 sps:$4 sm:$0xff]  }
  0xfd   :  { %2546 = vmatprep.subr.bf16.mxu1 %v7715_v21  ;;  %v7801_v21 = vld [vmem:[%s11529_s1 + $0xcd0] ss:$8 sps:$4 sm:$0xff]  }
  0xff   :  { %1715 = vmatpush1.bf16.msra.mxu0 %v7710_v22  ;;  %v7806_v22 = vld [vmem:[%s11529_s1 + $0x8e4] ss:$8 sps:$4 sm:$0xff]  }
 0x100   :  { %2547 = vmatpush1.bf16.msra.mxu1 %v7713_v23  ;;  %3225 = vmatprep.subr.bf16.mxu0 %v7722_v26  ;;  %v7809_v23 = vld [vmem:[%s11529_s1 + $0xce4] ss:$8 sps:$4 sm:$0xff]   ;;  %v7804_v26 = vld [vmem:[%s11529_s1 + $0x8e0] ss:$8 sps:$4 sm:$0xff]  }
 0x101   :  { %4057 = vmatprep.subr.bf16.mxu1 %v7725_v18  ;;  %v7807_v18 = vld [vmem:[%s11529_s1 + $0xce0] ss:$8 sps:$4 sm:$0xff]  }
 0x102   :  { %1717 = vmatmul.mubr.bf16.vlgmr.msra.gmra.mrb[0].mxu0 %v6294_v27  ;;  %v7812_v27 = vld [vmem:[%s11529_s1 + $0x8f4] ss:$8 sps:$4 sm:$0xff]  }
 0x103   :  { %2549 = vmatmul.mubr.bf16.vlgmr.msra.gmra.mrb[0].mxu1 %v6430_v28  ;;  %3226 = vmatpush1.bf16.msra.mxu0 %v7720_v30  ;;  %v7815_v28 = vld [vmem:[%s11529_s1 + $0xcf4] ss:$8 sps:$4 sm:$0xff]   ;;  %v7810_v30 = vld [vmem:[%s11529_s1 + $0x8f0] ss:$8 sps:$4 sm:$0xff]  }
 0x104   :  { %4058 = vmatpush1.bf16.msra.mxu1 %v7723_v31  ;;  %3227 = vmatprep.subr.bf16.mxu0 %v7728_v24  ;;  %v7813_v31 = vld [vmem:[%s11529_s1 + $0xcf0] ss:$8 sps:$4 sm:$0xff]   ;;  %v7820_v24 = vld [vmem:[%s11529_s1 + $0x904] ss:$8 sps:$4 sm:$0xff]  }
 0x105   :  { %4059 = vmatprep.subr.bf16.mxu1 %v7731_v25  ;;  %3257 = vmatprep.mubr.bf16.mxu0 %v6561_v32  ;;  %v7825_v25 = vld [vmem:[%s11529_s1 + $0xd04] ss:$8 sps:$4 sm:$0xff]  }
 0x106   :  { %4089 = vmatprep.mubr.bf16.mxu1 %v6697_v33  ;;  %v9646_v32 = vld [vmem:[%s11530_s0 + $0x48] sm:$0xff] }
 0x107   :  { %3228 = vmatpush1.bf16.msra.mxu0 %v7726_v34  ;;  %v9651_v33 = vld [vmem:[%s11530_s0 + $0x68] sm:$0xff]  ;;  %v6560_v34 = vcombine.low %v9436_v20, %v9436_v20  ;;  %v7831_v20 = vld [vmem:[%s11529_s1 + $0xd14] ss:$8 sps:$4 sm:$0xff]  }
 0x108   :  { %4060 = vmatpush1.bf16.msra.mxu1 %v7729_v35  ;;  %3229 = vmatprep.subr.bf16.mxu0 %v7734_v36  ;;  %v6696_v35 = vcombine.low %v9445_v29, %v9445_v29  ;;  %v7818_v36 = vld [vmem:[%s11529_s1 + $0x900] ss:$8 sps:$4 sm:$0xff]   ;;  %v6563_v29 = vcombine.high %v9646_v32, %v9646_v32 }
 0x109   :  { %4061 = vmatprep.subr.bf16.mxu1 %v7737_v37  ;;  %v7823_v37 = vld [vmem:[%s11529_s1 + $0xd00] ss:$8 sps:$4 sm:$0xff]  }
 0x10b   :  { %3230 = vmatpush1.bf16.msra.mxu0 %v7732_v38  ;;  %v7828_v38 = vld [vmem:[%s11529_s1 + $0x914] ss:$8 sps:$4 sm:$0xff]  }
 0x10c   :  { %4062 = vmatpush1.bf16.msra.mxu1 %v7735_v39  ;;  %3231 = vmatprep.subr.bf16.mxu0 %v7740_v40  ;;  %v6699_v39 = vcombine.high %v9651_v33, %v9651_v33  ;;  %v7826_v40 = vld [vmem:[%s11529_s1 + $0x910] ss:$8 sps:$4 sm:$0xff]  }
 0x10d   :  { %4063 = vmatprep.subr.bf16.mxu1 %v7743_v41  ;;  %v7829_v41 = vld [vmem:[%s11529_s1 + $0xd10] ss:$8 sps:$4 sm:$0xff]  }
 0x10f   :  { %3232 = vmatpush1.bf16.msra.mxu0 %v7738_v42  ;;  %v7834_v42 = vld [vmem:[%s11529_s1 + $0x924] ss:$8 sps:$4 sm:$0xff]  }
 0x110   :  { %4064 = vmatpush1.bf16.msra.mxu1 %v7741_v43  ;;  %3233 = vmatprep.subr.bf16.mxu0 %v7746_v44  ;;  %v7837_v43 = vld [vmem:[%s11529_s1 + $0xd24] ss:$8 sps:$4 sm:$0xff]   ;;  %v7832_v44 = vld [vmem:[%s11529_s1 + $0x920] ss:$8 sps:$4 sm:$0xff]  }
 0x111   :  { %4065 = vmatprep.subr.bf16.mxu1 %v7749_v45  ;;  %v7835_v45 = vld [vmem:[%s11529_s1 + $0xd20] ss:$8 sps:$4 sm:$0xff]  }
 0x113   :  { %3234 = vmatpush1.bf16.msra.mxu0 %v7744_v46  ;;  %v7840_v46 = vld [vmem:[%s11529_s1 + $0x934] ss:$8 sps:$4 sm:$0xff]  }
 0x114   :  { %4066 = vmatpush1.bf16.msra.mxu1 %v7747_v47  ;;  %3235 = vmatprep.subr.bf16.mxu0 %v7752_v48  ;;  %v7843_v47 = vld [vmem:[%s11529_s1 + $0xd34] ss:$8 sps:$4 sm:$0xff]   ;;  %v7838_v48 = vld [vmem:[%s11529_s1 + $0x930] ss:$8 sps:$4 sm:$0xff]  }
 0x115   :  { %4067 = vmatprep.subr.bf16.mxu1 %v7755_v49  ;;  %v7841_v49 = vld [vmem:[%s11529_s1 + $0xd30] ss:$8 sps:$4 sm:$0xff]  }
 0x117   :  { %3236 = vmatpush1.bf16.msra.mxu0 %v7750_v50  ;;  %v7846_v50 = vld [vmem:[%s11529_s1 + $0x944] ss:$8 sps:$4 sm:$0xff]  }
 0x118   :  { %4068 = vmatpush1.bf16.msra.mxu1 %v7753_v51  ;;  %3237 = vmatprep.subr.bf16.mxu0 %v7758_v52  ;;  %v7849_v51 = vld [vmem:[%s11529_s1 + $0xd44] ss:$8 sps:$4 sm:$0xff]   ;;  %v7844_v52 = vld [vmem:[%s11529_s1 + $0x940] ss:$8 sps:$4 sm:$0xff]  }
 0x119   :  { %4069 = vmatprep.subr.bf16.mxu1 %v7761_v53  ;;  %v7847_v53 = vld [vmem:[%s11529_s1 + $0xd40] ss:$8 sps:$4 sm:$0xff]  }
 0x11b   :  { %3238 = vmatpush1.bf16.msra.mxu0 %v7756_v54  ;;  %v7852_v54 = vld [vmem:[%s11529_s1 + $0x954] ss:$8 sps:$4 sm:$0xff]  }
 0x11c   :  { %4070 = vmatpush1.bf16.msra.mxu1 %v7759_v55  ;;  %3239 = vmatprep.subr.bf16.mxu0 %v7764_v56  ;;  %v7855_v55 = vld [vmem:[%s11529_s1 + $0xd54] ss:$8 sps:$4 sm:$0xff]   ;;  %v7850_v56 = vld [vmem:[%s11529_s1 + $0x950] ss:$8 sps:$4 sm:$0xff]  }
 0x11d   :  { %4071 = vmatprep.subr.bf16.mxu1 %v7767_v57  ;;  %v7853_v57 = vld [vmem:[%s11529_s1 + $0xd50] ss:$8 sps:$4 sm:$0xff]  }
 0x11f   :  { %3240 = vmatpush1.bf16.msra.mxu0 %v7762_v58  ;;  %v7858_v58 = vld [vmem:[%s11529_s1 + $0x964] ss:$8 sps:$4 sm:$0xff]  }
 0x120   :  { %4072 = vmatpush1.bf16.msra.mxu1 %v7765_v59  ;;  %3241 = vmatprep.subr.bf16.mxu0 %v7770_v60  ;;  %v7861_v59 = vld [vmem:[%s11529_s1 + $0xd64] ss:$8 sps:$4 sm:$0xff]   ;;  %v7856_v60 = vld [vmem:[%s11529_s1 + $0x960] ss:$8 sps:$4 sm:$0xff]  }
 0x121   :  { %4073 = vmatprep.subr.bf16.mxu1 %v7773_v61  ;;  %v7859_v61 = vld [vmem:[%s11529_s1 + $0xd60] ss:$8 sps:$4 sm:$0xff]  }
 0x123   :  { %3242 = vmatpush1.bf16.msra.mxu0 %v7768_v62  ;;  %v7864_v62 = vld [vmem:[%s11529_s1 + $0x974] ss:$8 sps:$4 sm:$0xff]  }
 0x124   :  { %4074 = vmatpush1.bf16.msra.mxu1 %v7771_v63  ;;  %3243 = vmatprep.subr.bf16.mxu0 %v7776_v0  ;;  %v7867_v63 = vld [vmem:[%s11529_s1 + $0xd74] ss:$8 sps:$4 sm:$0xff]   ;;  %v7862_v0 = vld [vmem:[%s11529_s1 + $0x970] ss:$8 sps:$4 sm:$0xff]  }
 0x125   :  { %4075 = vmatprep.subr.bf16.mxu1 %v7779_v1  ;;  %v7865_v1 = vld [vmem:[%s11529_s1 + $0xd70] ss:$8 sps:$4 sm:$0xff]  }
 0x127   :  { %3244 = vmatpush1.bf16.msra.mxu0 %v7774_v2  ;;  %v7870_v2 = vld [vmem:[%s11529_s1 + $0x984] ss:$8 sps:$4 sm:$0xff]  }
 0x128   :  { %4076 = vmatpush1.bf16.msra.mxu1 %v7777_v3  ;;  %3245 = vmatprep.subr.bf16.mxu0 %v7782_v4  ;;  %v7873_v3 = vld [vmem:[%s11529_s1 + $0xd84] ss:$8 sps:$4 sm:$0xff]   ;;  %v7868_v4 = vld [vmem:[%s11529_s1 + $0x980] ss:$8 sps:$4 sm:$0xff]  }
 0x129   :  { %4077 = vmatprep.subr.bf16.mxu1 %v7785_v5  ;;  %v7871_v5 = vld [vmem:[%s11529_s1 + $0xd80] ss:$8 sps:$4 sm:$0xff]  }
 0x12b   :  { %3246 = vmatpush1.bf16.msra.mxu0 %v7780_v6  ;;  %v7876_v6 = vld [vmem:[%s11529_s1 + $0x994] ss:$8 sps:$4 sm:$0xff]  }
 0x12c   :  { %4078 = vmatpush1.bf16.msra.mxu1 %v7783_v7  ;;  %3247 = vmatprep.subr.bf16.mxu0 %v7788_v8  ;;  %v7879_v7 = vld [vmem:[%s11529_s1 + $0xd94] ss:$8 sps:$4 sm:$0xff]   ;;  %v7874_v8 = vld [vmem:[%s11529_s1 + $0x990] ss:$8 sps:$4 sm:$0xff]  }
 0x12d   :  { %4079 = vmatprep.subr.bf16.mxu1 %v7791_v9  ;;  %v7877_v9 = vld [vmem:[%s11529_s1 + $0xd90] ss:$8 sps:$4 sm:$0xff]  }
 0x12f   :  { %3248 = vmatpush1.bf16.msra.mxu0 %v7786_v10  ;;  %v7882_v10 = vld [vmem:[%s11529_s1 + $0x9a4] ss:$8 sps:$4 sm:$0xff]  }
 0x130   :  { %4080 = vmatpush1.bf16.msra.mxu1 %v7789_v11  ;;  %3249 = vmatprep.subr.bf16.mxu0 %v7794_v12  ;;  %v7885_v11 = vld [vmem:[%s11529_s1 + $0xda4] ss:$8 sps:$4 sm:$0xff]   ;;  %v7880_v12 = vld [vmem:[%s11529_s1 + $0x9a0] ss:$8 sps:$4 sm:$0xff]  }
 0x131   :  { %4081 = vmatprep.subr.bf16.mxu1 %v7797_v13  ;;  %v7883_v13 = vld [vmem:[%s11529_s1 + $0xda0] ss:$8 sps:$4 sm:$0xff]  }
 0x133   :  { %3250 = vmatpush1.bf16.msra.mxu0 %v7792_v14  ;;  %v7888_v14 = vld [vmem:[%s11529_s1 + $0x9b4] ss:$8 sps:$4 sm:$0xff]  }
 0x134   :  { %4082 = vmatpush1.bf16.msra.mxu1 %v7795_v15  ;;  %3251 = vmatprep.subr.bf16.mxu0 %v7800_v16  ;;  %v7891_v15 = vld [vmem:[%s11529_s1 + $0xdb4] ss:$8 sps:$4 sm:$0xff]   ;;  %v7886_v16 = vld [vmem:[%s11529_s1 + $0x9b0] ss:$8 sps:$4 sm:$0xff]  }
 0x135   :  { %4083 = vmatprep.subr.bf16.mxu1 %v7803_v17  ;;  %v7889_v17 = vld [vmem:[%s11529_s1 + $0xdb0] ss:$8 sps:$4 sm:$0xff]  }
 0x137   :  { %3252 = vmatpush1.bf16.msra.mxu0 %v7798_v19  ;;  %v7894_v19 = vld [vmem:[%s11529_s1 + $0x9c4] ss:$8 sps:$4 sm:$0xff]  }
 0x138   :  { %4084 = vmatpush1.bf16.msra.mxu1 %v7801_v21  ;;  %3253 = vmatprep.subr.bf16.mxu0 %v7806_v22  ;;  %v7897_v21 = vld [vmem:[%s11529_s1 + $0xdc4] ss:$8 sps:$4 sm:$0xff]   ;;  %v7892_v22 = vld [vmem:[%s11529_s1 + $0x9c0] ss:$8 sps:$4 sm:$0xff]  }
 0x139   :  { %4085 = vmatprep.subr.bf16.mxu1 %v7809_v23  ;;  %v7895_v23 = vld [vmem:[%s11529_s1 + $0xdc0] ss:$8 sps:$4 sm:$0xff]  }
 0x13b   :  { %3254 = vmatpush1.bf16.msra.mxu0 %v7804_v26  ;;  %v7900_v26 = vld [vmem:[%s11529_s1 + $0x9d4] ss:$8 sps:$4 sm:$0xff]  }
 0x13c   :  { %4086 = vmatpush1.bf16.msra.mxu1 %v7807_v18  ;;  %3255 = vmatprep.subr.bf16.mxu0 %v7812_v27  ;;  %v7903_v18 = vld [vmem:[%s11529_s1 + $0xdd4] ss:$8 sps:$4 sm:$0xff]   ;;  %v7898_v27 = vld [vmem:[%s11529_s1 + $0x9d0] ss:$8 sps:$4 sm:$0xff]  }
 0x13d   :  { %4087 = vmatprep.subr.bf16.mxu1 %v7815_v28  ;;  %v7901_v28 = vld [vmem:[%s11529_s1 + $0xdd0] ss:$8 sps:$4 sm:$0xff]  }
 0x13f   :  { %3256 = vmatpush1.bf16.msra.mxu0 %v7810_v30  ;;  %v7906_v30 = vld [vmem:[%s11529_s1 + $0x9e4] ss:$8 sps:$4 sm:$0xff]  }
 0x140   :  { %4088 = vmatpush1.bf16.msra.mxu1 %v7813_v31  ;;  %3266 = vmatprep.subr.bf16.mxu0 %v7820_v24  ;;  %v7909_v31 = vld [vmem:[%s11529_s1 + $0xde4] ss:$8 sps:$4 sm:$0xff]   ;;  %v7904_v24 = vld [vmem:[%s11529_s1 + $0x9e0] ss:$8 sps:$4 sm:$0xff]  }
 0x141   :  { %4098 = vmatprep.subr.bf16.mxu1 %v7825_v25  ;;  %v7907_v25 = vld [vmem:[%s11529_s1 + $0xde0] ss:$8 sps:$4 sm:$0xff]  }
 0x142   :  { %3258 = vmatmul.mubr.bf16.vlgmr.msra.gmra.mrb[4].mxu0 %v6560_v34  ;;  %v7912_v34 = vld [vmem:[%s11529_s1 + $0x9f4] ss:$8 sps:$4 sm:$0xff]  }
 0x143   :  { %4090 = vmatmul.mubr.bf16.vlgmr.msra.gmra.mrb[4].mxu1 %v6696_v35  ;;  %3267 = vmatpush1.bf16.msra.mxu0 %v7818_v36  ;;  %v7915_v35 = vld [vmem:[%s11529_s1 + $0xdf4] ss:$8 sps:$4 sm:$0xff]   ;;  %v7910_v36 = vld [vmem:[%s11529_s1 + $0x9f0] ss:$8 sps:$4 sm:$0xff]  }
 0x144   :  { %4099 = vmatpush1.bf16.msra.mxu1 %v7823_v37  ;;  %3268 = vmatprep.subr.bf16.mxu0 %v7828_v38  ;;  %v7913_v37 = vld [vmem:[%s11529_s1 + $0xdf0] ss:$8 sps:$4 sm:$0xff]   ;;  %v7920_v38 = vld [vmem:[%s11529_s1 + $0xa04] ss:$8 sps:$4 sm:$0xff]  }
 0x145   :  { %4100 = vmatprep.subr.bf16.mxu1 %v7831_v20  ;;  %3298 = vmatprep.mubr.bf16.mxu0 %v6563_v29  ;;  %v7925_v20 = vld [vmem:[%s11529_s1 + $0xe04] ss:$8 sps:$4 sm:$0xff]   ;;  %v7918_v29 = vld [vmem:[%s11529_s1 + $0xa00] ss:$8 sps:$4 sm:$0xff]  }
 0x146   :  { %4130 = vmatprep.mubr.bf16.mxu1 %v6699_v39  ;;  %v7923_v39 = vld [vmem:[%s11529_s1 + $0xe00] ss:$8 sps:$4 sm:$0xff]  }
 0x147   :  { %3269 = vmatpush1.bf16.msra.mxu0 %v7826_v40  ;;  %v6562_v40 = vcombine.low %v9646_v32, %v9646_v32  ;;  %v7928_v32 = vld [vmem:[%s11529_s1 + $0xa14] ss:$8 sps:$4 sm:$0xff]  }
 0x148   :  { %4101 = vmatpush1.bf16.msra.mxu1 %v7829_v41  ;;  %3270 = vmatprep.subr.bf16.mxu0 %v7834_v42  ;;  %v6698_v41 = vcombine.low %v9651_v33, %v9651_v33  ;;  %v9866_v42 = vld [vmem:[%s11530_s0 + $0x50] sm:$0xff] }
 0x149   :  { %4102 = vmatprep.subr.bf16.mxu1 %v7837_v43  ;;  %v9871_v43 = vld [vmem:[%s11530_s0 + $0x70] sm:$0xff] }
 0x14a   :  { %v7931_v33 = vld [vmem:[%s11529_s1 + $0xe14] ss:$8 sps:$4 sm:$0xff]  }
 0x14b   :  { %3271 = vmatpush1.bf16.msra.mxu0 %v7832_v44  ;;  %v6565_v44 = vcombine.high %v9866_v42, %v9866_v42 }
 0x14c   :  { %4103 = vmatpush1.bf16.msra.mxu1 %v7835_v45  ;;  %3272 = vmatprep.subr.bf16.mxu0 %v7840_v46  ;;  %v6701_v45 = vcombine.high %v9871_v43, %v9871_v43  ;;  %v7926_v46 = vld [vmem:[%s11529_s1 + $0xa10] ss:$8 sps:$4 sm:$0xff]  }
 0x14d   :  { %4104 = vmatprep.subr.bf16.mxu1 %v7843_v47  ;;  %v7929_v47 = vld [vmem:[%s11529_s1 + $0xe10] ss:$8 sps:$4 sm:$0xff]  }
 0x14f   :  { %3273 = vmatpush1.bf16.msra.mxu0 %v7838_v48  ;;  %v7934_v48 = vld [vmem:[%s11529_s1 + $0xa24] ss:$8 sps:$4 sm:$0xff]  }
 0x150   :  { %4105 = vmatpush1.bf16.msra.mxu1 %v7841_v49  ;;  %3274 = vmatprep.subr.bf16.mxu0 %v7846_v50  ;;  %v7937_v49 = vld [vmem:[%s11529_s1 + $0xe24] ss:$8 sps:$4 sm:$0xff]   ;;  %v7932_v50 = vld [vmem:[%s11529_s1 + $0xa20] ss:$8 sps:$4 sm:$0xff]  }
 0x151   :  { %4106 = vmatprep.subr.bf16.mxu1 %v7849_v51  ;;  %v7935_v51 = vld [vmem:[%s11529_s1 + $0xe20] ss:$8 sps:$4 sm:$0xff]  }
 0x153   :  { %3275 = vmatpush1.bf16.msra.mxu0 %v7844_v52  ;;  %v7940_v52 = vld [vmem:[%s11529_s1 + $0xa34] ss:$8 sps:$4 sm:$0xff]  }
 0x154   :  { %4107 = vmatpush1.bf16.msra.mxu1 %v7847_v53  ;;  %3276 = vmatprep.subr.bf16.mxu0 %v7852_v54  ;;  %v7943_v53 = vld [vmem:[%s11529_s1 + $0xe34] ss:$8 sps:$4 sm:$0xff]   ;;  %v7938_v54 = vld [vmem:[%s11529_s1 + $0xa30] ss:$8 sps:$4 sm:$0xff]  }
 0x155   :  { %4108 = vmatprep.subr.bf16.mxu1 %v7855_v55  ;;  %v7941_v55 = vld [vmem:[%s11529_s1 + $0xe30] ss:$8 sps:$4 sm:$0xff]  }
 0x157   :  { %3277 = vmatpush1.bf16.msra.mxu0 %v7850_v56  ;;  %v7946_v56 = vld [vmem:[%s11529_s1 + $0xa44] ss:$8 sps:$4 sm:$0xff]  }
 0x158   :  { %4109 = vmatpush1.bf16.msra.mxu1 %v7853_v57  ;;  %3278 = vmatprep.subr.bf16.mxu0 %v7858_v58  ;;  %v7949_v57 = vld [vmem:[%s11529_s1 + $0xe44] ss:$8 sps:$4 sm:$0xff]   ;;  %v7944_v58 = vld [vmem:[%s11529_s1 + $0xa40] ss:$8 sps:$4 sm:$0xff]  }
 0x159   :  { %4110 = vmatprep.subr.bf16.mxu1 %v7861_v59  ;;  %v7947_v59 = vld [vmem:[%s11529_s1 + $0xe40] ss:$8 sps:$4 sm:$0xff]  }
 0x15b   :  { %3279 = vmatpush1.bf16.msra.mxu0 %v7856_v60  ;;  %v7952_v60 = vld [vmem:[%s11529_s1 + $0xa54] ss:$8 sps:$4 sm:$0xff]  }
 0x15c   :  { %4111 = vmatpush1.bf16.msra.mxu1 %v7859_v61  ;;  %3280 = vmatprep.subr.bf16.mxu0 %v7864_v62  ;;  %v7955_v61 = vld [vmem:[%s11529_s1 + $0xe54] ss:$8 sps:$4 sm:$0xff]   ;;  %v7950_v62 = vld [vmem:[%s11529_s1 + $0xa50] ss:$8 sps:$4 sm:$0xff]  }
 0x15d   :  { %4112 = vmatprep.subr.bf16.mxu1 %v7867_v63  ;;  %v7953_v63 = vld [vmem:[%s11529_s1 + $0xe50] ss:$8 sps:$4 sm:$0xff]  }
 0x15f   :  { %3281 = vmatpush1.bf16.msra.mxu0 %v7862_v0  ;;  %v7958_v0 = vld [vmem:[%s11529_s1 + $0xa64] ss:$8 sps:$4 sm:$0xff]  }
 0x160   :  { %4113 = vmatpush1.bf16.msra.mxu1 %v7865_v1  ;;  %3282 = vmatprep.subr.bf16.mxu0 %v7870_v2  ;;  %v7961_v1 = vld [vmem:[%s11529_s1 + $0xe64] ss:$8 sps:$4 sm:$0xff]   ;;  %v7956_v2 = vld [vmem:[%s11529_s1 + $0xa60] ss:$8 sps:$4 sm:$0xff]  }
 0x161   :  { %4114 = vmatprep.subr.bf16.mxu1 %v7873_v3  ;;  %v7959_v3 = vld [vmem:[%s11529_s1 + $0xe60] ss:$8 sps:$4 sm:$0xff]  }
 0x163   :  { %3283 = vmatpush1.bf16.msra.mxu0 %v7868_v4  ;;  %v7964_v4 = vld [vmem:[%s11529_s1 + $0xa74] ss:$8 sps:$4 sm:$0xff]  }
 0x164   :  { %4115 = vmatpush1.bf16.msra.mxu1 %v7871_v5  ;;  %3284 = vmatprep.subr.bf16.mxu0 %v7876_v6  ;;  %v7967_v5 = vld [vmem:[%s11529_s1 + $0xe74] ss:$8 sps:$4 sm:$0xff]   ;;  %v7962_v6 = vld [vmem:[%s11529_s1 + $0xa70] ss:$8 sps:$4 sm:$0xff]  }
 0x165   :  { %4116 = vmatprep.subr.bf16.mxu1 %v7879_v7  ;;  %v7965_v7 = vld [vmem:[%s11529_s1 + $0xe70] ss:$8 sps:$4 sm:$0xff]  }
 0x167   :  { %3285 = vmatpush1.bf16.msra.mxu0 %v7874_v8  ;;  %v7970_v8 = vld [vmem:[%s11529_s1 + $0xa84] ss:$8 sps:$4 sm:$0xff]  }
 0x168   :  { %4117 = vmatpush1.bf16.msra.mxu1 %v7877_v9  ;;  %3286 = vmatprep.subr.bf16.mxu0 %v7882_v10  ;;  %v7973_v9 = vld [vmem:[%s11529_s1 + $0xe84] ss:$8 sps:$4 sm:$0xff]   ;;  %v7968_v10 = vld [vmem:[%s11529_s1 + $0xa80] ss:$8 sps:$4 sm:$0xff]  }
 0x169   :  { %4118 = vmatprep.subr.bf16.mxu1 %v7885_v11  ;;  %v7971_v11 = vld [vmem:[%s11529_s1 + $0xe80] ss:$8 sps:$4 sm:$0xff]  }
 0x16b   :  { %3287 = vmatpush1.bf16.msra.mxu0 %v7880_v12  ;;  %v7976_v12 = vld [vmem:[%s11529_s1 + $0xa94] ss:$8 sps:$4 sm:$0xff]  }
 0x16c   :  { %4119 = vmatpush1.bf16.msra.mxu1 %v7883_v13  ;;  %3288 = vmatprep.subr.bf16.mxu0 %v7888_v14  ;;  %v7979_v13 = vld [vmem:[%s11529_s1 + $0xe94] ss:$8 sps:$4 sm:$0xff]   ;;  %v7974_v14 = vld [vmem:[%s11529_s1 + $0xa90] ss:$8 sps:$4 sm:$0xff]  }
 0x16d   :  { %4120 = vmatprep.subr.bf16.mxu1 %v7891_v15  ;;  %v7977_v15 = vld [vmem:[%s11529_s1 + $0xe90] ss:$8 sps:$4 sm:$0xff]  }
 0x16f   :  { %3289 = vmatpush1.bf16.msra.mxu0 %v7886_v16  ;;  %v7982_v16 = vld [vmem:[%s11529_s1 + $0xaa4] ss:$8 sps:$4 sm:$0xff]  }
 0x170   :  { %4121 = vmatpush1.bf16.msra.mxu1 %v7889_v17  ;;  %3290 = vmatprep.subr.bf16.mxu0 %v7894_v19  ;;  %v7985_v17 = vld [vmem:[%s11529_s1 + $0xea4] ss:$8 sps:$4 sm:$0xff]   ;;  %v7980_v19 = vld [vmem:[%s11529_s1 + $0xaa0] ss:$8 sps:$4 sm:$0xff]  }
 0x171   :  { %4122 = vmatprep.subr.bf16.mxu1 %v7897_v21  ;;  %v7983_v21 = vld [vmem:[%s11529_s1 + $0xea0] ss:$8 sps:$4 sm:$0xff]  }
 0x173   :  { %3291 = vmatpush1.bf16.msra.mxu0 %v7892_v22  ;;  %v7988_v22 = vld [vmem:[%s11529_s1 + $0xab4] ss:$8 sps:$4 sm:$0xff]  }
 0x174   :  { %4123 = vmatpush1.bf16.msra.mxu1 %v7895_v23  ;;  %3292 = vmatprep.subr.bf16.mxu0 %v7900_v26  ;;  %v7991_v23 = vld [vmem:[%s11529_s1 + $0xeb4] ss:$8 sps:$4 sm:$0xff]   ;;  %v7986_v26 = vld [vmem:[%s11529_s1 + $0xab0] ss:$8 sps:$4 sm:$0xff]  }
 0x175   :  { %4124 = vmatprep.subr.bf16.mxu1 %v7903_v18  ;;  %v7989_v18 = vld [vmem:[%s11529_s1 + $0xeb0] ss:$8 sps:$4 sm:$0xff]  }
 0x177   :  { %3293 = vmatpush1.bf16.msra.mxu0 %v7898_v27  ;;  %v7994_v27 = vld [vmem:[%s11529_s1 + $0xac4] ss:$8 sps:$4 sm:$0xff]  }
 0x178   :  { %4125 = vmatpush1.bf16.msra.mxu1 %v7901_v28  ;;  %3294 = vmatprep.subr.bf16.mxu0 %v7906_v30  ;;  %v7997_v28 = vld [vmem:[%s11529_s1 + $0xec4] ss:$8 sps:$4 sm:$0xff]   ;;  %v7992_v30 = vld [vmem:[%s11529_s1 + $0xac0] ss:$8 sps:$4 sm:$0xff]  }
 0x179   :  { %4126 = vmatprep.subr.bf16.mxu1 %v7909_v31  ;;  %v7995_v31 = vld [vmem:[%s11529_s1 + $0xec0] ss:$8 sps:$4 sm:$0xff]  }
 0x17b   :  { %3295 = vmatpush1.bf16.msra.mxu0 %v7904_v24  ;;  %v8000_v24 = vld [vmem:[%s11529_s1 + $0xad4] ss:$8 sps:$4 sm:$0xff]  }
 0x17c   :  { %4127 = vmatpush1.bf16.msra.mxu1 %v7907_v25  ;;  %3296 = vmatprep.subr.bf16.mxu0 %v7912_v34  ;;  %v8003_v25 = vld [vmem:[%s11529_s1 + $0xed4] ss:$8 sps:$4 sm:$0xff]   ;;  %v7998_v34 = vld [vmem:[%s11529_s1 + $0xad0] ss:$8 sps:$4 sm:$0xff]  }
 0x17d   :  { %4128 = vmatprep.subr.bf16.mxu1 %v7915_v35  ;;  %v8001_v35 = vld [vmem:[%s11529_s1 + $0xed0] ss:$8 sps:$4 sm:$0xff]  }
 0x17f   :  { %3297 = vmatpush1.bf16.msra.mxu0 %v7910_v36  ;;  %v8006_v36 = vld [vmem:[%s11529_s1 + $0xae4] ss:$8 sps:$4 sm:$0xff]  }
 0x180   :  { %4129 = vmatpush1.bf16.msra.mxu1 %v7913_v37  ;;  %3307 = vmatprep.subr.bf16.mxu0 %v7920_v38  ;;  %v8009_v37 = vld [vmem:[%s11529_s1 + $0xee4] ss:$8 sps:$4 sm:$0xff]   ;;  %v8004_v38 = vld [vmem:[%s11529_s1 + $0xae0] ss:$8 sps:$4 sm:$0xff]  }
 0x181   :  { %4139 = vmatprep.subr.bf16.mxu1 %v7925_v20  ;;  %v8007_v20 = vld [vmem:[%s11529_s1 + $0xee0] ss:$8 sps:$4 sm:$0xff]  }
 0x182   :  { %3299 = vmatmul.mubr.bf16.vlgmr.msra.gmra.mrb[4].mxu0 %v6562_v40  ;;  %v8010_v40 = vld [vmem:[%s11529_s1 + $0xaf0] ss:$8 sps:$4 sm:$0xff]  }
 0x183   :  { %4131 = vmatmul.mubr.bf16.vlgmr.msra.gmra.mrb[4].mxu1 %v6698_v41  ;;  %3308 = vmatpush1.bf16.msra.mxu0 %v7918_v29  ;;  %v8012_v29 = vld [vmem:[%s11529_s1 + $0xaf4] ss:$8 sps:$4 sm:$0xff]   ;;  %v8013_v41 = vld [vmem:[%s11529_s1 + $0xef0] ss:$8 sps:$4 sm:$0xff]  }
 0x184   :  { %4140 = vmatpush1.bf16.msra.mxu1 %v7923_v39  ;;  %3309 = vmatprep.subr.bf16.mxu0 %v7928_v32  ;;  %v8015_v39 = vld [vmem:[%s11529_s1 + $0xef4] ss:$8 sps:$4 sm:$0xff]   ;;  %v8020_v32 = vld [vmem:[%s11529_s1 + $0xb04] ss:$8 sps:$4 sm:$0xff]  }
 0x185   :  { %4141 = vmatprep.subr.bf16.mxu1 %v7931_v33  ;;  %3339 = vmatprep.mubr.bf16.mxu0 %v6565_v44  ;;  %v8025_v33 = vld [vmem:[%s11529_s1 + $0xf04] ss:$8 sps:$4 sm:$0xff]   ;;  %v10066_v44 = vld [vmem:[%s11530_s0 + $0x58] sm:$0xff] }
 0x186   :  { %4171 = vmatprep.mubr.bf16.mxu1 %v6701_v45  ;;  %v10071_v45 = vld [vmem:[%s11530_s0 + $0x78] sm:$0xff] }
 0x187   :  { %3310 = vmatpush1.bf16.msra.mxu0 %v7926_v46  ;;  %v6564_v46 = vcombine.low %v9866_v42, %v9866_v42  ;;  %v8031_v42 = vld [vmem:[%s11529_s1 + $0xf14] ss:$8 sps:$4 sm:$0xff]  }
 0x188   :  { %4142 = vmatpush1.bf16.msra.mxu1 %v7929_v47  ;;  %3311 = vmatprep.subr.bf16.mxu0 %v7934_v48  ;;  %v6700_v47 = vcombine.low %v9871_v43, %v9871_v43  ;;  %v8018_v48 = vld [vmem:[%s11529_s1 + $0xb00] ss:$8 sps:$4 sm:$0xff]   ;;  %v6567_v43 = vcombine.high %v10066_v44, %v10066_v44 }
 0x189   :  { %4143 = vmatprep.subr.bf16.mxu1 %v7937_v49  ;;  %v8023_v49 = vld [vmem:[%s11529_s1 + $0xf00] ss:$8 sps:$4 sm:$0xff]  }
 0x18b   :  { %3312 = vmatpush1.bf16.msra.mxu0 %v7932_v50  ;;  %v8028_v50 = vld [vmem:[%s11529_s1 + $0xb14] ss:$8 sps:$4 sm:$0xff]  }
 0x18c   :  { %4144 = vmatpush1.bf16.msra.mxu1 %v7935_v51  ;;  %3313 = vmatprep.subr.bf16.mxu0 %v7940_v52  ;;  %v6703_v51 = vcombine.high %v10071_v45, %v10071_v45  ;;  %v8026_v52 = vld [vmem:[%s11529_s1 + $0xb10] ss:$8 sps:$4 sm:$0xff]  }
 0x18d   :  { %4145 = vmatprep.subr.bf16.mxu1 %v7943_v53  ;;  %v8029_v53 = vld [vmem:[%s11529_s1 + $0xf10] ss:$8 sps:$4 sm:$0xff]  }
 0x18f   :  { %3314 = vmatpush1.bf16.msra.mxu0 %v7938_v54  ;;  %v8034_v54 = vld [vmem:[%s11529_s1 + $0xb24] ss:$8 sps:$4 sm:$0xff]  }
 0x190   :  { %4146 = vmatpush1.bf16.msra.mxu1 %v7941_v55  ;;  %3315 = vmatprep.subr.bf16.mxu0 %v7946_v56  ;;  %v8037_v55 = vld [vmem:[%s11529_s1 + $0xf24] ss:$8 sps:$4 sm:$0xff]   ;;  %v8032_v56 = vld [vmem:[%s11529_s1 + $0xb20] ss:$8 sps:$4 sm:$0xff]  }
 0x191   :  { %4147 = vmatprep.subr.bf16.mxu1 %v7949_v57  ;;  %v8035_v57 = vld [vmem:[%s11529_s1 + $0xf20] ss:$8 sps:$4 sm:$0xff]  }
 0x193   :  { %3316 = vmatpush1.bf16.msra.mxu0 %v7944_v58  ;;  %v8040_v58 = vld [vmem:[%s11529_s1 + $0xb34] ss:$8 sps:$4 sm:$0xff]  }
 0x194   :  { %4148 = vmatpush1.bf16.msra.mxu1 %v7947_v59  ;;  %3317 = vmatprep.subr.bf16.mxu0 %v7952_v60  ;;  %v8043_v59 = vld [vmem:[%s11529_s1 + $0xf34] ss:$8 sps:$4 sm:$0xff]   ;;  %v8038_v60 = vld [vmem:[%s11529_s1 + $0xb30] ss:$8 sps:$4 sm:$0xff]  }
 0x195   :  { %4149 = vmatprep.subr.bf16.mxu1 %v7955_v61  ;;  %v8041_v61 = vld [vmem:[%s11529_s1 + $0xf30] ss:$8 sps:$4 sm:$0xff]  }
 0x197   :  { %3318 = vmatpush1.bf16.msra.mxu0 %v7950_v62  ;;  %v8046_v62 = vld [vmem:[%s11529_s1 + $0xb44] ss:$8 sps:$4 sm:$0xff]  }
 0x198   :  { %4150 = vmatpush1.bf16.msra.mxu1 %v7953_v63  ;;  %3319 = vmatprep.subr.bf16.mxu0 %v7958_v0  ;;  %v8049_v63 = vld [vmem:[%s11529_s1 + $0xf44] ss:$8 sps:$4 sm:$0xff]   ;;  %v8044_v0 = vld [vmem:[%s11529_s1 + $0xb40] ss:$8 sps:$4 sm:$0xff]  }
 0x199   :  { %4151 = vmatprep.subr.bf16.mxu1 %v7961_v1  ;;  %v8047_v1 = vld [vmem:[%s11529_s1 + $0xf40] ss:$8 sps:$4 sm:$0xff]  }
 0x19b   :  { %3320 = vmatpush1.bf16.msra.mxu0 %v7956_v2  ;;  %v8052_v2 = vld [vmem:[%s11529_s1 + $0xb54] ss:$8 sps:$4 sm:$0xff]  }
 0x19c   :  { %4152 = vmatpush1.bf16.msra.mxu1 %v7959_v3  ;;  %3321 = vmatprep.subr.bf16.mxu0 %v7964_v4  ;;  %v8055_v3 = vld [vmem:[%s11529_s1 + $0xf54] ss:$8 sps:$4 sm:$0xff]   ;;  %v8050_v4 = vld [vmem:[%s11529_s1 + $0xb50] ss:$8 sps:$4 sm:$0xff]  }
 0x19d   :  { %4153 = vmatprep.subr.bf16.mxu1 %v7967_v5  ;;  %v8053_v5 = vld [vmem:[%s11529_s1 + $0xf50] ss:$8 sps:$4 sm:$0xff]  }
 0x19f   :  { %3322 = vmatpush1.bf16.msra.mxu0 %v7962_v6  ;;  %v8058_v6 = vld [vmem:[%s11529_s1 + $0xb64] ss:$8 sps:$4 sm:$0xff]  }
 0x1a0   :  { %4154 = vmatpush1.bf16.msra.mxu1 %v7965_v7  ;;  %3323 = vmatprep.subr.bf16.mxu0 %v7970_v8  ;;  %v8061_v7 = vld [vmem:[%s11529_s1 + $0xf64] ss:$8 sps:$4 sm:$0xff]  }
 0x1a1   :  { %4155 = vmatprep.subr.bf16.mxu1 %v7973_v9 }
 0x1a3   :  { %3324 = vmatpush1.bf16.msra.mxu0 %v7968_v10 }
 0x1a4   :  { %4156 = vmatpush1.bf16.msra.mxu1 %v7971_v11  ;;  %3325 = vmatprep.subr.bf16.mxu0 %v7976_v12 }
 0x1a5   :  { %4157 = vmatprep.subr.bf16.mxu1 %v7979_v13 }
 0x1a7   :  { %3326 = vmatpush1.bf16.msra.mxu0 %v7974_v14  ;;  %v8056_v14 = vld [vmem:[%s11529_s1 + $0xb60] ss:$8 sps:$4 sm:$0xff]  }
 0x1a8   :  { %4158 = vmatpush1.bf16.msra.mxu1 %v7977_v15  ;;  %3327 = vmatprep.subr.bf16.mxu0 %v7982_v16  ;;  %v8059_v15 = vld [vmem:[%s11529_s1 + $0xf60] ss:$8 sps:$4 sm:$0xff]  }
 0x1a9   :  { %4159 = vmatprep.subr.bf16.mxu1 %v7985_v17 }
 0x1ab   :  { %3328 = vmatpush1.bf16.msra.mxu0 %v7980_v19  ;;  %v8064_v19 = vld [vmem:[%s11529_s1 + $0xb74] ss:$8 sps:$4 sm:$0xff]  }
 0x1ac   :  { %4160 = vmatpush1.bf16.msra.mxu1 %v7983_v21  ;;  %3329 = vmatprep.subr.bf16.mxu0 %v7988_v22  ;;  %v8067_v21 = vld [vmem:[%s11529_s1 + $0xf74] ss:$8 sps:$4 sm:$0xff]   ;;  %v8062_v22 = vld [vmem:[%s11529_s1 + $0xb70] ss:$8 sps:$4 sm:$0xff]  }
 0x1ad   :  { %4161 = vmatprep.subr.bf16.mxu1 %v7991_v23  ;;  %v8065_v23 = vld [vmem:[%s11529_s1 + $0xf70] ss:$8 sps:$4 sm:$0xff]  }
 0x1af   :  { %3330 = vmatpush1.bf16.msra.mxu0 %v7986_v26  ;;  %v8070_v26 = vld [vmem:[%s11529_s1 + $0xb84] ss:$8 sps:$4 sm:$0xff]  }
 0x1b0   :  { %4162 = vmatpush1.bf16.msra.mxu1 %v7989_v18  ;;  %3331 = vmatprep.subr.bf16.mxu0 %v7994_v27  ;;  %v8073_v18 = vld [vmem:[%s11529_s1 + $0xf84] ss:$8 sps:$4 sm:$0xff]   ;;  %v8068_v27 = vld [vmem:[%s11529_s1 + $0xb80] ss:$8 sps:$4 sm:$0xff]  }
 0x1b1   :  { %4163 = vmatprep.subr.bf16.mxu1 %v7997_v28  ;;  %v8071_v28 = vld [vmem:[%s11529_s1 + $0xf80] ss:$8 sps:$4 sm:$0xff]  }
 0x1b3   :  { %3332 = vmatpush1.bf16.msra.mxu0 %v7992_v30  ;;  %v8076_v30 = vld [vmem:[%s11529_s1 + $0xb94] ss:$8 sps:$4 sm:$0xff]  }
 0x1b4   :  { %4164 = vmatpush1.bf16.msra.mxu1 %v7995_v31  ;;  %3333 = vmatprep.subr.bf16.mxu0 %v8000_v24  ;;  %v8079_v31 = vld [vmem:[%s11529_s1 + $0xf94] ss:$8 sps:$4 sm:$0xff]   ;;  %v8074_v24 = vld [vmem:[%s11529_s1 + $0xb90] ss:$8 sps:$4 sm:$0xff]  }
 0x1b5   :  { %4165 = vmatprep.subr.bf16.mxu1 %v8003_v25  ;;  %v8077_v25 = vld [vmem:[%s11529_s1 + $0xf90] ss:$8 sps:$4 sm:$0xff]  }
 0x1b7   :  { %3334 = vmatpush1.bf16.msra.mxu0 %v7998_v34  ;;  %v8082_v34 = vld [vmem:[%s11529_s1 + $0xba4] ss:$8 sps:$4 sm:$0xff]  }
 0x1b8   :  { %4166 = vmatpush1.bf16.msra.mxu1 %v8001_v35  ;;  %3335 = vmatprep.subr.bf16.mxu0 %v8006_v36  ;;  %v8085_v35 = vld [vmem:[%s11529_s1 + $0xfa4] ss:$8 sps:$4 sm:$0xff]   ;;  %v8080_v36 = vld [vmem:[%s11529_s1 + $0xba0] ss:$8 sps:$4 sm:$0xff]  }
 0x1b9   :  { %4167 = vmatprep.subr.bf16.mxu1 %v8009_v37  ;;  %v8083_v37 = vld [vmem:[%s11529_s1 + $0xfa0] ss:$8 sps:$4 sm:$0xff]  }
 0x1bb   :  { %3336 = vmatpush1.bf16.msra.mxu0 %v8004_v38  ;;  %v8088_v38 = vld [vmem:[%s11529_s1 + $0xbb4] ss:$8 sps:$4 sm:$0xff]  }
 0x1bc   :  { %4168 = vmatpush1.bf16.msra.mxu1 %v8007_v20  ;;  %3337 = vmatprep.subr.bf16.mxu0 %v8012_v29  ;;  %v8091_v20 = vld [vmem:[%s11529_s1 + $0xfb4] ss:$8 sps:$4 sm:$0xff]   ;;  %v8086_v29 = vld [vmem:[%s11529_s1 + $0xbb0] ss:$8 sps:$4 sm:$0xff]  }
 0x1bd   :  { %4169 = vmatprep.subr.bf16.mxu1 %v8015_v39  ;;  %v8089_v39 = vld [vmem:[%s11529_s1 + $0xfb0] ss:$8 sps:$4 sm:$0xff]  }
 0x1bf   :  { %3338 = vmatpush1.bf16.msra.mxu0 %v8010_v40  ;;  %v8094_v40 = vld [vmem:[%s11529_s1 + $0xbc4] ss:$8 sps:$4 sm:$0xff]  }
 0x1c0   :  { %4170 = vmatpush1.bf16.msra.mxu1 %v8013_v41  ;;  %3348 = vmatprep.subr.bf16.mxu0 %v8020_v32  ;;  %v8097_v41 = vld [vmem:[%s11529_s1 + $0xfc4] ss:$8 sps:$4 sm:$0xff]   ;;  %v8092_v32 = vld [vmem:[%s11529_s1 + $0xbc0] ss:$8 sps:$4 sm:$0xff]  }
 0x1c1   :  { %4180 = vmatprep.subr.bf16.mxu1 %v8025_v33  ;;  %v8095_v33 = vld [vmem:[%s11529_s1 + $0xfc0] ss:$8 sps:$4 sm:$0xff]  }
 0x1c2   :  { %3340 = vmatmul.mubr.bf16.vlgmr.msra.gmra.mrb[4].mxu0 %v6564_v46  ;;  %v8100_v46 = vld [vmem:[%s11529_s1 + $0xbd4] ss:$8 sps:$4 sm:$0xff]  }
 0x1c3   :  { %4172 = vmatmul.mubr.bf16.vlgmr.msra.gmra.mrb[4].mxu1 %v6700_v47  ;;  %3349 = vmatpush1.bf16.msra.mxu0 %v8018_v48  ;;  %v8103_v47 = vld [vmem:[%s11529_s1 + $0xfd4] ss:$8 sps:$4 sm:$0xff]   ;;  %v8098_v48 = vld [vmem:[%s11529_s1 + $0xbd0] ss:$8 sps:$4 sm:$0xff]  }
 0x1c4   :  { %4181 = vmatpush1.bf16.msra.mxu1 %v8023_v49  ;;  %3350 = vmatprep.subr.bf16.mxu0 %v8028_v50  ;;  %v8101_v49 = vld [vmem:[%s11529_s1 + $0xfd0] ss:$8 sps:$4 sm:$0xff]   ;;  %v8106_v50 = vld [vmem:[%s11529_s1 + $0xbe4] ss:$8 sps:$4 sm:$0xff]  }
 0x1c5   :  { %4182 = vmatprep.subr.bf16.mxu1 %v8031_v42  ;;  %3380 = vmatprep.mubr.bf16.mxu0 %v6567_v43  ;;  %v8109_v42 = vld [vmem:[%s11529_s1 + $0xfe4] ss:$8 sps:$4 sm:$0xff]   ;;  %v8104_v43 = vld [vmem:[%s11529_s1 + $0xbe0] ss:$8 sps:$4 sm:$0xff]  }
 0x1c6   :  { %4212 = vmatprep.mubr.bf16.mxu1 %v6703_v51  ;;  %v8107_v51 = vld [vmem:[%s11529_s1 + $0xfe0] ss:$8 sps:$4 sm:$0xff]  }
 0x1c7   :  { %3351 = vmatpush1.bf16.msra.mxu0 %v8026_v52  ;;  %v8112_v52 = vld [vmem:[%s11529_s1 + $0xbf4] ss:$8 sps:$4 sm:$0xff]  }
 0x1c8   :  { %4183 = vmatpush1.bf16.msra.mxu1 %v8029_v53  ;;  %3352 = vmatprep.subr.bf16.mxu0 %v8034_v54  ;;  %v8115_v53 = vld [vmem:[%s11529_s1 + $0xff4] ss:$8 sps:$4 sm:$0xff]   ;;  %v8110_v54 = vld [vmem:[%s11529_s1 + $0xbf0] ss:$8 sps:$4 sm:$0xff]  }
 0x1c9   :  { %4184 = vmatprep.subr.bf16.mxu1 %v8037_v55  ;;  %v8113_v55 = vld [vmem:[%s11529_s1 + $0xff0] ss:$8 sps:$4 sm:$0xff]  }
 0x1cb   :  { %3353 = vmatpush1.bf16.msra.mxu0 %v8032_v56  ;;  %v8122_v56 = vld [vmem:[%s11529_s1 + $0x1004] ss:$8 sps:$4 sm:$0xff]  }
 0x1cc   :  { %4185 = vmatpush1.bf16.msra.mxu1 %v8035_v57  ;;  %3354 = vmatprep.subr.bf16.mxu0 %v8040_v58  ;;  %v8125_v57 = vld [vmem:[%s11529_s1 + $0x1404] ss:$8 sps:$4 sm:$0xff]   ;;  %v6566_v58 = vcombine.low %v10066_v44, %v10066_v44  ;;  %v8123_v44 = vld [vmem:[%s11529_s1 + $0x1400] ss:$8 sps:$4 sm:$0xff]  }
 0x1cd   :  { %4186 = vmatprep.subr.bf16.mxu1 %v8043_v59  ;;  %v6702_v59 = vcombine.low %v10071_v45, %v10071_v45  ;;  %v8128_v45 = vld [vmem:[%s11529_s1 + $0x1014] ss:$8 sps:$4 sm:$0xff]  }
 0x1cf   :  { %3355 = vmatpush1.bf16.msra.mxu0 %v8038_v60  ;;  %v10288_v60 = vld [vmem:[%s11530_s0 + $0x80] sm:$0xff] }
 0x1d0   :  { %4187 = vmatpush1.bf16.msra.mxu1 %v8041_v61  ;;  %3356 = vmatprep.subr.bf16.mxu0 %v8046_v62  ;;  %v10293_v61 = vld [vmem:[%s11530_s0 + $0xa0] sm:$0xff] }
 0x1d1   :  { %4188 = vmatprep.subr.bf16.mxu1 %v8049_v63  ;;  %v8120_v62 = vld [vmem:[%s11529_s1 + $0x1000] ss:$8 sps:$4 sm:$0xff]   ;;  %v8131_v63 = vld [vmem:[%s11529_s1 + $0x1414] ss:$8 sps:$4 sm:$0xff]  }
 0x1d3   :  { %3357 = vmatpush1.bf16.msra.mxu0 %v8044_v0  ;;  %v6833_v0 = vcombine.high %v10288_v60, %v10288_v60 }
 0x1d4   :  { %4189 = vmatpush1.bf16.msra.mxu1 %v8047_v1  ;;  %3358 = vmatprep.subr.bf16.mxu0 %v8052_v2  ;;  %v6969_v1 = vcombine.high %v10293_v61, %v10293_v61  ;;  %v8126_v2 = vld [vmem:[%s11529_s1 + $0x1010] ss:$8 sps:$4 sm:$0xff]  }
 0x1d5   :  { %4190 = vmatprep.subr.bf16.mxu1 %v8055_v3  ;;  %v10153_v8 = vpop.f32.mrb[0].mxu0  ;;  %v8129_v3 = vld [vmem:[%s11529_s1 + $0x1410] ss:$8 sps:$4 sm:$0xff]  }
 0x1d6   :  { %v10155_v9 = vpop.f32.mrb[0].mxu1  ;;  %v10157_v10 = vpop.f32.mrb[1].mxu0 }
 0x1d7   :  { %v10159_v11 = vpop.f32.mrb[1].mxu1  ;;  %v1722_v12 = vpop.f32.mrb[2].mxu0  ;;  %3359 = vmatpush1.bf16.msra.mxu0 %v8050_v4  ;;  %v8134_v4 = vld [vmem:[%s11529_s1 + $0x1024] ss:$8 sps:$4 sm:$0xff]  }
 0x1d8   :  { %v2554_v13 = vpop.f32.mrb[2].mxu1  ;;  %4191 = vmatpush1.bf16.msra.mxu1 %v8053_v5  ;;  %v1723_v16 = vpop.f32.mrb[3].mxu0  ;;  %3360 = vmatprep.subr.bf16.mxu0 %v8058_v6  ;;  %v8137_v5 = vld [vmem:[%s11529_s1 + $0x1424] ss:$8 sps:$4 sm:$0xff]   ;;  %v8132_v6 = vld [vmem:[%s11529_s1 + $0x1020] ss:$8 sps:$4 sm:$0xff]  }
 0x1d9   :  { %v2555_v17 = vpop.f32.mrb[3].mxu1  ;;  %4192 = vmatprep.subr.bf16.mxu1 %v8061_v7  ;;  %v8135_v7 = vld [vmem:[%s11529_s1 + $0x1420] ss:$8 sps:$4 sm:$0xff]   ;;  %v8140_v12 = vld [vmem:[%s11529_s1 + $0x1034] ss:$8 sps:$4 sm:$0xff]  }
 0x1da   :  { %v8143_v13 = vld [vmem:[%s11529_s1 + $0x1434] ss:$8 sps:$4 sm:$0xff]   ;;  %v8146_v16 = vld [vmem:[%s11529_s1 + $0x1044] ss:$8 sps:$4 sm:$0xff]  }
 0x1db   :  { %3361 = vmatpush1.bf16.msra.mxu0 %v8056_v14  ;;  %v8138_v14 = vld [vmem:[%s11529_s1 + $0x1030] ss:$8 sps:$4 sm:$0xff]   ;;  %v8149_v17 = vld [vmem:[%s11529_s1 + $0x1444] ss:$8 sps:$4 sm:$0xff]  }
 0x1dc   :  { %4193 = vmatpush1.bf16.msra.mxu1 %v8059_v15  ;;  %3362 = vmatprep.subr.bf16.mxu0 %v8064_v19  ;;  %v8141_v15 = vld [vmem:[%s11529_s1 + $0x1430] ss:$8 sps:$4 sm:$0xff]   ;;  %v8144_v19 = vld [vmem:[%s11529_s1 + $0x1040] ss:$8 sps:$4 sm:$0xff]  }
 0x1dd   :  { %4194 = vmatprep.subr.bf16.mxu1 %v8067_v21  ;;  %v8147_v21 = vld [vmem:[%s11529_s1 + $0x1440] ss:$8 sps:$4 sm:$0xff]  }
 0x1df   :  { %3363 = vmatpush1.bf16.msra.mxu0 %v8062_v22  ;;  %v8152_v22 = vld [vmem:[%s11529_s1 + $0x1054] ss:$8 sps:$4 sm:$0xff]  }
 0x1e0   :  { %4195 = vmatpush1.bf16.msra.mxu1 %v8065_v23  ;;  %3364 = vmatprep.subr.bf16.mxu0 %v8070_v26  ;;  %v8155_v23 = vld [vmem:[%s11529_s1 + $0x1454] ss:$8 sps:$4 sm:$0xff]   ;;  %v8150_v26 = vld [vmem:[%s11529_s1 + $0x1050] ss:$8 sps:$4 sm:$0xff]  }
 0x1e1   :  { %4196 = vmatprep.subr.bf16.mxu1 %v8073_v18  ;;  %v8153_v18 = vld [vmem:[%s11529_s1 + $0x1450] ss:$8 sps:$4 sm:$0xff]  }
 0x1e3   :  { %3365 = vmatpush1.bf16.msra.mxu0 %v8068_v27  ;;  %v8158_v27 = vld [vmem:[%s11529_s1 + $0x1064] ss:$8 sps:$4 sm:$0xff]  }
 0x1e4   :  { %4197 = vmatpush1.bf16.msra.mxu1 %v8071_v28  ;;  %3366 = vmatprep.subr.bf16.mxu0 %v8076_v30  ;;  %v8161_v28 = vld [vmem:[%s11529_s1 + $0x1464] ss:$8 sps:$4 sm:$0xff]   ;;  %v8156_v30 = vld [vmem:[%s11529_s1 + $0x1060] ss:$8 sps:$4 sm:$0xff]  }
 0x1e5   :  { %4198 = vmatprep.subr.bf16.mxu1 %v8079_v31  ;;  %v8159_v31 = vld [vmem:[%s11529_s1 + $0x1460] ss:$8 sps:$4 sm:$0xff]  }
 0x1e7   :  { %3367 = vmatpush1.bf16.msra.mxu0 %v8074_v24  ;;  %v8164_v24 = vld [vmem:[%s11529_s1 + $0x1074] ss:$8 sps:$4 sm:$0xff]  }
 0x1e8   :  { %4199 = vmatpush1.bf16.msra.mxu1 %v8077_v25  ;;  %3368 = vmatprep.subr.bf16.mxu0 %v8082_v34  ;;  %v8167_v25 = vld [vmem:[%s11529_s1 + $0x1474] ss:$8 sps:$4 sm:$0xff]   ;;  %v8162_v34 = vld [vmem:[%s11529_s1 + $0x1070] ss:$8 sps:$4 sm:$0xff]  }
 0x1e9   :  { %4200 = vmatprep.subr.bf16.mxu1 %v8085_v35  ;;  %v8165_v35 = vld [vmem:[%s11529_s1 + $0x1470] ss:$8 sps:$4 sm:$0xff]  }
 0x1eb   :  { %3369 = vmatpush1.bf16.msra.mxu0 %v8080_v36  ;;  %v8170_v36 = vld [vmem:[%s11529_s1 + $0x1084] ss:$8 sps:$4 sm:$0xff]  }
 0x1ec   :  { %4201 = vmatpush1.bf16.msra.mxu1 %v8083_v37  ;;  %3370 = vmatprep.subr.bf16.mxu0 %v8088_v38  ;;  %v8173_v37 = vld [vmem:[%s11529_s1 + $0x1484] ss:$8 sps:$4 sm:$0xff]   ;;  %v8168_v38 = vld [vmem:[%s11529_s1 + $0x1080] ss:$8 sps:$4 sm:$0xff]  }
 0x1ed   :  { %4202 = vmatprep.subr.bf16.mxu1 %v8091_v20  ;;  %v8171_v20 = vld [vmem:[%s11529_s1 + $0x1480] ss:$8 sps:$4 sm:$0xff]  }
 0x1ef   :  { %3371 = vmatpush1.bf16.msra.mxu0 %v8086_v29  ;;  %v8176_v29 = vld [vmem:[%s11529_s1 + $0x1094] ss:$8 sps:$4 sm:$0xff]  }
 0x1f0   :  { %4203 = vmatpush1.bf16.msra.mxu1 %v8089_v39  ;;  %3372 = vmatprep.subr.bf16.mxu0 %v8094_v40  ;;  %v8179_v39 = vld [vmem:[%s11529_s1 + $0x1494] ss:$8 sps:$4 sm:$0xff]   ;;  %v8174_v40 = vld [vmem:[%s11529_s1 + $0x1090] ss:$8 sps:$4 sm:$0xff]  }
 0x1f1   :  { %4204 = vmatprep.subr.bf16.mxu1 %v8097_v41  ;;  %v8177_v41 = vld [vmem:[%s11529_s1 + $0x1490] ss:$8 sps:$4 sm:$0xff]  }
 0x1f3   :  { %3373 = vmatpush1.bf16.msra.mxu0 %v8092_v32  ;;  %v8182_v32 = vld [vmem:[%s11529_s1 + $0x10a4] ss:$8 sps:$4 sm:$0xff]  }
 0x1f4   :  { %4205 = vmatpush1.bf16.msra.mxu1 %v8095_v33  ;;  %3374 = vmatprep.subr.bf16.mxu0 %v8100_v46  ;;  %v8185_v33 = vld [vmem:[%s11529_s1 + $0x14a4] ss:$8 sps:$4 sm:$0xff]   ;;  %v8180_v46 = vld [vmem:[%s11529_s1 + $0x10a0] ss:$8 sps:$4 sm:$0xff]  }
 0x1f5   :  { %4206 = vmatprep.subr.bf16.mxu1 %v8103_v47  ;;  %v8183_v47 = vld [vmem:[%s11529_s1 + $0x14a0] ss:$8 sps:$4 sm:$0xff]  }
 0x1f7   :  { %3375 = vmatpush1.bf16.msra.mxu0 %v8098_v48  ;;  %v8188_v48 = vld [vmem:[%s11529_s1 + $0x10b4] ss:$8 sps:$4 sm:$0xff]  }
 0x1f8   :  { %4207 = vmatpush1.bf16.msra.mxu1 %v8101_v49  ;;  %3376 = vmatprep.subr.bf16.mxu0 %v8106_v50  ;;  %v8191_v49 = vld [vmem:[%s11529_s1 + $0x14b4] ss:$8 sps:$4 sm:$0xff]   ;;  %v8186_v50 = vld [vmem:[%s11529_s1 + $0x10b0] ss:$8 sps:$4 sm:$0xff]  }
 0x1f9   :  { %4208 = vmatprep.subr.bf16.mxu1 %v8109_v42  ;;  %v8189_v42 = vld [vmem:[%s11529_s1 + $0x14b0] ss:$8 sps:$4 sm:$0xff]  }
 0x1fb   :  { %3377 = vmatpush1.bf16.msra.mxu0 %v8104_v43  ;;  %v8194_v43 = vld [vmem:[%s11529_s1 + $0x10c4] ss:$8 sps:$4 sm:$0xff]  }
 0x1fc   :  { %4209 = vmatpush1.bf16.msra.mxu1 %v8107_v51  ;;  %3378 = vmatprep.subr.bf16.mxu0 %v8112_v52  ;;  %v8197_v51 = vld [vmem:[%s11529_s1 + $0x14c4] ss:$8 sps:$4 sm:$0xff]   ;;  %v8192_v52 = vld [vmem:[%s11529_s1 + $0x10c0] ss:$8 sps:$4 sm:$0xff]  }
 0x1fd   :  { %4210 = vmatprep.subr.bf16.mxu1 %v8115_v53  ;;  %v8195_v53 = vld [vmem:[%s11529_s1 + $0x14c0] ss:$8 sps:$4 sm:$0xff]  }
 0x1ff   :  { %3379 = vmatpush1.bf16.msra.mxu0 %v8110_v54  ;;  %v8200_v54 = vld [vmem:[%s11529_s1 + $0x10d4] ss:$8 sps:$4 sm:$0xff]  }
 0x200   :  { %4211 = vmatpush1.bf16.msra.mxu1 %v8113_v55  ;;  %4889 = vmatprep.subr.bf16.mxu0 %v8122_v56  ;;  %v8203_v55 = vld [vmem:[%s11529_s1 + $0x14d4] ss:$8 sps:$4 sm:$0xff]   ;;  %v8198_v56 = vld [vmem:[%s11529_s1 + $0x10d0] ss:$8 sps:$4 sm:$0xff]  }
 0x201   :  { %5721 = vmatprep.subr.bf16.mxu1 %v8125_v57  ;;  %v8201_v57 = vld [vmem:[%s11529_s1 + $0x14d0] ss:$8 sps:$4 sm:$0xff]  }
 0x202   :  { %3381 = vmatmul.mubr.bf16.vlgmr.msra.gmra.mrb[4].mxu0 %v6566_v58  ;;  %v8206_v58 = vld [vmem:[%s11529_s1 + $0x10e4] ss:$8 sps:$4 sm:$0xff]  }
 0x203   :  { %4213 = vmatmul.mubr.bf16.vlgmr.msra.gmra.mrb[4].mxu1 %v6702_v59  ;;  %4890 = vmatpush1.bf16.msra.mxu0 %v8120_v62  ;;  %v8209_v59 = vld [vmem:[%s11529_s1 + $0x14e4] ss:$8 sps:$4 sm:$0xff]   ;;  %v8204_v62 = vld [vmem:[%s11529_s1 + $0x10e0] ss:$8 sps:$4 sm:$0xff]  }
 0x204   :  { %5722 = vmatpush1.bf16.msra.mxu1 %v8123_v44  ;;  %4891 = vmatprep.subr.bf16.mxu0 %v8128_v45  ;;  %v8207_v44 = vld [vmem:[%s11529_s1 + $0x14e0] ss:$8 sps:$4 sm:$0xff]   ;;  %v8212_v45 = vld [vmem:[%s11529_s1 + $0x10f4] ss:$8 sps:$4 sm:$0xff]  }
 0x205   :  { %5723 = vmatprep.subr.bf16.mxu1 %v8131_v63  ;;  %4921 = vmatprep.mubr.bf16.mxu0 %v6833_v0  ;;  %v8215_v63 = vld [vmem:[%s11529_s1 + $0x14f4] ss:$8 sps:$4 sm:$0xff]   ;;  %v8210_v0 = vld [vmem:[%s11529_s1 + $0x10f0] ss:$8 sps:$4 sm:$0xff]  }
 0x206   :  { %5753 = vmatprep.mubr.bf16.mxu1 %v6969_v1  ;;  %v8213_v1 = vld [vmem:[%s11529_s1 + $0x14f0] ss:$8 sps:$4 sm:$0xff]  }
 0x207   :  { %4892 = vmatpush1.bf16.msra.mxu0 %v8126_v2  ;;  %v8220_v2 = vld [vmem:[%s11529_s1 + $0x1104] ss:$8 sps:$4 sm:$0xff]  }
 0x208   :  { %5724 = vmatpush1.bf16.msra.mxu1 %v8129_v3  ;;  %4893 = vmatprep.subr.bf16.mxu0 %v8134_v4  ;;  %v8225_v3 = vld [vmem:[%s11529_s1 + $0x1504] ss:$8 sps:$4 sm:$0xff]   ;;  %v6832_v4 = vcombine.low %v10288_v60, %v10288_v60  ;;  %v8223_v60 = vld [vmem:[%s11529_s1 + $0x1500] ss:$8 sps:$4 sm:$0xff]  }
 0x209   :  { %5725 = vmatprep.subr.bf16.mxu1 %v8137_v5  ;;  %v6968_v5 = vcombine.low %v10293_v61, %v10293_v61  ;;  %v8228_v61 = vld [vmem:[%s11529_s1 + $0x1114] ss:$8 sps:$4 sm:$0xff]  }
 0x20b   :  { %4894 = vmatpush1.bf16.msra.mxu0 %v8132_v6  ;;  %v10498_v6 = vld [vmem:[%s11530_s0 + $0x88] sm:$0xff] }
 0x20c   :  { %5726 = vmatpush1.bf16.msra.mxu1 %v8135_v7  ;;  %4895 = vmatprep.subr.bf16.mxu0 %v8140_v12  ;;  %v10503_v7 = vld [vmem:[%s11530_s0 + $0xa8] sm:$0xff] }
 0x20d   :  { %5727 = vmatprep.subr.bf16.mxu1 %v8143_v13  ;;  %v8218_v12 = vld [vmem:[%s11529_s1 + $0x1100] ss:$8 sps:$4 sm:$0xff]   ;;  %v8231_v13 = vld [vmem:[%s11529_s1 + $0x1514] ss:$8 sps:$4 sm:$0xff]  }
 0x20f   :  { %4896 = vmatpush1.bf16.msra.mxu0 %v8138_v14  ;;  %v6835_v14 = vcombine.high %v10498_v6, %v10498_v6 }
 0x210   :  { %5728 = vmatpush1.bf16.msra.mxu1 %v8141_v15  ;;  %4897 = vmatprep.subr.bf16.mxu0 %v8146_v16  ;;  %v6971_v15 = vcombine.high %v10503_v7, %v10503_v7  ;;  %v8226_v16 = vld [vmem:[%s11529_s1 + $0x1110] ss:$8 sps:$4 sm:$0xff]  }
 0x211   :  { %5729 = vmatprep.subr.bf16.mxu1 %v8149_v17  ;;  %v8229_v17 = vld [vmem:[%s11529_s1 + $0x1510] ss:$8 sps:$4 sm:$0xff]  }
 0x213   :  { %4898 = vmatpush1.bf16.msra.mxu0 %v8144_v19  ;;  %v8234_v19 = vld [vmem:[%s11529_s1 + $0x1124] ss:$8 sps:$4 sm:$0xff]  }
 0x214   :  { %5730 = vmatpush1.bf16.msra.mxu1 %v8147_v21  ;;  %4899 = vmatprep.subr.bf16.mxu0 %v8152_v22  ;;  %v8237_v21 = vld [vmem:[%s11529_s1 + $0x1524] ss:$8 sps:$4 sm:$0xff]   ;;  %v8232_v22 = vld [vmem:[%s11529_s1 + $0x1120] ss:$8 sps:$4 sm:$0xff]  }
 0x215   :  { %5731 = vmatprep.subr.bf16.mxu1 %v8155_v23  ;;  %v8235_v23 = vld [vmem:[%s11529_s1 + $0x1520] ss:$8 sps:$4 sm:$0xff]  }
 0x217   :  { %4900 = vmatpush1.bf16.msra.mxu0 %v8150_v26  ;;  %v8240_v26 = vld [vmem:[%s11529_s1 + $0x1134] ss:$8 sps:$4 sm:$0xff]  }
 0x218   :  { %5732 = vmatpush1.bf16.msra.mxu1 %v8153_v18  ;;  %4901 = vmatprep.subr.bf16.mxu0 %v8158_v27  ;;  %v8243_v18 = vld [vmem:[%s11529_s1 + $0x1534] ss:$8 sps:$4 sm:$0xff]   ;;  %v8238_v27 = vld [vmem:[%s11529_s1 + $0x1130] ss:$8 sps:$4 sm:$0xff]  }
 0x219   :  { %5733 = vmatprep.subr.bf16.mxu1 %v8161_v28  ;;  %v8241_v28 = vld [vmem:[%s11529_s1 + $0x1530] ss:$8 sps:$4 sm:$0xff]  }
 0x21b   :  { %4902 = vmatpush1.bf16.msra.mxu0 %v8156_v30  ;;  %v8246_v30 = vld [vmem:[%s11529_s1 + $0x1144] ss:$8 sps:$4 sm:$0xff]  }
 0x21c   :  { %5734 = vmatpush1.bf16.msra.mxu1 %v8159_v31  ;;  %4903 = vmatprep.subr.bf16.mxu0 %v8164_v24  ;;  %v8249_v31 = vld [vmem:[%s11529_s1 + $0x1544] ss:$8 sps:$4 sm:$0xff]   ;;  %v8244_v24 = vld [vmem:[%s11529_s1 + $0x1140] ss:$8 sps:$4 sm:$0xff]  }
 0x21d   :  { %5735 = vmatprep.subr.bf16.mxu1 %v8167_v25  ;;  %v8247_v25 = vld [vmem:[%s11529_s1 + $0x1540] ss:$8 sps:$4 sm:$0xff]  }
 0x21f   :  { %4904 = vmatpush1.bf16.msra.mxu0 %v8162_v34  ;;  %v8252_v34 = vld [vmem:[%s11529_s1 + $0x1154] ss:$8 sps:$4 sm:$0xff]  }
 0x220   :  { %5736 = vmatpush1.bf16.msra.mxu1 %v8165_v35  ;;  %4905 = vmatprep.subr.bf16.mxu0 %v8170_v36  ;;  %v8255_v35 = vld [vmem:[%s11529_s1 + $0x1554] ss:$8 sps:$4 sm:$0xff]   ;;  %v8250_v36 = vld [vmem:[%s11529_s1 + $0x1150] ss:$8 sps:$4 sm:$0xff]  }
 0x221   :  { %5737 = vmatprep.subr.bf16.mxu1 %v8173_v37  ;;  %v8253_v37 = vld [vmem:[%s11529_s1 + $0x1550] ss:$8 sps:$4 sm:$0xff]  }
 0x223   :  { %4906 = vmatpush1.bf16.msra.mxu0 %v8168_v38  ;;  %v8258_v38 = vld [vmem:[%s11529_s1 + $0x1164] ss:$8 sps:$4 sm:$0xff]  }
 0x224   :  { %5738 = vmatpush1.bf16.msra.mxu1 %v8171_v20  ;;  %4907 = vmatprep.subr.bf16.mxu0 %v8176_v29  ;;  %v8261_v20 = vld [vmem:[%s11529_s1 + $0x1564] ss:$8 sps:$4 sm:$0xff]   ;;  %v8256_v29 = vld [vmem:[%s11529_s1 + $0x1160] ss:$8 sps:$4 sm:$0xff]  }
 0x225   :  { %5739 = vmatprep.subr.bf16.mxu1 %v8179_v39  ;;  %v8259_v39 = vld [vmem:[%s11529_s1 + $0x1560] ss:$8 sps:$4 sm:$0xff]  }
 0x227   :  { %4908 = vmatpush1.bf16.msra.mxu0 %v8174_v40  ;;  %v8264_v40 = vld [vmem:[%s11529_s1 + $0x1174] ss:$8 sps:$4 sm:$0xff]  }
 0x228   :  { %5740 = vmatpush1.bf16.msra.mxu1 %v8177_v41  ;;  %4909 = vmatprep.subr.bf16.mxu0 %v8182_v32  ;;  %v8267_v41 = vld [vmem:[%s11529_s1 + $0x1574] ss:$8 sps:$4 sm:$0xff]   ;;  %v8262_v32 = vld [vmem:[%s11529_s1 + $0x1170] ss:$8 sps:$4 sm:$0xff]  }
 0x229   :  { %5741 = vmatprep.subr.bf16.mxu1 %v8185_v33  ;;  %v8265_v33 = vld [vmem:[%s11529_s1 + $0x1570] ss:$8 sps:$4 sm:$0xff]  }
 0x22b   :  { %4910 = vmatpush1.bf16.msra.mxu0 %v8180_v46  ;;  %v8270_v46 = vld [vmem:[%s11529_s1 + $0x1184] ss:$8 sps:$4 sm:$0xff]  }
 0x22c   :  { %5742 = vmatpush1.bf16.msra.mxu1 %v8183_v47  ;;  %4911 = vmatprep.subr.bf16.mxu0 %v8188_v48  ;;  %v8273_v47 = vld [vmem:[%s11529_s1 + $0x1584] ss:$8 sps:$4 sm:$0xff]   ;;  %v8268_v48 = vld [vmem:[%s11529_s1 + $0x1180] ss:$8 sps:$4 sm:$0xff]  }
 0x22d   :  { %5743 = vmatprep.subr.bf16.mxu1 %v8191_v49  ;;  %v8271_v49 = vld [vmem:[%s11529_s1 + $0x1580] ss:$8 sps:$4 sm:$0xff]  }
 0x22f   :  { %4912 = vmatpush1.bf16.msra.mxu0 %v8186_v50  ;;  %v8276_v50 = vld [vmem:[%s11529_s1 + $0x1194] ss:$8 sps:$4 sm:$0xff]  }
 0x230   :  { %5744 = vmatpush1.bf16.msra.mxu1 %v8189_v42  ;;  %4913 = vmatprep.subr.bf16.mxu0 %v8194_v43  ;;  %v8279_v42 = vld [vmem:[%s11529_s1 + $0x1594] ss:$8 sps:$4 sm:$0xff]   ;;  %v8274_v43 = vld [vmem:[%s11529_s1 + $0x1190] ss:$8 sps:$4 sm:$0xff]  }
 0x231   :  { %5745 = vmatprep.subr.bf16.mxu1 %v8197_v51  ;;  %v8277_v51 = vld [vmem:[%s11529_s1 + $0x1590] ss:$8 sps:$4 sm:$0xff]  }
 0x233   :  { %4914 = vmatpush1.bf16.msra.mxu0 %v8192_v52  ;;  %v8282_v52 = vld [vmem:[%s11529_s1 + $0x11a4] ss:$8 sps:$4 sm:$0xff]  }
 0x234   :  { %5746 = vmatpush1.bf16.msra.mxu1 %v8195_v53  ;;  %4915 = vmatprep.subr.bf16.mxu0 %v8200_v54  ;;  %v8285_v53 = vld [vmem:[%s11529_s1 + $0x15a4] ss:$8 sps:$4 sm:$0xff]   ;;  %v8280_v54 = vld [vmem:[%s11529_s1 + $0x11a0] ss:$8 sps:$4 sm:$0xff]  }
 0x235   :  { %5747 = vmatprep.subr.bf16.mxu1 %v8203_v55  ;;  %v8283_v55 = vld [vmem:[%s11529_s1 + $0x15a0] ss:$8 sps:$4 sm:$0xff]  }
 0x237   :  { %4916 = vmatpush1.bf16.msra.mxu0 %v8198_v56  ;;  %v8288_v56 = vld [vmem:[%s11529_s1 + $0x11b4] ss:$8 sps:$4 sm:$0xff]  }
 0x238   :  { %5748 = vmatpush1.bf16.msra.mxu1 %v8201_v57  ;;  %4917 = vmatprep.subr.bf16.mxu0 %v8206_v58  ;;  %v8291_v57 = vld [vmem:[%s11529_s1 + $0x15b4] ss:$8 sps:$4 sm:$0xff]   ;;  %v8286_v58 = vld [vmem:[%s11529_s1 + $0x11b0] ss:$8 sps:$4 sm:$0xff]  }
 0x239   :  { %5749 = vmatprep.subr.bf16.mxu1 %v8209_v59  ;;  %v8289_v59 = vld [vmem:[%s11529_s1 + $0x15b0] ss:$8 sps:$4 sm:$0xff]  }
 0x23b   :  { %4918 = vmatpush1.bf16.msra.mxu0 %v8204_v62  ;;  %v8294_v62 = vld [vmem:[%s11529_s1 + $0x11c4] ss:$8 sps:$4 sm:$0xff]  }
 0x23c   :  { %5750 = vmatpush1.bf16.msra.mxu1 %v8207_v44  ;;  %4919 = vmatprep.subr.bf16.mxu0 %v8212_v45  ;;  %v8297_v44 = vld [vmem:[%s11529_s1 + $0x15c4] ss:$8 sps:$4 sm:$0xff]   ;;  %v8292_v45 = vld [vmem:[%s11529_s1 + $0x11c0] ss:$8 sps:$4 sm:$0xff]  }
 0x23d   :  { %5751 = vmatprep.subr.bf16.mxu1 %v8215_v63  ;;  %v8295_v63 = vld [vmem:[%s11529_s1 + $0x15c0] ss:$8 sps:$4 sm:$0xff]  }
 0x23f   :  { %4920 = vmatpush1.bf16.msra.mxu0 %v8210_v0  ;;  %v8300_v0 = vld [vmem:[%s11529_s1 + $0x11d4] ss:$8 sps:$4 sm:$0xff]  }
 0x240   :  { %5752 = vmatpush1.bf16.msra.mxu1 %v8213_v1  ;;  %4930 = vmatprep.subr.bf16.mxu0 %v8220_v2  ;;  %v8303_v1 = vld [vmem:[%s11529_s1 + $0x15d4] ss:$8 sps:$4 sm:$0xff]   ;;  %v8298_v2 = vld [vmem:[%s11529_s1 + $0x11d0] ss:$8 sps:$4 sm:$0xff]  }
 0x241   :  { %5762 = vmatprep.subr.bf16.mxu1 %v8225_v3  ;;  %v8301_v3 = vld [vmem:[%s11529_s1 + $0x15d0] ss:$8 sps:$4 sm:$0xff]  }
 0x242   :  { %4922 = vmatmul.mubr.bf16.vlgmr.msra.gmra.mrb[8].mxu0 %v6832_v4  ;;  %v8306_v4 = vld [vmem:[%s11529_s1 + $0x11e4] ss:$8 sps:$4 sm:$0xff]  }
 0x243   :  { %5754 = vmatmul.mubr.bf16.vlgmr.msra.gmra.mrb[8].mxu1 %v6968_v5  ;;  %4931 = vmatpush1.bf16.msra.mxu0 %v8218_v12  ;;  %v8309_v5 = vld [vmem:[%s11529_s1 + $0x15e4] ss:$8 sps:$4 sm:$0xff]   ;;  %v8304_v12 = vld [vmem:[%s11529_s1 + $0x11e0] ss:$8 sps:$4 sm:$0xff]  }
 0x244   :  { %5763 = vmatpush1.bf16.msra.mxu1 %v8223_v60  ;;  %4932 = vmatprep.subr.bf16.mxu0 %v8228_v61  ;;  %v8307_v60 = vld [vmem:[%s11529_s1 + $0x15e0] ss:$8 sps:$4 sm:$0xff]   ;;  %v8312_v61 = vld [vmem:[%s11529_s1 + $0x11f4] ss:$8 sps:$4 sm:$0xff]  }
 0x245   :  { %5764 = vmatprep.subr.bf16.mxu1 %v8231_v13  ;;  %4962 = vmatprep.mubr.bf16.mxu0 %v6835_v14  ;;  %v8315_v13 = vld [vmem:[%s11529_s1 + $0x15f4] ss:$8 sps:$4 sm:$0xff]   ;;  %v8310_v14 = vld [vmem:[%s11529_s1 + $0x11f0] ss:$8 sps:$4 sm:$0xff]  }
 0x246   :  { %5794 = vmatprep.mubr.bf16.mxu1 %v6971_v15  ;;  %v8313_v15 = vld [vmem:[%s11529_s1 + $0x15f0] ss:$8 sps:$4 sm:$0xff]  }
 0x247   :  { %4933 = vmatpush1.bf16.msra.mxu0 %v8226_v16  ;;  %v8320_v16 = vld [vmem:[%s11529_s1 + $0x1204] ss:$8 sps:$4 sm:$0xff]  }
 0x248   :  { %5765 = vmatpush1.bf16.msra.mxu1 %v8229_v17  ;;  %4934 = vmatprep.subr.bf16.mxu0 %v8234_v19  ;;  %v8325_v17 = vld [vmem:[%s11529_s1 + $0x1604] ss:$8 sps:$4 sm:$0xff]   ;;  %v6834_v19 = vcombine.low %v10498_v6, %v10498_v6  ;;  %v8323_v6 = vld [vmem:[%s11529_s1 + $0x1600] ss:$8 sps:$4 sm:$0xff]  }
 0x249   :  { %5766 = vmatprep.subr.bf16.mxu1 %v8237_v21  ;;  %v6970_v21 = vcombine.low %v10503_v7, %v10503_v7  ;;  %v8328_v7 = vld [vmem:[%s11529_s1 + $0x1214] ss:$8 sps:$4 sm:$0xff]  }
 0x24b   :  { %4935 = vmatpush1.bf16.msra.mxu0 %v8232_v22  ;;  %v10708_v22 = vld [vmem:[%s11530_s0 + $0x90] sm:$0xff] }
 0x24c   :  { %5767 = vmatpush1.bf16.msra.mxu1 %v8235_v23  ;;  %4936 = vmatprep.subr.bf16.mxu0 %v8240_v26  ;;  %v10713_v23 = vld [vmem:[%s11530_s0 + $0xb0] sm:$0xff]  ;;  %v8318_v26 = vld [vmem:[%s11529_s1 + $0x1200] ss:$8 sps:$4 sm:$0xff]  }
 0x24d   :  { %5768 = vmatprep.subr.bf16.mxu1 %v8243_v18  ;;  %v8331_v18 = vld [vmem:[%s11529_s1 + $0x1614] ss:$8 sps:$4 sm:$0xff]  }
 0x24f   :  { %4937 = vmatpush1.bf16.msra.mxu0 %v8238_v27  ;;  %v6837_v27 = vcombine.high %v10708_v22, %v10708_v22 }
 0x250   :  { %5769 = vmatpush1.bf16.msra.mxu1 %v8241_v28  ;;  %4938 = vmatprep.subr.bf16.mxu0 %v8246_v30  ;;  %v6973_v28 = vcombine.high %v10713_v23, %v10713_v23  ;;  %v8326_v30 = vld [vmem:[%s11529_s1 + $0x1210] ss:$8 sps:$4 sm:$0xff]  }
 0x251   :  { %5770 = vmatprep.subr.bf16.mxu1 %v8249_v31  ;;  %v8329_v31 = vld [vmem:[%s11529_s1 + $0x1610] ss:$8 sps:$4 sm:$0xff]  }
 0x253   :  { %4939 = vmatpush1.bf16.msra.mxu0 %v8244_v24  ;;  %v8334_v24 = vld [vmem:[%s11529_s1 + $0x1224] ss:$8 sps:$4 sm:$0xff]  }
 0x254   :  { %5771 = vmatpush1.bf16.msra.mxu1 %v8247_v25  ;;  %4940 = vmatprep.subr.bf16.mxu0 %v8252_v34  ;;  %v8337_v25 = vld [vmem:[%s11529_s1 + $0x1624] ss:$8 sps:$4 sm:$0xff]   ;;  %v8332_v34 = vld [vmem:[%s11529_s1 + $0x1220] ss:$8 sps:$4 sm:$0xff]  }
 0x255   :  { %5772 = vmatprep.subr.bf16.mxu1 %v8255_v35  ;;  %v8335_v35 = vld [vmem:[%s11529_s1 + $0x1620] ss:$8 sps:$4 sm:$0xff]  }
 0x257   :  { %4941 = vmatpush1.bf16.msra.mxu0 %v8250_v36  ;;  %v8340_v36 = vld [vmem:[%s11529_s1 + $0x1234] ss:$8 sps:$4 sm:$0xff]  }
 0x258   :  { %5773 = vmatpush1.bf16.msra.mxu1 %v8253_v37  ;;  %4942 = vmatprep.subr.bf16.mxu0 %v8258_v38  ;;  %v8343_v37 = vld [vmem:[%s11529_s1 + $0x1634] ss:$8 sps:$4 sm:$0xff]   ;;  %v8338_v38 = vld [vmem:[%s11529_s1 + $0x1230] ss:$8 sps:$4 sm:$0xff]  }
 0x259   :  { %5774 = vmatprep.subr.bf16.mxu1 %v8261_v20  ;;  %v8341_v20 = vld [vmem:[%s11529_s1 + $0x1630] ss:$8 sps:$4 sm:$0xff]  }
 0x25b   :  { %4943 = vmatpush1.bf16.msra.mxu0 %v8256_v29  ;;  %v8346_v29 = vld [vmem:[%s11529_s1 + $0x1244] ss:$8 sps:$4 sm:$0xff]  }
 0x25c   :  { %5775 = vmatpush1.bf16.msra.mxu1 %v8259_v39  ;;  %4944 = vmatprep.subr.bf16.mxu0 %v8264_v40  ;;  %v8349_v39 = vld [vmem:[%s11529_s1 + $0x1644] ss:$8 sps:$4 sm:$0xff]   ;;  %v8344_v40 = vld [vmem:[%s11529_s1 + $0x1240] ss:$8 sps:$4 sm:$0xff]  }
 0x25d   :  { %5776 = vmatprep.subr.bf16.mxu1 %v8267_v41  ;;  %v8347_v41 = vld [vmem:[%s11529_s1 + $0x1640] ss:$8 sps:$4 sm:$0xff]  }
 0x25f   :  { %4945 = vmatpush1.bf16.msra.mxu0 %v8262_v32  ;;  %v8352_v32 = vld [vmem:[%s11529_s1 + $0x1254] ss:$8 sps:$4 sm:$0xff]  }
 0x260   :  { %5777 = vmatpush1.bf16.msra.mxu1 %v8265_v33  ;;  %4946 = vmatprep.subr.bf16.mxu0 %v8270_v46  ;;  %v8355_v33 = vld [vmem:[%s11529_s1 + $0x1654] ss:$8 sps:$4 sm:$0xff]   ;;  %v8350_v46 = vld [vmem:[%s11529_s1 + $0x1250] ss:$8 sps:$4 sm:$0xff]  }
 0x261   :  { %5778 = vmatprep.subr.bf16.mxu1 %v8273_v47  ;;  %v8353_v47 = vld [vmem:[%s11529_s1 + $0x1650] ss:$8 sps:$4 sm:$0xff]  }
 0x263   :  { %4947 = vmatpush1.bf16.msra.mxu0 %v8268_v48  ;;  %v8358_v48 = vld [vmem:[%s11529_s1 + $0x1264] ss:$8 sps:$4 sm:$0xff]  }
 0x264   :  { %5779 = vmatpush1.bf16.msra.mxu1 %v8271_v49  ;;  %4948 = vmatprep.subr.bf16.mxu0 %v8276_v50  ;;  %v8361_v49 = vld [vmem:[%s11529_s1 + $0x1664] ss:$8 sps:$4 sm:$0xff]   ;;  %v8356_v50 = vld [vmem:[%s11529_s1 + $0x1260] ss:$8 sps:$4 sm:$0xff]  }
 0x265   :  { %5780 = vmatprep.subr.bf16.mxu1 %v8279_v42  ;;  %v8359_v42 = vld [vmem:[%s11529_s1 + $0x1660] ss:$8 sps:$4 sm:$0xff]  }
 0x267   :  { %4949 = vmatpush1.bf16.msra.mxu0 %v8274_v43  ;;  %v8364_v43 = vld [vmem:[%s11529_s1 + $0x1274] ss:$8 sps:$4 sm:$0xff]  }
 0x268   :  { %5781 = vmatpush1.bf16.msra.mxu1 %v8277_v51  ;;  %4950 = vmatprep.subr.bf16.mxu0 %v8282_v52  ;;  %v8367_v51 = vld [vmem:[%s11529_s1 + $0x1674] ss:$8 sps:$4 sm:$0xff]   ;;  %v8362_v52 = vld [vmem:[%s11529_s1 + $0x1270] ss:$8 sps:$4 sm:$0xff]  }
 0x269   :  { %5782 = vmatprep.subr.bf16.mxu1 %v8285_v53  ;;  %v8365_v53 = vld [vmem:[%s11529_s1 + $0x1670] ss:$8 sps:$4 sm:$0xff]  }
 0x26b   :  { %4951 = vmatpush1.bf16.msra.mxu0 %v8280_v54  ;;  %v8370_v54 = vld [vmem:[%s11529_s1 + $0x1284] ss:$8 sps:$4 sm:$0xff]  }
 0x26c   :  { %5783 = vmatpush1.bf16.msra.mxu1 %v8283_v55  ;;  %4952 = vmatprep.subr.bf16.mxu0 %v8288_v56  ;;  %v8373_v55 = vld [vmem:[%s11529_s1 + $0x1684] ss:$8 sps:$4 sm:$0xff]   ;;  %v8368_v56 = vld [vmem:[%s11529_s1 + $0x1280] ss:$8 sps:$4 sm:$0xff]  }
 0x26d   :  { %5784 = vmatprep.subr.bf16.mxu1 %v8291_v57  ;;  %v8371_v57 = vld [vmem:[%s11529_s1 + $0x1680] ss:$8 sps:$4 sm:$0xff]  }
 0x26f   :  { %4953 = vmatpush1.bf16.msra.mxu0 %v8286_v58  ;;  %v8376_v58 = vld [vmem:[%s11529_s1 + $0x1294] ss:$8 sps:$4 sm:$0xff]  }
 0x270   :  { %5785 = vmatpush1.bf16.msra.mxu1 %v8289_v59  ;;  %4954 = vmatprep.subr.bf16.mxu0 %v8294_v62  ;;  %v8379_v59 = vld [vmem:[%s11529_s1 + $0x1694] ss:$8 sps:$4 sm:$0xff]   ;;  %v8374_v62 = vld [vmem:[%s11529_s1 + $0x1290] ss:$8 sps:$4 sm:$0xff]  }
 0x271   :  { %5786 = vmatprep.subr.bf16.mxu1 %v8297_v44  ;;  %v8377_v44 = vld [vmem:[%s11529_s1 + $0x1690] ss:$8 sps:$4 sm:$0xff]  }
 0x273   :  { %4955 = vmatpush1.bf16.msra.mxu0 %v8292_v45  ;;  %v8382_v45 = vld [vmem:[%s11529_s1 + $0x12a4] ss:$8 sps:$4 sm:$0xff]  }
 0x274   :  { %5787 = vmatpush1.bf16.msra.mxu1 %v8295_v63  ;;  %4956 = vmatprep.subr.bf16.mxu0 %v8300_v0  ;;  %v8385_v63 = vld [vmem:[%s11529_s1 + $0x16a4] ss:$8 sps:$4 sm:$0xff]   ;;  %v8380_v0 = vld [vmem:[%s11529_s1 + $0x12a0] ss:$8 sps:$4 sm:$0xff]  }
 0x275   :  { %5788 = vmatprep.subr.bf16.mxu1 %v8303_v1  ;;  %v8383_v1 = vld [vmem:[%s11529_s1 + $0x16a0] ss:$8 sps:$4 sm:$0xff]  }
 0x277   :  { %4957 = vmatpush1.bf16.msra.mxu0 %v8298_v2  ;;  %v8388_v2 = vld [vmem:[%s11529_s1 + $0x12b4] ss:$8 sps:$4 sm:$0xff]  }
 0x278   :  { %5789 = vmatpush1.bf16.msra.mxu1 %v8301_v3  ;;  %4958 = vmatprep.subr.bf16.mxu0 %v8306_v4  ;;  %v8391_v3 = vld [vmem:[%s11529_s1 + $0x16b4] ss:$8 sps:$4 sm:$0xff]   ;;  %v8386_v4 = vld [vmem:[%s11529_s1 + $0x12b0] ss:$8 sps:$4 sm:$0xff]  }
 0x279   :  { %5790 = vmatprep.subr.bf16.mxu1 %v8309_v5  ;;  %v8389_v5 = vld [vmem:[%s11529_s1 + $0x16b0] ss:$8 sps:$4 sm:$0xff]  }
 0x27b   :  { %4959 = vmatpush1.bf16.msra.mxu0 %v8304_v12  ;;  %v8394_v12 = vld [vmem:[%s11529_s1 + $0x12c4] ss:$8 sps:$4 sm:$0xff]  }
 0x27c   :  { %5791 = vmatpush1.bf16.msra.mxu1 %v8307_v60  ;;  %4960 = vmatprep.subr.bf16.mxu0 %v8312_v61  ;;  %v8397_v60 = vld [vmem:[%s11529_s1 + $0x16c4] ss:$8 sps:$4 sm:$0xff]   ;;  %v8392_v61 = vld [vmem:[%s11529_s1 + $0x12c0] ss:$8 sps:$4 sm:$0xff]  }
 0x27d   :  { %5792 = vmatprep.subr.bf16.mxu1 %v8315_v13  ;;  %v8395_v13 = vld [vmem:[%s11529_s1 + $0x16c0] ss:$8 sps:$4 sm:$0xff]  }
 0x27f   :  { %4961 = vmatpush1.bf16.msra.mxu0 %v8310_v14  ;;  %v8400_v14 = vld [vmem:[%s11529_s1 + $0x12d4] ss:$8 sps:$4 sm:$0xff]  }
 0x280   :  { %5793 = vmatpush1.bf16.msra.mxu1 %v8313_v15  ;;  %4971 = vmatprep.subr.bf16.mxu0 %v8320_v16  ;;  %v8403_v15 = vld [vmem:[%s11529_s1 + $0x16d4] ss:$8 sps:$4 sm:$0xff]   ;;  %v8398_v16 = vld [vmem:[%s11529_s1 + $0x12d0] ss:$8 sps:$4 sm:$0xff]  }
 0x281   :  { %5803 = vmatprep.subr.bf16.mxu1 %v8325_v17  ;;  %v8401_v17 = vld [vmem:[%s11529_s1 + $0x16d0] ss:$8 sps:$4 sm:$0xff]  }
 0x282   :  { %4963 = vmatmul.mubr.bf16.vlgmr.msra.gmra.mrb[8].mxu0 %v6834_v19  ;;  %v8406_v19 = vld [vmem:[%s11529_s1 + $0x12e4] ss:$8 sps:$4 sm:$0xff]  }
 0x283   :  { %5795 = vmatmul.mubr.bf16.vlgmr.msra.gmra.mrb[8].mxu1 %v6970_v21  ;;  %4972 = vmatpush1.bf16.msra.mxu0 %v8318_v26  ;;  %v8409_v21 = vld [vmem:[%s11529_s1 + $0x16e4] ss:$8 sps:$4 sm:$0xff]   ;;  %v8404_v26 = vld [vmem:[%s11529_s1 + $0x12e0] ss:$8 sps:$4 sm:$0xff]  }
 0x284   :  { %5804 = vmatpush1.bf16.msra.mxu1 %v8323_v6  ;;  %4973 = vmatprep.subr.bf16.mxu0 %v8328_v7  ;;  %v8407_v6 = vld [vmem:[%s11529_s1 + $0x16e0] ss:$8 sps:$4 sm:$0xff]   ;;  %v8412_v7 = vld [vmem:[%s11529_s1 + $0x12f4] ss:$8 sps:$4 sm:$0xff]  }
 0x285   :  { %5805 = vmatprep.subr.bf16.mxu1 %v8331_v18  ;;  %5003 = vmatprep.mubr.bf16.mxu0 %v6837_v27  ;;  %v8415_v18 = vld [vmem:[%s11529_s1 + $0x16f4] ss:$8 sps:$4 sm:$0xff]   ;;  %v8410_v27 = vld [vmem:[%s11529_s1 + $0x12f0] ss:$8 sps:$4 sm:$0xff]  }
 0x286   :  { %5835 = vmatprep.mubr.bf16.mxu1 %v6973_v28  ;;  %v8413_v28 = vld [vmem:[%s11529_s1 + $0x16f0] ss:$8 sps:$4 sm:$0xff]  }
 0x287   :  { %4974 = vmatpush1.bf16.msra.mxu0 %v8326_v30  ;;  %v8420_v30 = vld [vmem:[%s11529_s1 + $0x1304] ss:$8 sps:$4 sm:$0xff]  }
 0x288   :  { %5806 = vmatpush1.bf16.msra.mxu1 %v8329_v31  ;;  %4975 = vmatprep.subr.bf16.mxu0 %v8334_v24  ;;  %v8425_v31 = vld [vmem:[%s11529_s1 + $0x1704] ss:$8 sps:$4 sm:$0xff]   ;;  %v6836_v24 = vcombine.low %v10708_v22, %v10708_v22  ;;  %v8423_v22 = vld [vmem:[%s11529_s1 + $0x1700] ss:$8 sps:$4 sm:$0xff]  }
 0x289   :  { %5807 = vmatprep.subr.bf16.mxu1 %v8337_v25  ;;  %v6972_v25 = vcombine.low %v10713_v23, %v10713_v23  ;;  %v8428_v23 = vld [vmem:[%s11529_s1 + $0x1314] ss:$8 sps:$4 sm:$0xff]  }
 0x28b   :  { %4976 = vmatpush1.bf16.msra.mxu0 %v8332_v34  ;;  %v10918_v34 = vld [vmem:[%s11530_s0 + $0x98] sm:$0xff] }
 0x28c   :  { %5808 = vmatpush1.bf16.msra.mxu1 %v8335_v35  ;;  %4977 = vmatprep.subr.bf16.mxu0 %v8340_v36  ;;  %v10923_v35 = vld [vmem:[%s11530_s0 + $0xb8] sm:$0xff]  ;;  %v8418_v36 = vld [vmem:[%s11529_s1 + $0x1300] ss:$8 sps:$4 sm:$0xff]  }
 0x28d   :  { %5809 = vmatprep.subr.bf16.mxu1 %v8343_v37  ;;  %v8431_v37 = vld [vmem:[%s11529_s1 + $0x1714] ss:$8 sps:$4 sm:$0xff]  }
 0x28f   :  { %4978 = vmatpush1.bf16.msra.mxu0 %v8338_v38  ;;  %v6839_v38 = vcombine.high %v10918_v34, %v10918_v34 }
 0x290   :  { %5810 = vmatpush1.bf16.msra.mxu1 %v8341_v20  ;;  %4979 = vmatprep.subr.bf16.mxu0 %v8346_v29  ;;  %v6975_v20 = vcombine.high %v10923_v35, %v10923_v35  ;;  %v8426_v29 = vld [vmem:[%s11529_s1 + $0x1310] ss:$8 sps:$4 sm:$0xff]  }
 0x291   :  { %5811 = vmatprep.subr.bf16.mxu1 %v8349_v39  ;;  %v8429_v39 = vld [vmem:[%s11529_s1 + $0x1710] ss:$8 sps:$4 sm:$0xff]  }
 0x293   :  { %4980 = vmatpush1.bf16.msra.mxu0 %v8344_v40  ;;  %v8434_v40 = vld [vmem:[%s11529_s1 + $0x1324] ss:$8 sps:$4 sm:$0xff]  }
 0x294   :  { %5812 = vmatpush1.bf16.msra.mxu1 %v8347_v41  ;;  %4981 = vmatprep.subr.bf16.mxu0 %v8352_v32  ;;  %v8437_v41 = vld [vmem:[%s11529_s1 + $0x1724] ss:$8 sps:$4 sm:$0xff]   ;;  %v8432_v32 = vld [vmem:[%s11529_s1 + $0x1320] ss:$8 sps:$4 sm:$0xff]  }
 0x295   :  { %5813 = vmatprep.subr.bf16.mxu1 %v8355_v33  ;;  %v8435_v33 = vld [vmem:[%s11529_s1 + $0x1720] ss:$8 sps:$4 sm:$0xff]  }
 0x297   :  { %4982 = vmatpush1.bf16.msra.mxu0 %v8350_v46  ;;  %v8440_v46 = vld [vmem:[%s11529_s1 + $0x1334] ss:$8 sps:$4 sm:$0xff]  }
 0x298   :  { %5814 = vmatpush1.bf16.msra.mxu1 %v8353_v47  ;;  %4983 = vmatprep.subr.bf16.mxu0 %v8358_v48  ;;  %v8443_v47 = vld [vmem:[%s11529_s1 + $0x1734] ss:$8 sps:$4 sm:$0xff]   ;;  %v8438_v48 = vld [vmem:[%s11529_s1 + $0x1330] ss:$8 sps:$4 sm:$0xff]  }
 0x299   :  { %5815 = vmatprep.subr.bf16.mxu1 %v8361_v49  ;;  %v8441_v49 = vld [vmem:[%s11529_s1 + $0x1730] ss:$8 sps:$4 sm:$0xff]  }
 0x29b   :  { %4984 = vmatpush1.bf16.msra.mxu0 %v8356_v50  ;;  %v8446_v50 = vld [vmem:[%s11529_s1 + $0x1344] ss:$8 sps:$4 sm:$0xff]  }
 0x29c   :  { %5816 = vmatpush1.bf16.msra.mxu1 %v8359_v42  ;;  %4985 = vmatprep.subr.bf16.mxu0 %v8364_v43  ;;  %v8449_v42 = vld [vmem:[%s11529_s1 + $0x1744] ss:$8 sps:$4 sm:$0xff]   ;;  %v8444_v43 = vld [vmem:[%s11529_s1 + $0x1340] ss:$8 sps:$4 sm:$0xff]  }
 0x29d   :  { %5817 = vmatprep.subr.bf16.mxu1 %v8367_v51  ;;  %v8447_v51 = vld [vmem:[%s11529_s1 + $0x1740] ss:$8 sps:$4 sm:$0xff]  }
 0x29f   :  { %4986 = vmatpush1.bf16.msra.mxu0 %v8362_v52  ;;  %v8452_v52 = vld [vmem:[%s11529_s1 + $0x1354] ss:$8 sps:$4 sm:$0xff]  }
 0x2a0   :  { %5818 = vmatpush1.bf16.msra.mxu1 %v8365_v53  ;;  %4987 = vmatprep.subr.bf16.mxu0 %v8370_v54  ;;  %v8455_v53 = vld [vmem:[%s11529_s1 + $0x1754] ss:$8 sps:$4 sm:$0xff]   ;;  %v8450_v54 = vld [vmem:[%s11529_s1 + $0x1350] ss:$8 sps:$4 sm:$0xff]  }
 0x2a1   :  { %5819 = vmatprep.subr.bf16.mxu1 %v8373_v55  ;;  %v8453_v55 = vld [vmem:[%s11529_s1 + $0x1750] ss:$8 sps:$4 sm:$0xff]  }
 0x2a3   :  { %4988 = vmatpush1.bf16.msra.mxu0 %v8368_v56  ;;  %v8458_v56 = vld [vmem:[%s11529_s1 + $0x1364] ss:$8 sps:$4 sm:$0xff]  }
 0x2a4   :  { %5820 = vmatpush1.bf16.msra.mxu1 %v8371_v57  ;;  %4989 = vmatprep.subr.bf16.mxu0 %v8376_v58  ;;  %v8461_v57 = vld [vmem:[%s11529_s1 + $0x1764] ss:$8 sps:$4 sm:$0xff]  }
 0x2a5   :  { %5821 = vmatprep.subr.bf16.mxu1 %v8379_v59 }
 0x2a7   :  { %4990 = vmatpush1.bf16.msra.mxu0 %v8374_v62 }
 0x2a8   :  { %5822 = vmatpush1.bf16.msra.mxu1 %v8377_v44  ;;  %4991 = vmatprep.subr.bf16.mxu0 %v8382_v45 }
 0x2a9   :  { %5823 = vmatprep.subr.bf16.mxu1 %v8385_v63 }
 0x2ab   :  { %4992 = vmatpush1.bf16.msra.mxu0 %v8380_v0  ;;  %v8456_v0 = vld [vmem:[%s11529_s1 + $0x1360] ss:$8 sps:$4 sm:$0xff]  }
 0x2ac   :  { %5824 = vmatpush1.bf16.msra.mxu1 %v8383_v1  ;;  %4993 = vmatprep.subr.bf16.mxu0 %v8388_v2  ;;  %v8459_v1 = vld [vmem:[%s11529_s1 + $0x1760] ss:$8 sps:$4 sm:$0xff]  }
 0x2ad   :  { %5825 = vmatprep.subr.bf16.mxu1 %v8391_v3 }
 0x2af   :  { %4994 = vmatpush1.bf16.msra.mxu0 %v8386_v4  ;;  %v8464_v4 = vld [vmem:[%s11529_s1 + $0x1374] ss:$8 sps:$4 sm:$0xff]  }
 0x2b0   :  { %5826 = vmatpush1.bf16.msra.mxu1 %v8389_v5  ;;  %4995 = vmatprep.subr.bf16.mxu0 %v8394_v12  ;;  %v8467_v5 = vld [vmem:[%s11529_s1 + $0x1774] ss:$8 sps:$4 sm:$0xff]   ;;  %v8462_v12 = vld [vmem:[%s11529_s1 + $0x1370] ss:$8 sps:$4 sm:$0xff]  }
 0x2b1   :  { %5827 = vmatprep.subr.bf16.mxu1 %v8397_v60  ;;  %v8465_v60 = vld [vmem:[%s11529_s1 + $0x1770] ss:$8 sps:$4 sm:$0xff]  }
 0x2b3   :  { %4996 = vmatpush1.bf16.msra.mxu0 %v8392_v61  ;;  %v8470_v61 = vld [vmem:[%s11529_s1 + $0x1384] ss:$8 sps:$4 sm:$0xff]  }
 0x2b4   :  { %5828 = vmatpush1.bf16.msra.mxu1 %v8395_v13  ;;  %4997 = vmatprep.subr.bf16.mxu0 %v8400_v14  ;;  %v8473_v13 = vld [vmem:[%s11529_s1 + $0x1784] ss:$8 sps:$4 sm:$0xff]   ;;  %v8468_v14 = vld [vmem:[%s11529_s1 + $0x1380] ss:$8 sps:$4 sm:$0xff]  }
 0x2b5   :  { %5829 = vmatprep.subr.bf16.mxu1 %v8403_v15  ;;  %v8471_v15 = vld [vmem:[%s11529_s1 + $0x1780] ss:$8 sps:$4 sm:$0xff]  }
 0x2b7   :  { %4998 = vmatpush1.bf16.msra.mxu0 %v8398_v16  ;;  %v8476_v16 = vld [vmem:[%s11529_s1 + $0x1394] ss:$8 sps:$4 sm:$0xff]  }
 0x2b8   :  { %5830 = vmatpush1.bf16.msra.mxu1 %v8401_v17  ;;  %4999 = vmatprep.subr.bf16.mxu0 %v8406_v19  ;;  %v8479_v17 = vld [vmem:[%s11529_s1 + $0x1794] ss:$8 sps:$4 sm:$0xff]   ;;  %v8474_v19 = vld [vmem:[%s11529_s1 + $0x1390] ss:$8 sps:$4 sm:$0xff]  }
 0x2b9   :  { %5831 = vmatprep.subr.bf16.mxu1 %v8409_v21  ;;  %v8477_v21 = vld [vmem:[%s11529_s1 + $0x1790] ss:$8 sps:$4 sm:$0xff]  }
 0x2bb   :  { %5000 = vmatpush1.bf16.msra.mxu0 %v8404_v26  ;;  %v8482_v26 = vld [vmem:[%s11529_s1 + $0x13a4] ss:$8 sps:$4 sm:$0xff]  }
 0x2bc   :  { %5832 = vmatpush1.bf16.msra.mxu1 %v8407_v6  ;;  %5001 = vmatprep.subr.bf16.mxu0 %v8412_v7  ;;  %v8485_v6 = vld [vmem:[%s11529_s1 + $0x17a4] ss:$8 sps:$4 sm:$0xff]   ;;  %v8480_v7 = vld [vmem:[%s11529_s1 + $0x13a0] ss:$8 sps:$4 sm:$0xff]  }
 0x2bd   :  { %5833 = vmatprep.subr.bf16.mxu1 %v8415_v18  ;;  %v8483_v18 = vld [vmem:[%s11529_s1 + $0x17a0] ss:$8 sps:$4 sm:$0xff]  }
 0x2bf   :  { %5002 = vmatpush1.bf16.msra.mxu0 %v8410_v27  ;;  %v8488_v27 = vld [vmem:[%s11529_s1 + $0x13b4] ss:$8 sps:$4 sm:$0xff]  }
 0x2c0   :  { %5834 = vmatpush1.bf16.msra.mxu1 %v8413_v28  ;;  %5012 = vmatprep.subr.bf16.mxu0 %v8420_v30  ;;  %v8491_v28 = vld [vmem:[%s11529_s1 + $0x17b4] ss:$8 sps:$4 sm:$0xff]   ;;  %v8486_v30 = vld [vmem:[%s11529_s1 + $0x13b0] ss:$8 sps:$4 sm:$0xff]  }
 0x2c1   :  { %5844 = vmatprep.subr.bf16.mxu1 %v8425_v31  ;;  %v8489_v31 = vld [vmem:[%s11529_s1 + $0x17b0] ss:$8 sps:$4 sm:$0xff]  }
 0x2c2   :  { %5004 = vmatmul.mubr.bf16.vlgmr.msra.gmra.mrb[8].mxu0 %v6836_v24  ;;  %v8494_v24 = vld [vmem:[%s11529_s1 + $0x13c4] ss:$8 sps:$4 sm:$0xff]  }
 0x2c3   :  { %5836 = vmatmul.mubr.bf16.vlgmr.msra.gmra.mrb[8].mxu1 %v6972_v25  ;;  %5013 = vmatpush1.bf16.msra.mxu0 %v8418_v36  ;;  %v8497_v25 = vld [vmem:[%s11529_s1 + $0x17c4] ss:$8 sps:$4 sm:$0xff]   ;;  %v8492_v36 = vld [vmem:[%s11529_s1 + $0x13c0] ss:$8 sps:$4 sm:$0xff]  }
 0x2c4   :  { %5845 = vmatpush1.bf16.msra.mxu1 %v8423_v22  ;;  %5014 = vmatprep.subr.bf16.mxu0 %v8428_v23  ;;  %v8495_v22 = vld [vmem:[%s11529_s1 + $0x17c0] ss:$8 sps:$4 sm:$0xff]   ;;  %v8500_v23 = vld [vmem:[%s11529_s1 + $0x13d4] ss:$8 sps:$4 sm:$0xff]  }
 0x2c5   :  { %5846 = vmatprep.subr.bf16.mxu1 %v8431_v37  ;;  %5044 = vmatprep.mubr.bf16.mxu0 %v6839_v38  ;;  %v8503_v37 = vld [vmem:[%s11529_s1 + $0x17d4] ss:$8 sps:$4 sm:$0xff]   ;;  %v833_v38 = vlaneseq }
 0x2c6   :  { %5876 = vmatprep.mubr.bf16.mxu1 %v6975_v20  ;;  %v8498_v20 = vld [vmem:[%s11529_s1 + $0x13d0] ss:$8 sps:$4 sm:$0xff]  }
 0x2c7   :  { %5015 = vmatpush1.bf16.msra.mxu0 %v8426_v29  ;;  %v8501_v29 = vld [vmem:[%s11529_s1 + $0x17d0] ss:$8 sps:$4 sm:$0xff]  }
 0x2c8   :  { %5847 = vmatpush1.bf16.msra.mxu1 %v8429_v39  ;;  %5016 = vmatprep.subr.bf16.mxu0 %v8434_v40  ;;  %v8506_v39 = vld [vmem:[%s11529_s1 + $0x13e4] ss:$8 sps:$4 sm:$0xff]  }
 0x2c9   :  { %5848 = vmatprep.subr.bf16.mxu1 %v8437_v41  ;;  %v8509_v40 = vld [vmem:[%s11529_s1 + $0x17e4] ss:$8 sps:$4 sm:$0xff]   ;;  %v11105_v41 = vshrl.u32 %v833_v38, 7 }
 0x2ca   :  { %v5909_v38 = vld [vmem:[%s11531_s3 + $0xc0] sm:$0xff] }
 0x2cb   :  { %5017 = vmatpush1.bf16.msra.mxu0 %v8432_v32  ;;  %v8504_v32 = vld [vmem:[%s11529_s1 + $0x13e0] ss:$8 sps:$4 sm:$0xff]  }
 0x2cc   :  { %5849 = vmatpush1.bf16.msra.mxu1 %v8435_v33  ;;  %5018 = vmatprep.subr.bf16.mxu0 %v8440_v46  ;;  %v8507_v33 = vld [vmem:[%s11529_s1 + $0x17e0] ss:$8 sps:$4 sm:$0xff]   ;;  %v8512_v46 = vld [vmem:[%s11529_s1 + $0x13f4] ss:$8 sps:$4 sm:$0xff]  }
 0x2cd   :  { %5850 = vmatprep.subr.bf16.mxu1 %v8443_v47  ;;  %v8515_v47 = vld [vmem:[%s11529_s1 + $0x17f4] ss:$8 sps:$4 sm:$0xff]  }
 0x2cf   :  { %5019 = vmatpush1.bf16.msra.mxu0 %v8438_v48  ;;  %v11120_v48 = vsub.s32 1, %v11105_v41 }
 0x2d0   :  { %5851 = vmatpush1.bf16.msra.mxu1 %v8441_v49  ;;  %5020 = vmatprep.subr.bf16.mxu0 %v8446_v50  ;;  %v5886_v49 = vld [vmem:[%s11531_s3 + $0x8] sm:$0xff]  ;;  %v5888_v50 = vld [vmem:[%s11531_s3 + $0x18] sm:$0xff] }
 0x2d1   :  { %5852 = vmatprep.subr.bf16.mxu1 %v8449_v42  ;;  %v11131_v42 = vld [vmem:[%s11532_s2] sm:$0x3] }
 0x2d3   :  { %5021 = vmatpush1.bf16.msra.mxu0 %v8444_v43  ;;  %v8510_v43 = vld [vmem:[%s11529_s1 + $0x13f0] ss:$8 sps:$4 sm:$0xff]  }
 0x2d4   :  { %5853 = vmatpush1.bf16.msra.mxu1 %v8447_v51  ;;  %5022 = vmatprep.subr.bf16.mxu0 %v8452_v52  ;;  %v8513_v51 = vld [vmem:[%s11529_s1 + $0x17f0] ss:$8 sps:$4 sm:$0xff]   ;;  %v7140_v52 = vpack.c.bf16 %v5888_v50, %v5886_v49 }
 0x2d5   :  { %5854 = vmatprep.subr.bf16.mxu1 %v8455_v53  ;;  %v11001_v58 = vpop.f32.mrb[4].mxu0  ;;  %v5885_v53 = vld [vmem:[%s11531_s3] sm:$0xff]  ;;  %v5920_v49 = vld [vmem:[%s11531_s3 + $0x118] sm:$0xff] }
 0x2d6   :  { %v11003_v59 = vpop.f32.mrb[4].mxu1  ;;  %v11005_v62 = vpop.f32.mrb[5].mxu0 }
 0x2d7   :  { %v11007_v44 = vpop.f32.mrb[5].mxu1  ;;  %v3386_v45 = vpop.f32.mrb[6].mxu0  ;;  %5023 = vmatpush1.bf16.msra.mxu0 %v8450_v54  ;;  %v5887_v54 = vld [vmem:[%s11531_s3 + $0x10] sm:$0xff] }
 0x2d8   :  { %v4218_v63 = vpop.f32.mrb[6].mxu1  ;;  %5855 = vmatpush1.bf16.msra.mxu1 %v8453_v55  ;;  %v3387_v2 = vpop.f32.mrb[7].mxu0  ;;  %5024 = vmatprep.subr.bf16.mxu0 %v8458_v56  ;;  %v840_v55 = vrot.slane %v11131_v42, %v11120_v48  ;;  %v5890_v56 = vld [vmem:[%s11531_s3 + $0x28] sm:$0xff]  ;;  %v6838_v45 = vcombine.low %v10918_v34, %v10918_v34 }
 0x2d9   :  { %v4219_v3 = vpop.f32.mrb[7].mxu1  ;;  %5856 = vmatprep.subr.bf16.mxu1 %v8461_v57  ;;  %v5892_v57 = vld [vmem:[%s11531_s3 + $0x38] sm:$0xff]  ;;  %v6974_v63 = vcombine.low %v10923_v35, %v10923_v35  ;;  %v5889_v2 = vld [vmem:[%s11531_s3 + $0x20] sm:$0xff]  ;;  %v5894_v34 = vld [vmem:[%s11531_s3 + $0x48] sm:$0xff] }
 0x2da   :  { %v5891_v3 = vld [vmem:[%s11531_s3 + $0x30] sm:$0xff]  ;;  %v5896_v35 = vld [vmem:[%s11531_s3 + $0x58] sm:$0xff] }
 0x2db   :  { %5025 = vmatpush1.bf16.msra.mxu0 %v8456_v0  ;;  %v7142_v0 = vpack.c.bf16 %v5887_v54, %v5885_v53  ;;  %v5922_v53 = vld [vmem:[%s11531_s3 + $0x128] sm:$0xff]  ;;  %v5924_v54 = vld [vmem:[%s11531_s3 + $0x138] sm:$0xff] }
 0x2dc   :  { %5857 = vmatpush1.bf16.msra.mxu1 %v8459_v1  ;;  %5026 = vmatprep.subr.bf16.mxu0 %v8464_v4  ;;  %v7144_v1 = vpack.c.bf16 %v5892_v57, %v5890_v56  ;;  %v11164_v4 = vadd.f32 %v10157_v10, %v840_v55  ;;  %v5893_v10 = vld [vmem:[%s11531_s3 + $0x40] sm:$0xff]  ;;  %v7176_v56 = vpack.c.bf16 %v5924_v54, %v5922_v53 }
 0x2dd   :  { %5858 = vmatprep.subr.bf16.mxu1 %v8467_v5  ;;  %v7146_v5 = vpack.c.bf16 %v5891_v3, %v5889_v2  ;;  %v5921_v57 = vld [vmem:[%s11531_s3 + $0x120] sm:$0xff] }
 0x2de   :  { %v5925_v3 = vld [vmem:[%s11531_s3 + $0x140] sm:$0xff] }
 0x2df   :  { %5027 = vmatpush1.bf16.msra.mxu0 %v8462_v12  ;;  %v7148_v12 = vpack.c.bf16 %v5896_v35, %v5894_v34  ;;  %v5927_v34 = vld [vmem:[%s11531_s3 + $0x150] sm:$0xff]  ;;  %v5930_v35 = vld [vmem:[%s11531_s3 + $0x168] sm:$0xff] }
 0x2e0   :  { %5859 = vmatpush1.bf16.msra.mxu1 %v8465_v60  ;;  %5028 = vmatprep.subr.bf16.mxu0 %v8470_v61  ;;  %v5895_v60 = vld [vmem:[%s11531_s3 + $0x50] sm:$0xff]  ;;  %v5898_v61 = vld [vmem:[%s11531_s3 + $0x68] sm:$0xff] }
 0x2e1   :  { %5860 = vmatprep.subr.bf16.mxu1 %v8473_v13  ;;  %v5900_v13 = vld [vmem:[%s11531_s3 + $0x78] sm:$0xff] }
 0x2e3   :  { %5029 = vmatpush1.bf16.msra.mxu0 %v8468_v14  ;;  %v7150_v14 = vpack.c.bf16 %v5895_v60, %v5893_v10  ;;  %v5929_v60 = vld [vmem:[%s11531_s3 + $0x160] sm:$0xff] }
 0x2e4   :  { %5861 = vmatpush1.bf16.msra.mxu1 %v8471_v15  ;;  %5030 = vmatprep.subr.bf16.mxu0 %v8476_v16  ;;  %v7152_v15 = vpack.c.bf16 %v5900_v13, %v5898_v61  ;;  %v5897_v16 = vld [vmem:[%s11531_s3 + $0x60] sm:$0xff]  ;;  %v5931_v61 = vld [vmem:[%s11531_s3 + $0x170] sm:$0xff]  ;;  %v5934_v13 = vld [vmem:[%s11531_s3 + $0x188] sm:$0xff] }
 0x2e5   :  { %5862 = vmatprep.subr.bf16.mxu1 %v8479_v17  ;;  %v5899_v17 = vld [vmem:[%s11531_s3 + $0x70] sm:$0xff] }
 0x2e7   :  { %5031 = vmatpush1.bf16.msra.mxu0 %v8474_v19  ;;  %v5902_v19 = vld [vmem:[%s11531_s3 + $0x88] sm:$0xff] }
 0x2e8   :  { %5863 = vmatpush1.bf16.msra.mxu1 %v8477_v21  ;;  %5032 = vmatprep.subr.bf16.mxu0 %v8482_v26  ;;  %v5904_v21 = vld [vmem:[%s11531_s3 + $0x98] sm:$0xff]  ;;  %v7154_v26 = vpack.c.bf16 %v5899_v17, %v5897_v16  ;;  %v5933_v17 = vld [vmem:[%s11531_s3 + $0x180] sm:$0xff] }
 0x2e9   :  { %5864 = vmatprep.subr.bf16.mxu1 %v8485_v6  ;;  %v7156_v6 = vpack.c.bf16 %v5904_v21, %v5902_v19  ;;  %v5935_v19 = vld [vmem:[%s11531_s3 + $0x190] sm:$0xff]  ;;  %v5938_v21 = vld [vmem:[%s11531_s3 + $0x1a8] sm:$0xff] }
 0x2eb   :  { %5033 = vmatpush1.bf16.msra.mxu0 %v8480_v7  ;;  %v5901_v7 = vld [vmem:[%s11531_s3 + $0x80] sm:$0xff] }
 0x2ec   :  { %5865 = vmatpush1.bf16.msra.mxu1 %v8483_v18  ;;  %5034 = vmatprep.subr.bf16.mxu0 %v8488_v27  ;;  %v5903_v18 = vld [vmem:[%s11531_s3 + $0x90] sm:$0xff]  ;;  %v5906_v27 = vld [vmem:[%s11531_s3 + $0xa8] sm:$0xff] }
 0x2ed   :  { %5866 = vmatprep.subr.bf16.mxu1 %v8491_v28  ;;  %v5908_v28 = vld [vmem:[%s11531_s3 + $0xb8] sm:$0xff] }
 0x2ef   :  { %5035 = vmatpush1.bf16.msra.mxu0 %v8486_v30  ;;  %v7158_v30 = vpack.c.bf16 %v5903_v18, %v5901_v7  ;;  %v5937_v18 = vld [vmem:[%s11531_s3 + $0x1a0] sm:$0xff] }
 0x2f0   :  { %5867 = vmatpush1.bf16.msra.mxu1 %v8489_v31  ;;  %5036 = vmatprep.subr.bf16.mxu0 %v8494_v24  ;;  %v7160_v31 = vpack.c.bf16 %v5908_v28, %v5906_v27  ;;  %v5905_v24 = vld [vmem:[%s11531_s3 + $0xa0] sm:$0xff]  ;;  %v5939_v27 = vld [vmem:[%s11531_s3 + $0x1b0] sm:$0xff]  ;;  %v5942_v28 = vld [vmem:[%s11531_s3 + $0x1c8] sm:$0xff] }
 0x2f1   :  { %5868 = vmatprep.subr.bf16.mxu1 %v8497_v25  ;;  %v5907_v25 = vld [vmem:[%s11531_s3 + $0xb0] sm:$0xff] }
 0x2f3   :  { %5037 = vmatpush1.bf16.msra.mxu0 %v8492_v36  ;;  %v5910_v36 = vld [vmem:[%s11531_s3 + $0xc8] sm:$0xff] }
 0x2f4   :  { %5869 = vmatpush1.bf16.msra.mxu1 %v8495_v22  ;;  %5038 = vmatprep.subr.bf16.mxu0 %v8500_v23  ;;  %v5912_v22 = vld [vmem:[%s11531_s3 + $0xd8] sm:$0xff]  ;;  %v7162_v23 = vpack.c.bf16 %v5907_v25, %v5905_v24  ;;  %v5941_v25 = vld [vmem:[%s11531_s3 + $0x1c0] sm:$0xff] }
 0x2f5   :  { %5870 = vmatprep.subr.bf16.mxu1 %v8503_v37  ;;  %v7164_v37 = vpack.c.bf16 %v5912_v22, %v5910_v36  ;;  %v5943_v36 = vld [vmem:[%s11531_s3 + $0x1d0] sm:$0xff]  ;;  %v5946_v22 = vld [vmem:[%s11531_s3 + $0x1e8] sm:$0xff] }
 0x2f7   :  { %5039 = vmatpush1.bf16.msra.mxu0 %v8498_v20  ;;  %v5911_v20 = vld [vmem:[%s11531_s3 + $0xd0] sm:$0xff] }
 0x2f8   :  { %5871 = vmatpush1.bf16.msra.mxu1 %v8501_v29  ;;  %5040 = vmatprep.subr.bf16.mxu0 %v8506_v39  ;;  %v5914_v29 = vld [vmem:[%s11531_s3 + $0xe8] sm:$0xff]  ;;  %v5916_v39 = vld [vmem:[%s11531_s3 + $0xf8] sm:$0xff] }
 0x2f9   :  { %5872 = vmatprep.subr.bf16.mxu1 %v8509_v40  ;;  %v7166_v40 = vpack.c.bf16 %v5911_v20, %v5909_v38  ;;  %v11330_v38 = vsub.s32 0, %v11105_v41 }
 0x2fb   :  { %5041 = vmatpush1.bf16.msra.mxu0 %v8504_v32  ;;  %v7168_v32 = vpack.c.bf16 %v5916_v39, %v5914_v29  ;;  %v5945_v29 = vld [vmem:[%s11531_s3 + $0x1e0] sm:$0xff]  ;;  %v5947_v39 = vld [vmem:[%s11531_s3 + $0x1f0] sm:$0xff]  ;;  %v836_v41 = vrot.slane %v11131_v42, %v11330_v38 }
 0x2fc   :  { %5873 = vmatpush1.bf16.msra.mxu1 %v8507_v33  ;;  %5042 = vmatprep.subr.bf16.mxu0 %v8512_v46  ;;  %v5913_v33 = vld [vmem:[%s11531_s3 + $0xe0] sm:$0xff]  ;;  %v5915_v46 = vld [vmem:[%s11531_s3 + $0xf0] sm:$0xff] }
 0x2fd   :  { %5874 = vmatprep.subr.bf16.mxu1 %v8515_v47  ;;  %v5918_v47 = vld [vmem:[%s11531_s3 + $0x108] sm:$0xff]  ;;  %v7170_v50 = vpack.c.bf16 %v5915_v46, %v5913_v33  ;;  %v823_v46 = vld [vmem:[%s11532_s2 + $0x4] sm:$0x3]  ;;  %v824_v42 = vld [vmem:[%s11532_s2 + $0x6] sm:$0x3] }
 0x2fe   :  { %v860_v54 = vrot.slane %v824_v42, %v11330_v38 }
 0x2ff   :  { %5043 = vmatpush1.bf16.msra.mxu0 %v8510_v43  ;;  %v7172_v43 = vpack.c.bf16 %v5920_v49, %v5918_v47  ;;  %v11348_v47 = vadd.f32 %v10153_v8, %v836_v41  ;;  %v852_v8 = vrot.slane %v823_v46, %v11330_v38 }
 0x300   :  { %5875 = vmatpush1.bf16.msra.mxu1 %v8513_v51  ;;  %7141 = vmatprep.subr.bf16.mxu0 %v7140_v52  ;;  %v5917_v51 = vld [vmem:[%s11531_s3 + $0x100] sm:$0xff]  ;;  %v5919_v52 = vld [vmem:[%s11531_s3 + $0x110] sm:$0xff] }
 0x301   :  { %v7174_v55 = vpack.c.bf16 %v5919_v52, %v5917_v51  ;;  %v11371_v53 = vadd.f32 %v11001_v58, %v852_v8  ;;  %v826_v58 = vld [vmem:[%s11532_s2 + $0xa] sm:$0x3] }
 0x302   :  { %5045 = vmatmul.mubr.bf16.vlgmr.msra.gmra.mrb[8].mxu0 %v6838_v45  ;;  %v5923_v45 = vld [vmem:[%s11531_s3 + $0x130] sm:$0xff] }
 0x303   :  { %5877 = vmatmul.mubr.bf16.vlgmr.msra.gmra.mrb[8].mxu1 %v6974_v63  ;;  %7143 = vmatpush1.bf16.msra.mxu0 %v7142_v0  ;;  %v5926_v63 = vld [vmem:[%s11531_s3 + $0x148] sm:$0xff]  ;;  %v5928_v0 = vld [vmem:[%s11531_s3 + $0x158] sm:$0xff] }
 0x304   :  { %6025 = vmatprep.mubr.f32.mxu0 %v11164_v4  ;;  %7145 = vmatprep.subr.bf16.mxu0 %v7144_v1  ;;  %v7178_v1 = vpack.c.bf16 %v5923_v45, %v5921_v57  ;;  %v7180_v2 = vpack.c.bf16 %v5928_v0, %v5926_v63  ;;  %v880_v63 = vrot.slane %v826_v58, %v11120_v48 }
 0x307   :  { %7147 = vmatpush1.bf16.msra.mxu0 %v7146_v5  ;;  %v5932_v5 = vld [vmem:[%s11531_s3 + $0x178] sm:$0xff] }
 0x308   :  { %7149 = vmatprep.subr.bf16.mxu0 %v7148_v12  ;;  %v7182_v12 = vpack.c.bf16 %v5927_v34, %v5925_v3  ;;  %v7184_v10 = vpack.c.bf16 %v5932_v5, %v5930_v35  ;;  %v876_v35 = vrot.slane %v826_v58, %v11330_v38 }
 0x30b   :  { %7151 = vmatpush1.bf16.msra.mxu0 %v7150_v14  ;;  %v5936_v14 = vld [vmem:[%s11531_s3 + $0x198] sm:$0xff] }
 0x30c   :  { %7153 = vmatprep.subr.bf16.mxu0 %v7152_v15  ;;  %v7186_v15 = vpack.c.bf16 %v5931_v61, %v5929_v60  ;;  %v7188_v16 = vpack.c.bf16 %v5936_v14, %v5934_v13  ;;  %v5949_v61 = vld [vmem:[%s11533_s4] sm:$0x3] }
 0x30d   :  { %v5954_v13 = vrot.slane %v5949_v61, %v11330_v38  ;;  %v5958_v14 = vrot.slane %v5949_v61, %v11120_v48 }
 0x30f   :  { %7155 = vmatpush1.bf16.msra.mxu0 %v7154_v26  ;;  %v5940_v26 = vld [vmem:[%s11531_s3 + $0x1b8] sm:$0xff] }
 0x310   :  { %7157 = vmatprep.subr.bf16.mxu0 %v7156_v6  ;;  %v7190_v6 = vpack.c.bf16 %v5935_v19, %v5933_v17  ;;  %v7192_v7 = vpack.c.bf16 %v5940_v26, %v5938_v21 }
 0x313   :  { %7159 = vmatpush1.bf16.msra.mxu0 %v7158_v30  ;;  %v5944_v30 = vld [vmem:[%s11531_s3 + $0x1d8] sm:$0xff] }
 0x314   :  { %7161 = vmatprep.subr.bf16.mxu0 %v7160_v31  ;;  %v7194_v31 = vpack.c.bf16 %v5939_v27, %v5937_v18  ;;  %v7196_v24 = vpack.c.bf16 %v5944_v30, %v5942_v28  ;;  %v6074_v18 = vld [vmem:[%s11534_s5] sm:$0x3] }
 0x317   :  { %7163 = vmatpush1.bf16.msra.mxu0 %v7162_v23  ;;  %v5948_v23 = vld [vmem:[%s11531_s3 + $0x1f8] sm:$0xff] }
 0x318   :  { %7165 = vmatprep.subr.bf16.mxu0 %v7164_v37  ;;  %v7198_v37 = vpack.c.bf16 %v5943_v36, %v5941_v25  ;;  %v7200_v20 = vpack.c.bf16 %v5948_v23, %v5946_v22  ;;  %v6083_v25 = vrot.slane %v6074_v18, %v11120_v48 }
 0x31b   :  { %7167 = vmatpush1.bf16.msra.mxu0 %v7166_v40  ;;  %v822_v40 = vld [vmem:[%s11532_s2 + $0x2] sm:$0x3] }
 0x31c   :  { %7169 = vmatprep.subr.bf16.mxu0 %v7168_v32  ;;  %v7202_v32 = vpack.c.bf16 %v5947_v39, %v5945_v29  ;;  %v848_v33 = vrot.slane %v822_v40, %v11120_v48  ;;  %v844_v49 = vrot.slane %v822_v40, %v11330_v38 }
 0x31e   :  { %v11361_v51 = vadd.f32 %v10155_v9, %v844_v49  ;;  %v11380_v9 = vadd.f32 %v11003_v59, %v860_v54 }
 0x31f   :  { %7171 = vmatpush1.bf16.msra.mxu0 %v7170_v50  ;;  %v11352_v50 = vadd.f32 %v10159_v11, %v848_v33  ;;  %v864_v11 = vrot.slane %v824_v42, %v11120_v48 }
 0x320   :  { %7173 = vmatprep.subr.bf16.mxu0 %v7172_v43  ;;  %v856_v43 = vrot.slane %v823_v46, %v11120_v48 }
 0x322   :  { %v11365_v52 = vadd.f32 %v11005_v62, %v856_v43  ;;  %v825_v62 = vld [vmem:[%s11532_s2 + $0x8] sm:$0x3] }
 0x323   :  { %7175 = vmatpush1.bf16.msra.mxu0 %v7174_v55  ;;  %v11375_v55 = vadd.f32 %v11007_v44, %v864_v11  ;;  %v872_v44 = vrot.slane %v825_v62, %v11120_v48 }
 0x324   :  { %7177 = vmatprep.subr.bf16.mxu0 %v7176_v56  ;;  %v868_v56 = vrot.slane %v825_v62, %v11330_v38 }
 0x327   :  { %7179 = vmatpush1.bf16.msra.mxu0 %v7178_v1 }
 0x328   :  { %7181 = vmatprep.subr.bf16.mxu0 %v7180_v2 }
 0x32b   :  { %7183 = vmatpush1.bf16.msra.mxu0 %v7182_v12 }
 0x32c   :  { %7185 = vmatprep.subr.bf16.mxu0 %v7184_v10 }
 0x32f   :  { %7187 = vmatpush1.bf16.msra.mxu0 %v7186_v15 }
 0x330   :  { %7189 = vmatprep.subr.bf16.mxu0 %v7188_v16 }
 0x333   :  { %7191 = vmatpush1.bf16.msra.mxu0 %v7190_v6 }
 0x334   :  { %7193 = vmatprep.subr.bf16.mxu0 %v7192_v7 }
 0x337   :  { %7195 = vmatpush1.bf16.msra.mxu0 %v7194_v31 }
 0x338   :  { %7197 = vmatprep.subr.bf16.mxu0 %v7196_v24  ;;  %v6079_v24 = vrot.slane %v6074_v18, %v11330_v38  ;;  %v6173_v18 = vld [vmem:[%s11535_s6] sm:$0xff] }
 0x33b   :  { %7199 = vmatpush1.bf16.msra.mxu0 %v7198_v37 }
 0x33c   :  { %7201 = vmatprep.subr.bf16.mxu0 %v7200_v20 }
 0x33f   :  { %7203 = vmatpush1.bf16.msra.mxu0 %v7202_v32 }
 0x342   :  { %6026 = vmatmul.mubr.f32.vlgmr.msra.gmra.mrb[12].mxu0 %v11348_v47 }
 0x343   :  { %6031 = vmatprep.mubr.f32.mxu0 %v11352_v50 }
 0x346   :  { %6032 = vmatmul.mubr.f32.gmra.mrb[14].mxu0 %v11361_v51 }
 0x347   :  { %6037 = vmatprep.mubr.f32.mxu0 %v11365_v52 }
 0x34a   :  { %6038 = vmatmul.mubr.f32.gmra.mrb[16].mxu0 %v11371_v53 }
 0x34b   :  { %6043 = vmatprep.mubr.f32.mxu0 %v11375_v55 }
 0x34e   :  { %6044 = vmatmul.mubr.f32.gmra.mrb[18].mxu0 %v11380_v9 }
 0x3d5   :  { %v5046_v57 = vpop.f32.mrb[8].mxu0 }
 0x3d6   :  { %v5878_v45 = vpop.f32.mrb[8].mxu1  ;;  %v5048_v59 = vpop.f32.mrb[9].mxu0  ;;  %v11394_v34 = vadd.f32 %v5046_v57, %v868_v56 }
 0x3d7   :  { %v5880_v0 = vpop.f32.mrb[9].mxu1  ;;  %v11392_v1 = vadd.f32 %v5048_v59, %v872_v44  ;;  %v5050_v2 = vpop.f32.mrb[10].mxu0  ;;  %v11402_v60 = vadd.f32 %v5878_v45, %v876_v35 }
 0x3d8   :  { %v5882_v3 = vpop.f32.mrb[10].mxu1  ;;  %v5051_v5 = vpop.f32.mrb[11].mxu0  ;;  %v11397_v10 = vadd.f32 %v5880_v0, %v880_v63 }
 0x3d9   :  { %v5883_v12 = vpop.f32.mrb[11].mxu1  ;;  %6049 = vmatprep.mubr.f32.mxu0 %v11392_v1 }
 0x3da   :  { %6050 = vmatmul.mubr.f32.gmra.mrb[20].mxu0 %v11394_v34 }
 0x3db   :  { %6055 = vmatprep.mubr.f32.mxu0 %v11397_v10 }
 0x3de   :  { %6056 = vmatmul.mubr.f32.gmra.mrb[22].mxu0 %v11402_v60 }
 0x415   :  { %v6027_v15 = vpop.f32.mrb[12].mxu0 }
 0x416   :  { %v6028_v16 = vadd.f32 %v6027_v15, %v5954_v13  ;;  %v6029_v17 = vpop.f32.mrb[13].mxu0 }
 0x417   :  { %v6030_v19 = vadd.f32 %v6029_v17, %v5958_v14 }
 0x418   :  { %8520 = vtanh.f32 %v6028_v16 }
 0x419   :  { %8522 = vtanh.f32 %v6030_v19  ;;  %v6033_v21 = vpop.f32.mrb[14].mxu0 }
 0x41a   :  { %v6034_v26 = vadd.f32 %v6033_v21, %v5954_v13  ;;  %v6035_v6 = vpop.f32.mrb[15].mxu0 }
 0x41b   :  { %v6036_v7 = vadd.f32 %v6035_v6, %v5958_v14 }
 0x41c   :  { %8524 = vtanh.f32 %v6034_v26 }
 0x41d   :  { %8526 = vtanh.f32 %v6036_v7  ;;  %v6039_v27 = vpop.f32.mrb[16].mxu0 }
 0x41e   :  { %v6040_v28 = vadd.f32 %v6039_v27, %v5954_v13  ;;  %v6041_v30 = vpop.f32.mrb[17].mxu0  ;;  %v6174_v27 = vld [vmem:[%s11535_s6 + $0x8] sm:$0xff] }
 0x41f   :  { %v6042_v31 = vadd.f32 %v6041_v30, %v5958_v14  ;;  %v6191_v30 = vld [vmem:[%s11535_s6 + $0x90] sm:$0xff] }
 0x420   :  { %8528 = vtanh.f32 %v6040_v28  ;;  %v7206_v28 = vpack.c.bf16 %v6174_v27, %v6173_v18 }
 0x421   :  { %8530 = vtanh.f32 %v6042_v31  ;;  %v6045_v36 = vpop.f32.mrb[18].mxu0  ;;  %v6192_v31 = vld [vmem:[%s11535_s6 + $0x98] sm:$0xff] }
 0x422   :  { %v8521_v22 = vpop.eup %8520  ;;  %v6046_v23 = vadd.f32 %v6045_v36, %v5954_v13  ;;  %v6047_v37 = vpop.f32.mrb[19].mxu0  ;;  %v6176_v36 = vld [vmem:[%s11535_s6 + $0x18] sm:$0xff] }
 0x423   :  { %v8523_v20 = vpop.eup %8522  ;;  %v6048_v29 = vadd.f32 %v6047_v37, %v5958_v14  ;;  %v6086_v39 = vmul.f32 %v8521_v22, %v6079_v24  ;;  %v6193_v22 = vld [vmem:[%s11535_s6 + $0xa0] sm:$0xff]  ;;  %v6194_v37 = vld [vmem:[%s11535_s6 + $0xa8] sm:$0xff] }
 0x424   :  { %8532 = vtanh.f32 %v6046_v23  ;;  %v6087_v40 = vmul.f32 %v8523_v20, %v6083_v25  ;;  %v6177_v20 = vld [vmem:[%s11535_s6 + $0x20] sm:$0xff] }
 0x425   :  { %8534 = vtanh.f32 %v6048_v29  ;;  %v6178_v29 = vld [vmem:[%s11535_s6 + $0x28] sm:$0xff] }
 0x426   :  { %v8525_v32 = vpop.eup %8524  ;;  %v6098_v41 = vadd.f32 %v6087_v40, %v6086_v39  ;;  %v7212_v39 = vpack.c.bf16 %v6194_v37, %v6193_v22  ;;  %v6195_v40 = vld [vmem:[%s11535_s6 + $0xb0] sm:$0xff] }
 0x427   :  { %v8527_v33 = vpop.eup %8526  ;;  %v6088_v46 = vmul.f32 %v8525_v32, %v6079_v24  ;;  %v6196_v32 = vld [vmem:[%s11535_s6 + $0xb8] sm:$0xff] }
 0x428   :  { %6099 = vadd.xlane.f32.xlu0 %v6098_v41  ;;  %v6089_v38 = vmul.f32 %v8527_v33, %v6083_v25  ;;  %v7214_v41 = vpack.c.bf16 %v6178_v29, %v6177_v20  ;;  %v7216_v33 = vpack.c.bf16 %v6196_v32, %v6195_v40 }
 0x42a   :  { %v8529_v49 = vpop.eup %8528  ;;  %v6101_v43 = vadd.f32 %v6089_v38, %v6088_v46  ;;  %v6179_v46 = vld [vmem:[%s11535_s6 + $0x30] sm:$0xff]  ;;  %v6180_v38 = vld [vmem:[%s11535_s6 + $0x38] sm:$0xff] }
 0x42b   :  { %v8531_v48 = vpop.eup %8530  ;;  %v6090_v42 = vmul.f32 %v8529_v49, %v6079_v24  ;;  %v6197_v49 = vld [vmem:[%s11535_s6 + $0xc0] sm:$0xff] }
 0x42c   :  { %6102 = vadd.xlane.f32.xlu0 %v6101_v43  ;;  %v6091_v8 = vmul.f32 %v8531_v48, %v6083_v25  ;;  %v6198_v43 = vld [vmem:[%s11535_s6 + $0xc8] sm:$0xff]  ;;  %v7218_v48 = vpack.c.bf16 %v6180_v38, %v6179_v46 }
 0x42e   :  { %v8533_v11 = vpop.eup %8532  ;;  %v6104_v54 = vadd.f32 %v6091_v8, %v6090_v42  ;;  %v7220_v42 = vpack.c.bf16 %v6198_v43, %v6197_v49  ;;  %v6181_v8 = vld [vmem:[%s11535_s6 + $0x40] sm:$0xff] }
 0x42f   :  { %v8535_v62 = vpop.eup %8534  ;;  %v6092_v58 = vmul.f32 %v8533_v11, %v6079_v24  ;;  %v6182_v11 = vld [vmem:[%s11535_s6 + $0x48] sm:$0xff] }
 0x430   :  { %6105 = vadd.xlane.f32.xlu0 %v6104_v54  ;;  %v6093_v44 = vmul.f32 %v8535_v62, %v6083_v25  ;;  %v6199_v54 = vld [vmem:[%s11535_s6 + $0xd0] sm:$0xff]  ;;  %v6200_v62 = vld [vmem:[%s11535_s6 + $0xd8] sm:$0xff] }
 0x432   :  { %v6107_v56 = vadd.f32 %v6093_v44, %v6092_v58  ;;  %v7222_v58 = vpack.c.bf16 %v6182_v11, %v6181_v8  ;;  %v7224_v44 = vpack.c.bf16 %v6200_v62, %v6199_v54 }
 0x4ad   :  { %v6051_v57 = vpop.f32.mrb[20].mxu0 }
 0x4ae   :  { %v6052_v45 = vadd.f32 %v6051_v57, %v5954_v13  ;;  %v6053_v63 = vpop.f32.mrb[21].mxu0  ;;  %v6184_v57 = vld [vmem:[%s11535_s6 + $0x58] sm:$0xff] }
 0x4af   :  { %v6054_v59 = vadd.f32 %v6053_v63, %v5958_v14  ;;  %v6202_v63 = vld [vmem:[%s11535_s6 + $0xe8] sm:$0xff] }
 0x4b0   :  { %8536 = vtanh.f32 %v6052_v45  ;;  %v6201_v45 = vld [vmem:[%s11535_s6 + $0xe0] sm:$0xff] }
 0x4b1   :  { %8538 = vtanh.f32 %v6054_v59  ;;  %v6057_v0 = vpop.f32.mrb[22].mxu0 }
 0x4b2   :  { %v6058_v2 = vadd.f32 %v6057_v0, %v5954_v13  ;;  %v6059_v3 = vpop.f32.mrb[23].mxu0  ;;  %v6189_v13 = vld [vmem:[%s11535_s6 + $0x80] sm:$0xff]  ;;  %v7228_v0 = vpack.c.bf16 %v6202_v63, %v6201_v45 }
 0x4b3   :  { %v6060_v35 = vadd.f32 %v6059_v3, %v5958_v14  ;;  %v6190_v14 = vld [vmem:[%s11535_s6 + $0x88] sm:$0xff] }
 0x4b4   :  { %8540 = vtanh.f32 %v6058_v2  ;;  %v7204_v7 = vpack.c.bf16 %v6190_v14, %v6189_v13  ;;  %v6185_v2 = vld [vmem:[%s11535_s6 + $0x60] sm:$0xff]  ;;  %v6186_v3 = vld [vmem:[%s11535_s6 + $0x68] sm:$0xff] }
 0x4b5   :  { %8542 = vtanh.f32 %v6060_v35  ;;  %v6203_v35 = vld [vmem:[%s11535_s6 + $0xf0] sm:$0xff] }
 0x4b6   :  { %7205 = vmatprep.subr.bf16.mxu1 %v7204_v7 }
 0x4b7   :  { %7207 = vmatpush3.bf16.msra.mxu1 %v7206_v28 }
 0x4ba   :  { %v8537_v5 = vpop.eup %8536 }
 0x4bb   :  { %v8539_v12 = vpop.eup %8538  ;;  %v6094_v61 = vmul.f32 %v8537_v5, %v6079_v24  ;;  %v6204_v5 = vld [vmem:[%s11535_s6 + $0xf8] sm:$0xff] }
 0x4bc   :  { %v6095_v15 = vmul.f32 %v8539_v12, %v6083_v25  ;;  %v7230_v12 = vpack.c.bf16 %v6186_v3, %v6185_v2 }
 0x4be   :  { %v8541_v16 = vpop.eup %8540  ;;  %v6110_v17 = vadd.f32 %v6095_v15, %v6094_v61  ;;  %v7232_v61 = vpack.c.bf16 %v6204_v5, %v6203_v35  ;;  %v6187_v15 = vld [vmem:[%s11535_s6 + $0x70] sm:$0xff] }
 0x4bf   :  { %v8543_v19 = vpop.eup %8542  ;;  %v6096_v21 = vmul.f32 %v8541_v16, %v6079_v24  ;;  %v7208_v24 = vpack.c.bf16 %v6192_v31, %v6191_v30  ;;  %v6188_v16 = vld [vmem:[%s11535_s6 + $0x78] sm:$0xff] }
 0x4c0   :  { %6111 = vadd.xlane.f32.xlu1 %v6110_v17  ;;  %v6097_v26 = vmul.f32 %v8543_v19, %v6083_v25  ;;  %v6175_v25 = vld [vmem:[%s11535_s6 + $0x10] sm:$0xff]  ;;  %v7234_v17 = vpack.c.bf16 %v6188_v16, %v6187_v15  ;;  %v6100_v19 = vpop.xlane.xlu0 %6099 }
 0x4c1   :  { %v7210_v23 = vpack.c.bf16 %v6176_v36, %v6175_v25  ;;  %7209 = vmatprep.subr.bf16.mxu1 %v7208_v24 }
 0x4c2   :  { %v6113_v6 = vadd.f32 %v6097_v26, %v6096_v21 }
 0x4c3   :  { %7211 = vmatpush3.bf16.msra.mxu1 %v7210_v23 }
 0x4c4   :  { %6114 = vadd.xlane.f32.xlu1 %v6113_v6  ;;  %7213 = vmatprep.subr.bf16.mxu1 %v7212_v39  ;;  %v6103_v26 = vpop.xlane.xlu0 %6102 }
 0x4c7   :  { %7215 = vmatpush3.bf16.msra.mxu1 %v7214_v41 }
 0x4c8   :  { %6108 = vadd.xlane.f32.xlu1 %v6107_v56  ;;  %7217 = vmatprep.subr.bf16.mxu1 %v7216_v33  ;;  %v6183_v56 = vld [vmem:[%s11535_s6 + $0x50] sm:$0xff]  ;;  %v6106_v7 = vpop.xlane.xlu0 %6105 }
 0x4c9   :  { %v7226_v59 = vpack.c.bf16 %v6184_v57, %v6183_v56 }
 0x4cb   :  { %7219 = vmatpush3.bf16.msra.mxu1 %v7218_v48 }
 0x4cc   :  { %7221 = vmatprep.subr.bf16.mxu1 %v7220_v42 }
 0x4cf   :  { %7223 = vmatpush3.bf16.msra.mxu1 %v7222_v58 }
 0x4d0   :  { %7225 = vmatprep.subr.bf16.mxu1 %v7224_v44 }
 0x4d3   :  { %7227 = vmatpush3.bf16.msra.mxu1 %v7226_v59 }
 0x4d4   :  { %7229 = vmatprep.subr.bf16.mxu1 %v7228_v0 }
 0x4d7   :  { %7231 = vmatpush3.bf16.msra.mxu1 %v7230_v12 }
 0x4d8   :  { %7233 = vmatprep.subr.bf16.mxu1 %v7232_v61 }
 0x4db   :  { %7235 = vmatpush3.bf16.msra.mxu1 %v7234_v17 }
 0x54d   :  { %v6112_v21 = vpop.xlane.xlu1 %6111 }
 0x54e   :  { %v6116_v14 = vmax.f32 %v6100_v19, %v6112_v21 }
 0x551   :  { %v6115_v6 = vpop.xlane.xlu1 %6114 }
 0x552   :  { %v6117_v13 = vmax.f32 %v6103_v26, %v6115_v6 }
 0x554   :  { %v6118_v27 = vmax.f32 %v6116_v14, %v6117_v13 }
 0x555   :  { %v6109_v18 = vpop.xlane.xlu1 %6108 }
 0x556   :  { %v6119_v28 = vmax.f32 %v6106_v7, %v6109_v18 }
 0x558   :  { %v6120_v30 = vmax.f32 %v6118_v27, %v6119_v28 }
 0x55a   :  { %v6121_v31 = vsub.f32 %v6100_v19, %v6120_v30  ;;  %v6122_v24 = vsub.f32 %v6103_v26, %v6120_v30  ;;  %v6123_v25 = vsub.f32 %v6106_v7, %v6120_v30  ;;  %v6124_v36 = vsub.f32 %v6109_v18, %v6120_v30 }
 0x55b   :  { %v6125_v37 = vsub.f32 %v6112_v21, %v6120_v30  ;;  %v6126_v29 = vsub.f32 %v6115_v6, %v6120_v30 }
 0x55c   :  { %v6127_v22 = vmul.f32 1.442695, %v6121_v31  ;;  %v6129_v23 = vmul.f32 1.442695, %v6122_v24  ;;  %v6131_v20 = vmul.f32 1.442695, %v6123_v25 }
 0x55d   :  { %v6133_v39 = vmul.f32 1.442695, %v6124_v36  ;;  %v6135_v40 = vmul.f32 1.442695, %v6125_v37  ;;  %v6137_v32 = vmul.f32 1.442695, %v6126_v29 }
 0x55e   :  { %8544 = vpow2.f32 %v6127_v22 }
 0x55f   :  { %8546 = vpow2.f32 %v6129_v23 }
 0x560   :  { %8548 = vpow2.f32 %v6131_v20 }
 0x561   :  { %8550 = vpow2.f32 %v6133_v39 }
 0x562   :  { %8552 = vpow2.f32 %v6135_v40 }
 0x563   :  { %8554 = vpow2.f32 %v6137_v32 }
 0x568   :  { %v8545_v41 = vpop.eup %8544 }
 0x569   :  { %v8547_v33 = vpop.eup %8546 }
 0x56a   :  { %v6139_v46 = vadd.f32 %v8547_v33, %v8545_v41  ;;  %v8549_v38 = vpop.eup %8548 }
 0x56b   :  { %v8551_v43 = vpop.eup %8550 }
 0x56c   :  { %v6140_v49 = vadd.f32 %v8549_v38, %v6139_v46  ;;  %v8553_v42 = vpop.eup %8552 }
 0x56d   :  { %v8555_v11 = vpop.eup %8554 }
 0x56e   :  { %v6141_v48 = vadd.f32 %v8551_v43, %v6140_v49 }
 0x570   :  { %v6142_v8 = vadd.f32 %v8553_v42, %v6141_v48 }
 0x572   :  { %v6143_v54 = vadd.f32 %v8555_v11, %v6142_v8 }
 0x574   :  { %8556 = vrcp.f32 %v6143_v54 }
 0x57e   :  { %v8557_v62 = vpop.eup %8556 }
 0x57f   :  { %v6145_v58 = vmul.f32 %v8557_v62, %v8545_v41  ;;  %v6146_v44 = vmul.f32 %v8557_v62, %v8547_v33  ;;  %v6147_v56 = vmul.f32 %v8557_v62, %v8549_v38  ;;  %v6148_v57 = vmul.f32 %v8557_v62, %v8551_v43 }
 0x580   :  { %v6149_v2 = vmul.f32 %v8557_v62, %v8553_v42  ;;  %v6150_v61 = vmul.f32 %v8557_v62, %v8555_v11 }
 0x581   :  { %v6152_v45 = vmul.f32 %v11164_v4, %v6145_v58  ;;  %v6154_v63 = vmul.f32 %v11352_v50, %v6146_v44  ;;  %v6151_v59 = vmul.f32 %v11348_v47, %v6145_v58  ;;  %v6153_v0 = vmul.f32 %v11361_v51, %v6146_v44 }
 0x582   :  { %v6156_v3 = vmul.f32 %v11365_v52, %v6147_v56  ;;  %v6155_v5 = vmul.f32 %v11371_v53, %v6147_v56  ;;  %v6158_v15 = vmul.f32 %v11375_v55, %v6148_v57  ;;  %v6157_v17 = vmul.f32 %v11380_v9, %v6148_v57  ;;  %v7104_v9 = vld [vmem:[%s11536_s7] ss:$0 sm:$0xff] }
 0x583   :  { %v6168_v35 = vadd.f32 %v6154_v63, %v6152_v45  ;;  %v6163_v12 = vadd.f32 %v6153_v0, %v6151_v59  ;;  %v6160_v50 = vmul.f32 %v11392_v1, %v6149_v2  ;;  %v6159_v47 = vmul.f32 %v11394_v34, %v6149_v2 }
 0x584   :  { %v6162_v21 = vmul.f32 %v11397_v10, %v6150_v61  ;;  %v6161_v26 = vmul.f32 %v11402_v60, %v6150_v61 }
 0x585   :  { %v6169_v16 = vadd.f32 %v6168_v35, %v6156_v3  ;;  %v6164_v4 = vadd.f32 %v6163_v12, %v6155_v5 }
 0x587   :  { %v6170_v19 = vadd.f32 %v6169_v16, %v6158_v15  ;;  %v6165_v51 = vadd.f32 %v6164_v4, %v6157_v17 }
 0x589   :  { %v6171_v52 = vadd.f32 %v6170_v19, %v6160_v50  ;;  %v6166_v53 = vadd.f32 %v6165_v51, %v6159_v47 }
 0x58b   :  { %v6172_v6 = vadd.f32 %v6171_v52, %v6162_v21  ;;  %v6167_v13 = vadd.f32 %v6166_v53, %v6161_v26 }
 0x58d   :  { %6276 = vmatprep.mubr.f32.mxu1 %v6172_v6 }
 0x58e   :  { %6277 = vmatmul.mubr.f32.vlgmr.msra.gmra.mrb[12].mxu1 %v6167_v13 }
 0x661   :  { %v7137_v55 = vpop.f32.mrb[12].mxu1 }
 0x662   :  { %v7138_v1 = vpop.f32.mrb[13].mxu1 }
 0x663   :  { %v7139_v14 = vadd.f32 %v7138_v1, %v7137_v55 }
 0x665   :  { %v6279_v34 = vadd.f32 %v7139_v14, %v7104_v9 }
 0x667   :  { %6283 = vst.msk [vmem:[%s11537_s8] sm:$0xff] %vm6282_vm0, %v6279_v34 }

</bundles_post_ra>
